<compile_context>
chip_gen: v5e
topology: v5e:2x2
jax: 0.10.0
libtpu: 0.0.40
codegen_flags: <defaults>
</compile_context>

<pallas_src>
import math

import jax
import jax.numpy as jnp
from jax.experimental import pallas as pl
from jax.experimental.pallas import tpu as pltpu


# ---------------- synthetic hyperparameters (small "hps") ----------------
class HPS:
    num_mels = 8
    n_frames_per_step = 1
    prenet_dim = 32
    encoder_embedding_dim = 32
    attention_rnn_dim = 32
    decoder_rnn_dim = 32
    attention_dim = 16
    attention_location_n_filters = 8
    attention_location_kernel_size = 5
    p_attention_dropout = 0.1
    p_decoder_dropout = 0.1


hps = HPS()

B_PAD = 8        # pad batch to a full sublane tile
OUT_PAD = 128    # lane-dense width for the per-step mel+gate store


# ------------------------------ Pallas kernel ------------------------------
def make_decoder_kernel(B_pad, T_in, E, P, A, D, ATT, M, T_steps, out_pad):
    f32 = jnp.float32

    def kernel(di_ref, m1_ref, m2_ref,              # prenet inputs / dropout masks
               pw1_ref, pw2_ref,                    # prenet weights (transposed)
               mem_ref, pmem_ref, emask_ref,        # memory, flat proc. memory, add. mask
               wax_ref, wac_ref, wah_ref, ba_ref,   # attention LSTM column blocks + bias
               wq_ref, wbp_ref, wbc_ref, vblk_ref,  # tiled query, banded loc, block-diag v
               wda_ref, wdc_ref, wdh_ref, bd_ref,   # decoder LSTM column blocks + bias
               wpd_ref, wpc_ref, bp_ref,            # mel+gate projection (lane padded)
               adrop_ref, ddrop_ref,                # rnn dropout masks
               melgate_ref, align_ref,              # outputs
               prenet_scr):                         # scratch: prenet outputs
        # ---------------- prenet over all frames at once (2 matmuls total) ----------------
        h1 = jnp.maximum(
            jnp.dot(di_ref[...], pw1_ref[...], preferred_element_type=f32), 0.0
        ) * m1_ref[...]
        h2 = jnp.maximum(
            jnp.dot(h1, pw2_ref[...], preferred_element_type=f32), 0.0
        ) * m2_ref[...]
        # stage into (T_steps, B_pad, P) scratch with static tile-aligned slices
        for tt in range(T_steps):
            prenet_scr[tt] = h2[tt * B_pad:(tt + 1) * B_pad, :]

        emask = emask_ref[...]                       # additive -1e30 pad mask (hoisted)

        def step(t, carry):
            ah, ac, dh, dc, aw, awc, actx = carry
            x = prenet_scr[t]                        # (B_pad, P)
            adrop = adrop_ref[t]                     # (B_pad, A)
            ddrop = ddrop_ref[t]                     # (B_pad, D)

            # ---- attention LSTM cell: column-split weights, no lane concat ----
            ga = (jnp.dot(x, wax_ref[...], preferred_element_type=f32)
                  + jnp.dot(actx, wac_ref[...], preferred_element_type=f32)
                  + jnp.dot(ah, wah_ref[...], preferred_element_type=f32)
                  + ba_ref[...])
            i_g = jax.nn.sigmoid(ga[:, 0:A])
            f_g = jax.nn.sigmoid(ga[:, A:2 * A])
            g_g = jnp.tanh(ga[:, 2 * A:3 * A])
            o_g = jax.nn.sigmoid(ga[:, 3 * A:4 * A])
            ac_n = f_g * ac + i_g * g_g
            ah_n = o_g * jnp.tanh(ac_n) * adrop      # attention-rnn dropout

            # ---- location-sensitive attention, flattened to (B, T_in*ATT) ----
            # query tiled over T_in, location conv+dense folded into banded matmuls,
            # v-reduction expressed as a block-diagonal matmul: no padding / shifted
            # slices / rank-3 reshapes on the serial critical path.
            g_flat = (jnp.dot(ah_n, wq_ref[...], preferred_element_type=f32)
                      + jnp.dot(aw, wbp_ref[...], preferred_element_type=f32)
                      + jnp.dot(awc, wbc_ref[...], preferred_element_type=f32)
                      + pmem_ref[...])
            e_flat = jnp.tanh(g_flat)                                   # (B, T_in*ATT)
            energies = jnp.dot(e_flat, vblk_ref[...],
                               preferred_element_type=f32) + emask      # (B, T_in)
            emax = jnp.max(energies, axis=-1, keepdims=True)
            pexp = jnp.exp(energies - emax)
            # exact divide kept (softmax rows must sum to 1 within 1e-5)
            w_new = pexp / jnp.sum(pexp, axis=-1, keepdims=True)        # (B, T_in)

            # attention context: batched (1, T_in) @ (T_in, E) on the MXU
            ctx = jnp.einsum('bqt,bte->bqe', w_new[:, None, :], mem_ref[...],
                             preferred_element_type=f32).reshape(B_pad, E)
            awc_n = awc + w_new

            # ---- decoder LSTM cell: column-split weights, no lane concat ----
            gd = (jnp.dot(ah_n, wda_ref[...], preferred_element_type=f32)
                  + jnp.dot(ctx, wdc_ref[...], preferred_element_type=f32)
                  + jnp.dot(dh, wdh_ref[...], preferred_element_type=f32)
                  + bd_ref[...])
            i2 = jax.nn.sigmoid(gd[:, 0:D])
            f2 = jax.nn.sigmoid(gd[:, D:2 * D])
            g2 = jnp.tanh(gd[:, 2 * D:3 * D])
            o2 = jax.nn.sigmoid(gd[:, 3 * D:4 * D])
            dc_n = f2 * dc + i2 * g2
            dh_n = o2 * jnp.tanh(dc_n) * ddrop       # decoder-rnn dropout

            # ---- fused mel+gate projection, padded to a lane-dense 128-wide store ----
            mg = (jnp.dot(dh_n, wpd_ref[...], preferred_element_type=f32)
                  + jnp.dot(ctx, wpc_ref[...], preferred_element_type=f32)
                  + bp_ref[...])                                        # (B_pad, 128)
            melgate_ref[t] = mg
            align_ref[t] = w_new
            return (ah_n, ac_n, dh_n, dc_n, w_new, awc_n, ctx)

        zf = lambda *s: jnp.zeros(s, f32)
        init = (zf(B_pad, A), zf(B_pad, A), zf(B_pad, D), zf(B_pad, D),
                zf(B_pad, T_in), zf(B_pad, T_in), zf(B_pad, E))
        # fully unroll the short serial recurrence (T_steps=8 here)
        jax.lax.fori_loop(0, T_steps, step, init, unroll=True)

    return kernel


# ------------------------------ parameter init ------------------------------
def xavier_uniform(key, shape, gain=1.0):
    fan_out, fan_in = shape
    limit = gain * math.sqrt(6.0 / (fan_in + fan_out))
    return jax.random.uniform(key, shape, jnp.float32, -limit, limit)


def init_params(key):
    P, E = hps.prenet_dim, hps.encoder_embedding_dim
    A, D = hps.attention_rnn_dim, hps.decoder_rnn_dim
    ATT = hps.attention_dim
    M = hps.num_mels * hps.n_frames_per_step
    NF, K = hps.attention_location_n_filters, hps.attention_location_kernel_size
    gain_tanh = 5.0 / 3.0

    ks = jax.random.split(key, 19)

    def uni(k, shape, bound):
        return jax.random.uniform(k, shape, jnp.float32, -bound, bound)

    ba, bd, bl = 1.0 / math.sqrt(A), 1.0 / math.sqrt(D), 1.0 / math.sqrt(D + E)
    return {
        # Prenet (two bias-free linears)
        "prenet_w1": xavier_uniform(ks[0], (P, M)),
        "prenet_w2": xavier_uniform(ks[1], (P, P)),
        # attention LSTMCell(P + E -> A)
        "attn_rnn_wih": uni(ks[2], (4 * A, P + E), ba),
        "attn_rnn_whh": uni(ks[3], (4 * A, A), ba),
        "attn_rnn_bih": uni(ks[4], (4 * A,), ba),
        "attn_rnn_bhh": uni(ks[5], (4 * A,), ba),
        # Attention layer
        "query_w": xavier_uniform(ks[6], (ATT, A), gain_tanh),
        "memory_w": xavier_uniform(ks[7], (ATT, E), gain_tanh),
        "v_w": xavier_uniform(ks[8], (1, ATT)),
        "loc_conv_w": xavier_uniform(ks[9], (NF, 2 * K)).reshape(NF, 2, K),
        "loc_dense_w": xavier_uniform(ks[10], (ATT, NF), gain_tanh),
        # decoder LSTMCell(A + E -> D)
        "dec_rnn_wih": uni(ks[11], (4 * D, A + E), bd),
        "dec_rnn_whh": uni(ks[12], (4 * D, D), bd),
        "dec_rnn_bih": uni(ks[13], (4 * D,), bd),
        "dec_rnn_bhh": uni(ks[14], (4 * D,), bd),
        # projections
        "proj_w": xavier_uniform(ks[15], (M, D + E)),
        "proj_b": uni(ks[16], (M,), bl),
        "gate_w": xavier_uniform(ks[17], (1, D + E)),
        "gate_b": uni(ks[18], (1,), bl),
    }


# ------------------------------ forward wrapper ------------------------------
def decoder_forward(params, memory, decoder_inputs, memory_lengths, dropout_key):
    B, T_in, E = memory.shape
    NM, NFPS = hps.num_mels, hps.n_frames_per_step
    M = NM * NFPS
    T_out = decoder_inputs.shape[2]
    T_steps = T_out // NFPS
    P, A, D = hps.prenet_dim, hps.attention_rnn_dim, hps.decoder_rnn_dim
    ATT = hps.attention_dim
    K, NF = hps.attention_location_kernel_size, hps.attention_location_n_filters
    pad = (K - 1) // 2
    Bp = B_PAD
    assert B <= Bp

    # ---- parse_decoder_inputs + go frame (only the first T_steps frames are consumed) ----
    di = jnp.transpose(decoder_inputs, (0, 2, 1)).reshape(B, T_steps, M)
    di = jnp.transpose(di, (1, 0, 2))                                    # (T_steps, B, M)
    di = jnp.concatenate([jnp.zeros((1, B, M), jnp.float32), di], axis=0)[:T_steps]
    di = jnp.pad(di, ((0, 0), (0, Bp - B), (0, 0)))                      # (T_steps, Bp, M)
    di2 = di.reshape(T_steps * Bp, M)

    # ---- deterministic dropout masks, pre-scaled by 1/keep_prob ----
    # TODO(synk): generate these in-kernel with pltpu.prng_seed/prng_random_bits at
    # production sizes to remove the HBM traffic and VMEM residency.
    kd1, kd2, kd3, kd4 = jax.random.split(dropout_key, 4)
    N = T_steps * Bp
    m1 = jax.random.bernoulli(kd1, 0.5, (N, P)).astype(jnp.float32) / 0.5
    m2 = jax.random.bernoulli(kd2, 0.5, (N, P)).astype(jnp.float32) / 0.5
    pa_keep = 1.0 - hps.p_attention_dropout
    pd_keep = 1.0 - hps.p_decoder_dropout
    adrop = jax.random.bernoulli(kd3, pa_keep, (T_steps, Bp, A)).astype(jnp.float32) / pa_keep
    ddrop = jax.random.bernoulli(kd4, pd_keep, (T_steps, Bp, D)).astype(jnp.float32) / pd_keep

    # ---- memory, processed memory, additive pad mask (batch padded to Bp) ----
    mem_p = jnp.pad(memory, ((0, Bp - B), (0, 0), (0, 0)))               # (Bp, T_in, E)
    lens_p = jnp.concatenate(
        [memory_lengths.astype(jnp.int32), jnp.full((Bp - B,), T_in, jnp.int32)])
    ids = jnp.arange(T_in)
    emask = jnp.where(ids[None, :] >= lens_p[:, None], -1e30, 0.0).astype(jnp.float32)
    # processed_memory = memory_layer(memory), flattened to (Bp, T_in*ATT)
    pmem_flat = jnp.einsum('bte,ae->bta', mem_p, params["memory_w"]).reshape(Bp, T_in * ATT)

    # ---- attention LSTM weights split by input block (no in-kernel concat) ----
    wih_a = params["attn_rnn_wih"].T                                     # (P+E, 4A)
    wax, wac = wih_a[:P], wih_a[P:]
    wah = params["attn_rnn_whh"].T                                       # (A, 4A)
    b_attn = (params["attn_rnn_bih"] + params["attn_rnn_bhh"]).reshape(1, 4 * A)

    # ---- location conv + dense folded into banded weights; v as block-diag matmul ----
    wloc = (params["loc_dense_w"] @ params["loc_conv_w"].reshape(NF, 2 * K)).T   # (2K, ATT)
    jj = jnp.arange(T_in)[:, None]
    tt = jnp.arange(T_in)[None, :]
    kk = jj - tt + pad
    valid = ((kk >= 0) & (kk < K))[:, :, None]
    kk_c = jnp.clip(kk, 0, K - 1)
    wb_prev = jnp.where(valid, wloc[kk_c], 0.0).reshape(T_in, T_in * ATT)
    wb_cum = jnp.where(valid, wloc[K + kk_c], 0.0).reshape(T_in, T_in * ATT)
    wq_tiled = jnp.tile(params["query_w"].T, (1, T_in))                  # (A, T_in*ATT)
    v = params["v_w"].reshape(ATT)
    v_block = (jnp.eye(T_in, dtype=jnp.float32)[:, None, :]
               * v[None, :, None]).reshape(T_in * ATT, T_in)

    # ---- decoder LSTM weights split by input block ----
    wih_d = params["dec_rnn_wih"].T                                      # (A+E, 4D)
    wda, wdc = wih_d[:A], wih_d[A:]
    wdh = params["dec_rnn_whh"].T
    b_dec = (params["dec_rnn_bih"] + params["dec_rnn_bhh"]).reshape(1, 4 * D)

    # ---- fused mel + gate projection, zero-padded to 128 lane-dense output columns ----
    wproj_t = jnp.concatenate([params["proj_w"], params["gate_w"]], axis=0).T   # (D+E, M+1)
    padw = OUT_PAD - (M + 1)
    wp_d = jnp.pad(wproj_t[:D], ((0, 0), (0, padw)))
    wp_c = jnp.pad(wproj_t[D:], ((0, 0), (0, padw)))
    bp = jnp.pad(jnp.concatenate([params["proj_b"], params["gate_b"]]),
                 (0, padw)).reshape(1, OUT_PAD)

    kernel = make_decoder_kernel(Bp, T_in, E, P, A, D, ATT, M, T_steps, OUT_PAD)

    # TODO(synk): for production hps add a grid over time chunks (outputs BlockSpec'd
    # along time, state carried in VMEM scratch) and a batch-parallel grid axis for
    # v7x's second TensorCore; cast matmul operands to bf16 on v6e/v7x.
    melgate, align = pl.pallas_call(
        kernel,
        out_shape=(
            jax.ShapeDtypeStruct((T_steps, Bp, OUT_PAD), jnp.float32),
            jax.ShapeDtypeStruct((T_steps, Bp, T_in), jnp.float32),
        ),
        scratch_shapes=[pltpu.VMEM((T_steps, Bp, P), jnp.float32)],
    )(
        di2, m1, m2,
        params["prenet_w1"].T, params["prenet_w2"].T,
        mem_p, pmem_flat, emask,
        wax, wac, wah, b_attn,
        wq_tiled, wb_prev, wb_cum, v_block,
        wda, wdc, wdh, b_dec,
        wp_d, wp_c, bp,
        adrop, ddrop,
    )

    # ---- parse_decoder_outputs (drop batch / lane padding) ----
    mel_tbm = melgate[:, :B, :M]                              # (T_steps, B, M)
    gate_tb = melgate[:, :B, M]                               # (T_steps, B)
    align_b = align[:, :B, :]                                 # (T_steps, B, T_in)
    mel_outputs = jnp.transpose(mel_tbm, (1, 0, 2)).reshape(B, T_steps * NFPS, NM)
    mel_outputs = jnp.transpose(mel_outputs, (0, 2, 1))       # (B, num_mels, T_out)
    gate_outputs = jnp.transpose(gate_tb, (1, 0))             # (B, T_steps)
    alignments = jnp.transpose(align_b, (1, 0, 2))            # (B, T_steps, T_in)
    return mel_outputs, gate_outputs, alignments


# ---------------------------------- main ----------------------------------
if __name__ == "__main__":
    key = jax.random.PRNGKey(0)
    kparams, kmem, kdec, kdrop = jax.random.split(key, 4)

    B, T_in, T_out = 2, 16, 8
    params = init_params(kparams)
    memory = jax.random.normal(kmem, (B, T_in, hps.encoder_embedding_dim), jnp.float32)
    decoder_inputs = jax.random.normal(kdec, (B, hps.num_mels, T_out), jnp.float32)
    memory_lengths = jnp.array([T_in, 11], dtype=jnp.int32)

    mel, gate, align = decoder_forward(params, memory, decoder_inputs, memory_lengths, kdrop)
    jax.block_until_ready((mel, gate, align))

    assert mel.shape == (B, hps.num_mels, T_out)
    assert gate.shape == (B, T_out)
    assert align.shape == (B, T_out, T_in)
    assert bool(jnp.all(jnp.isfinite(mel))) and bool(jnp.all(jnp.isfinite(gate)))
    # attention weights over valid positions sum to 1; padded positions are exactly 0
    assert bool(jnp.allclose(jnp.sum(align, axis=-1), 1.0, atol=1e-5))
    assert bool(jnp.all(align[1, :, 11:] == 0.0))

    print("KERNEL_OK")
</pallas_src>

<mosaic_0001>
module attributes {stable_mosaic.version = 11 : i64} {
  func.func @kernel(%arg0: memref<64x8xf32, #tpu.memory_space<vmem>>, %arg1: memref<64x32xf32, #tpu.memory_space<vmem>>, %arg2: memref<64x32xf32, #tpu.memory_space<vmem>>, %arg3: memref<8x32xf32, #tpu.memory_space<vmem>>, %arg4: memref<32x32xf32, #tpu.memory_space<vmem>>, %arg5: memref<8x16x32xf32, #tpu.memory_space<vmem>>, %arg6: memref<8x256xf32, #tpu.memory_space<vmem>>, %arg7: memref<8x16xf32, #tpu.memory_space<vmem>>, %arg8: memref<32x128xf32, #tpu.memory_space<vmem>>, %arg9: memref<32x128xf32, #tpu.memory_space<vmem>>, %arg10: memref<32x128xf32, #tpu.memory_space<vmem>>, %arg11: memref<1x128xf32, #tpu.memory_space<vmem>>, %arg12: memref<32x256xf32, #tpu.memory_space<vmem>>, %arg13: memref<16x256xf32, #tpu.memory_space<vmem>>, %arg14: memref<16x256xf32, #tpu.memory_space<vmem>>, %arg15: memref<256x16xf32, #tpu.memory_space<vmem>>, %arg16: memref<32x128xf32, #tpu.memory_space<vmem>>, %arg17: memref<32x128xf32, #tpu.memory_space<vmem>>, %arg18: memref<32x128xf32, #tpu.memory_space<vmem>>, %arg19: memref<1x128xf32, #tpu.memory_space<vmem>>, %arg20: memref<32x128xf32, #tpu.memory_space<vmem>>, %arg21: memref<32x128xf32, #tpu.memory_space<vmem>>, %arg22: memref<1x128xf32, #tpu.memory_space<vmem>>, %arg23: memref<8x8x32xf32, #tpu.memory_space<vmem>>, %arg24: memref<8x8x32xf32, #tpu.memory_space<vmem>>, %arg25: memref<8x8x128xf32, #tpu.memory_space<vmem>>, %arg26: memref<8x8x16xf32, #tpu.memory_space<vmem>>, %arg27: memref<8x8x32xf32, #tpu.memory_space<vmem>>) attributes {dimension_semantics = [], scalar_prefetch = 0 : i64, scratch_operands = 1 : i64, tpu.core_type = #tpu.core_type<tc>} {
    %c0 = arith.constant 0 : index
    %c0_0 = arith.constant 0 : index
    %0 = vector.load %arg0[%c0, %c0_0] : memref<64x8xf32, #tpu.memory_space<vmem>>, vector<64x8xf32>
    %c0_1 = arith.constant 0 : index
    %c0_2 = arith.constant 0 : index
    %1 = vector.load %arg3[%c0_1, %c0_2] : memref<8x32xf32, #tpu.memory_space<vmem>>, vector<8x32xf32>
    %cst = arith.constant dense<0.000000e+00> : vector<64x32xf32>
    %2 = tpu.matmul %0, %1, %cst {dimension_numbers = #tpu.dot_dimension_numbers<[1], [0], [0], [1], [0, 0, 1, 1], [], []>} : vector<64x8xf32>, vector<8x32xf32>, vector<64x32xf32> -> vector<64x32xf32>
    %cst_3 = arith.constant 0.000000e+00 : f32
    %3 = vector.broadcast %cst_3 : f32 to vector<64x32xf32>
    %4 = arith.maximumf %2, %3 : vector<64x32xf32>
    %c0_4 = arith.constant 0 : index
    %c0_5 = arith.constant 0 : index
    %5 = vector.load %arg1[%c0_4, %c0_5] : memref<64x32xf32, #tpu.memory_space<vmem>>, vector<64x32xf32>
    %6 = arith.mulf %4, %5 : vector<64x32xf32>
    %c0_6 = arith.constant 0 : index
    %c0_7 = arith.constant 0 : index
    %7 = vector.load %arg4[%c0_6, %c0_7] : memref<32x32xf32, #tpu.memory_space<vmem>>, vector<32x32xf32>
    %cst_8 = arith.constant dense<0.000000e+00> : vector<64x32xf32>
    %8 = tpu.matmul %6, %7, %cst_8 {dimension_numbers = #tpu.dot_dimension_numbers<[1], [0], [0], [1], [0, 0, 1, 1], [], []>} : vector<64x32xf32>, vector<32x32xf32>, vector<64x32xf32> -> vector<64x32xf32>
    %cst_9 = arith.constant 0.000000e+00 : f32
    %9 = vector.broadcast %cst_9 : f32 to vector<64x32xf32>
    %10 = arith.maximumf %8, %9 : vector<64x32xf32>
    %c0_10 = arith.constant 0 : index
    %c0_11 = arith.constant 0 : index
    %11 = vector.load %arg2[%c0_10, %c0_11] : memref<64x32xf32, #tpu.memory_space<vmem>>, vector<64x32xf32>
    %12 = arith.mulf %10, %11 : vector<64x32xf32>
    %13 = vector.extract_strided_slice %12 {offsets = [0, 0], sizes = [8, 32], strides = [1, 1]} : vector<64x32xf32> to vector<8x32xf32>
    %c0_12 = arith.constant 0 : index
    %c0_13 = arith.constant 0 : index
    %c0_14 = arith.constant 0 : index
    %14 = vector.load %arg27[%c0_12, %c0_13, %c0_14] : memref<8x8x32xf32, #tpu.memory_space<vmem>>, vector<1x8x32xf32>
    %15 = vector.shape_cast %14 : vector<1x8x32xf32> to vector<8x32xf32>
    %16 = vector.shape_cast %13 : vector<8x32xf32> to vector<1x8x32xf32>
    tpu.vector_store %arg27[%c0_12, %c0_13, %c0_14], %16 {strides = array<i32>} : memref<8x8x32xf32, #tpu.memory_space<vmem>>, vector<1x8x32xf32>,
    %17 = vector.extract_strided_slice %12 {offsets = [8, 0], sizes = [8, 32], strides = [1, 1]} : vector<64x32xf32> to vector<8x32xf32>
    %c1 = arith.constant 1 : index
    %c0_15 = arith.constant 0 : index
    %c0_16 = arith.constant 0 : index
    %18 = vector.load %arg27[%c1, %c0_15, %c0_16] : memref<8x8x32xf32, #tpu.memory_space<vmem>>, vector<1x8x32xf32>
    %19 = vector.shape_cast %18 : vector<1x8x32xf32> to vector<8x32xf32>
    %20 = vector.shape_cast %17 : vector<8x32xf32> to vector<1x8x32xf32>
    tpu.vector_store %arg27[%c1, %c0_15, %c0_16], %20 {strides = array<i32>} : memref<8x8x32xf32, #tpu.memory_space<vmem>>, vector<1x8x32xf32>,
    %21 = vector.extract_strided_slice %12 {offsets = [16, 0], sizes = [8, 32], strides = [1, 1]} : vector<64x32xf32> to vector<8x32xf32>
    %c2 = arith.constant 2 : index
    %c0_17 = arith.constant 0 : index
    %c0_18 = arith.constant 0 : index
    %22 = vector.load %arg27[%c2, %c0_17, %c0_18] : memref<8x8x32xf32, #tpu.memory_space<vmem>>, vector<1x8x32xf32>
    %23 = vector.shape_cast %22 : vector<1x8x32xf32> to vector<8x32xf32>
    %24 = vector.shape_cast %21 : vector<8x32xf32> to vector<1x8x32xf32>
    tpu.vector_store %arg27[%c2, %c0_17, %c0_18], %24 {strides = array<i32>} : memref<8x8x32xf32, #tpu.memory_space<vmem>>, vector<1x8x32xf32>,
    %25 = vector.extract_strided_slice %12 {offsets = [24, 0], sizes = [8, 32], strides = [1, 1]} : vector<64x32xf32> to vector<8x32xf32>
    %c3 = arith.constant 3 : index
    %c0_19 = arith.constant 0 : index
    %c0_20 = arith.constant 0 : index
    %26 = vector.load %arg27[%c3, %c0_19, %c0_20] : memref<8x8x32xf32, #tpu.memory_space<vmem>>, vector<1x8x32xf32>
    %27 = vector.shape_cast %26 : vector<1x8x32xf32> to vector<8x32xf32>
    %28 = vector.shape_cast %25 : vector<8x32xf32> to vector<1x8x32xf32>
    tpu.vector_store %arg27[%c3, %c0_19, %c0_20], %28 {strides = array<i32>} : memref<8x8x32xf32, #tpu.memory_space<vmem>>, vector<1x8x32xf32>,
    %29 = vector.extract_strided_slice %12 {offsets = [32, 0], sizes = [8, 32], strides = [1, 1]} : vector<64x32xf32> to vector<8x32xf32>
    %c4 = arith.constant 4 : index
    %c0_21 = arith.constant 0 : index
    %c0_22 = arith.constant 0 : index
    %30 = vector.load %arg27[%c4, %c0_21, %c0_22] : memref<8x8x32xf32, #tpu.memory_space<vmem>>, vector<1x8x32xf32>
    %31 = vector.shape_cast %30 : vector<1x8x32xf32> to vector<8x32xf32>
    %32 = vector.shape_cast %29 : vector<8x32xf32> to vector<1x8x32xf32>
    tpu.vector_store %arg27[%c4, %c0_21, %c0_22], %32 {strides = array<i32>} : memref<8x8x32xf32, #tpu.memory_space<vmem>>, vector<1x8x32xf32>,
    %33 = vector.extract_strided_slice %12 {offsets = [40, 0], sizes = [8, 32], strides = [1, 1]} : vector<64x32xf32> to vector<8x32xf32>
    %c5 = arith.constant 5 : index
    %c0_23 = arith.constant 0 : index
    %c0_24 = arith.constant 0 : index
    %34 = vector.load %arg27[%c5, %c0_23, %c0_24] : memref<8x8x32xf32, #tpu.memory_space<vmem>>, vector<1x8x32xf32>
    %35 = vector.shape_cast %34 : vector<1x8x32xf32> to vector<8x32xf32>
    %36 = vector.shape_cast %33 : vector<8x32xf32> to vector<1x8x32xf32>
    tpu.vector_store %arg27[%c5, %c0_23, %c0_24], %36 {strides = array<i32>} : memref<8x8x32xf32, #tpu.memory_space<vmem>>, vector<1x8x32xf32>,
    %37 = vector.extract_strided_slice %12 {offsets = [48, 0], sizes = [8, 32], strides = [1, 1]} : vector<64x32xf32> to vector<8x32xf32>
    %c6 = arith.constant 6 : index
    %c0_25 = arith.constant 0 : index
    %c0_26 = arith.constant 0 : index
    %38 = vector.load %arg27[%c6, %c0_25, %c0_26] : memref<8x8x32xf32, #tpu.memory_space<vmem>>, vector<1x8x32xf32>
    %39 = vector.shape_cast %38 : vector<1x8x32xf32> to vector<8x32xf32>
    %40 = vector.shape_cast %37 : vector<8x32xf32> to vector<1x8x32xf32>
    tpu.vector_store %arg27[%c6, %c0_25, %c0_26], %40 {strides = array<i32>} : memref<8x8x32xf32, #tpu.memory_space<vmem>>, vector<1x8x32xf32>,
    %41 = vector.extract_strided_slice %12 {offsets = [56, 0], sizes = [8, 32], strides = [1, 1]} : vector<64x32xf32> to vector<8x32xf32>
    %c7 = arith.constant 7 : index
    %c0_27 = arith.constant 0 : index
    %c0_28 = arith.constant 0 : index
    %42 = vector.load %arg27[%c7, %c0_27, %c0_28] : memref<8x8x32xf32, #tpu.memory_space<vmem>>, vector<1x8x32xf32>
    %43 = vector.shape_cast %42 : vector<1x8x32xf32> to vector<8x32xf32>
    %44 = vector.shape_cast %41 : vector<8x32xf32> to vector<1x8x32xf32>
    tpu.vector_store %arg27[%c7, %c0_27, %c0_28], %44 {strides = array<i32>} : memref<8x8x32xf32, #tpu.memory_space<vmem>>, vector<1x8x32xf32>,
    %c0_29 = arith.constant 0 : index
    %c0_30 = arith.constant 0 : index
    %45 = vector.load %arg7[%c0_29, %c0_30] : memref<8x16xf32, #tpu.memory_space<vmem>>, vector<8x16xf32>
    %cst_31 = arith.constant 0.000000e+00 : f32
    %46 = vector.broadcast %cst_31 : f32 to vector<8x32xf32>
    %cst_32 = arith.constant 0.000000e+00 : f32
    %47 = vector.broadcast %cst_32 : f32 to vector<8x32xf32>
    %cst_33 = arith.constant 0.000000e+00 : f32
    %48 = vector.broadcast %cst_33 : f32 to vector<8x32xf32>
    %cst_34 = arith.constant 0.000000e+00 : f32
    %49 = vector.broadcast %cst_34 : f32 to vector<8x32xf32>
    %cst_35 = arith.constant 0.000000e+00 : f32
    %50 = vector.broadcast %cst_35 : f32 to vector<8x16xf32>
    %cst_36 = arith.constant 0.000000e+00 : f32
    %51 = vector.broadcast %cst_36 : f32 to vector<8x16xf32>
    %cst_37 = arith.constant 0.000000e+00 : f32
    %52 = vector.broadcast %cst_37 : f32 to vector<8x32xf32>
    %c0_i32 = arith.constant 0 : i32
    %53 = arith.index_cast %c0_i32 : i32 to index
    %c0_38 = arith.constant 0 : index
    %c0_39 = arith.constant 0 : index
    %54 = vector.load %arg27[%53, %c0_38, %c0_39] : memref<8x8x32xf32, #tpu.memory_space<vmem>>, vector<1x8x32xf32>
    %55 = vector.shape_cast %54 : vector<1x8x32xf32> to vector<8x32xf32>
    %56 = arith.index_cast %c0_i32 : i32 to index
    %c0_40 = arith.constant 0 : index
    %c0_41 = arith.constant 0 : index
    %57 = vector.load %arg23[%56, %c0_40, %c0_41] : memref<8x8x32xf32, #tpu.memory_space<vmem>>, vector<1x8x32xf32>
    %58 = vector.shape_cast %57 : vector<1x8x32xf32> to vector<8x32xf32>
    %59 = arith.index_cast %c0_i32 : i32 to index
    %c0_42 = arith.constant 0 : index
    %c0_43 = arith.constant 0 : index
    %60 = vector.load %arg24[%59, %c0_42, %c0_43] : memref<8x8x32xf32, #tpu.memory_space<vmem>>, vector<1x8x32xf32>
    %61 = vector.shape_cast %60 : vector<1x8x32xf32> to vector<8x32xf32>
    %c0_44 = arith.constant 0 : index
    %c0_45 = arith.constant 0 : index
    %62 = vector.load %arg8[%c0_44, %c0_45] : memref<32x128xf32, #tpu.memory_space<vmem>>, vector<32x128xf32>
    %cst_46 = arith.constant dense<0.000000e+00> : vector<8x128xf32>
    %63 = tpu.matmul %55, %62, %cst_46 {dimension_numbers = #tpu.dot_dimension_numbers<[1], [0], [0], [1], [0, 0, 1, 1], [], []>} : vector<8x32xf32>, vector<32x128xf32>, vector<8x128xf32> -> vector<8x128xf32>
    %c0_47 = arith.constant 0 : index
    %c0_48 = arith.constant 0 : index
    %64 = vector.load %arg9[%c0_47, %c0_48] : memref<32x128xf32, #tpu.memory_space<vmem>>, vector<32x128xf32>
    %cst_49 = arith.constant dense<0.000000e+00> : vector<8x128xf32>
    %65 = tpu.matmul %52, %64, %cst_49 {dimension_numbers = #tpu.dot_dimension_numbers<[1], [0], [0], [1], [0, 0, 1, 1], [], []>} : vector<8x32xf32>, vector<32x128xf32>, vector<8x128xf32> -> vector<8x128xf32>
    %66 = arith.addf %63, %65 : vector<8x128xf32>
    %c0_50 = arith.constant 0 : index
    %c0_51 = arith.constant 0 : index
    %67 = vector.load %arg10[%c0_50, %c0_51] : memref<32x128xf32, #tpu.memory_space<vmem>>, vector<32x128xf32>
    %cst_52 = arith.constant dense<0.000000e+00> : vector<8x128xf32>
    %68 = tpu.matmul %46, %67, %cst_52 {dimension_numbers = #tpu.dot_dimension_numbers<[1], [0], [0], [1], [0, 0, 1, 1], [], []>} : vector<8x32xf32>, vector<32x128xf32>, vector<8x128xf32> -> vector<8x128xf32>
    %69 = arith.addf %66, %68 : vector<8x128xf32>
    %c0_53 = arith.constant 0 : index
    %c0_54 = arith.constant 0 : index
    %70 = vector.load %arg11[%c0_53, %c0_54] : memref<1x128xf32, #tpu.memory_space<vmem>>, vector<1x128xf32>
    %71 = vector.broadcast %70 : vector<1x128xf32> to vector<8x128xf32>
    %72 = arith.addf %69, %71 : vector<8x128xf32>
    %73 = vector.extract_strided_slice %72 {offsets = [0, 0], sizes = [8, 32], strides = [1, 1]} : vector<8x128xf32> to vector<8x32xf32>
    %74 = arith.negf %73 : vector<8x32xf32>
    %75 = math.exp %74 : vector<8x32xf32>
    %cst_55 = arith.constant 1.000000e+00 : f32
    %76 = vector.broadcast %cst_55 : f32 to vector<8x32xf32>
    %77 = arith.addf %76, %75 : vector<8x32xf32>
    %78 = arith.divf %76, %77 : vector<8x32xf32>
    %79 = vector.extract_strided_slice %72 {offsets = [0, 32], sizes = [8, 32], strides = [1, 1]} : vector<8x128xf32> to vector<8x32xf32>
    %80 = arith.negf %79 : vector<8x32xf32>
    %81 = math.exp %80 : vector<8x32xf32>
    %cst_56 = arith.constant 1.000000e+00 : f32
    %82 = vector.broadcast %cst_56 : f32 to vector<8x32xf32>
    %83 = arith.addf %82, %81 : vector<8x32xf32>
    %84 = arith.divf %82, %83 : vector<8x32xf32>
    %85 = vector.extract_strided_slice %72 {offsets = [0, 64], sizes = [8, 32], strides = [1, 1]} : vector<8x128xf32> to vector<8x32xf32>
    %86 = math.tanh %85 : vector<8x32xf32>
    %87 = vector.extract_strided_slice %72 {offsets = [0, 96], sizes = [8, 32], strides = [1, 1]} : vector<8x128xf32> to vector<8x32xf32>
    %88 = arith.negf %87 : vector<8x32xf32>
    %89 = math.exp %88 : vector<8x32xf32>
    %cst_57 = arith.constant 1.000000e+00 : f32
    %90 = vector.broadcast %cst_57 : f32 to vector<8x32xf32>
    %91 = arith.addf %90, %89 : vector<8x32xf32>
    %92 = arith.divf %90, %91 : vector<8x32xf32>
    %93 = arith.mulf %84, %47 : vector<8x32xf32>
    %94 = arith.mulf %78, %86 : vector<8x32xf32>
    %95 = arith.addf %93, %94 : vector<8x32xf32>
    %96 = math.tanh %95 : vector<8x32xf32>
    %97 = arith.mulf %92, %96 : vector<8x32xf32>
    %98 = arith.mulf %97, %58 : vector<8x32xf32>
    %c0_58 = arith.constant 0 : index
    %c0_59 = arith.constant 0 : index
    %99 = vector.load %arg12[%c0_58, %c0_59] : memref<32x256xf32, #tpu.memory_space<vmem>>, vector<32x256xf32>
    %cst_60 = arith.constant dense<0.000000e+00> : vector<8x256xf32>
    %100 = tpu.matmul %98, %99, %cst_60 {dimension_numbers = #tpu.dot_dimension_numbers<[1], [0], [0], [1], [0, 0, 1, 1], [], []>} : vector<8x32xf32>, vector<32x256xf32>, vector<8x256xf32> -> vector<8x256xf32>
    %c0_61 = arith.constant 0 : index
    %c0_62 = arith.constant 0 : index
    %101 = vector.load %arg13[%c0_61, %c0_62] : memref<16x256xf32, #tpu.memory_space<vmem>>, vector<16x256xf32>
    %cst_63 = arith.constant dense<0.000000e+00> : vector<8x256xf32>
    %102 = tpu.matmul %50, %101, %cst_63 {dimension_numbers = #tpu.dot_dimension_numbers<[1], [0], [0], [1], [0, 0, 1, 1], [], []>} : vector<8x16xf32>, vector<16x256xf32>, vector<8x256xf32> -> vector<8x256xf32>
    %103 = arith.addf %100, %102 : vector<8x256xf32>
    %c0_64 = arith.constant 0 : index
    %c0_65 = arith.constant 0 : index
    %104 = vector.load %arg14[%c0_64, %c0_65] : memref<16x256xf32, #tpu.memory_space<vmem>>, vector<16x256xf32>
    %cst_66 = arith.constant dense<0.000000e+00> : vector<8x256xf32>
    %105 = tpu.matmul %51, %104, %cst_66 {dimension_numbers = #tpu.dot_dimension_numbers<[1], [0], [0], [1], [0, 0, 1, 1], [], []>} : vector<8x16xf32>, vector<16x256xf32>, vector<8x256xf32> -> vector<8x256xf32>
    %106 = arith.addf %103, %105 : vector<8x256xf32>
    %c0_67 = arith.constant 0 : index
    %c0_68 = arith.constant 0 : index
    %107 = vector.load %arg6[%c0_67, %c0_68] : memref<8x256xf32, #tpu.memory_space<vmem>>, vector<8x256xf32>
    %108 = arith.addf %106, %107 : vector<8x256xf32>
    %109 = math.tanh %108 : vector<8x256xf32>
    %c0_69 = arith.constant 0 : index
    %c0_70 = arith.constant 0 : index
    %110 = vector.load %arg15[%c0_69, %c0_70] : memref<256x16xf32, #tpu.memory_space<vmem>>, vector<256x16xf32>
    %cst_71 = arith.constant dense<0.000000e+00> : vector<8x16xf32>
    %111 = tpu.matmul %109, %110, %cst_71 {dimension_numbers = #tpu.dot_dimension_numbers<[1], [0], [0], [1], [0, 0, 1, 1], [], []>} : vector<8x256xf32>, vector<256x16xf32>, vector<8x16xf32> -> vector<8x16xf32>
    %112 = arith.addf %111, %45 : vector<8x16xf32>
    %cst_72 = arith.constant dense<0xFF800000> : vector<8xf32>
    %113 = vector.multi_reduction <maximumf>, %112, %cst_72 [1] : vector<8x16xf32> to vector<8xf32>
    %114 = vector.shape_cast %113 : vector<8xf32> to vector<8x1xf32>
    %115 = vector.broadcast %114 : vector<8x1xf32> to vector<8x16xf32>
    %116 = arith.subf %112, %115 : vector<8x16xf32>
    %117 = math.exp %116 : vector<8x16xf32>
    %cst_73 = arith.constant dense<0.000000e+00> : vector<8xf32>
    %118 = vector.multi_reduction <add>, %117, %cst_73 [1] : vector<8x16xf32> to vector<8xf32>
    %119 = vector.shape_cast %118 : vector<8xf32> to vector<8x1xf32>
    %120 = vector.broadcast %119 : vector<8x1xf32> to vector<8x16xf32>
    %121 = arith.divf %117, %120 : vector<8x16xf32>
    %122 = vector.shape_cast %121 : vector<8x16xf32> to vector<8x1x16xf32>
    %c0_74 = arith.constant 0 : index
    %c0_75 = arith.constant 0 : index
    %c0_76 = arith.constant 0 : index
    %123 = vector.load %arg5[%c0_74, %c0_75, %c0_76] : memref<8x16x32xf32, #tpu.memory_space<vmem>>, vector<8x16x32xf32>
    "tpu.trace_start"() <{level = 10 : i32, message = "bqt,bte->bqe"}> : () -> ()
    %cst_77 = arith.constant dense<0.000000e+00> : vector<8x1x32xf32>
    %124 = tpu.matmul %122, %123, %cst_77 {dimension_numbers = #tpu.dot_dimension_numbers<[2], [1], [1], [2], [0, 0, 0, 1, 1, 2], [0], [0]>} : vector<8x1x16xf32>, vector<8x16x32xf32>, vector<8x1x32xf32> -> vector<8x1x32xf32>
    "tpu.trace_stop"() : () -> ()
    %125 = vector.shape_cast %124 : vector<8x1x32xf32> to vector<8x32xf32>
    %126 = arith.addf %51, %121 : vector<8x16xf32>
    %c0_78 = arith.constant 0 : index
    %c0_79 = arith.constant 0 : index
    %127 = vector.load %arg16[%c0_78, %c0_79] : memref<32x128xf32, #tpu.memory_space<vmem>>, vector<32x128xf32>
    %cst_80 = arith.constant dense<0.000000e+00> : vector<8x128xf32>
    %128 = tpu.matmul %98, %127, %cst_80 {dimension_numbers = #tpu.dot_dimension_numbers<[1], [0], [0], [1], [0, 0, 1, 1], [], []>} : vector<8x32xf32>, vector<32x128xf32>, vector<8x128xf32> -> vector<8x128xf32>
    %c0_81 = arith.constant 0 : index
    %c0_82 = arith.constant 0 : index
    %129 = vector.load %arg17[%c0_81, %c0_82] : memref<32x128xf32, #tpu.memory_space<vmem>>, vector<32x128xf32>
    %cst_83 = arith.constant dense<0.000000e+00> : vector<8x128xf32>
    %130 = tpu.matmul %125, %129, %cst_83 {dimension_numbers = #tpu.dot_dimension_numbers<[1], [0], [0], [1], [0, 0, 1, 1], [], []>} : vector<8x32xf32>, vector<32x128xf32>, vector<8x128xf32> -> vector<8x128xf32>
    %131 = arith.addf %128, %130 : vector<8x128xf32>
    %c0_84 = arith.constant 0 : index
    %c0_85 = arith.constant 0 : index
    %132 = vector.load %arg18[%c0_84, %c0_85] : memref<32x128xf32, #tpu.memory_space<vmem>>, vector<32x128xf32>
    %cst_86 = arith.constant dense<0.000000e+00> : vector<8x128xf32>
    %133 = tpu.matmul %48, %132, %cst_86 {dimension_numbers = #tpu.dot_dimension_numbers<[1], [0], [0], [1], [0, 0, 1, 1], [], []>} : vector<8x32xf32>, vector<32x128xf32>, vector<8x128xf32> -> vector<8x128xf32>
    %134 = arith.addf %131, %133 : vector<8x128xf32>
    %c0_87 = arith.constant 0 : index
    %c0_88 = arith.constant 0 : index
    %135 = vector.load %arg19[%c0_87, %c0_88] : memref<1x128xf32, #tpu.memory_space<vmem>>, vector<1x128xf32>
    %136 = vector.broadcast %135 : vector<1x128xf32> to vector<8x128xf32>
    %137 = arith.addf %134, %136 : vector<8x128xf32>
    %138 = vector.extract_strided_slice %137 {offsets = [0, 0], sizes = [8, 32], strides = [1, 1]} : vector<8x128xf32> to vector<8x32xf32>
    %139 = arith.negf %138 : vector<8x32xf32>
    %140 = math.exp %139 : vector<8x32xf32>
    %cst_89 = arith.constant 1.000000e+00 : f32
    %141 = vector.broadcast %cst_89 : f32 to vector<8x32xf32>
    %142 = arith.addf %141, %140 : vector<8x32xf32>
    %143 = arith.divf %141, %142 : vector<8x32xf32>
    %144 = vector.extract_strided_slice %137 {offsets = [0, 32], sizes = [8, 32], strides = [1, 1]} : vector<8x128xf32> to vector<8x32xf32>
    %145 = arith.negf %144 : vector<8x32xf32>
    %146 = math.exp %145 : vector<8x32xf32>
    %cst_90 = arith.constant 1.000000e+00 : f32
    %147 = vector.broadcast %cst_90 : f32 to vector<8x32xf32>
    %148 = arith.addf %147, %146 : vector<8x32xf32>
    %149 = arith.divf %147, %148 : vector<8x32xf32>
    %150 = vector.extract_strided_slice %137 {offsets = [0, 64], sizes = [8, 32], strides = [1, 1]} : vector<8x128xf32> to vector<8x32xf32>
    %151 = math.tanh %150 : vector<8x32xf32>
    %152 = vector.extract_strided_slice %137 {offsets = [0, 96], sizes = [8, 32], strides = [1, 1]} : vector<8x128xf32> to vector<8x32xf32>
    %153 = arith.negf %152 : vector<8x32xf32>
    %154 = math.exp %153 : vector<8x32xf32>
    %cst_91 = arith.constant 1.000000e+00 : f32
    %155 = vector.broadcast %cst_91 : f32 to vector<8x32xf32>
    %156 = arith.addf %155, %154 : vector<8x32xf32>
    %157 = arith.divf %155, %156 : vector<8x32xf32>
    %158 = arith.mulf %149, %49 : vector<8x32xf32>
    %159 = arith.mulf %143, %151 : vector<8x32xf32>
    %160 = arith.addf %158, %159 : vector<8x32xf32>
    %161 = math.tanh %160 : vector<8x32xf32>
    %162 = arith.mulf %157, %161 : vector<8x32xf32>
    %163 = arith.mulf %162, %61 : vector<8x32xf32>
    %c0_92 = arith.constant 0 : index
    %c0_93 = arith.constant 0 : index
    %164 = vector.load %arg20[%c0_92, %c0_93] : memref<32x128xf32, #tpu.memory_space<vmem>>, vector<32x128xf32>
    %cst_94 = arith.constant dense<0.000000e+00> : vector<8x128xf32>
    %165 = tpu.matmul %163, %164, %cst_94 {dimension_numbers = #tpu.dot_dimension_numbers<[1], [0], [0], [1], [0, 0, 1, 1], [], []>} : vector<8x32xf32>, vector<32x128xf32>, vector<8x128xf32> -> vector<8x128xf32>
    %c0_95 = arith.constant 0 : index
    %c0_96 = arith.constant 0 : index
    %166 = vector.load %arg21[%c0_95, %c0_96] : memref<32x128xf32, #tpu.memory_space<vmem>>, vector<32x128xf32>
    %cst_97 = arith.constant dense<0.000000e+00> : vector<8x128xf32>
    %167 = tpu.matmul %125, %166, %cst_97 {dimension_numbers = #tpu.dot_dimension_numbers<[1], [0], [0], [1], [0, 0, 1, 1], [], []>} : vector<8x32xf32>, vector<32x128xf32>, vector<8x128xf32> -> vector<8x128xf32>
    %168 = arith.addf %165, %167 : vector<8x128xf32>
    %c0_98 = arith.constant 0 : index
    %c0_99 = arith.constant 0 : index
    %169 = vector.load %arg22[%c0_98, %c0_99] : memref<1x128xf32, #tpu.memory_space<vmem>>, vector<1x128xf32>
    %170 = vector.broadcast %169 : vector<1x128xf32> to vector<8x128xf32>
    %171 = arith.addf %168, %170 : vector<8x128xf32>
    %172 = arith.index_cast %c0_i32 : i32 to index
    %c0_100 = arith.constant 0 : index
    %c0_101 = arith.constant 0 : index
    %173 = vector.load %arg25[%172, %c0_100, %c0_101] : memref<8x8x128xf32, #tpu.memory_space<vmem>>, vector<1x8x128xf32>
    %174 = vector.shape_cast %173 : vector<1x8x128xf32> to vector<8x128xf32>
    %175 = vector.shape_cast %171 : vector<8x128xf32> to vector<1x8x128xf32>
    tpu.vector_store %arg25[%172, %c0_100, %c0_101], %175 {strides = array<i32>} : memref<8x8x128xf32, #tpu.memory_space<vmem>>, vector<1x8x128xf32>,
    %176 = arith.index_cast %c0_i32 : i32 to index
    %c0_102 = arith.constant 0 : index
    %c0_103 = arith.constant 0 : index
    %177 = vector.load %arg26[%176, %c0_102, %c0_103] : memref<8x8x16xf32, #tpu.memory_space<vmem>>, vector<1x8x16xf32>
    %178 = vector.shape_cast %177 : vector<1x8x16xf32> to vector<8x16xf32>
    %179 = vector.shape_cast %121 : vector<8x16xf32> to vector<1x8x16xf32>
    tpu.vector_store %arg26[%176, %c0_102, %c0_103], %179 {strides = array<i32>} : memref<8x8x16xf32, #tpu.memory_space<vmem>>, vector<1x8x16xf32>,
    %c1_i32 = arith.constant 1 : i32
    %180 = arith.index_cast %c1_i32 : i32 to index
    %c0_104 = arith.constant 0 : index
    %c0_105 = arith.constant 0 : index
    %181 = vector.load %arg27[%180, %c0_104, %c0_105] : memref<8x8x32xf32, #tpu.memory_space<vmem>>, vector<1x8x32xf32>
    %182 = vector.shape_cast %181 : vector<1x8x32xf32> to vector<8x32xf32>
    %183 = arith.index_cast %c1_i32 : i32 to index
    %c0_106 = arith.constant 0 : index
    %c0_107 = arith.constant 0 : index
    %184 = vector.load %arg23[%183, %c0_106, %c0_107] : memref<8x8x32xf32, #tpu.memory_space<vmem>>, vector<1x8x32xf32>
    %185 = vector.shape_cast %184 : vector<1x8x32xf32> to vector<8x32xf32>
    %186 = arith.index_cast %c1_i32 : i32 to index
    %c0_108 = arith.constant 0 : index
    %c0_109 = arith.constant 0 : index
    %187 = vector.load %arg24[%186, %c0_108, %c0_109] : memref<8x8x32xf32, #tpu.memory_space<vmem>>, vector<1x8x32xf32>
    %188 = vector.shape_cast %187 : vector<1x8x32xf32> to vector<8x32xf32>
    %c0_110 = arith.constant 0 : index
    %c0_111 = arith.constant 0 : index
    %189 = vector.load %arg8[%c0_110, %c0_111] : memref<32x128xf32, #tpu.memory_space<vmem>>, vector<32x128xf32>
    %cst_112 = arith.constant dense<0.000000e+00> : vector<8x128xf32>
    %190 = tpu.matmul %182, %189, %cst_112 {dimension_numbers = #tpu.dot_dimension_numbers<[1], [0], [0], [1], [0, 0, 1, 1], [], []>} : vector<8x32xf32>, vector<32x128xf32>, vector<8x128xf32> -> vector<8x128xf32>
    %c0_113 = arith.constant 0 : index
    %c0_114 = arith.constant 0 : index
    %191 = vector.load %arg9[%c0_113, %c0_114] : memref<32x128xf32, #tpu.memory_space<vmem>>, vector<32x128xf32>
    %cst_115 = arith.constant dense<0.000000e+00> : vector<8x128xf32>
    %192 = tpu.matmul %125, %191, %cst_115 {dimension_numbers = #tpu.dot_dimension_numbers<[1], [0], [0], [1], [0, 0, 1, 1], [], []>} : vector<8x32xf32>, vector<32x128xf32>, vector<8x128xf32> -> vector<8x128xf32>
    %193 = arith.addf %190, %192 : vector<8x128xf32>
    %c0_116 = arith.constant 0 : index
    %c0_117 = arith.constant 0 : index
    %194 = vector.load %arg10[%c0_116, %c0_117] : memref<32x128xf32, #tpu.memory_space<vmem>>, vector<32x128xf32>
    %cst_118 = arith.constant dense<0.000000e+00> : vector<8x128xf32>
    %195 = tpu.matmul %98, %194, %cst_118 {dimension_numbers = #tpu.dot_dimension_numbers<[1], [0], [0], [1], [0, 0, 1, 1], [], []>} : vector<8x32xf32>, vector<32x128xf32>, vector<8x128xf32> -> vector<8x128xf32>
    %196 = arith.addf %193, %195 : vector<8x128xf32>
    %c0_119 = arith.constant 0 : index
    %c0_120 = arith.constant 0 : index
    %197 = vector.load %arg11[%c0_119, %c0_120] : memref<1x128xf32, #tpu.memory_space<vmem>>, vector<1x128xf32>
    %198 = vector.broadcast %197 : vector<1x128xf32> to vector<8x128xf32>
    %199 = arith.addf %196, %198 : vector<8x128xf32>
    %200 = vector.extract_strided_slice %199 {offsets = [0, 0], sizes = [8, 32], strides = [1, 1]} : vector<8x128xf32> to vector<8x32xf32>
    %201 = arith.negf %200 : vector<8x32xf32>
    %202 = math.exp %201 : vector<8x32xf32>
    %cst_121 = arith.constant 1.000000e+00 : f32
    %203 = vector.broadcast %cst_121 : f32 to vector<8x32xf32>
    %204 = arith.addf %203, %202 : vector<8x32xf32>
    %205 = arith.divf %203, %204 : vector<8x32xf32>
    %206 = vector.extract_strided_slice %199 {offsets = [0, 32], sizes = [8, 32], strides = [1, 1]} : vector<8x128xf32> to vector<8x32xf32>
    %207 = arith.negf %206 : vector<8x32xf32>
    %208 = math.exp %207 : vector<8x32xf32>
    %cst_122 = arith.constant 1.000000e+00 : f32
    %209 = vector.broadcast %cst_122 : f32 to vector<8x32xf32>
    %210 = arith.addf %209, %208 : vector<8x32xf32>
    %211 = arith.divf %209, %210 : vector<8x32xf32>
    %212 = vector.extract_strided_slice %199 {offsets = [0, 64], sizes = [8, 32], strides = [1, 1]} : vector<8x128xf32> to vector<8x32xf32>
    %213 = math.tanh %212 : vector<8x32xf32>
    %214 = vector.extract_strided_slice %199 {offsets = [0, 96], sizes = [8, 32], strides = [1, 1]} : vector<8x128xf32> to vector<8x32xf32>
    %215 = arith.negf %214 : vector<8x32xf32>
    %216 = math.exp %215 : vector<8x32xf32>
    %cst_123 = arith.constant 1.000000e+00 : f32
    %217 = vector.broadcast %cst_123 : f32 to vector<8x32xf32>
    %218 = arith.addf %217, %216 : vector<8x32xf32>
    %219 = arith.divf %217, %218 : vector<8x32xf32>
    %220 = arith.mulf %211, %95 : vector<8x32xf32>
    %221 = arith.mulf %205, %213 : vector<8x32xf32>
    %222 = arith.addf %220, %221 : vector<8x32xf32>
    %223 = math.tanh %222 : vector<8x32xf32>
    %224 = arith.mulf %219, %223 : vector<8x32xf32>
    %225 = arith.mulf %224, %185 : vector<8x32xf32>
    %c0_124 = arith.constant 0 : index
    %c0_125 = arith.constant 0 : index
    %226 = vector.load %arg12[%c0_124, %c0_125] : memref<32x256xf32, #tpu.memory_space<vmem>>, vector<32x256xf32>
    %cst_126 = arith.constant dense<0.000000e+00> : vector<8x256xf32>
    %227 = tpu.matmul %225, %226, %cst_126 {dimension_numbers = #tpu.dot_dimension_numbers<[1], [0], [0], [1], [0, 0, 1, 1], [], []>} : vector<8x32xf32>, vector<32x256xf32>, vector<8x256xf32> -> vector<8x256xf32>
    %c0_127 = arith.constant 0 : index
    %c0_128 = arith.constant 0 : index
    %228 = vector.load %arg13[%c0_127, %c0_128] : memref<16x256xf32, #tpu.memory_space<vmem>>, vector<16x256xf32>
    %cst_129 = arith.constant dense<0.000000e+00> : vector<8x256xf32>
    %229 = tpu.matmul %121, %228, %cst_129 {dimension_numbers = #tpu.dot_dimension_numbers<[1], [0], [0], [1], [0, 0, 1, 1], [], []>} : vector<8x16xf32>, vector<16x256xf32>, vector<8x256xf32> -> vector<8x256xf32>
    %230 = arith.addf %227, %229 : vector<8x256xf32>
    %c0_130 = arith.constant 0 : index
    %c0_131 = arith.constant 0 : index
    %231 = vector.load %arg14[%c0_130, %c0_131] : memref<16x256xf32, #tpu.memory_space<vmem>>, vector<16x256xf32>
    %cst_132 = arith.constant dense<0.000000e+00> : vector<8x256xf32>
    %232 = tpu.matmul %126, %231, %cst_132 {dimension_numbers = #tpu.dot_dimension_numbers<[1], [0], [0], [1], [0, 0, 1, 1], [], []>} : vector<8x16xf32>, vector<16x256xf32>, vector<8x256xf32> -> vector<8x256xf32>
    %233 = arith.addf %230, %232 : vector<8x256xf32>
    %c0_133 = arith.constant 0 : index
    %c0_134 = arith.constant 0 : index
    %234 = vector.load %arg6[%c0_133, %c0_134] : memref<8x256xf32, #tpu.memory_space<vmem>>, vector<8x256xf32>
    %235 = arith.addf %233, %234 : vector<8x256xf32>
    %236 = math.tanh %235 : vector<8x256xf32>
    %c0_135 = arith.constant 0 : index
    %c0_136 = arith.constant 0 : index
    %237 = vector.load %arg15[%c0_135, %c0_136] : memref<256x16xf32, #tpu.memory_space<vmem>>, vector<256x16xf32>
    %cst_137 = arith.constant dense<0.000000e+00> : vector<8x16xf32>
    %238 = tpu.matmul %236, %237, %cst_137 {dimension_numbers = #tpu.dot_dimension_numbers<[1], [0], [0], [1], [0, 0, 1, 1], [], []>} : vector<8x256xf32>, vector<256x16xf32>, vector<8x16xf32> -> vector<8x16xf32>
    %239 = arith.addf %238, %45 : vector<8x16xf32>
    %cst_138 = arith.constant dense<0xFF800000> : vector<8xf32>
    %240 = vector.multi_reduction <maximumf>, %239, %cst_138 [1] : vector<8x16xf32> to vector<8xf32>
    %241 = vector.shape_cast %240 : vector<8xf32> to vector<8x1xf32>
    %242 = vector.broadcast %241 : vector<8x1xf32> to vector<8x16xf32>
    %243 = arith.subf %239, %242 : vector<8x16xf32>
    %244 = math.exp %243 : vector<8x16xf32>
    %cst_139 = arith.constant dense<0.000000e+00> : vector<8xf32>
    %245 = vector.multi_reduction <add>, %244, %cst_139 [1] : vector<8x16xf32> to vector<8xf32>
    %246 = vector.shape_cast %245 : vector<8xf32> to vector<8x1xf32>
    %247 = vector.broadcast %246 : vector<8x1xf32> to vector<8x16xf32>
    %248 = arith.divf %244, %247 : vector<8x16xf32>
    %249 = vector.shape_cast %248 : vector<8x16xf32> to vector<8x1x16xf32>
    %c0_140 = arith.constant 0 : index
    %c0_141 = arith.constant 0 : index
    %c0_142 = arith.constant 0 : index
    %250 = vector.load %arg5[%c0_140, %c0_141, %c0_142] : memref<8x16x32xf32, #tpu.memory_space<vmem>>, vector<8x16x32xf32>
    "tpu.trace_start"() <{level = 10 : i32, message = "bqt,bte->bqe"}> : () -> ()
    %cst_143 = arith.constant dense<0.000000e+00> : vector<8x1x32xf32>
    %251 = tpu.matmul %249, %250, %cst_143 {dimension_numbers = #tpu.dot_dimension_numbers<[2], [1], [1], [2], [0, 0, 0, 1, 1, 2], [0], [0]>} : vector<8x1x16xf32>, vector<8x16x32xf32>, vector<8x1x32xf32> -> vector<8x1x32xf32>
    "tpu.trace_stop"() : () -> ()
    %252 = vector.shape_cast %251 : vector<8x1x32xf32> to vector<8x32xf32>
    %253 = arith.addf %126, %248 : vector<8x16xf32>
    %c0_144 = arith.constant 0 : index
    %c0_145 = arith.constant 0 : index
    %254 = vector.load %arg16[%c0_144, %c0_145] : memref<32x128xf32, #tpu.memory_space<vmem>>, vector<32x128xf32>
    %cst_146 = arith.constant dense<0.000000e+00> : vector<8x128xf32>
    %255 = tpu.matmul %225, %254, %cst_146 {dimension_numbers = #tpu.dot_dimension_numbers<[1], [0], [0], [1], [0, 0, 1, 1], [], []>} : vector<8x32xf32>, vector<32x128xf32>, vector<8x128xf32> -> vector<8x128xf32>
    %c0_147 = arith.constant 0 : index
    %c0_148 = arith.constant 0 : index
    %256 = vector.load %arg17[%c0_147, %c0_148] : memref<32x128xf32, #tpu.memory_space<vmem>>, vector<32x128xf32>
    %cst_149 = arith.constant dense<0.000000e+00> : vector<8x128xf32>
    %257 = tpu.matmul %252, %256, %cst_149 {dimension_numbers = #tpu.dot_dimension_numbers<[1], [0], [0], [1], [0, 0, 1, 1], [], []>} : vector<8x32xf32>, vector<32x128xf32>, vector<8x128xf32> -> vector<8x128xf32>
    %258 = arith.addf %255, %257 : vector<8x128xf32>
    %c0_150 = arith.constant 0 : index
    %c0_151 = arith.constant 0 : index
    %259 = vector.load %arg18[%c0_150, %c0_151] : memref<32x128xf32, #tpu.memory_space<vmem>>, vector<32x128xf32>
    %cst_152 = arith.constant dense<0.000000e+00> : vector<8x128xf32>
    %260 = tpu.matmul %163, %259, %cst_152 {dimension_numbers = #tpu.dot_dimension_numbers<[1], [0], [0], [1], [0, 0, 1, 1], [], []>} : vector<8x32xf32>, vector<32x128xf32>, vector<8x128xf32> -> vector<8x128xf32>
    %261 = arith.addf %258, %260 : vector<8x128xf32>
    %c0_153 = arith.constant 0 : index
    %c0_154 = arith.constant 0 : index
    %262 = vector.load %arg19[%c0_153, %c0_154] : memref<1x128xf32, #tpu.memory_space<vmem>>, vector<1x128xf32>
    %263 = vector.broadcast %262 : vector<1x128xf32> to vector<8x128xf32>
    %264 = arith.addf %261, %263 : vector<8x128xf32>
    %265 = vector.extract_strided_slice %264 {offsets = [0, 0], sizes = [8, 32], strides = [1, 1]} : vector<8x128xf32> to vector<8x32xf32>
    %266 = arith.negf %265 : vector<8x32xf32>
    %267 = math.exp %266 : vector<8x32xf32>
    %cst_155 = arith.constant 1.000000e+00 : f32
    %268 = vector.broadcast %cst_155 : f32 to vector<8x32xf32>
    %269 = arith.addf %268, %267 : vector<8x32xf32>
    %270 = arith.divf %268, %269 : vector<8x32xf32>
    %271 = vector.extract_strided_slice %264 {offsets = [0, 32], sizes = [8, 32], strides = [1, 1]} : vector<8x128xf32> to vector<8x32xf32>
    %272 = arith.negf %271 : vector<8x32xf32>
    %273 = math.exp %272 : vector<8x32xf32>
    %cst_156 = arith.constant 1.000000e+00 : f32
    %274 = vector.broadcast %cst_156 : f32 to vector<8x32xf32>
    %275 = arith.addf %274, %273 : vector<8x32xf32>
    %276 = arith.divf %274, %275 : vector<8x32xf32>
    %277 = vector.extract_strided_slice %264 {offsets = [0, 64], sizes = [8, 32], strides = [1, 1]} : vector<8x128xf32> to vector<8x32xf32>
    %278 = math.tanh %277 : vector<8x32xf32>
    %279 = vector.extract_strided_slice %264 {offsets = [0, 96], sizes = [8, 32], strides = [1, 1]} : vector<8x128xf32> to vector<8x32xf32>
    %280 = arith.negf %279 : vector<8x32xf32>
    %281 = math.exp %280 : vector<8x32xf32>
    %cst_157 = arith.constant 1.000000e+00 : f32
    %282 = vector.broadcast %cst_157 : f32 to vector<8x32xf32>
    %283 = arith.addf %282, %281 : vector<8x32xf32>
    %284 = arith.divf %282, %283 : vector<8x32xf32>
    %285 = arith.mulf %276, %160 : vector<8x32xf32>
    %286 = arith.mulf %270, %278 : vector<8x32xf32>
    %287 = arith.addf %285, %286 : vector<8x32xf32>
    %288 = math.tanh %287 : vector<8x32xf32>
    %289 = arith.mulf %284, %288 : vector<8x32xf32>
    %290 = arith.mulf %289, %188 : vector<8x32xf32>
    %c0_158 = arith.constant 0 : index
    %c0_159 = arith.constant 0 : index
    %291 = vector.load %arg20[%c0_158, %c0_159] : memref<32x128xf32, #tpu.memory_space<vmem>>, vector<32x128xf32>
    %cst_160 = arith.constant dense<0.000000e+00> : vector<8x128xf32>
    %292 = tpu.matmul %290, %291, %cst_160 {dimension_numbers = #tpu.dot_dimension_numbers<[1], [0], [0], [1], [0, 0, 1, 1], [], []>} : vector<8x32xf32>, vector<32x128xf32>, vector<8x128xf32> -> vector<8x128xf32>
    %c0_161 = arith.constant 0 : index
    %c0_162 = arith.constant 0 : index
    %293 = vector.load %arg21[%c0_161, %c0_162] : memref<32x128xf32, #tpu.memory_space<vmem>>, vector<32x128xf32>
    %cst_163 = arith.constant dense<0.000000e+00> : vector<8x128xf32>
    %294 = tpu.matmul %252, %293, %cst_163 {dimension_numbers = #tpu.dot_dimension_numbers<[1], [0], [0], [1], [0, 0, 1, 1], [], []>} : vector<8x32xf32>, vector<32x128xf32>, vector<8x128xf32> -> vector<8x128xf32>
    %295 = arith.addf %292, %294 : vector<8x128xf32>
    %c0_164 = arith.constant 0 : index
    %c0_165 = arith.constant 0 : index
    %296 = vector.load %arg22[%c0_164, %c0_165] : memref<1x128xf32, #tpu.memory_space<vmem>>, vector<1x128xf32>
    %297 = vector.broadcast %296 : vector<1x128xf32> to vector<8x128xf32>
    %298 = arith.addf %295, %297 : vector<8x128xf32>
    %299 = arith.index_cast %c1_i32 : i32 to index
    %c0_166 = arith.constant 0 : index
    %c0_167 = arith.constant 0 : index
    %300 = vector.load %arg25[%299, %c0_166, %c0_167] : memref<8x8x128xf32, #tpu.memory_space<vmem>>, vector<1x8x128xf32>
    %301 = vector.shape_cast %300 : vector<1x8x128xf32> to vector<8x128xf32>
    %302 = vector.shape_cast %298 : vector<8x128xf32> to vector<1x8x128xf32>
    tpu.vector_store %arg25[%299, %c0_166, %c0_167], %302 {strides = array<i32>} : memref<8x8x128xf32, #tpu.memory_space<vmem>>, vector<1x8x128xf32>,
    %303 = arith.index_cast %c1_i32 : i32 to index
    %c0_168 = arith.constant 0 : index
    %c0_169 = arith.constant 0 : index
    %304 = vector.load %arg26[%303, %c0_168, %c0_169] : memref<8x8x16xf32, #tpu.memory_space<vmem>>, vector<1x8x16xf32>
    %305 = vector.shape_cast %304 : vector<1x8x16xf32> to vector<8x16xf32>
    %306 = vector.shape_cast %248 : vector<8x16xf32> to vector<1x8x16xf32>
    tpu.vector_store %arg26[%303, %c0_168, %c0_169], %306 {strides = array<i32>} : memref<8x8x16xf32, #tpu.memory_space<vmem>>, vector<1x8x16xf32>,
    %c2_i32 = arith.constant 2 : i32
    %307 = arith.index_cast %c2_i32 : i32 to index
    %c0_170 = arith.constant 0 : index
    %c0_171 = arith.constant 0 : index
    %308 = vector.load %arg27[%307, %c0_170, %c0_171] : memref<8x8x32xf32, #tpu.memory_space<vmem>>, vector<1x8x32xf32>
    %309 = vector.shape_cast %308 : vector<1x8x32xf32> to vector<8x32xf32>
    %310 = arith.index_cast %c2_i32 : i32 to index
    %c0_172 = arith.constant 0 : index
    %c0_173 = arith.constant 0 : index
    %311 = vector.load %arg23[%310, %c0_172, %c0_173] : memref<8x8x32xf32, #tpu.memory_space<vmem>>, vector<1x8x32xf32>
    %312 = vector.shape_cast %311 : vector<1x8x32xf32> to vector<8x32xf32>
    %313 = arith.index_cast %c2_i32 : i32 to index
    %c0_174 = arith.constant 0 : index
    %c0_175 = arith.constant 0 : index
    %314 = vector.load %arg24[%313, %c0_174, %c0_175] : memref<8x8x32xf32, #tpu.memory_space<vmem>>, vector<1x8x32xf32>
    %315 = vector.shape_cast %314 : vector<1x8x32xf32> to vector<8x32xf32>
    %c0_176 = arith.constant 0 : index
    %c0_177 = arith.constant 0 : index
    %316 = vector.load %arg8[%c0_176, %c0_177] : memref<32x128xf32, #tpu.memory_space<vmem>>, vector<32x128xf32>
    %cst_178 = arith.constant dense<0.000000e+00> : vector<8x128xf32>
    %317 = tpu.matmul %309, %316, %cst_178 {dimension_numbers = #tpu.dot_dimension_numbers<[1], [0], [0], [1], [0, 0, 1, 1], [], []>} : vector<8x32xf32>, vector<32x128xf32>, vector<8x128xf32> -> vector<8x128xf32>
    %c0_179 = arith.constant 0 : index
    %c0_180 = arith.constant 0 : index
    %318 = vector.load %arg9[%c0_179, %c0_180] : memref<32x128xf32, #tpu.memory_space<vmem>>, vector<32x128xf32>
    %cst_181 = arith.constant dense<0.000000e+00> : vector<8x128xf32>
    %319 = tpu.matmul %252, %318, %cst_181 {dimension_numbers = #tpu.dot_dimension_numbers<[1], [0], [0], [1], [0, 0, 1, 1], [], []>} : vector<8x32xf32>, vector<32x128xf32>, vector<8x128xf32> -> vector<8x128xf32>
    %320 = arith.addf %317, %319 : vector<8x128xf32>
    %c0_182 = arith.constant 0 : index
    %c0_183 = arith.constant 0 : index
    %321 = vector.load %arg10[%c0_182, %c0_183] : memref<32x128xf32, #tpu.memory_space<vmem>>, vector<32x128xf32>
    %cst_184 = arith.constant dense<0.000000e+00> : vector<8x128xf32>
    %322 = tpu.matmul %225, %321, %cst_184 {dimension_numbers = #tpu.dot_dimension_numbers<[1], [0], [0], [1], [0, 0, 1, 1], [], []>} : vector<8x32xf32>, vector<32x128xf32>, vector<8x128xf32> -> vector<8x128xf32>
    %323 = arith.addf %320, %322 : vector<8x128xf32>
    %c0_185 = arith.constant 0 : index
    %c0_186 = arith.constant 0 : index
    %324 = vector.load %arg11[%c0_185, %c0_186] : memref<1x128xf32, #tpu.memory_space<vmem>>, vector<1x128xf32>
    %325 = vector.broadcast %324 : vector<1x128xf32> to vector<8x128xf32>
    %326 = arith.addf %323, %325 : vector<8x128xf32>
    %327 = vector.extract_strided_slice %326 {offsets = [0, 0], sizes = [8, 32], strides = [1, 1]} : vector<8x128xf32> to vector<8x32xf32>
    %328 = arith.negf %327 : vector<8x32xf32>
    %329 = math.exp %328 : vector<8x32xf32>
    %cst_187 = arith.constant 1.000000e+00 : f32
    %330 = vector.broadcast %cst_187 : f32 to vector<8x32xf32>
    %331 = arith.addf %330, %329 : vector<8x32xf32>
    %332 = arith.divf %330, %331 : vector<8x32xf32>
    %333 = vector.extract_strided_slice %326 {offsets = [0, 32], sizes = [8, 32], strides = [1, 1]} : vector<8x128xf32> to vector<8x32xf32>
    %334 = arith.negf %333 : vector<8x32xf32>
    %335 = math.exp %334 : vector<8x32xf32>
    %cst_188 = arith.constant 1.000000e+00 : f32
    %336 = vector.broadcast %cst_188 : f32 to vector<8x32xf32>
    %337 = arith.addf %336, %335 : vector<8x32xf32>
    %338 = arith.divf %336, %337 : vector<8x32xf32>
    %339 = vector.extract_strided_slice %326 {offsets = [0, 64], sizes = [8, 32], strides = [1, 1]} : vector<8x128xf32> to vector<8x32xf32>
    %340 = math.tanh %339 : vector<8x32xf32>
    %341 = vector.extract_strided_slice %326 {offsets = [0, 96], sizes = [8, 32], strides = [1, 1]} : vector<8x128xf32> to vector<8x32xf32>
    %342 = arith.negf %341 : vector<8x32xf32>
    %343 = math.exp %342 : vector<8x32xf32>
    %cst_189 = arith.constant 1.000000e+00 : f32
    %344 = vector.broadcast %cst_189 : f32 to vector<8x32xf32>
    %345 = arith.addf %344, %343 : vector<8x32xf32>
    %346 = arith.divf %344, %345 : vector<8x32xf32>
    %347 = arith.mulf %338, %222 : vector<8x32xf32>
    %348 = arith.mulf %332, %340 : vector<8x32xf32>
    %349 = arith.addf %347, %348 : vector<8x32xf32>
    %350 = math.tanh %349 : vector<8x32xf32>
    %351 = arith.mulf %346, %350 : vector<8x32xf32>
    %352 = arith.mulf %351, %312 : vector<8x32xf32>
    %c0_190 = arith.constant 0 : index
    %c0_191 = arith.constant 0 : index
    %353 = vector.load %arg12[%c0_190, %c0_191] : memref<32x256xf32, #tpu.memory_space<vmem>>, vector<32x256xf32>
    %cst_192 = arith.constant dense<0.000000e+00> : vector<8x256xf32>
    %354 = tpu.matmul %352, %353, %cst_192 {dimension_numbers = #tpu.dot_dimension_numbers<[1], [0], [0], [1], [0, 0, 1, 1], [], []>} : vector<8x32xf32>, vector<32x256xf32>, vector<8x256xf32> -> vector<8x256xf32>
    %c0_193 = arith.constant 0 : index
    %c0_194 = arith.constant 0 : index
    %355 = vector.load %arg13[%c0_193, %c0_194] : memref<16x256xf32, #tpu.memory_space<vmem>>, vector<16x256xf32>
    %cst_195 = arith.constant dense<0.000000e+00> : vector<8x256xf32>
    %356 = tpu.matmul %248, %355, %cst_195 {dimension_numbers = #tpu.dot_dimension_numbers<[1], [0], [0], [1], [0, 0, 1, 1], [], []>} : vector<8x16xf32>, vector<16x256xf32>, vector<8x256xf32> -> vector<8x256xf32>
    %357 = arith.addf %354, %356 : vector<8x256xf32>
    %c0_196 = arith.constant 0 : index
    %c0_197 = arith.constant 0 : index
    %358 = vector.load %arg14[%c0_196, %c0_197] : memref<16x256xf32, #tpu.memory_space<vmem>>, vector<16x256xf32>
    %cst_198 = arith.constant dense<0.000000e+00> : vector<8x256xf32>
    %359 = tpu.matmul %253, %358, %cst_198 {dimension_numbers = #tpu.dot_dimension_numbers<[1], [0], [0], [1], [0, 0, 1, 1], [], []>} : vector<8x16xf32>, vector<16x256xf32>, vector<8x256xf32> -> vector<8x256xf32>
    %360 = arith.addf %357, %359 : vector<8x256xf32>
    %c0_199 = arith.constant 0 : index
    %c0_200 = arith.constant 0 : index
    %361 = vector.load %arg6[%c0_199, %c0_200] : memref<8x256xf32, #tpu.memory_space<vmem>>, vector<8x256xf32>
    %362 = arith.addf %360, %361 : vector<8x256xf32>
    %363 = math.tanh %362 : vector<8x256xf32>
    %c0_201 = arith.constant 0 : index
    %c0_202 = arith.constant 0 : index
    %364 = vector.load %arg15[%c0_201, %c0_202] : memref<256x16xf32, #tpu.memory_space<vmem>>, vector<256x16xf32>
    %cst_203 = arith.constant dense<0.000000e+00> : vector<8x16xf32>
    %365 = tpu.matmul %363, %364, %cst_203 {dimension_numbers = #tpu.dot_dimension_numbers<[1], [0], [0], [1], [0, 0, 1, 1], [], []>} : vector<8x256xf32>, vector<256x16xf32>, vector<8x16xf32> -> vector<8x16xf32>
    %366 = arith.addf %365, %45 : vector<8x16xf32>
    %cst_204 = arith.constant dense<0xFF800000> : vector<8xf32>
    %367 = vector.multi_reduction <maximumf>, %366, %cst_204 [1] : vector<8x16xf32> to vector<8xf32>
    %368 = vector.shape_cast %367 : vector<8xf32> to vector<8x1xf32>
    %369 = vector.broadcast %368 : vector<8x1xf32> to vector<8x16xf32>
    %370 = arith.subf %366, %369 : vector<8x16xf32>
    %371 = math.exp %370 : vector<8x16xf32>
    %cst_205 = arith.constant dense<0.000000e+00> : vector<8xf32>
    %372 = vector.multi_reduction <add>, %371, %cst_205 [1] : vector<8x16xf32> to vector<8xf32>
    %373 = vector.shape_cast %372 : vector<8xf32> to vector<8x1xf32>
    %374 = vector.broadcast %373 : vector<8x1xf32> to vector<8x16xf32>
    %375 = arith.divf %371, %374 : vector<8x16xf32>
    %376 = vector.shape_cast %375 : vector<8x16xf32> to vector<8x1x16xf32>
    %c0_206 = arith.constant 0 : index
    %c0_207 = arith.constant 0 : index
    %c0_208 = arith.constant 0 : index
    %377 = vector.load %arg5[%c0_206, %c0_207, %c0_208] : memref<8x16x32xf32, #tpu.memory_space<vmem>>, vector<8x16x32xf32>
    "tpu.trace_start"() <{level = 10 : i32, message = "bqt,bte->bqe"}> : () -> ()
    %cst_209 = arith.constant dense<0.000000e+00> : vector<8x1x32xf32>
    %378 = tpu.matmul %376, %377, %cst_209 {dimension_numbers = #tpu.dot_dimension_numbers<[2], [1], [1], [2], [0, 0, 0, 1, 1, 2], [0], [0]>} : vector<8x1x16xf32>, vector<8x16x32xf32>, vector<8x1x32xf32> -> vector<8x1x32xf32>
    "tpu.trace_stop"() : () -> ()
    %379 = vector.shape_cast %378 : vector<8x1x32xf32> to vector<8x32xf32>
    %380 = arith.addf %253, %375 : vector<8x16xf32>
    %c0_210 = arith.constant 0 : index
    %c0_211 = arith.constant 0 : index
    %381 = vector.load %arg16[%c0_210, %c0_211] : memref<32x128xf32, #tpu.memory_space<vmem>>, vector<32x128xf32>
    %cst_212 = arith.constant dense<0.000000e+00> : vector<8x128xf32>
    %382 = tpu.matmul %352, %381, %cst_212 {dimension_numbers = #tpu.dot_dimension_numbers<[1], [0], [0], [1], [0, 0, 1, 1], [], []>} : vector<8x32xf32>, vector<32x128xf32>, vector<8x128xf32> -> vector<8x128xf32>
    %c0_213 = arith.constant 0 : index
    %c0_214 = arith.constant 0 : index
    %383 = vector.load %arg17[%c0_213, %c0_214] : memref<32x128xf32, #tpu.memory_space<vmem>>, vector<32x128xf32>
    %cst_215 = arith.constant dense<0.000000e+00> : vector<8x128xf32>
    %384 = tpu.matmul %379, %383, %cst_215 {dimension_numbers = #tpu.dot_dimension_numbers<[1], [0], [0], [1], [0, 0, 1, 1], [], []>} : vector<8x32xf32>, vector<32x128xf32>, vector<8x128xf32> -> vector<8x128xf32>
    %385 = arith.addf %382, %384 : vector<8x128xf32>
    %c0_216 = arith.constant 0 : index
    %c0_217 = arith.constant 0 : index
    %386 = vector.load %arg18[%c0_216, %c0_217] : memref<32x128xf32, #tpu.memory_space<vmem>>, vector<32x128xf32>
    %cst_218 = arith.constant dense<0.000000e+00> : vector<8x128xf32>
    %387 = tpu.matmul %290, %386, %cst_218 {dimension_numbers = #tpu.dot_dimension_numbers<[1], [0], [0], [1], [0, 0, 1, 1], [], []>} : vector<8x32xf32>, vector<32x128xf32>, vector<8x128xf32> -> vector<8x128xf32>
    %388 = arith.addf %385, %387 : vector<8x128xf32>
    %c0_219 = arith.constant 0 : index
    %c0_220 = arith.constant 0 : index
    %389 = vector.load %arg19[%c0_219, %c0_220] : memref<1x128xf32, #tpu.memory_space<vmem>>, vector<1x128xf32>
    %390 = vector.broadcast %389 : vector<1x128xf32> to vector<8x128xf32>
    %391 = arith.addf %388, %390 : vector<8x128xf32>
    %392 = vector.extract_strided_slice %391 {offsets = [0, 0], sizes = [8, 32], strides = [1, 1]} : vector<8x128xf32> to vector<8x32xf32>
    %393 = arith.negf %392 : vector<8x32xf32>
    %394 = math.exp %393 : vector<8x32xf32>
    %cst_221 = arith.constant 1.000000e+00 : f32
    %395 = vector.broadcast %cst_221 : f32 to vector<8x32xf32>
    %396 = arith.addf %395, %394 : vector<8x32xf32>
    %397 = arith.divf %395, %396 : vector<8x32xf32>
    %398 = vector.extract_strided_slice %391 {offsets = [0, 32], sizes = [8, 32], strides = [1, 1]} : vector<8x128xf32> to vector<8x32xf32>
    %399 = arith.negf %398 : vector<8x32xf32>
    %400 = math.exp %399 : vector<8x32xf32>
    %cst_222 = arith.constant 1.000000e+00 : f32
    %401 = vector.broadcast %cst_222 : f32 to vector<8x32xf32>
    %402 = arith.addf %401, %400 : vector<8x32xf32>
    %403 = arith.divf %401, %402 : vector<8x32xf32>
    %404 = vector.extract_strided_slice %391 {offsets = [0, 64], sizes = [8, 32], strides = [1, 1]} : vector<8x128xf32> to vector<8x32xf32>
    %405 = math.tanh %404 : vector<8x32xf32>
    %406 = vector.extract_strided_slice %391 {offsets = [0, 96], sizes = [8, 32], strides = [1, 1]} : vector<8x128xf32> to vector<8x32xf32>
    %407 = arith.negf %406 : vector<8x32xf32>
    %408 = math.exp %407 : vector<8x32xf32>
    %cst_223 = arith.constant 1.000000e+00 : f32
    %409 = vector.broadcast %cst_223 : f32 to vector<8x32xf32>
    %410 = arith.addf %409, %408 : vector<8x32xf32>
    %411 = arith.divf %409, %410 : vector<8x32xf32>
    %412 = arith.mulf %403, %287 : vector<8x32xf32>
    %413 = arith.mulf %397, %405 : vector<8x32xf32>
    %414 = arith.addf %412, %413 : vector<8x32xf32>
    %415 = math.tanh %414 : vector<8x32xf32>
    %416 = arith.mulf %411, %415 : vector<8x32xf32>
    %417 = arith.mulf %416, %315 : vector<8x32xf32>
    %c0_224 = arith.constant 0 : index
    %c0_225 = arith.constant 0 : index
    %418 = vector.load %arg20[%c0_224, %c0_225] : memref<32x128xf32, #tpu.memory_space<vmem>>, vector<32x128xf32>
    %cst_226 = arith.constant dense<0.000000e+00> : vector<8x128xf32>
    %419 = tpu.matmul %417, %418, %cst_226 {dimension_numbers = #tpu.dot_dimension_numbers<[1], [0], [0], [1], [0, 0, 1, 1], [], []>} : vector<8x32xf32>, vector<32x128xf32>, vector<8x128xf32> -> vector<8x128xf32>
    %c0_227 = arith.constant 0 : index
    %c0_228 = arith.constant 0 : index
    %420 = vector.load %arg21[%c0_227, %c0_228] : memref<32x128xf32, #tpu.memory_space<vmem>>, vector<32x128xf32>
    %cst_229 = arith.constant dense<0.000000e+00> : vector<8x128xf32>
    %421 = tpu.matmul %379, %420, %cst_229 {dimension_numbers = #tpu.dot_dimension_numbers<[1], [0], [0], [1], [0, 0, 1, 1], [], []>} : vector<8x32xf32>, vector<32x128xf32>, vector<8x128xf32> -> vector<8x128xf32>
    %422 = arith.addf %419, %421 : vector<8x128xf32>
    %c0_230 = arith.constant 0 : index
    %c0_231 = arith.constant 0 : index
    %423 = vector.load %arg22[%c0_230, %c0_231] : memref<1x128xf32, #tpu.memory_space<vmem>>, vector<1x128xf32>
    %424 = vector.broadcast %423 : vector<1x128xf32> to vector<8x128xf32>
    %425 = arith.addf %422, %424 : vector<8x128xf32>
    %426 = arith.index_cast %c2_i32 : i32 to index
    %c0_232 = arith.constant 0 : index
    %c0_233 = arith.constant 0 : index
    %427 = vector.load %arg25[%426, %c0_232, %c0_233] : memref<8x8x128xf32, #tpu.memory_space<vmem>>, vector<1x8x128xf32>
    %428 = vector.shape_cast %427 : vector<1x8x128xf32> to vector<8x128xf32>
    %429 = vector.shape_cast %425 : vector<8x128xf32> to vector<1x8x128xf32>
    tpu.vector_store %arg25[%426, %c0_232, %c0_233], %429 {strides = array<i32>} : memref<8x8x128xf32, #tpu.memory_space<vmem>>, vector<1x8x128xf32>,
    %430 = arith.index_cast %c2_i32 : i32 to index
    %c0_234 = arith.constant 0 : index
    %c0_235 = arith.constant 0 : index
    %431 = vector.load %arg26[%430, %c0_234, %c0_235] : memref<8x8x16xf32, #tpu.memory_space<vmem>>, vector<1x8x16xf32>
    %432 = vector.shape_cast %431 : vector<1x8x16xf32> to vector<8x16xf32>
    %433 = vector.shape_cast %375 : vector<8x16xf32> to vector<1x8x16xf32>
    tpu.vector_store %arg26[%430, %c0_234, %c0_235], %433 {strides = array<i32>} : memref<8x8x16xf32, #tpu.memory_space<vmem>>, vector<1x8x16xf32>,
    %c3_i32 = arith.constant 3 : i32
    %434 = arith.index_cast %c3_i32 : i32 to index
    %c0_236 = arith.constant 0 : index
    %c0_237 = arith.constant 0 : index
    %435 = vector.load %arg27[%434, %c0_236, %c0_237] : memref<8x8x32xf32, #tpu.memory_space<vmem>>, vector<1x8x32xf32>
    %436 = vector.shape_cast %435 : vector<1x8x32xf32> to vector<8x32xf32>
    %437 = arith.index_cast %c3_i32 : i32 to index
    %c0_238 = arith.constant 0 : index
    %c0_239 = arith.constant 0 : index
    %438 = vector.load %arg23[%437, %c0_238, %c0_239] : memref<8x8x32xf32, #tpu.memory_space<vmem>>, vector<1x8x32xf32>
    %439 = vector.shape_cast %438 : vector<1x8x32xf32> to vector<8x32xf32>
    %440 = arith.index_cast %c3_i32 : i32 to index
    %c0_240 = arith.constant 0 : index
    %c0_241 = arith.constant 0 : index
    %441 = vector.load %arg24[%440, %c0_240, %c0_241] : memref<8x8x32xf32, #tpu.memory_space<vmem>>, vector<1x8x32xf32>
    %442 = vector.shape_cast %441 : vector<1x8x32xf32> to vector<8x32xf32>
    %c0_242 = arith.constant 0 : index
    %c0_243 = arith.constant 0 : index
    %443 = vector.load %arg8[%c0_242, %c0_243] : memref<32x128xf32, #tpu.memory_space<vmem>>, vector<32x128xf32>
    %cst_244 = arith.constant dense<0.000000e+00> : vector<8x128xf32>
    %444 = tpu.matmul %436, %443, %cst_244 {dimension_numbers = #tpu.dot_dimension_numbers<[1], [0], [0], [1], [0, 0, 1, 1], [], []>} : vector<8x32xf32>, vector<32x128xf32>, vector<8x128xf32> -> vector<8x128xf32>
    %c0_245 = arith.constant 0 : index
    %c0_246 = arith.constant 0 : index
    %445 = vector.load %arg9[%c0_245, %c0_246] : memref<32x128xf32, #tpu.memory_space<vmem>>, vector<32x128xf32>
    %cst_247 = arith.constant dense<0.000000e+00> : vector<8x128xf32>
    %446 = tpu.matmul %379, %445, %cst_247 {dimension_numbers = #tpu.dot_dimension_numbers<[1], [0], [0], [1], [0, 0, 1, 1], [], []>} : vector<8x32xf32>, vector<32x128xf32>, vector<8x128xf32> -> vector<8x128xf32>
    %447 = arith.addf %444, %446 : vector<8x128xf32>
    %c0_248 = arith.constant 0 : index
    %c0_249 = arith.constant 0 : index
    %448 = vector.load %arg10[%c0_248, %c0_249] : memref<32x128xf32, #tpu.memory_space<vmem>>, vector<32x128xf32>
    %cst_250 = arith.constant dense<0.000000e+00> : vector<8x128xf32>
    %449 = tpu.matmul %352, %448, %cst_250 {dimension_numbers = #tpu.dot_dimension_numbers<[1], [0], [0], [1], [0, 0, 1, 1], [], []>} : vector<8x32xf32>, vector<32x128xf32>, vector<8x128xf32> -> vector<8x128xf32>
    %450 = arith.addf %447, %449 : vector<8x128xf32>
    %c0_251 = arith.constant 0 : index
    %c0_252 = arith.constant 0 : index
    %451 = vector.load %arg11[%c0_251, %c0_252] : memref<1x128xf32, #tpu.memory_space<vmem>>, vector<1x128xf32>
    %452 = vector.broadcast %451 : vector<1x128xf32> to vector<8x128xf32>
    %453 = arith.addf %450, %452 : vector<8x128xf32>
    %454 = vector.extract_strided_slice %453 {offsets = [0, 0], sizes = [8, 32], strides = [1, 1]} : vector<8x128xf32> to vector<8x32xf32>
    %455 = arith.negf %454 : vector<8x32xf32>
    %456 = math.exp %455 : vector<8x32xf32>
    %cst_253 = arith.constant 1.000000e+00 : f32
    %457 = vector.broadcast %cst_253 : f32 to vector<8x32xf32>
    %458 = arith.addf %457, %456 : vector<8x32xf32>
    %459 = arith.divf %457, %458 : vector<8x32xf32>
    %460 = vector.extract_strided_slice %453 {offsets = [0, 32], sizes = [8, 32], strides = [1, 1]} : vector<8x128xf32> to vector<8x32xf32>
    %461 = arith.negf %460 : vector<8x32xf32>
    %462 = math.exp %461 : vector<8x32xf32>
    %cst_254 = arith.constant 1.000000e+00 : f32
    %463 = vector.broadcast %cst_254 : f32 to vector<8x32xf32>
    %464 = arith.addf %463, %462 : vector<8x32xf32>
    %465 = arith.divf %463, %464 : vector<8x32xf32>
    %466 = vector.extract_strided_slice %453 {offsets = [0, 64], sizes = [8, 32], strides = [1, 1]} : vector<8x128xf32> to vector<8x32xf32>
    %467 = math.tanh %466 : vector<8x32xf32>
    %468 = vector.extract_strided_slice %453 {offsets = [0, 96], sizes = [8, 32], strides = [1, 1]} : vector<8x128xf32> to vector<8x32xf32>
    %469 = arith.negf %468 : vector<8x32xf32>
    %470 = math.exp %469 : vector<8x32xf32>
    %cst_255 = arith.constant 1.000000e+00 : f32
    %471 = vector.broadcast %cst_255 : f32 to vector<8x32xf32>
    %472 = arith.addf %471, %470 : vector<8x32xf32>
    %473 = arith.divf %471, %472 : vector<8x32xf32>
    %474 = arith.mulf %465, %349 : vector<8x32xf32>
    %475 = arith.mulf %459, %467 : vector<8x32xf32>
    %476 = arith.addf %474, %475 : vector<8x32xf32>
    %477 = math.tanh %476 : vector<8x32xf32>
    %478 = arith.mulf %473, %477 : vector<8x32xf32>
    %479 = arith.mulf %478, %439 : vector<8x32xf32>
    %c0_256 = arith.constant 0 : index
    %c0_257 = arith.constant 0 : index
    %480 = vector.load %arg12[%c0_256, %c0_257] : memref<32x256xf32, #tpu.memory_space<vmem>>, vector<32x256xf32>
    %cst_258 = arith.constant dense<0.000000e+00> : vector<8x256xf32>
    %481 = tpu.matmul %479, %480, %cst_258 {dimension_numbers = #tpu.dot_dimension_numbers<[1], [0], [0], [1], [0, 0, 1, 1], [], []>} : vector<8x32xf32>, vector<32x256xf32>, vector<8x256xf32> -> vector<8x256xf32>
    %c0_259 = arith.constant 0 : index
    %c0_260 = arith.constant 0 : index
    %482 = vector.load %arg13[%c0_259, %c0_260] : memref<16x256xf32, #tpu.memory_space<vmem>>, vector<16x256xf32>
    %cst_261 = arith.constant dense<0.000000e+00> : vector<8x256xf32>
    %483 = tpu.matmul %375, %482, %cst_261 {dimension_numbers = #tpu.dot_dimension_numbers<[1], [0], [0], [1], [0, 0, 1, 1], [], []>} : vector<8x16xf32>, vector<16x256xf32>, vector<8x256xf32> -> vector<8x256xf32>
    %484 = arith.addf %481, %483 : vector<8x256xf32>
    %c0_262 = arith.constant 0 : index
    %c0_263 = arith.constant 0 : index
    %485 = vector.load %arg14[%c0_262, %c0_263] : memref<16x256xf32, #tpu.memory_space<vmem>>, vector<16x256xf32>
    %cst_264 = arith.constant dense<0.000000e+00> : vector<8x256xf32>
    %486 = tpu.matmul %380, %485, %cst_264 {dimension_numbers = #tpu.dot_dimension_numbers<[1], [0], [0], [1], [0, 0, 1, 1], [], []>} : vector<8x16xf32>, vector<16x256xf32>, vector<8x256xf32> -> vector<8x256xf32>
    %487 = arith.addf %484, %486 : vector<8x256xf32>
    %c0_265 = arith.constant 0 : index
    %c0_266 = arith.constant 0 : index
    %488 = vector.load %arg6[%c0_265, %c0_266] : memref<8x256xf32, #tpu.memory_space<vmem>>, vector<8x256xf32>
    %489 = arith.addf %487, %488 : vector<8x256xf32>
    %490 = math.tanh %489 : vector<8x256xf32>
    %c0_267 = arith.constant 0 : index
    %c0_268 = arith.constant 0 : index
    %491 = vector.load %arg15[%c0_267, %c0_268] : memref<256x16xf32, #tpu.memory_space<vmem>>, vector<256x16xf32>
    %cst_269 = arith.constant dense<0.000000e+00> : vector<8x16xf32>
    %492 = tpu.matmul %490, %491, %cst_269 {dimension_numbers = #tpu.dot_dimension_numbers<[1], [0], [0], [1], [0, 0, 1, 1], [], []>} : vector<8x256xf32>, vector<256x16xf32>, vector<8x16xf32> -> vector<8x16xf32>
    %493 = arith.addf %492, %45 : vector<8x16xf32>
    %cst_270 = arith.constant dense<0xFF800000> : vector<8xf32>
    %494 = vector.multi_reduction <maximumf>, %493, %cst_270 [1] : vector<8x16xf32> to vector<8xf32>
    %495 = vector.shape_cast %494 : vector<8xf32> to vector<8x1xf32>
    %496 = vector.broadcast %495 : vector<8x1xf32> to vector<8x16xf32>
    %497 = arith.subf %493, %496 : vector<8x16xf32>
    %498 = math.exp %497 : vector<8x16xf32>
    %cst_271 = arith.constant dense<0.000000e+00> : vector<8xf32>
    %499 = vector.multi_reduction <add>, %498, %cst_271 [1] : vector<8x16xf32> to vector<8xf32>
    %500 = vector.shape_cast %499 : vector<8xf32> to vector<8x1xf32>
    %501 = vector.broadcast %500 : vector<8x1xf32> to vector<8x16xf32>
    %502 = arith.divf %498, %501 : vector<8x16xf32>
    %503 = vector.shape_cast %502 : vector<8x16xf32> to vector<8x1x16xf32>
    %c0_272 = arith.constant 0 : index
    %c0_273 = arith.constant 0 : index
    %c0_274 = arith.constant 0 : index
    %504 = vector.load %arg5[%c0_272, %c0_273, %c0_274] : memref<8x16x32xf32, #tpu.memory_space<vmem>>, vector<8x16x32xf32>
    "tpu.trace_start"() <{level = 10 : i32, message = "bqt,bte->bqe"}> : () -> ()
    %cst_275 = arith.constant dense<0.000000e+00> : vector<8x1x32xf32>
    %505 = tpu.matmul %503, %504, %cst_275 {dimension_numbers = #tpu.dot_dimension_numbers<[2], [1], [1], [2], [0, 0, 0, 1, 1, 2], [0], [0]>} : vector<8x1x16xf32>, vector<8x16x32xf32>, vector<8x1x32xf32> -> vector<8x1x32xf32>
    "tpu.trace_stop"() : () -> ()
    %506 = vector.shape_cast %505 : vector<8x1x32xf32> to vector<8x32xf32>
    %507 = arith.addf %380, %502 : vector<8x16xf32>
    %c0_276 = arith.constant 0 : index
    %c0_277 = arith.constant 0 : index
    %508 = vector.load %arg16[%c0_276, %c0_277] : memref<32x128xf32, #tpu.memory_space<vmem>>, vector<32x128xf32>
    %cst_278 = arith.constant dense<0.000000e+00> : vector<8x128xf32>
    %509 = tpu.matmul %479, %508, %cst_278 {dimension_numbers = #tpu.dot_dimension_numbers<[1], [0], [0], [1], [0, 0, 1, 1], [], []>} : vector<8x32xf32>, vector<32x128xf32>, vector<8x128xf32> -> vector<8x128xf32>
    %c0_279 = arith.constant 0 : index
    %c0_280 = arith.constant 0 : index
    %510 = vector.load %arg17[%c0_279, %c0_280] : memref<32x128xf32, #tpu.memory_space<vmem>>, vector<32x128xf32>
    %cst_281 = arith.constant dense<0.000000e+00> : vector<8x128xf32>
    %511 = tpu.matmul %506, %510, %cst_281 {dimension_numbers = #tpu.dot_dimension_numbers<[1], [0], [0], [1], [0, 0, 1, 1], [], []>} : vector<8x32xf32>, vector<32x128xf32>, vector<8x128xf32> -> vector<8x128xf32>
    %512 = arith.addf %509, %511 : vector<8x128xf32>
    %c0_282 = arith.constant 0 : index
    %c0_283 = arith.constant 0 : index
    %513 = vector.load %arg18[%c0_282, %c0_283] : memref<32x128xf32, #tpu.memory_space<vmem>>, vector<32x128xf32>
    %cst_284 = arith.constant dense<0.000000e+00> : vector<8x128xf32>
    %514 = tpu.matmul %417, %513, %cst_284 {dimension_numbers = #tpu.dot_dimension_numbers<[1], [0], [0], [1], [0, 0, 1, 1], [], []>} : vector<8x32xf32>, vector<32x128xf32>, vector<8x128xf32> -> vector<8x128xf32>
    %515 = arith.addf %512, %514 : vector<8x128xf32>
    %c0_285 = arith.constant 0 : index
    %c0_286 = arith.constant 0 : index
    %516 = vector.load %arg19[%c0_285, %c0_286] : memref<1x128xf32, #tpu.memory_space<vmem>>, vector<1x128xf32>
    %517 = vector.broadcast %516 : vector<1x128xf32> to vector<8x128xf32>
    %518 = arith.addf %515, %517 : vector<8x128xf32>
    %519 = vector.extract_strided_slice %518 {offsets = [0, 0], sizes = [8, 32], strides = [1, 1]} : vector<8x128xf32> to vector<8x32xf32>
    %520 = arith.negf %519 : vector<8x32xf32>
    %521 = math.exp %520 : vector<8x32xf32>
    %cst_287 = arith.constant 1.000000e+00 : f32
    %522 = vector.broadcast %cst_287 : f32 to vector<8x32xf32>
    %523 = arith.addf %522, %521 : vector<8x32xf32>
    %524 = arith.divf %522, %523 : vector<8x32xf32>
    %525 = vector.extract_strided_slice %518 {offsets = [0, 32], sizes = [8, 32], strides = [1, 1]} : vector<8x128xf32> to vector<8x32xf32>
    %526 = arith.negf %525 : vector<8x32xf32>
    %527 = math.exp %526 : vector<8x32xf32>
    %cst_288 = arith.constant 1.000000e+00 : f32
    %528 = vector.broadcast %cst_288 : f32 to vector<8x32xf32>
    %529 = arith.addf %528, %527 : vector<8x32xf32>
    %530 = arith.divf %528, %529 : vector<8x32xf32>
    %531 = vector.extract_strided_slice %518 {offsets = [0, 64], sizes = [8, 32], strides = [1, 1]} : vector<8x128xf32> to vector<8x32xf32>
    %532 = math.tanh %531 : vector<8x32xf32>
    %533 = vector.extract_strided_slice %518 {offsets = [0, 96], sizes = [8, 32], strides = [1, 1]} : vector<8x128xf32> to vector<8x32xf32>
    %534 = arith.negf %533 : vector<8x32xf32>
    %535 = math.exp %534 : vector<8x32xf32>
    %cst_289 = arith.constant 1.000000e+00 : f32
    %536 = vector.broadcast %cst_289 : f32 to vector<8x32xf32>
    %537 = arith.addf %536, %535 : vector<8x32xf32>
    %538 = arith.divf %536, %537 : vector<8x32xf32>
    %539 = arith.mulf %530, %414 : vector<8x32xf32>
    %540 = arith.mulf %524, %532 : vector<8x32xf32>
    %541 = arith.addf %539, %540 : vector<8x32xf32>
    %542 = math.tanh %541 : vector<8x32xf32>
    %543 = arith.mulf %538, %542 : vector<8x32xf32>
    %544 = arith.mulf %543, %442 : vector<8x32xf32>
    %c0_290 = arith.constant 0 : index
    %c0_291 = arith.constant 0 : index
    %545 = vector.load %arg20[%c0_290, %c0_291] : memref<32x128xf32, #tpu.memory_space<vmem>>, vector<32x128xf32>
    %cst_292 = arith.constant dense<0.000000e+00> : vector<8x128xf32>
    %546 = tpu.matmul %544, %545, %cst_292 {dimension_numbers = #tpu.dot_dimension_numbers<[1], [0], [0], [1], [0, 0, 1, 1], [], []>} : vector<8x32xf32>, vector<32x128xf32>, vector<8x128xf32> -> vector<8x128xf32>
    %c0_293 = arith.constant 0 : index
    %c0_294 = arith.constant 0 : index
    %547 = vector.load %arg21[%c0_293, %c0_294] : memref<32x128xf32, #tpu.memory_space<vmem>>, vector<32x128xf32>
    %cst_295 = arith.constant dense<0.000000e+00> : vector<8x128xf32>
    %548 = tpu.matmul %506, %547, %cst_295 {dimension_numbers = #tpu.dot_dimension_numbers<[1], [0], [0], [1], [0, 0, 1, 1], [], []>} : vector<8x32xf32>, vector<32x128xf32>, vector<8x128xf32> -> vector<8x128xf32>
    %549 = arith.addf %546, %548 : vector<8x128xf32>
    %c0_296 = arith.constant 0 : index
    %c0_297 = arith.constant 0 : index
    %550 = vector.load %arg22[%c0_296, %c0_297] : memref<1x128xf32, #tpu.memory_space<vmem>>, vector<1x128xf32>
    %551 = vector.broadcast %550 : vector<1x128xf32> to vector<8x128xf32>
    %552 = arith.addf %549, %551 : vector<8x128xf32>
    %553 = arith.index_cast %c3_i32 : i32 to index
    %c0_298 = arith.constant 0 : index
    %c0_299 = arith.constant 0 : index
    %554 = vector.load %arg25[%553, %c0_298, %c0_299] : memref<8x8x128xf32, #tpu.memory_space<vmem>>, vector<1x8x128xf32>
    %555 = vector.shape_cast %554 : vector<1x8x128xf32> to vector<8x128xf32>
    %556 = vector.shape_cast %552 : vector<8x128xf32> to vector<1x8x128xf32>
    tpu.vector_store %arg25[%553, %c0_298, %c0_299], %556 {strides = array<i32>} : memref<8x8x128xf32, #tpu.memory_space<vmem>>, vector<1x8x128xf32>,
    %557 = arith.index_cast %c3_i32 : i32 to index
    %c0_300 = arith.constant 0 : index
    %c0_301 = arith.constant 0 : index
    %558 = vector.load %arg26[%557, %c0_300, %c0_301] : memref<8x8x16xf32, #tpu.memory_space<vmem>>, vector<1x8x16xf32>
    %559 = vector.shape_cast %558 : vector<1x8x16xf32> to vector<8x16xf32>
    %560 = vector.shape_cast %502 : vector<8x16xf32> to vector<1x8x16xf32>
    tpu.vector_store %arg26[%557, %c0_300, %c0_301], %560 {strides = array<i32>} : memref<8x8x16xf32, #tpu.memory_space<vmem>>, vector<1x8x16xf32>,
    %c4_i32 = arith.constant 4 : i32
    %561 = arith.index_cast %c4_i32 : i32 to index
    %c0_302 = arith.constant 0 : index
    %c0_303 = arith.constant 0 : index
    %562 = vector.load %arg27[%561, %c0_302, %c0_303] : memref<8x8x32xf32, #tpu.memory_space<vmem>>, vector<1x8x32xf32>
    %563 = vector.shape_cast %562 : vector<1x8x32xf32> to vector<8x32xf32>
    %564 = arith.index_cast %c4_i32 : i32 to index
    %c0_304 = arith.constant 0 : index
    %c0_305 = arith.constant 0 : index
    %565 = vector.load %arg23[%564, %c0_304, %c0_305] : memref<8x8x32xf32, #tpu.memory_space<vmem>>, vector<1x8x32xf32>
    %566 = vector.shape_cast %565 : vector<1x8x32xf32> to vector<8x32xf32>
    %567 = arith.index_cast %c4_i32 : i32 to index
    %c0_306 = arith.constant 0 : index
    %c0_307 = arith.constant 0 : index
    %568 = vector.load %arg24[%567, %c0_306, %c0_307] : memref<8x8x32xf32, #tpu.memory_space<vmem>>, vector<1x8x32xf32>
    %569 = vector.shape_cast %568 : vector<1x8x32xf32> to vector<8x32xf32>
    %c0_308 = arith.constant 0 : index
    %c0_309 = arith.constant 0 : index
    %570 = vector.load %arg8[%c0_308, %c0_309] : memref<32x128xf32, #tpu.memory_space<vmem>>, vector<32x128xf32>
    %cst_310 = arith.constant dense<0.000000e+00> : vector<8x128xf32>
    %571 = tpu.matmul %563, %570, %cst_310 {dimension_numbers = #tpu.dot_dimension_numbers<[1], [0], [0], [1], [0, 0, 1, 1], [], []>} : vector<8x32xf32>, vector<32x128xf32>, vector<8x128xf32> -> vector<8x128xf32>
    %c0_311 = arith.constant 0 : index
    %c0_312 = arith.constant 0 : index
    %572 = vector.load %arg9[%c0_311, %c0_312] : memref<32x128xf32, #tpu.memory_space<vmem>>, vector<32x128xf32>
    %cst_313 = arith.constant dense<0.000000e+00> : vector<8x128xf32>
    %573 = tpu.matmul %506, %572, %cst_313 {dimension_numbers = #tpu.dot_dimension_numbers<[1], [0], [0], [1], [0, 0, 1, 1], [], []>} : vector<8x32xf32>, vector<32x128xf32>, vector<8x128xf32> -> vector<8x128xf32>
    %574 = arith.addf %571, %573 : vector<8x128xf32>
    %c0_314 = arith.constant 0 : index
    %c0_315 = arith.constant 0 : index
    %575 = vector.load %arg10[%c0_314, %c0_315] : memref<32x128xf32, #tpu.memory_space<vmem>>, vector<32x128xf32>
    %cst_316 = arith.constant dense<0.000000e+00> : vector<8x128xf32>
    %576 = tpu.matmul %479, %575, %cst_316 {dimension_numbers = #tpu.dot_dimension_numbers<[1], [0], [0], [1], [0, 0, 1, 1], [], []>} : vector<8x32xf32>, vector<32x128xf32>, vector<8x128xf32> -> vector<8x128xf32>
    %577 = arith.addf %574, %576 : vector<8x128xf32>
    %c0_317 = arith.constant 0 : index
    %c0_318 = arith.constant 0 : index
    %578 = vector.load %arg11[%c0_317, %c0_318] : memref<1x128xf32, #tpu.memory_space<vmem>>, vector<1x128xf32>
    %579 = vector.broadcast %578 : vector<1x128xf32> to vector<8x128xf32>
    %580 = arith.addf %577, %579 : vector<8x128xf32>
    %581 = vector.extract_strided_slice %580 {offsets = [0, 0], sizes = [8, 32], strides = [1, 1]} : vector<8x128xf32> to vector<8x32xf32>
    %582 = arith.negf %581 : vector<8x32xf32>
    %583 = math.exp %582 : vector<8x32xf32>
    %cst_319 = arith.constant 1.000000e+00 : f32
    %584 = vector.broadcast %cst_319 : f32 to vector<8x32xf32>
    %585 = arith.addf %584, %583 : vector<8x32xf32>
    %586 = arith.divf %584, %585 : vector<8x32xf32>
    %587 = vector.extract_strided_slice %580 {offsets = [0, 32], sizes = [8, 32], strides = [1, 1]} : vector<8x128xf32> to vector<8x32xf32>
    %588 = arith.negf %587 : vector<8x32xf32>
    %589 = math.exp %588 : vector<8x32xf32>
    %cst_320 = arith.constant 1.000000e+00 : f32
    %590 = vector.broadcast %cst_320 : f32 to vector<8x32xf32>
    %591 = arith.addf %590, %589 : vector<8x32xf32>
    %592 = arith.divf %590, %591 : vector<8x32xf32>
    %593 = vector.extract_strided_slice %580 {offsets = [0, 64], sizes = [8, 32], strides = [1, 1]} : vector<8x128xf32> to vector<8x32xf32>
    %594 = math.tanh %593 : vector<8x32xf32>
    %595 = vector.extract_strided_slice %580 {offsets = [0, 96], sizes = [8, 32], strides = [1, 1]} : vector<8x128xf32> to vector<8x32xf32>
    %596 = arith.negf %595 : vector<8x32xf32>
    %597 = math.exp %596 : vector<8x32xf32>
    %cst_321 = arith.constant 1.000000e+00 : f32
    %598 = vector.broadcast %cst_321 : f32 to vector<8x32xf32>
    %599 = arith.addf %598, %597 : vector<8x32xf32>
    %600 = arith.divf %598, %599 : vector<8x32xf32>
    %601 = arith.mulf %592, %476 : vector<8x32xf32>
    %602 = arith.mulf %586, %594 : vector<8x32xf32>
    %603 = arith.addf %601, %602 : vector<8x32xf32>
    %604 = math.tanh %603 : vector<8x32xf32>
    %605 = arith.mulf %600, %604 : vector<8x32xf32>
    %606 = arith.mulf %605, %566 : vector<8x32xf32>
    %c0_322 = arith.constant 0 : index
    %c0_323 = arith.constant 0 : index
    %607 = vector.load %arg12[%c0_322, %c0_323] : memref<32x256xf32, #tpu.memory_space<vmem>>, vector<32x256xf32>
    %cst_324 = arith.constant dense<0.000000e+00> : vector<8x256xf32>
    %608 = tpu.matmul %606, %607, %cst_324 {dimension_numbers = #tpu.dot_dimension_numbers<[1], [0], [0], [1], [0, 0, 1, 1], [], []>} : vector<8x32xf32>, vector<32x256xf32>, vector<8x256xf32> -> vector<8x256xf32>
    %c0_325 = arith.constant 0 : index
    %c0_326 = arith.constant 0 : index
    %609 = vector.load %arg13[%c0_325, %c0_326] : memref<16x256xf32, #tpu.memory_space<vmem>>, vector<16x256xf32>
    %cst_327 = arith.constant dense<0.000000e+00> : vector<8x256xf32>
    %610 = tpu.matmul %502, %609, %cst_327 {dimension_numbers = #tpu.dot_dimension_numbers<[1], [0], [0], [1], [0, 0, 1, 1], [], []>} : vector<8x16xf32>, vector<16x256xf32>, vector<8x256xf32> -> vector<8x256xf32>
    %611 = arith.addf %608, %610 : vector<8x256xf32>
    %c0_328 = arith.constant 0 : index
    %c0_329 = arith.constant 0 : index
    %612 = vector.load %arg14[%c0_328, %c0_329] : memref<16x256xf32, #tpu.memory_space<vmem>>, vector<16x256xf32>
    %cst_330 = arith.constant dense<0.000000e+00> : vector<8x256xf32>
    %613 = tpu.matmul %507, %612, %cst_330 {dimension_numbers = #tpu.dot_dimension_numbers<[1], [0], [0], [1], [0, 0, 1, 1], [], []>} : vector<8x16xf32>, vector<16x256xf32>, vector<8x256xf32> -> vector<8x256xf32>
    %614 = arith.addf %611, %613 : vector<8x256xf32>
    %c0_331 = arith.constant 0 : index
    %c0_332 = arith.constant 0 : index
    %615 = vector.load %arg6[%c0_331, %c0_332] : memref<8x256xf32, #tpu.memory_space<vmem>>, vector<8x256xf32>
    %616 = arith.addf %614, %615 : vector<8x256xf32>
    %617 = math.tanh %616 : vector<8x256xf32>
    %c0_333 = arith.constant 0 : index
    %c0_334 = arith.constant 0 : index
    %618 = vector.load %arg15[%c0_333, %c0_334] : memref<256x16xf32, #tpu.memory_space<vmem>>, vector<256x16xf32>
    %cst_335 = arith.constant dense<0.000000e+00> : vector<8x16xf32>
    %619 = tpu.matmul %617, %618, %cst_335 {dimension_numbers = #tpu.dot_dimension_numbers<[1], [0], [0], [1], [0, 0, 1, 1], [], []>} : vector<8x256xf32>, vector<256x16xf32>, vector<8x16xf32> -> vector<8x16xf32>
    %620 = arith.addf %619, %45 : vector<8x16xf32>
    %cst_336 = arith.constant dense<0xFF800000> : vector<8xf32>
    %621 = vector.multi_reduction <maximumf>, %620, %cst_336 [1] : vector<8x16xf32> to vector<8xf32>
    %622 = vector.shape_cast %621 : vector<8xf32> to vector<8x1xf32>
    %623 = vector.broadcast %622 : vector<8x1xf32> to vector<8x16xf32>
    %624 = arith.subf %620, %623 : vector<8x16xf32>
    %625 = math.exp %624 : vector<8x16xf32>
    %cst_337 = arith.constant dense<0.000000e+00> : vector<8xf32>
    %626 = vector.multi_reduction <add>, %625, %cst_337 [1] : vector<8x16xf32> to vector<8xf32>
    %627 = vector.shape_cast %626 : vector<8xf32> to vector<8x1xf32>
    %628 = vector.broadcast %627 : vector<8x1xf32> to vector<8x16xf32>
    %629 = arith.divf %625, %628 : vector<8x16xf32>
    %630 = vector.shape_cast %629 : vector<8x16xf32> to vector<8x1x16xf32>
    %c0_338 = arith.constant 0 : index
    %c0_339 = arith.constant 0 : index
    %c0_340 = arith.constant 0 : index
    %631 = vector.load %arg5[%c0_338, %c0_339, %c0_340] : memref<8x16x32xf32, #tpu.memory_space<vmem>>, vector<8x16x32xf32>
    "tpu.trace_start"() <{level = 10 : i32, message = "bqt,bte->bqe"}> : () -> ()
    %cst_341 = arith.constant dense<0.000000e+00> : vector<8x1x32xf32>
    %632 = tpu.matmul %630, %631, %cst_341 {dimension_numbers = #tpu.dot_dimension_numbers<[2], [1], [1], [2], [0, 0, 0, 1, 1, 2], [0], [0]>} : vector<8x1x16xf32>, vector<8x16x32xf32>, vector<8x1x32xf32> -> vector<8x1x32xf32>
    "tpu.trace_stop"() : () -> ()
    %633 = vector.shape_cast %632 : vector<8x1x32xf32> to vector<8x32xf32>
    %634 = arith.addf %507, %629 : vector<8x16xf32>
    %c0_342 = arith.constant 0 : index
    %c0_343 = arith.constant 0 : index
    %635 = vector.load %arg16[%c0_342, %c0_343] : memref<32x128xf32, #tpu.memory_space<vmem>>, vector<32x128xf32>
    %cst_344 = arith.constant dense<0.000000e+00> : vector<8x128xf32>
    %636 = tpu.matmul %606, %635, %cst_344 {dimension_numbers = #tpu.dot_dimension_numbers<[1], [0], [0], [1], [0, 0, 1, 1], [], []>} : vector<8x32xf32>, vector<32x128xf32>, vector<8x128xf32> -> vector<8x128xf32>
    %c0_345 = arith.constant 0 : index
    %c0_346 = arith.constant 0 : index
    %637 = vector.load %arg17[%c0_345, %c0_346] : memref<32x128xf32, #tpu.memory_space<vmem>>, vector<32x128xf32>
    %cst_347 = arith.constant dense<0.000000e+00> : vector<8x128xf32>
    %638 = tpu.matmul %633, %637, %cst_347 {dimension_numbers = #tpu.dot_dimension_numbers<[1], [0], [0], [1], [0, 0, 1, 1], [], []>} : vector<8x32xf32>, vector<32x128xf32>, vector<8x128xf32> -> vector<8x128xf32>
    %639 = arith.addf %636, %638 : vector<8x128xf32>
    %c0_348 = arith.constant 0 : index
    %c0_349 = arith.constant 0 : index
    %640 = vector.load %arg18[%c0_348, %c0_349] : memref<32x128xf32, #tpu.memory_space<vmem>>, vector<32x128xf32>
    %cst_350 = arith.constant dense<0.000000e+00> : vector<8x128xf32>
    %641 = tpu.matmul %544, %640, %cst_350 {dimension_numbers = #tpu.dot_dimension_numbers<[1], [0], [0], [1], [0, 0, 1, 1], [], []>} : vector<8x32xf32>, vector<32x128xf32>, vector<8x128xf32> -> vector<8x128xf32>
    %642 = arith.addf %639, %641 : vector<8x128xf32>
    %c0_351 = arith.constant 0 : index
    %c0_352 = arith.constant 0 : index
    %643 = vector.load %arg19[%c0_351, %c0_352] : memref<1x128xf32, #tpu.memory_space<vmem>>, vector<1x128xf32>
    %644 = vector.broadcast %643 : vector<1x128xf32> to vector<8x128xf32>
    %645 = arith.addf %642, %644 : vector<8x128xf32>
    %646 = vector.extract_strided_slice %645 {offsets = [0, 0], sizes = [8, 32], strides = [1, 1]} : vector<8x128xf32> to vector<8x32xf32>
    %647 = arith.negf %646 : vector<8x32xf32>
    %648 = math.exp %647 : vector<8x32xf32>
    %cst_353 = arith.constant 1.000000e+00 : f32
    %649 = vector.broadcast %cst_353 : f32 to vector<8x32xf32>
    %650 = arith.addf %649, %648 : vector<8x32xf32>
    %651 = arith.divf %649, %650 : vector<8x32xf32>
    %652 = vector.extract_strided_slice %645 {offsets = [0, 32], sizes = [8, 32], strides = [1, 1]} : vector<8x128xf32> to vector<8x32xf32>
    %653 = arith.negf %652 : vector<8x32xf32>
    %654 = math.exp %653 : vector<8x32xf32>
    %cst_354 = arith.constant 1.000000e+00 : f32
    %655 = vector.broadcast %cst_354 : f32 to vector<8x32xf32>
    %656 = arith.addf %655, %654 : vector<8x32xf32>
    %657 = arith.divf %655, %656 : vector<8x32xf32>
    %658 = vector.extract_strided_slice %645 {offsets = [0, 64], sizes = [8, 32], strides = [1, 1]} : vector<8x128xf32> to vector<8x32xf32>
    %659 = math.tanh %658 : vector<8x32xf32>
    %660 = vector.extract_strided_slice %645 {offsets = [0, 96], sizes = [8, 32], strides = [1, 1]} : vector<8x128xf32> to vector<8x32xf32>
    %661 = arith.negf %660 : vector<8x32xf32>
    %662 = math.exp %661 : vector<8x32xf32>
    %cst_355 = arith.constant 1.000000e+00 : f32
    %663 = vector.broadcast %cst_355 : f32 to vector<8x32xf32>
    %664 = arith.addf %663, %662 : vector<8x32xf32>
    %665 = arith.divf %663, %664 : vector<8x32xf32>
    %666 = arith.mulf %657, %541 : vector<8x32xf32>
    %667 = arith.mulf %651, %659 : vector<8x32xf32>
    %668 = arith.addf %666, %667 : vector<8x32xf32>
    %669 = math.tanh %668 : vector<8x32xf32>
    %670 = arith.mulf %665, %669 : vector<8x32xf32>
    %671 = arith.mulf %670, %569 : vector<8x32xf32>
    %c0_356 = arith.constant 0 : index
    %c0_357 = arith.constant 0 : index
    %672 = vector.load %arg20[%c0_356, %c0_357] : memref<32x128xf32, #tpu.memory_space<vmem>>, vector<32x128xf32>
    %cst_358 = arith.constant dense<0.000000e+00> : vector<8x128xf32>
    %673 = tpu.matmul %671, %672, %cst_358 {dimension_numbers = #tpu.dot_dimension_numbers<[1], [0], [0], [1], [0, 0, 1, 1], [], []>} : vector<8x32xf32>, vector<32x128xf32>, vector<8x128xf32> -> vector<8x128xf32>
    %c0_359 = arith.constant 0 : index
    %c0_360 = arith.constant 0 : index
    %674 = vector.load %arg21[%c0_359, %c0_360] : memref<32x128xf32, #tpu.memory_space<vmem>>, vector<32x128xf32>
    %cst_361 = arith.constant dense<0.000000e+00> : vector<8x128xf32>
    %675 = tpu.matmul %633, %674, %cst_361 {dimension_numbers = #tpu.dot_dimension_numbers<[1], [0], [0], [1], [0, 0, 1, 1], [], []>} : vector<8x32xf32>, vector<32x128xf32>, vector<8x128xf32> -> vector<8x128xf32>
    %676 = arith.addf %673, %675 : vector<8x128xf32>
    %c0_362 = arith.constant 0 : index
    %c0_363 = arith.constant 0 : index
    %677 = vector.load %arg22[%c0_362, %c0_363] : memref<1x128xf32, #tpu.memory_space<vmem>>, vector<1x128xf32>
    %678 = vector.broadcast %677 : vector<1x128xf32> to vector<8x128xf32>
    %679 = arith.addf %676, %678 : vector<8x128xf32>
    %680 = arith.index_cast %c4_i32 : i32 to index
    %c0_364 = arith.constant 0 : index
    %c0_365 = arith.constant 0 : index
    %681 = vector.load %arg25[%680, %c0_364, %c0_365] : memref<8x8x128xf32, #tpu.memory_space<vmem>>, vector<1x8x128xf32>
    %682 = vector.shape_cast %681 : vector<1x8x128xf32> to vector<8x128xf32>
    %683 = vector.shape_cast %679 : vector<8x128xf32> to vector<1x8x128xf32>
    tpu.vector_store %arg25[%680, %c0_364, %c0_365], %683 {strides = array<i32>} : memref<8x8x128xf32, #tpu.memory_space<vmem>>, vector<1x8x128xf32>,
    %684 = arith.index_cast %c4_i32 : i32 to index
    %c0_366 = arith.constant 0 : index
    %c0_367 = arith.constant 0 : index
    %685 = vector.load %arg26[%684, %c0_366, %c0_367] : memref<8x8x16xf32, #tpu.memory_space<vmem>>, vector<1x8x16xf32>
    %686 = vector.shape_cast %685 : vector<1x8x16xf32> to vector<8x16xf32>
    %687 = vector.shape_cast %629 : vector<8x16xf32> to vector<1x8x16xf32>
    tpu.vector_store %arg26[%684, %c0_366, %c0_367], %687 {strides = array<i32>} : memref<8x8x16xf32, #tpu.memory_space<vmem>>, vector<1x8x16xf32>,
    %c5_i32 = arith.constant 5 : i32
    %688 = arith.index_cast %c5_i32 : i32 to index
    %c0_368 = arith.constant 0 : index
    %c0_369 = arith.constant 0 : index
    %689 = vector.load %arg27[%688, %c0_368, %c0_369] : memref<8x8x32xf32, #tpu.memory_space<vmem>>, vector<1x8x32xf32>
    %690 = vector.shape_cast %689 : vector<1x8x32xf32> to vector<8x32xf32>
    %691 = arith.index_cast %c5_i32 : i32 to index
    %c0_370 = arith.constant 0 : index
    %c0_371 = arith.constant 0 : index
    %692 = vector.load %arg23[%691, %c0_370, %c0_371] : memref<8x8x32xf32, #tpu.memory_space<vmem>>, vector<1x8x32xf32>
    %693 = vector.shape_cast %692 : vector<1x8x32xf32> to vector<8x32xf32>
    %694 = arith.index_cast %c5_i32 : i32 to index
    %c0_372 = arith.constant 0 : index
    %c0_373 = arith.constant 0 : index
    %695 = vector.load %arg24[%694, %c0_372, %c0_373] : memref<8x8x32xf32, #tpu.memory_space<vmem>>, vector<1x8x32xf32>
    %696 = vector.shape_cast %695 : vector<1x8x32xf32> to vector<8x32xf32>
    %c0_374 = arith.constant 0 : index
    %c0_375 = arith.constant 0 : index
    %697 = vector.load %arg8[%c0_374, %c0_375] : memref<32x128xf32, #tpu.memory_space<vmem>>, vector<32x128xf32>
    %cst_376 = arith.constant dense<0.000000e+00> : vector<8x128xf32>
    %698 = tpu.matmul %690, %697, %cst_376 {dimension_numbers = #tpu.dot_dimension_numbers<[1], [0], [0], [1], [0, 0, 1, 1], [], []>} : vector<8x32xf32>, vector<32x128xf32>, vector<8x128xf32> -> vector<8x128xf32>
    %c0_377 = arith.constant 0 : index
    %c0_378 = arith.constant 0 : index
    %699 = vector.load %arg9[%c0_377, %c0_378] : memref<32x128xf32, #tpu.memory_space<vmem>>, vector<32x128xf32>
    %cst_379 = arith.constant dense<0.000000e+00> : vector<8x128xf32>
    %700 = tpu.matmul %633, %699, %cst_379 {dimension_numbers = #tpu.dot_dimension_numbers<[1], [0], [0], [1], [0, 0, 1, 1], [], []>} : vector<8x32xf32>, vector<32x128xf32>, vector<8x128xf32> -> vector<8x128xf32>
    %701 = arith.addf %698, %700 : vector<8x128xf32>
    %c0_380 = arith.constant 0 : index
    %c0_381 = arith.constant 0 : index
    %702 = vector.load %arg10[%c0_380, %c0_381] : memref<32x128xf32, #tpu.memory_space<vmem>>, vector<32x128xf32>
    %cst_382 = arith.constant dense<0.000000e+00> : vector<8x128xf32>
    %703 = tpu.matmul %606, %702, %cst_382 {dimension_numbers = #tpu.dot_dimension_numbers<[1], [0], [0], [1], [0, 0, 1, 1], [], []>} : vector<8x32xf32>, vector<32x128xf32>, vector<8x128xf32> -> vector<8x128xf32>
    %704 = arith.addf %701, %703 : vector<8x128xf32>
    %c0_383 = arith.constant 0 : index
    %c0_384 = arith.constant 0 : index
    %705 = vector.load %arg11[%c0_383, %c0_384] : memref<1x128xf32, #tpu.memory_space<vmem>>, vector<1x128xf32>
    %706 = vector.broadcast %705 : vector<1x128xf32> to vector<8x128xf32>
    %707 = arith.addf %704, %706 : vector<8x128xf32>
    %708 = vector.extract_strided_slice %707 {offsets = [0, 0], sizes = [8, 32], strides = [1, 1]} : vector<8x128xf32> to vector<8x32xf32>
    %709 = arith.negf %708 : vector<8x32xf32>
    %710 = math.exp %709 : vector<8x32xf32>
    %cst_385 = arith.constant 1.000000e+00 : f32
    %711 = vector.broadcast %cst_385 : f32 to vector<8x32xf32>
    %712 = arith.addf %711, %710 : vector<8x32xf32>
    %713 = arith.divf %711, %712 : vector<8x32xf32>
    %714 = vector.extract_strided_slice %707 {offsets = [0, 32], sizes = [8, 32], strides = [1, 1]} : vector<8x128xf32> to vector<8x32xf32>
    %715 = arith.negf %714 : vector<8x32xf32>
    %716 = math.exp %715 : vector<8x32xf32>
    %cst_386 = arith.constant 1.000000e+00 : f32
    %717 = vector.broadcast %cst_386 : f32 to vector<8x32xf32>
    %718 = arith.addf %717, %716 : vector<8x32xf32>
    %719 = arith.divf %717, %718 : vector<8x32xf32>
    %720 = vector.extract_strided_slice %707 {offsets = [0, 64], sizes = [8, 32], strides = [1, 1]} : vector<8x128xf32> to vector<8x32xf32>
    %721 = math.tanh %720 : vector<8x32xf32>
    %722 = vector.extract_strided_slice %707 {offsets = [0, 96], sizes = [8, 32], strides = [1, 1]} : vector<8x128xf32> to vector<8x32xf32>
    %723 = arith.negf %722 : vector<8x32xf32>
    %724 = math.exp %723 : vector<8x32xf32>
    %cst_387 = arith.constant 1.000000e+00 : f32
    %725 = vector.broadcast %cst_387 : f32 to vector<8x32xf32>
    %726 = arith.addf %725, %724 : vector<8x32xf32>
    %727 = arith.divf %725, %726 : vector<8x32xf32>
    %728 = arith.mulf %719, %603 : vector<8x32xf32>
    %729 = arith.mulf %713, %721 : vector<8x32xf32>
    %730 = arith.addf %728, %729 : vector<8x32xf32>
    %731 = math.tanh %730 : vector<8x32xf32>
    %732 = arith.mulf %727, %731 : vector<8x32xf32>
    %733 = arith.mulf %732, %693 : vector<8x32xf32>
    %c0_388 = arith.constant 0 : index
    %c0_389 = arith.constant 0 : index
    %734 = vector.load %arg12[%c0_388, %c0_389] : memref<32x256xf32, #tpu.memory_space<vmem>>, vector<32x256xf32>
    %cst_390 = arith.constant dense<0.000000e+00> : vector<8x256xf32>
    %735 = tpu.matmul %733, %734, %cst_390 {dimension_numbers = #tpu.dot_dimension_numbers<[1], [0], [0], [1], [0, 0, 1, 1], [], []>} : vector<8x32xf32>, vector<32x256xf32>, vector<8x256xf32> -> vector<8x256xf32>
    %c0_391 = arith.constant 0 : index
    %c0_392 = arith.constant 0 : index
    %736 = vector.load %arg13[%c0_391, %c0_392] : memref<16x256xf32, #tpu.memory_space<vmem>>, vector<16x256xf32>
    %cst_393 = arith.constant dense<0.000000e+00> : vector<8x256xf32>
    %737 = tpu.matmul %629, %736, %cst_393 {dimension_numbers = #tpu.dot_dimension_numbers<[1], [0], [0], [1], [0, 0, 1, 1], [], []>} : vector<8x16xf32>, vector<16x256xf32>, vector<8x256xf32> -> vector<8x256xf32>
    %738 = arith.addf %735, %737 : vector<8x256xf32>
    %c0_394 = arith.constant 0 : index
    %c0_395 = arith.constant 0 : index
    %739 = vector.load %arg14[%c0_394, %c0_395] : memref<16x256xf32, #tpu.memory_space<vmem>>, vector<16x256xf32>
    %cst_396 = arith.constant dense<0.000000e+00> : vector<8x256xf32>
    %740 = tpu.matmul %634, %739, %cst_396 {dimension_numbers = #tpu.dot_dimension_numbers<[1], [0], [0], [1], [0, 0, 1, 1], [], []>} : vector<8x16xf32>, vector<16x256xf32>, vector<8x256xf32> -> vector<8x256xf32>
    %741 = arith.addf %738, %740 : vector<8x256xf32>
    %c0_397 = arith.constant 0 : index
    %c0_398 = arith.constant 0 : index
    %742 = vector.load %arg6[%c0_397, %c0_398] : memref<8x256xf32, #tpu.memory_space<vmem>>, vector<8x256xf32>
    %743 = arith.addf %741, %742 : vector<8x256xf32>
    %744 = math.tanh %743 : vector<8x256xf32>
    %c0_399 = arith.constant 0 : index
    %c0_400 = arith.constant 0 : index
    %745 = vector.load %arg15[%c0_399, %c0_400] : memref<256x16xf32, #tpu.memory_space<vmem>>, vector<256x16xf32>
    %cst_401 = arith.constant dense<0.000000e+00> : vector<8x16xf32>
    %746 = tpu.matmul %744, %745, %cst_401 {dimension_numbers = #tpu.dot_dimension_numbers<[1], [0], [0], [1], [0, 0, 1, 1], [], []>} : vector<8x256xf32>, vector<256x16xf32>, vector<8x16xf32> -> vector<8x16xf32>
    %747 = arith.addf %746, %45 : vector<8x16xf32>
    %cst_402 = arith.constant dense<0xFF800000> : vector<8xf32>
    %748 = vector.multi_reduction <maximumf>, %747, %cst_402 [1] : vector<8x16xf32> to vector<8xf32>
    %749 = vector.shape_cast %748 : vector<8xf32> to vector<8x1xf32>
    %750 = vector.broadcast %749 : vector<8x1xf32> to vector<8x16xf32>
    %751 = arith.subf %747, %750 : vector<8x16xf32>
    %752 = math.exp %751 : vector<8x16xf32>
    %cst_403 = arith.constant dense<0.000000e+00> : vector<8xf32>
    %753 = vector.multi_reduction <add>, %752, %cst_403 [1] : vector<8x16xf32> to vector<8xf32>
    %754 = vector.shape_cast %753 : vector<8xf32> to vector<8x1xf32>
    %755 = vector.broadcast %754 : vector<8x1xf32> to vector<8x16xf32>
    %756 = arith.divf %752, %755 : vector<8x16xf32>
    %757 = vector.shape_cast %756 : vector<8x16xf32> to vector<8x1x16xf32>
    %c0_404 = arith.constant 0 : index
    %c0_405 = arith.constant 0 : index
    %c0_406 = arith.constant 0 : index
    %758 = vector.load %arg5[%c0_404, %c0_405, %c0_406] : memref<8x16x32xf32, #tpu.memory_space<vmem>>, vector<8x16x32xf32>
    "tpu.trace_start"() <{level = 10 : i32, message = "bqt,bte->bqe"}> : () -> ()
    %cst_407 = arith.constant dense<0.000000e+00> : vector<8x1x32xf32>
    %759 = tpu.matmul %757, %758, %cst_407 {dimension_numbers = #tpu.dot_dimension_numbers<[2], [1], [1], [2], [0, 0, 0, 1, 1, 2], [0], [0]>} : vector<8x1x16xf32>, vector<8x16x32xf32>, vector<8x1x32xf32> -> vector<8x1x32xf32>
    "tpu.trace_stop"() : () -> ()
    %760 = vector.shape_cast %759 : vector<8x1x32xf32> to vector<8x32xf32>
    %761 = arith.addf %634, %756 : vector<8x16xf32>
    %c0_408 = arith.constant 0 : index
    %c0_409 = arith.constant 0 : index
    %762 = vector.load %arg16[%c0_408, %c0_409] : memref<32x128xf32, #tpu.memory_space<vmem>>, vector<32x128xf32>
    %cst_410 = arith.constant dense<0.000000e+00> : vector<8x128xf32>
    %763 = tpu.matmul %733, %762, %cst_410 {dimension_numbers = #tpu.dot_dimension_numbers<[1], [0], [0], [1], [0, 0, 1, 1], [], []>} : vector<8x32xf32>, vector<32x128xf32>, vector<8x128xf32> -> vector<8x128xf32>
    %c0_411 = arith.constant 0 : index
    %c0_412 = arith.constant 0 : index
    %764 = vector.load %arg17[%c0_411, %c0_412] : memref<32x128xf32, #tpu.memory_space<vmem>>, vector<32x128xf32>
    %cst_413 = arith.constant dense<0.000000e+00> : vector<8x128xf32>
    %765 = tpu.matmul %760, %764, %cst_413 {dimension_numbers = #tpu.dot_dimension_numbers<[1], [0], [0], [1], [0, 0, 1, 1], [], []>} : vector<8x32xf32>, vector<32x128xf32>, vector<8x128xf32> -> vector<8x128xf32>
    %766 = arith.addf %763, %765 : vector<8x128xf32>
    %c0_414 = arith.constant 0 : index
    %c0_415 = arith.constant 0 : index
    %767 = vector.load %arg18[%c0_414, %c0_415] : memref<32x128xf32, #tpu.memory_space<vmem>>, vector<32x128xf32>
    %cst_416 = arith.constant dense<0.000000e+00> : vector<8x128xf32>
    %768 = tpu.matmul %671, %767, %cst_416 {dimension_numbers = #tpu.dot_dimension_numbers<[1], [0], [0], [1], [0, 0, 1, 1], [], []>} : vector<8x32xf32>, vector<32x128xf32>, vector<8x128xf32> -> vector<8x128xf32>
    %769 = arith.addf %766, %768 : vector<8x128xf32>
    %c0_417 = arith.constant 0 : index
    %c0_418 = arith.constant 0 : index
    %770 = vector.load %arg19[%c0_417, %c0_418] : memref<1x128xf32, #tpu.memory_space<vmem>>, vector<1x128xf32>
    %771 = vector.broadcast %770 : vector<1x128xf32> to vector<8x128xf32>
    %772 = arith.addf %769, %771 : vector<8x128xf32>
    %773 = vector.extract_strided_slice %772 {offsets = [0, 0], sizes = [8, 32], strides = [1, 1]} : vector<8x128xf32> to vector<8x32xf32>
    %774 = arith.negf %773 : vector<8x32xf32>
    %775 = math.exp %774 : vector<8x32xf32>
    %cst_419 = arith.constant 1.000000e+00 : f32
    %776 = vector.broadcast %cst_419 : f32 to vector<8x32xf32>
    %777 = arith.addf %776, %775 : vector<8x32xf32>
    %778 = arith.divf %776, %777 : vector<8x32xf32>
    %779 = vector.extract_strided_slice %772 {offsets = [0, 32], sizes = [8, 32], strides = [1, 1]} : vector<8x128xf32> to vector<8x32xf32>
    %780 = arith.negf %779 : vector<8x32xf32>
    %781 = math.exp %780 : vector<8x32xf32>
    %cst_420 = arith.constant 1.000000e+00 : f32
    %782 = vector.broadcast %cst_420 : f32 to vector<8x32xf32>
    %783 = arith.addf %782, %781 : vector<8x32xf32>
    %784 = arith.divf %782, %783 : vector<8x32xf32>
    %785 = vector.extract_strided_slice %772 {offsets = [0, 64], sizes = [8, 32], strides = [1, 1]} : vector<8x128xf32> to vector<8x32xf32>
    %786 = math.tanh %785 : vector<8x32xf32>
    %787 = vector.extract_strided_slice %772 {offsets = [0, 96], sizes = [8, 32], strides = [1, 1]} : vector<8x128xf32> to vector<8x32xf32>
    %788 = arith.negf %787 : vector<8x32xf32>
    %789 = math.exp %788 : vector<8x32xf32>
    %cst_421 = arith.constant 1.000000e+00 : f32
    %790 = vector.broadcast %cst_421 : f32 to vector<8x32xf32>
    %791 = arith.addf %790, %789 : vector<8x32xf32>
    %792 = arith.divf %790, %791 : vector<8x32xf32>
    %793 = arith.mulf %784, %668 : vector<8x32xf32>
    %794 = arith.mulf %778, %786 : vector<8x32xf32>
    %795 = arith.addf %793, %794 : vector<8x32xf32>
    %796 = math.tanh %795 : vector<8x32xf32>
    %797 = arith.mulf %792, %796 : vector<8x32xf32>
    %798 = arith.mulf %797, %696 : vector<8x32xf32>
    %c0_422 = arith.constant 0 : index
    %c0_423 = arith.constant 0 : index
    %799 = vector.load %arg20[%c0_422, %c0_423] : memref<32x128xf32, #tpu.memory_space<vmem>>, vector<32x128xf32>
    %cst_424 = arith.constant dense<0.000000e+00> : vector<8x128xf32>
    %800 = tpu.matmul %798, %799, %cst_424 {dimension_numbers = #tpu.dot_dimension_numbers<[1], [0], [0], [1], [0, 0, 1, 1], [], []>} : vector<8x32xf32>, vector<32x128xf32>, vector<8x128xf32> -> vector<8x128xf32>
    %c0_425 = arith.constant 0 : index
    %c0_426 = arith.constant 0 : index
    %801 = vector.load %arg21[%c0_425, %c0_426] : memref<32x128xf32, #tpu.memory_space<vmem>>, vector<32x128xf32>
    %cst_427 = arith.constant dense<0.000000e+00> : vector<8x128xf32>
    %802 = tpu.matmul %760, %801, %cst_427 {dimension_numbers = #tpu.dot_dimension_numbers<[1], [0], [0], [1], [0, 0, 1, 1], [], []>} : vector<8x32xf32>, vector<32x128xf32>, vector<8x128xf32> -> vector<8x128xf32>
    %803 = arith.addf %800, %802 : vector<8x128xf32>
    %c0_428 = arith.constant 0 : index
    %c0_429 = arith.constant 0 : index
    %804 = vector.load %arg22[%c0_428, %c0_429] : memref<1x128xf32, #tpu.memory_space<vmem>>, vector<1x128xf32>
    %805 = vector.broadcast %804 : vector<1x128xf32> to vector<8x128xf32>
    %806 = arith.addf %803, %805 : vector<8x128xf32>
    %807 = arith.index_cast %c5_i32 : i32 to index
    %c0_430 = arith.constant 0 : index
    %c0_431 = arith.constant 0 : index
    %808 = vector.load %arg25[%807, %c0_430, %c0_431] : memref<8x8x128xf32, #tpu.memory_space<vmem>>, vector<1x8x128xf32>
    %809 = vector.shape_cast %808 : vector<1x8x128xf32> to vector<8x128xf32>
    %810 = vector.shape_cast %806 : vector<8x128xf32> to vector<1x8x128xf32>
    tpu.vector_store %arg25[%807, %c0_430, %c0_431], %810 {strides = array<i32>} : memref<8x8x128xf32, #tpu.memory_space<vmem>>, vector<1x8x128xf32>,
    %811 = arith.index_cast %c5_i32 : i32 to index
    %c0_432 = arith.constant 0 : index
    %c0_433 = arith.constant 0 : index
    %812 = vector.load %arg26[%811, %c0_432, %c0_433] : memref<8x8x16xf32, #tpu.memory_space<vmem>>, vector<1x8x16xf32>
    %813 = vector.shape_cast %812 : vector<1x8x16xf32> to vector<8x16xf32>
    %814 = vector.shape_cast %756 : vector<8x16xf32> to vector<1x8x16xf32>
    tpu.vector_store %arg26[%811, %c0_432, %c0_433], %814 {strides = array<i32>} : memref<8x8x16xf32, #tpu.memory_space<vmem>>, vector<1x8x16xf32>,
    %c6_i32 = arith.constant 6 : i32
    %815 = arith.index_cast %c6_i32 : i32 to index
    %c0_434 = arith.constant 0 : index
    %c0_435 = arith.constant 0 : index
    %816 = vector.load %arg27[%815, %c0_434, %c0_435] : memref<8x8x32xf32, #tpu.memory_space<vmem>>, vector<1x8x32xf32>
    %817 = vector.shape_cast %816 : vector<1x8x32xf32> to vector<8x32xf32>
    %818 = arith.index_cast %c6_i32 : i32 to index
    %c0_436 = arith.constant 0 : index
    %c0_437 = arith.constant 0 : index
    %819 = vector.load %arg23[%818, %c0_436, %c0_437] : memref<8x8x32xf32, #tpu.memory_space<vmem>>, vector<1x8x32xf32>
    %820 = vector.shape_cast %819 : vector<1x8x32xf32> to vector<8x32xf32>
    %821 = arith.index_cast %c6_i32 : i32 to index
    %c0_438 = arith.constant 0 : index
    %c0_439 = arith.constant 0 : index
    %822 = vector.load %arg24[%821, %c0_438, %c0_439] : memref<8x8x32xf32, #tpu.memory_space<vmem>>, vector<1x8x32xf32>
    %823 = vector.shape_cast %822 : vector<1x8x32xf32> to vector<8x32xf32>
    %c0_440 = arith.constant 0 : index
    %c0_441 = arith.constant 0 : index
    %824 = vector.load %arg8[%c0_440, %c0_441] : memref<32x128xf32, #tpu.memory_space<vmem>>, vector<32x128xf32>
    %cst_442 = arith.constant dense<0.000000e+00> : vector<8x128xf32>
    %825 = tpu.matmul %817, %824, %cst_442 {dimension_numbers = #tpu.dot_dimension_numbers<[1], [0], [0], [1], [0, 0, 1, 1], [], []>} : vector<8x32xf32>, vector<32x128xf32>, vector<8x128xf32> -> vector<8x128xf32>
    %c0_443 = arith.constant 0 : index
    %c0_444 = arith.constant 0 : index
    %826 = vector.load %arg9[%c0_443, %c0_444] : memref<32x128xf32, #tpu.memory_space<vmem>>, vector<32x128xf32>
    %cst_445 = arith.constant dense<0.000000e+00> : vector<8x128xf32>
    %827 = tpu.matmul %760, %826, %cst_445 {dimension_numbers = #tpu.dot_dimension_numbers<[1], [0], [0], [1], [0, 0, 1, 1], [], []>} : vector<8x32xf32>, vector<32x128xf32>, vector<8x128xf32> -> vector<8x128xf32>
    %828 = arith.addf %825, %827 : vector<8x128xf32>
    %c0_446 = arith.constant 0 : index
    %c0_447 = arith.constant 0 : index
    %829 = vector.load %arg10[%c0_446, %c0_447] : memref<32x128xf32, #tpu.memory_space<vmem>>, vector<32x128xf32>
    %cst_448 = arith.constant dense<0.000000e+00> : vector<8x128xf32>
    %830 = tpu.matmul %733, %829, %cst_448 {dimension_numbers = #tpu.dot_dimension_numbers<[1], [0], [0], [1], [0, 0, 1, 1], [], []>} : vector<8x32xf32>, vector<32x128xf32>, vector<8x128xf32> -> vector<8x128xf32>
    %831 = arith.addf %828, %830 : vector<8x128xf32>
    %c0_449 = arith.constant 0 : index
    %c0_450 = arith.constant 0 : index
    %832 = vector.load %arg11[%c0_449, %c0_450] : memref<1x128xf32, #tpu.memory_space<vmem>>, vector<1x128xf32>
    %833 = vector.broadcast %832 : vector<1x128xf32> to vector<8x128xf32>
    %834 = arith.addf %831, %833 : vector<8x128xf32>
    %835 = vector.extract_strided_slice %834 {offsets = [0, 0], sizes = [8, 32], strides = [1, 1]} : vector<8x128xf32> to vector<8x32xf32>
    %836 = arith.negf %835 : vector<8x32xf32>
    %837 = math.exp %836 : vector<8x32xf32>
    %cst_451 = arith.constant 1.000000e+00 : f32
    %838 = vector.broadcast %cst_451 : f32 to vector<8x32xf32>
    %839 = arith.addf %838, %837 : vector<8x32xf32>
    %840 = arith.divf %838, %839 : vector<8x32xf32>
    %841 = vector.extract_strided_slice %834 {offsets = [0, 32], sizes = [8, 32], strides = [1, 1]} : vector<8x128xf32> to vector<8x32xf32>
    %842 = arith.negf %841 : vector<8x32xf32>
    %843 = math.exp %842 : vector<8x32xf32>
    %cst_452 = arith.constant 1.000000e+00 : f32
    %844 = vector.broadcast %cst_452 : f32 to vector<8x32xf32>
    %845 = arith.addf %844, %843 : vector<8x32xf32>
    %846 = arith.divf %844, %845 : vector<8x32xf32>
    %847 = vector.extract_strided_slice %834 {offsets = [0, 64], sizes = [8, 32], strides = [1, 1]} : vector<8x128xf32> to vector<8x32xf32>
    %848 = math.tanh %847 : vector<8x32xf32>
    %849 = vector.extract_strided_slice %834 {offsets = [0, 96], sizes = [8, 32], strides = [1, 1]} : vector<8x128xf32> to vector<8x32xf32>
    %850 = arith.negf %849 : vector<8x32xf32>
    %851 = math.exp %850 : vector<8x32xf32>
    %cst_453 = arith.constant 1.000000e+00 : f32
    %852 = vector.broadcast %cst_453 : f32 to vector<8x32xf32>
    %853 = arith.addf %852, %851 : vector<8x32xf32>
    %854 = arith.divf %852, %853 : vector<8x32xf32>
    %855 = arith.mulf %846, %730 : vector<8x32xf32>
    %856 = arith.mulf %840, %848 : vector<8x32xf32>
    %857 = arith.addf %855, %856 : vector<8x32xf32>
    %858 = math.tanh %857 : vector<8x32xf32>
    %859 = arith.mulf %854, %858 : vector<8x32xf32>
    %860 = arith.mulf %859, %820 : vector<8x32xf32>
    %c0_454 = arith.constant 0 : index
    %c0_455 = arith.constant 0 : index
    %861 = vector.load %arg12[%c0_454, %c0_455] : memref<32x256xf32, #tpu.memory_space<vmem>>, vector<32x256xf32>
    %cst_456 = arith.constant dense<0.000000e+00> : vector<8x256xf32>
    %862 = tpu.matmul %860, %861, %cst_456 {dimension_numbers = #tpu.dot_dimension_numbers<[1], [0], [0], [1], [0, 0, 1, 1], [], []>} : vector<8x32xf32>, vector<32x256xf32>, vector<8x256xf32> -> vector<8x256xf32>
    %c0_457 = arith.constant 0 : index
    %c0_458 = arith.constant 0 : index
    %863 = vector.load %arg13[%c0_457, %c0_458] : memref<16x256xf32, #tpu.memory_space<vmem>>, vector<16x256xf32>
    %cst_459 = arith.constant dense<0.000000e+00> : vector<8x256xf32>
    %864 = tpu.matmul %756, %863, %cst_459 {dimension_numbers = #tpu.dot_dimension_numbers<[1], [0], [0], [1], [0, 0, 1, 1], [], []>} : vector<8x16xf32>, vector<16x256xf32>, vector<8x256xf32> -> vector<8x256xf32>
    %865 = arith.addf %862, %864 : vector<8x256xf32>
    %c0_460 = arith.constant 0 : index
    %c0_461 = arith.constant 0 : index
    %866 = vector.load %arg14[%c0_460, %c0_461] : memref<16x256xf32, #tpu.memory_space<vmem>>, vector<16x256xf32>
    %cst_462 = arith.constant dense<0.000000e+00> : vector<8x256xf32>
    %867 = tpu.matmul %761, %866, %cst_462 {dimension_numbers = #tpu.dot_dimension_numbers<[1], [0], [0], [1], [0, 0, 1, 1], [], []>} : vector<8x16xf32>, vector<16x256xf32>, vector<8x256xf32> -> vector<8x256xf32>
    %868 = arith.addf %865, %867 : vector<8x256xf32>
    %c0_463 = arith.constant 0 : index
    %c0_464 = arith.constant 0 : index
    %869 = vector.load %arg6[%c0_463, %c0_464] : memref<8x256xf32, #tpu.memory_space<vmem>>, vector<8x256xf32>
    %870 = arith.addf %868, %869 : vector<8x256xf32>
    %871 = math.tanh %870 : vector<8x256xf32>
    %c0_465 = arith.constant 0 : index
    %c0_466 = arith.constant 0 : index
    %872 = vector.load %arg15[%c0_465, %c0_466] : memref<256x16xf32, #tpu.memory_space<vmem>>, vector<256x16xf32>
    %cst_467 = arith.constant dense<0.000000e+00> : vector<8x16xf32>
    %873 = tpu.matmul %871, %872, %cst_467 {dimension_numbers = #tpu.dot_dimension_numbers<[1], [0], [0], [1], [0, 0, 1, 1], [], []>} : vector<8x256xf32>, vector<256x16xf32>, vector<8x16xf32> -> vector<8x16xf32>
    %874 = arith.addf %873, %45 : vector<8x16xf32>
    %cst_468 = arith.constant dense<0xFF800000> : vector<8xf32>
    %875 = vector.multi_reduction <maximumf>, %874, %cst_468 [1] : vector<8x16xf32> to vector<8xf32>
    %876 = vector.shape_cast %875 : vector<8xf32> to vector<8x1xf32>
    %877 = vector.broadcast %876 : vector<8x1xf32> to vector<8x16xf32>
    %878 = arith.subf %874, %877 : vector<8x16xf32>
    %879 = math.exp %878 : vector<8x16xf32>
    %cst_469 = arith.constant dense<0.000000e+00> : vector<8xf32>
    %880 = vector.multi_reduction <add>, %879, %cst_469 [1] : vector<8x16xf32> to vector<8xf32>
    %881 = vector.shape_cast %880 : vector<8xf32> to vector<8x1xf32>
    %882 = vector.broadcast %881 : vector<8x1xf32> to vector<8x16xf32>
    %883 = arith.divf %879, %882 : vector<8x16xf32>
    %884 = vector.shape_cast %883 : vector<8x16xf32> to vector<8x1x16xf32>
    %c0_470 = arith.constant 0 : index
    %c0_471 = arith.constant 0 : index
    %c0_472 = arith.constant 0 : index
    %885 = vector.load %arg5[%c0_470, %c0_471, %c0_472] : memref<8x16x32xf32, #tpu.memory_space<vmem>>, vector<8x16x32xf32>
    "tpu.trace_start"() <{level = 10 : i32, message = "bqt,bte->bqe"}> : () -> ()
    %cst_473 = arith.constant dense<0.000000e+00> : vector<8x1x32xf32>
    %886 = tpu.matmul %884, %885, %cst_473 {dimension_numbers = #tpu.dot_dimension_numbers<[2], [1], [1], [2], [0, 0, 0, 1, 1, 2], [0], [0]>} : vector<8x1x16xf32>, vector<8x16x32xf32>, vector<8x1x32xf32> -> vector<8x1x32xf32>
    "tpu.trace_stop"() : () -> ()
    %887 = vector.shape_cast %886 : vector<8x1x32xf32> to vector<8x32xf32>
    %888 = arith.addf %761, %883 : vector<8x16xf32>
    %c0_474 = arith.constant 0 : index
    %c0_475 = arith.constant 0 : index
    %889 = vector.load %arg16[%c0_474, %c0_475] : memref<32x128xf32, #tpu.memory_space<vmem>>, vector<32x128xf32>
    %cst_476 = arith.constant dense<0.000000e+00> : vector<8x128xf32>
    %890 = tpu.matmul %860, %889, %cst_476 {dimension_numbers = #tpu.dot_dimension_numbers<[1], [0], [0], [1], [0, 0, 1, 1], [], []>} : vector<8x32xf32>, vector<32x128xf32>, vector<8x128xf32> -> vector<8x128xf32>
    %c0_477 = arith.constant 0 : index
    %c0_478 = arith.constant 0 : index
    %891 = vector.load %arg17[%c0_477, %c0_478] : memref<32x128xf32, #tpu.memory_space<vmem>>, vector<32x128xf32>
    %cst_479 = arith.constant dense<0.000000e+00> : vector<8x128xf32>
    %892 = tpu.matmul %887, %891, %cst_479 {dimension_numbers = #tpu.dot_dimension_numbers<[1], [0], [0], [1], [0, 0, 1, 1], [], []>} : vector<8x32xf32>, vector<32x128xf32>, vector<8x128xf32> -> vector<8x128xf32>
    %893 = arith.addf %890, %892 : vector<8x128xf32>
    %c0_480 = arith.constant 0 : index
    %c0_481 = arith.constant 0 : index
    %894 = vector.load %arg18[%c0_480, %c0_481] : memref<32x128xf32, #tpu.memory_space<vmem>>, vector<32x128xf32>
    %cst_482 = arith.constant dense<0.000000e+00> : vector<8x128xf32>
    %895 = tpu.matmul %798, %894, %cst_482 {dimension_numbers = #tpu.dot_dimension_numbers<[1], [0], [0], [1], [0, 0, 1, 1], [], []>} : vector<8x32xf32>, vector<32x128xf32>, vector<8x128xf32> -> vector<8x128xf32>
    %896 = arith.addf %893, %895 : vector<8x128xf32>
    %c0_483 = arith.constant 0 : index
    %c0_484 = arith.constant 0 : index
    %897 = vector.load %arg19[%c0_483, %c0_484] : memref<1x128xf32, #tpu.memory_space<vmem>>, vector<1x128xf32>
    %898 = vector.broadcast %897 : vector<1x128xf32> to vector<8x128xf32>
    %899 = arith.addf %896, %898 : vector<8x128xf32>
    %900 = vector.extract_strided_slice %899 {offsets = [0, 0], sizes = [8, 32], strides = [1, 1]} : vector<8x128xf32> to vector<8x32xf32>
    %901 = arith.negf %900 : vector<8x32xf32>
    %902 = math.exp %901 : vector<8x32xf32>
    %cst_485 = arith.constant 1.000000e+00 : f32
    %903 = vector.broadcast %cst_485 : f32 to vector<8x32xf32>
    %904 = arith.addf %903, %902 : vector<8x32xf32>
    %905 = arith.divf %903, %904 : vector<8x32xf32>
    %906 = vector.extract_strided_slice %899 {offsets = [0, 32], sizes = [8, 32], strides = [1, 1]} : vector<8x128xf32> to vector<8x32xf32>
    %907 = arith.negf %906 : vector<8x32xf32>
    %908 = math.exp %907 : vector<8x32xf32>
    %cst_486 = arith.constant 1.000000e+00 : f32
    %909 = vector.broadcast %cst_486 : f32 to vector<8x32xf32>
    %910 = arith.addf %909, %908 : vector<8x32xf32>
    %911 = arith.divf %909, %910 : vector<8x32xf32>
    %912 = vector.extract_strided_slice %899 {offsets = [0, 64], sizes = [8, 32], strides = [1, 1]} : vector<8x128xf32> to vector<8x32xf32>
    %913 = math.tanh %912 : vector<8x32xf32>
    %914 = vector.extract_strided_slice %899 {offsets = [0, 96], sizes = [8, 32], strides = [1, 1]} : vector<8x128xf32> to vector<8x32xf32>
    %915 = arith.negf %914 : vector<8x32xf32>
    %916 = math.exp %915 : vector<8x32xf32>
    %cst_487 = arith.constant 1.000000e+00 : f32
    %917 = vector.broadcast %cst_487 : f32 to vector<8x32xf32>
    %918 = arith.addf %917, %916 : vector<8x32xf32>
    %919 = arith.divf %917, %918 : vector<8x32xf32>
    %920 = arith.mulf %911, %795 : vector<8x32xf32>
    %921 = arith.mulf %905, %913 : vector<8x32xf32>
    %922 = arith.addf %920, %921 : vector<8x32xf32>
    %923 = math.tanh %922 : vector<8x32xf32>
    %924 = arith.mulf %919, %923 : vector<8x32xf32>
    %925 = arith.mulf %924, %823 : vector<8x32xf32>
    %c0_488 = arith.constant 0 : index
    %c0_489 = arith.constant 0 : index
    %926 = vector.load %arg20[%c0_488, %c0_489] : memref<32x128xf32, #tpu.memory_space<vmem>>, vector<32x128xf32>
    %cst_490 = arith.constant dense<0.000000e+00> : vector<8x128xf32>
    %927 = tpu.matmul %925, %926, %cst_490 {dimension_numbers = #tpu.dot_dimension_numbers<[1], [0], [0], [1], [0, 0, 1, 1], [], []>} : vector<8x32xf32>, vector<32x128xf32>, vector<8x128xf32> -> vector<8x128xf32>
    %c0_491 = arith.constant 0 : index
    %c0_492 = arith.constant 0 : index
    %928 = vector.load %arg21[%c0_491, %c0_492] : memref<32x128xf32, #tpu.memory_space<vmem>>, vector<32x128xf32>
    %cst_493 = arith.constant dense<0.000000e+00> : vector<8x128xf32>
    %929 = tpu.matmul %887, %928, %cst_493 {dimension_numbers = #tpu.dot_dimension_numbers<[1], [0], [0], [1], [0, 0, 1, 1], [], []>} : vector<8x32xf32>, vector<32x128xf32>, vector<8x128xf32> -> vector<8x128xf32>
    %930 = arith.addf %927, %929 : vector<8x128xf32>
    %c0_494 = arith.constant 0 : index
    %c0_495 = arith.constant 0 : index
    %931 = vector.load %arg22[%c0_494, %c0_495] : memref<1x128xf32, #tpu.memory_space<vmem>>, vector<1x128xf32>
    %932 = vector.broadcast %931 : vector<1x128xf32> to vector<8x128xf32>
    %933 = arith.addf %930, %932 : vector<8x128xf32>
    %934 = arith.index_cast %c6_i32 : i32 to index
    %c0_496 = arith.constant 0 : index
    %c0_497 = arith.constant 0 : index
    %935 = vector.load %arg25[%934, %c0_496, %c0_497] : memref<8x8x128xf32, #tpu.memory_space<vmem>>, vector<1x8x128xf32>
    %936 = vector.shape_cast %935 : vector<1x8x128xf32> to vector<8x128xf32>
    %937 = vector.shape_cast %933 : vector<8x128xf32> to vector<1x8x128xf32>
    tpu.vector_store %arg25[%934, %c0_496, %c0_497], %937 {strides = array<i32>} : memref<8x8x128xf32, #tpu.memory_space<vmem>>, vector<1x8x128xf32>,
    %938 = arith.index_cast %c6_i32 : i32 to index
    %c0_498 = arith.constant 0 : index
    %c0_499 = arith.constant 0 : index
    %939 = vector.load %arg26[%938, %c0_498, %c0_499] : memref<8x8x16xf32, #tpu.memory_space<vmem>>, vector<1x8x16xf32>
    %940 = vector.shape_cast %939 : vector<1x8x16xf32> to vector<8x16xf32>
    %941 = vector.shape_cast %883 : vector<8x16xf32> to vector<1x8x16xf32>
    tpu.vector_store %arg26[%938, %c0_498, %c0_499], %941 {strides = array<i32>} : memref<8x8x16xf32, #tpu.memory_space<vmem>>, vector<1x8x16xf32>,
    %c7_i32 = arith.constant 7 : i32
    %942 = arith.index_cast %c7_i32 : i32 to index
    %c0_500 = arith.constant 0 : index
    %c0_501 = arith.constant 0 : index
    %943 = vector.load %arg27[%942, %c0_500, %c0_501] : memref<8x8x32xf32, #tpu.memory_space<vmem>>, vector<1x8x32xf32>
    %944 = vector.shape_cast %943 : vector<1x8x32xf32> to vector<8x32xf32>
    %945 = arith.index_cast %c7_i32 : i32 to index
    %c0_502 = arith.constant 0 : index
    %c0_503 = arith.constant 0 : index
    %946 = vector.load %arg23[%945, %c0_502, %c0_503] : memref<8x8x32xf32, #tpu.memory_space<vmem>>, vector<1x8x32xf32>
    %947 = vector.shape_cast %946 : vector<1x8x32xf32> to vector<8x32xf32>
    %948 = arith.index_cast %c7_i32 : i32 to index
    %c0_504 = arith.constant 0 : index
    %c0_505 = arith.constant 0 : index
    %949 = vector.load %arg24[%948, %c0_504, %c0_505] : memref<8x8x32xf32, #tpu.memory_space<vmem>>, vector<1x8x32xf32>
    %950 = vector.shape_cast %949 : vector<1x8x32xf32> to vector<8x32xf32>
    %c0_506 = arith.constant 0 : index
    %c0_507 = arith.constant 0 : index
    %951 = vector.load %arg8[%c0_506, %c0_507] : memref<32x128xf32, #tpu.memory_space<vmem>>, vector<32x128xf32>
    %cst_508 = arith.constant dense<0.000000e+00> : vector<8x128xf32>
    %952 = tpu.matmul %944, %951, %cst_508 {dimension_numbers = #tpu.dot_dimension_numbers<[1], [0], [0], [1], [0, 0, 1, 1], [], []>} : vector<8x32xf32>, vector<32x128xf32>, vector<8x128xf32> -> vector<8x128xf32>
    %c0_509 = arith.constant 0 : index
    %c0_510 = arith.constant 0 : index
    %953 = vector.load %arg9[%c0_509, %c0_510] : memref<32x128xf32, #tpu.memory_space<vmem>>, vector<32x128xf32>
    %cst_511 = arith.constant dense<0.000000e+00> : vector<8x128xf32>
    %954 = tpu.matmul %887, %953, %cst_511 {dimension_numbers = #tpu.dot_dimension_numbers<[1], [0], [0], [1], [0, 0, 1, 1], [], []>} : vector<8x32xf32>, vector<32x128xf32>, vector<8x128xf32> -> vector<8x128xf32>
    %955 = arith.addf %952, %954 : vector<8x128xf32>
    %c0_512 = arith.constant 0 : index
    %c0_513 = arith.constant 0 : index
    %956 = vector.load %arg10[%c0_512, %c0_513] : memref<32x128xf32, #tpu.memory_space<vmem>>, vector<32x128xf32>
    %cst_514 = arith.constant dense<0.000000e+00> : vector<8x128xf32>
    %957 = tpu.matmul %860, %956, %cst_514 {dimension_numbers = #tpu.dot_dimension_numbers<[1], [0], [0], [1], [0, 0, 1, 1], [], []>} : vector<8x32xf32>, vector<32x128xf32>, vector<8x128xf32> -> vector<8x128xf32>
    %958 = arith.addf %955, %957 : vector<8x128xf32>
    %c0_515 = arith.constant 0 : index
    %c0_516 = arith.constant 0 : index
    %959 = vector.load %arg11[%c0_515, %c0_516] : memref<1x128xf32, #tpu.memory_space<vmem>>, vector<1x128xf32>
    %960 = vector.broadcast %959 : vector<1x128xf32> to vector<8x128xf32>
    %961 = arith.addf %958, %960 : vector<8x128xf32>
    %962 = vector.extract_strided_slice %961 {offsets = [0, 0], sizes = [8, 32], strides = [1, 1]} : vector<8x128xf32> to vector<8x32xf32>
    %963 = arith.negf %962 : vector<8x32xf32>
    %964 = math.exp %963 : vector<8x32xf32>
    %cst_517 = arith.constant 1.000000e+00 : f32
    %965 = vector.broadcast %cst_517 : f32 to vector<8x32xf32>
    %966 = arith.addf %965, %964 : vector<8x32xf32>
    %967 = arith.divf %965, %966 : vector<8x32xf32>
    %968 = vector.extract_strided_slice %961 {offsets = [0, 32], sizes = [8, 32], strides = [1, 1]} : vector<8x128xf32> to vector<8x32xf32>
    %969 = arith.negf %968 : vector<8x32xf32>
    %970 = math.exp %969 : vector<8x32xf32>
    %cst_518 = arith.constant 1.000000e+00 : f32
    %971 = vector.broadcast %cst_518 : f32 to vector<8x32xf32>
    %972 = arith.addf %971, %970 : vector<8x32xf32>
    %973 = arith.divf %971, %972 : vector<8x32xf32>
    %974 = vector.extract_strided_slice %961 {offsets = [0, 64], sizes = [8, 32], strides = [1, 1]} : vector<8x128xf32> to vector<8x32xf32>
    %975 = math.tanh %974 : vector<8x32xf32>
    %976 = vector.extract_strided_slice %961 {offsets = [0, 96], sizes = [8, 32], strides = [1, 1]} : vector<8x128xf32> to vector<8x32xf32>
    %977 = arith.negf %976 : vector<8x32xf32>
    %978 = math.exp %977 : vector<8x32xf32>
    %cst_519 = arith.constant 1.000000e+00 : f32
    %979 = vector.broadcast %cst_519 : f32 to vector<8x32xf32>
    %980 = arith.addf %979, %978 : vector<8x32xf32>
    %981 = arith.divf %979, %980 : vector<8x32xf32>
    %982 = arith.mulf %973, %857 : vector<8x32xf32>
    %983 = arith.mulf %967, %975 : vector<8x32xf32>
    %984 = arith.addf %982, %983 : vector<8x32xf32>
    %985 = math.tanh %984 : vector<8x32xf32>
    %986 = arith.mulf %981, %985 : vector<8x32xf32>
    %987 = arith.mulf %986, %947 : vector<8x32xf32>
    %c0_520 = arith.constant 0 : index
    %c0_521 = arith.constant 0 : index
    %988 = vector.load %arg12[%c0_520, %c0_521] : memref<32x256xf32, #tpu.memory_space<vmem>>, vector<32x256xf32>
    %cst_522 = arith.constant dense<0.000000e+00> : vector<8x256xf32>
    %989 = tpu.matmul %987, %988, %cst_522 {dimension_numbers = #tpu.dot_dimension_numbers<[1], [0], [0], [1], [0, 0, 1, 1], [], []>} : vector<8x32xf32>, vector<32x256xf32>, vector<8x256xf32> -> vector<8x256xf32>
    %c0_523 = arith.constant 0 : index
    %c0_524 = arith.constant 0 : index
    %990 = vector.load %arg13[%c0_523, %c0_524] : memref<16x256xf32, #tpu.memory_space<vmem>>, vector<16x256xf32>
    %cst_525 = arith.constant dense<0.000000e+00> : vector<8x256xf32>
    %991 = tpu.matmul %883, %990, %cst_525 {dimension_numbers = #tpu.dot_dimension_numbers<[1], [0], [0], [1], [0, 0, 1, 1], [], []>} : vector<8x16xf32>, vector<16x256xf32>, vector<8x256xf32> -> vector<8x256xf32>
    %992 = arith.addf %989, %991 : vector<8x256xf32>
    %c0_526 = arith.constant 0 : index
    %c0_527 = arith.constant 0 : index
    %993 = vector.load %arg14[%c0_526, %c0_527] : memref<16x256xf32, #tpu.memory_space<vmem>>, vector<16x256xf32>
    %cst_528 = arith.constant dense<0.000000e+00> : vector<8x256xf32>
    %994 = tpu.matmul %888, %993, %cst_528 {dimension_numbers = #tpu.dot_dimension_numbers<[1], [0], [0], [1], [0, 0, 1, 1], [], []>} : vector<8x16xf32>, vector<16x256xf32>, vector<8x256xf32> -> vector<8x256xf32>
    %995 = arith.addf %992, %994 : vector<8x256xf32>
    %c0_529 = arith.constant 0 : index
    %c0_530 = arith.constant 0 : index
    %996 = vector.load %arg6[%c0_529, %c0_530] : memref<8x256xf32, #tpu.memory_space<vmem>>, vector<8x256xf32>
    %997 = arith.addf %995, %996 : vector<8x256xf32>
    %998 = math.tanh %997 : vector<8x256xf32>
    %c0_531 = arith.constant 0 : index
    %c0_532 = arith.constant 0 : index
    %999 = vector.load %arg15[%c0_531, %c0_532] : memref<256x16xf32, #tpu.memory_space<vmem>>, vector<256x16xf32>
    %cst_533 = arith.constant dense<0.000000e+00> : vector<8x16xf32>
    %1000 = tpu.matmul %998, %999, %cst_533 {dimension_numbers = #tpu.dot_dimension_numbers<[1], [0], [0], [1], [0, 0, 1, 1], [], []>} : vector<8x256xf32>, vector<256x16xf32>, vector<8x16xf32> -> vector<8x16xf32>
    %1001 = arith.addf %1000, %45 : vector<8x16xf32>
    %cst_534 = arith.constant dense<0xFF800000> : vector<8xf32>
    %1002 = vector.multi_reduction <maximumf>, %1001, %cst_534 [1] : vector<8x16xf32> to vector<8xf32>
    %1003 = vector.shape_cast %1002 : vector<8xf32> to vector<8x1xf32>
    %1004 = vector.broadcast %1003 : vector<8x1xf32> to vector<8x16xf32>
    %1005 = arith.subf %1001, %1004 : vector<8x16xf32>
    %1006 = math.exp %1005 : vector<8x16xf32>
    %cst_535 = arith.constant dense<0.000000e+00> : vector<8xf32>
    %1007 = vector.multi_reduction <add>, %1006, %cst_535 [1] : vector<8x16xf32> to vector<8xf32>
    %1008 = vector.shape_cast %1007 : vector<8xf32> to vector<8x1xf32>
    %1009 = vector.broadcast %1008 : vector<8x1xf32> to vector<8x16xf32>
    %1010 = arith.divf %1006, %1009 : vector<8x16xf32>
    %1011 = vector.shape_cast %1010 : vector<8x16xf32> to vector<8x1x16xf32>
    %c0_536 = arith.constant 0 : index
    %c0_537 = arith.constant 0 : index
    %c0_538 = arith.constant 0 : index
    %1012 = vector.load %arg5[%c0_536, %c0_537, %c0_538] : memref<8x16x32xf32, #tpu.memory_space<vmem>>, vector<8x16x32xf32>
    "tpu.trace_start"() <{level = 10 : i32, message = "bqt,bte->bqe"}> : () -> ()
    %cst_539 = arith.constant dense<0.000000e+00> : vector<8x1x32xf32>
    %1013 = tpu.matmul %1011, %1012, %cst_539 {dimension_numbers = #tpu.dot_dimension_numbers<[2], [1], [1], [2], [0, 0, 0, 1, 1, 2], [0], [0]>} : vector<8x1x16xf32>, vector<8x16x32xf32>, vector<8x1x32xf32> -> vector<8x1x32xf32>
    "tpu.trace_stop"() : () -> ()
    %1014 = vector.shape_cast %1013 : vector<8x1x32xf32> to vector<8x32xf32>
    %1015 = arith.addf %888, %1010 : vector<8x16xf32>
    %c0_540 = arith.constant 0 : index
    %c0_541 = arith.constant 0 : index
    %1016 = vector.load %arg16[%c0_540, %c0_541] : memref<32x128xf32, #tpu.memory_space<vmem>>, vector<32x128xf32>
    %cst_542 = arith.constant dense<0.000000e+00> : vector<8x128xf32>
    %1017 = tpu.matmul %987, %1016, %cst_542 {dimension_numbers = #tpu.dot_dimension_numbers<[1], [0], [0], [1], [0, 0, 1, 1], [], []>} : vector<8x32xf32>, vector<32x128xf32>, vector<8x128xf32> -> vector<8x128xf32>
    %c0_543 = arith.constant 0 : index
    %c0_544 = arith.constant 0 : index
    %1018 = vector.load %arg17[%c0_543, %c0_544] : memref<32x128xf32, #tpu.memory_space<vmem>>, vector<32x128xf32>
    %cst_545 = arith.constant dense<0.000000e+00> : vector<8x128xf32>
    %1019 = tpu.matmul %1014, %1018, %cst_545 {dimension_numbers = #tpu.dot_dimension_numbers<[1], [0], [0], [1], [0, 0, 1, 1], [], []>} : vector<8x32xf32>, vector<32x128xf32>, vector<8x128xf32> -> vector<8x128xf32>
    %1020 = arith.addf %1017, %1019 : vector<8x128xf32>
    %c0_546 = arith.constant 0 : index
    %c0_547 = arith.constant 0 : index
    %1021 = vector.load %arg18[%c0_546, %c0_547] : memref<32x128xf32, #tpu.memory_space<vmem>>, vector<32x128xf32>
    %cst_548 = arith.constant dense<0.000000e+00> : vector<8x128xf32>
    %1022 = tpu.matmul %925, %1021, %cst_548 {dimension_numbers = #tpu.dot_dimension_numbers<[1], [0], [0], [1], [0, 0, 1, 1], [], []>} : vector<8x32xf32>, vector<32x128xf32>, vector<8x128xf32> -> vector<8x128xf32>
    %1023 = arith.addf %1020, %1022 : vector<8x128xf32>
    %c0_549 = arith.constant 0 : index
    %c0_550 = arith.constant 0 : index
    %1024 = vector.load %arg19[%c0_549, %c0_550] : memref<1x128xf32, #tpu.memory_space<vmem>>, vector<1x128xf32>
    %1025 = vector.broadcast %1024 : vector<1x128xf32> to vector<8x128xf32>
    %1026 = arith.addf %1023, %1025 : vector<8x128xf32>
    %1027 = vector.extract_strided_slice %1026 {offsets = [0, 0], sizes = [8, 32], strides = [1, 1]} : vector<8x128xf32> to vector<8x32xf32>
    %1028 = arith.negf %1027 : vector<8x32xf32>
    %1029 = math.exp %1028 : vector<8x32xf32>
    %cst_551 = arith.constant 1.000000e+00 : f32
    %1030 = vector.broadcast %cst_551 : f32 to vector<8x32xf32>
    %1031 = arith.addf %1030, %1029 : vector<8x32xf32>
    %1032 = arith.divf %1030, %1031 : vector<8x32xf32>
    %1033 = vector.extract_strided_slice %1026 {offsets = [0, 32], sizes = [8, 32], strides = [1, 1]} : vector<8x128xf32> to vector<8x32xf32>
    %1034 = arith.negf %1033 : vector<8x32xf32>
    %1035 = math.exp %1034 : vector<8x32xf32>
    %cst_552 = arith.constant 1.000000e+00 : f32
    %1036 = vector.broadcast %cst_552 : f32 to vector<8x32xf32>
    %1037 = arith.addf %1036, %1035 : vector<8x32xf32>
    %1038 = arith.divf %1036, %1037 : vector<8x32xf32>
    %1039 = vector.extract_strided_slice %1026 {offsets = [0, 64], sizes = [8, 32], strides = [1, 1]} : vector<8x128xf32> to vector<8x32xf32>
    %1040 = math.tanh %1039 : vector<8x32xf32>
    %1041 = vector.extract_strided_slice %1026 {offsets = [0, 96], sizes = [8, 32], strides = [1, 1]} : vector<8x128xf32> to vector<8x32xf32>
    %1042 = arith.negf %1041 : vector<8x32xf32>
    %1043 = math.exp %1042 : vector<8x32xf32>
    %cst_553 = arith.constant 1.000000e+00 : f32
    %1044 = vector.broadcast %cst_553 : f32 to vector<8x32xf32>
    %1045 = arith.addf %1044, %1043 : vector<8x32xf32>
    %1046 = arith.divf %1044, %1045 : vector<8x32xf32>
    %1047 = arith.mulf %1038, %922 : vector<8x32xf32>
    %1048 = arith.mulf %1032, %1040 : vector<8x32xf32>
    %1049 = arith.addf %1047, %1048 : vector<8x32xf32>
    %1050 = math.tanh %1049 : vector<8x32xf32>
    %1051 = arith.mulf %1046, %1050 : vector<8x32xf32>
    %1052 = arith.mulf %1051, %950 : vector<8x32xf32>
    %c0_554 = arith.constant 0 : index
    %c0_555 = arith.constant 0 : index
    %1053 = vector.load %arg20[%c0_554, %c0_555] : memref<32x128xf32, #tpu.memory_space<vmem>>, vector<32x128xf32>
    %cst_556 = arith.constant dense<0.000000e+00> : vector<8x128xf32>
    %1054 = tpu.matmul %1052, %1053, %cst_556 {dimension_numbers = #tpu.dot_dimension_numbers<[1], [0], [0], [1], [0, 0, 1, 1], [], []>} : vector<8x32xf32>, vector<32x128xf32>, vector<8x128xf32> -> vector<8x128xf32>
    %c0_557 = arith.constant 0 : index
    %c0_558 = arith.constant 0 : index
    %1055 = vector.load %arg21[%c0_557, %c0_558] : memref<32x128xf32, #tpu.memory_space<vmem>>, vector<32x128xf32>
    %cst_559 = arith.constant dense<0.000000e+00> : vector<8x128xf32>
    %1056 = tpu.matmul %1014, %1055, %cst_559 {dimension_numbers = #tpu.dot_dimension_numbers<[1], [0], [0], [1], [0, 0, 1, 1], [], []>} : vector<8x32xf32>, vector<32x128xf32>, vector<8x128xf32> -> vector<8x128xf32>
    %1057 = arith.addf %1054, %1056 : vector<8x128xf32>
    %c0_560 = arith.constant 0 : index
    %c0_561 = arith.constant 0 : index
    %1058 = vector.load %arg22[%c0_560, %c0_561] : memref<1x128xf32, #tpu.memory_space<vmem>>, vector<1x128xf32>
    %1059 = vector.broadcast %1058 : vector<1x128xf32> to vector<8x128xf32>
    %1060 = arith.addf %1057, %1059 : vector<8x128xf32>
    %1061 = arith.index_cast %c7_i32 : i32 to index
    %c0_562 = arith.constant 0 : index
    %c0_563 = arith.constant 0 : index
    %1062 = vector.load %arg25[%1061, %c0_562, %c0_563] : memref<8x8x128xf32, #tpu.memory_space<vmem>>, vector<1x8x128xf32>
    %1063 = vector.shape_cast %1062 : vector<1x8x128xf32> to vector<8x128xf32>
    %1064 = vector.shape_cast %1060 : vector<8x128xf32> to vector<1x8x128xf32>
    tpu.vector_store %arg25[%1061, %c0_562, %c0_563], %1064 {strides = array<i32>} : memref<8x8x128xf32, #tpu.memory_space<vmem>>, vector<1x8x128xf32>,
    %1065 = arith.index_cast %c7_i32 : i32 to index
    %c0_564 = arith.constant 0 : index
    %c0_565 = arith.constant 0 : index
    %1066 = vector.load %arg26[%1065, %c0_564, %c0_565] : memref<8x8x16xf32, #tpu.memory_space<vmem>>, vector<1x8x16xf32>
    %1067 = vector.shape_cast %1066 : vector<1x8x16xf32> to vector<8x16xf32>
    %1068 = vector.shape_cast %1010 : vector<8x16xf32> to vector<1x8x16xf32>
    tpu.vector_store %arg26[%1065, %c0_564, %c0_565], %1068 {strides = array<i32>} : memref<8x8x16xf32, #tpu.memory_space<vmem>>, vector<1x8x16xf32>,
    %c8_i32 = arith.constant 8 : i32
    return
  }
}

</mosaic_0001>

<bundles_post_ra>
// kernel: tpu_custom_call.1
= control target key start
LH: loop header
LB: loop body
LE: loop exit
PB: predicated region body
PF: predicated region fallthrough
CT: control target
= control target key end

     0   :  { %s10909_s0 = inlined_call_operand.vmem [shape: f32[64,8], index: 0, kind: input, shape index: {}]   ;;  %s10910_s1 = inlined_call_operand.vmem [shape: f32[64,32], index: 1, kind: input, shape index: {}]   ;;  %s10911_s2 = inlined_call_operand.vmem [shape: f32[64,32], index: 2, kind: input, shape index: {}]   ;;  %s10912_s3 = inlined_call_operand.vmem [shape: f32[8,32], index: 3, kind: input, shape index: {}]   ;;  %s10913_s4 = inlined_call_operand.vmem [shape: f32[32,32], index: 4, kind: input, shape index: {}]   ;;  %s10914_s5 = inlined_call_operand.vmem [shape: f32[8,16,32], index: 5, kind: input, shape index: {}]   ;;  %s10915_s6 = inlined_call_operand.hbm [shape: f32[8,256], index: 6, kind: input, shape index: {}]   ;;  %s10916_s7 = inlined_call_operand.hbm [shape: f32[8,16], index: 7, kind: input, shape index: {}]   ;;  %s10917_s8 = inlined_call_operand.vmem [shape: f32[32,128], index: 8, kind: input, shape index: {}]   ;;  %s10918_s9 = inlined_call_operand.vmem [shape: f32[32,128], index: 9, kind: input, shape index: {}]   ;;  %s10919_s10 = inlined_call_operand.vmem [shape: f32[32,128], index: 10, kind: input, shape index: {}]   ;;  %s10920_s11 = inlined_call_operand.vmem [shape: f32[1,128], index: 11, kind: input, shape index: {}]   ;;  %s10921_s12 = inlined_call_operand.vmem [shape: f32[32,256], index: 12, kind: input, shape index: {}]   ;;  %s10922_s13 = inlined_call_operand.hbm [shape: f32[16,256], index: 13, kind: input, shape index: {}]   ;;  %s10923_s14 = inlined_call_operand.hbm [shape: f32[16,256], index: 14, kind: input, shape index: {}]   ;;  %s10924_s15 = inlined_call_operand.vmem [shape: f32[256,16], index: 15, kind: input, shape index: {}]   ;;  %s10925_s16 = inlined_call_operand.hbm [shape: f32[32,128], index: 16, kind: input, shape index: {}]   ;;  %s10926_s17 = inlined_call_operand.hbm [shape: f32[32,128], index: 17, kind: input, shape index: {}]   ;;  %s10927_s18 = inlined_call_operand.hbm [shape: f32[32,128], index: 18, kind: input, shape index: {}]   ;;  %s10928_s19 = inlined_call_operand.vmem [shape: f32[1,128], index: 19, kind: input, shape index: {}]   ;;  %s10929_s20 = inlined_call_operand.hbm [shape: f32[32,128], index: 20, kind: input, shape index: {}]   ;;  %s10930_s21 = inlined_call_operand.hbm [shape: f32[32,128], index: 21, kind: input, shape index: {}]   ;;  %s10931_s22 = inlined_call_operand.vmem [shape: f32[1,128], index: 22, kind: input, shape index: {}]   ;;  %s10932_s23 = inlined_call_operand.vmem [shape: f32[8,8,32], index: 23, kind: input, shape index: {}]   ;;  %s10933_s24 = inlined_call_operand.vmem [shape: f32[8,8,32], index: 24, kind: input, shape index: {}]   ;;  %s10934_s25 = inlined_call_operand.hbm [shape: f32[8,8,128], index: 25, kind: output, shape index: {0}]   ;;  %s10935_s26 = inlined_call_operand.hbm [shape: f32[8,8,16], index: 26, kind: output, shape index: {1}]  }
   0x1   :  { %11057 = sst [smem:[#allocation61_spill]] %s10909_s0 }
   0x2   :  { %11058 = sst [smem:[#allocation62_spill]] %s10910_s1 }
   0x3   :  { %11059 = sst [smem:[#allocation63_spill]] %s10911_s2 }
   0x4   :  { %11060 = sst [smem:[#allocation64_spill]] %s10912_s3 }
   0x5   :  { %11061 = sst [smem:[#allocation65_spill]] %s10913_s4 }
   0x6   :  { %11062 = sst [smem:[#allocation66_spill]] %s10914_s5 }
   0x7   :  { %11063 = sst [smem:[#allocation67_spill]] %s10915_s6 }
   0x8   :  { %11064 = sst [smem:[#allocation68_spill]] %s10916_s7 }
   0x9   :  { %11065 = sst [smem:[#allocation69_spill]] %s10917_s8 }
   0xa   :  { %11066 = sst [smem:[#allocation70_spill]] %s10918_s9 }
   0xb   :  { %11067 = sst [smem:[#allocation71_spill]] %s10919_s10 }
   0xc   :  { %32 = vsyncpa [#allocation4], 0 }
   0xd   :  { %33 = vsyncpa [#allocation7], 0 }
   0xe   :  { %34 = vsyncpa [#allocation10], 0 }
   0xf   :  { %35 = vsyncpa [#allocation13], 0 }
  0x10   :  { %36 = vsyncpa [#allocation16], 0 }
  0x11   :  { %37 = vsyncpa [#allocation5], 0  ;;  %s11068_s7 = sld [smem:[#allocation68_spill]] }
  0x17   :  { %s67_s28 = sshll.u32 %s11068_s7, 4  ;;  %s68_s28 = int_to_ptr.hbm [resolvable:$true] %s67_s28 }
  0x18   :  { %38 = vsyncpa [#allocation20], 0  ;;  %s7472_s8 = smov [#allocation6]   ;;  %s100_s9 = sshll.u32 %s10923_s14, 4  ;;  %s101_s9 = int_to_ptr.hbm [resolvable:$true] %s100_s9 }
  0x19   :  { %s69_s4 = sshll.u32 %s7472_s8, 4  ;;  %s7473_s30 = smov [#allocation9]   ;;  %s70_s4 = int_to_ptr.vmem [resolvable:$true] %s69_s4 }
  0x1a   :  { %72 = dma.hbm_to_vmem [thread:$0]  %s68_s28, 128, %s70_s4, [#allocation7]  }
  0x1b   :  { %s102_s2 = sshll.u32 %s7473_s30, 4  ;;  %s7474_s5 = smov 256   ;;  %s103_s2 = int_to_ptr.vmem [resolvable:$true] %s102_s2 }
  0x1c   :  { %s7475_s10 = smov 16   ;;  %s128_s27 = sshll.u32 %s10926_s17, 4  ;;  %s129_s27 = int_to_ptr.hbm [resolvable:$true] %s128_s27 }
  0x1d   :  { %108 = dma.hbm_to_vmem [thread:$0]  %s101_s9, 512, %s103_s2, [#allocation10], %s7474_s5, %s7474_s5, %s7475_s10  }
  0x1e   :  { %s7476_s3 = smov [#allocation12]   ;;  %s156_s8 = sshll.u32 %s10929_s20, 4  ;;  %s157_s8 = int_to_ptr.hbm [resolvable:$true] %s156_s8 }
  0x1f   :  { %s130_s7 = sshll.u32 %s7476_s3, 4  ;;  %s7477_s4 = smov 128   ;;  %s131_s7 = int_to_ptr.vmem [resolvable:$true] %s130_s7 }
  0x20   :  { %s7478_s29 = smov 8   ;;  %s7479_s0 = smov [#allocation15]  }
  0x21   :  { %136 = dma.hbm_to_vmem [thread:$0]  %s129_s27, 512, %s131_s7, [#allocation13], %s7477_s4, %s7477_s4, %s7478_s29  }
  0x22   :  { %s158_s9 = sshll.u32 %s7479_s0, 4  ;;  %s11069_s17 = sld [smem:[#allocation67_spill]]  ;;  %s159_s9 = int_to_ptr.vmem [resolvable:$true] %s158_s9 }
  0x23   :  { %164 = dma.hbm_to_vmem [thread:$0]  %s157_s8, 512, %s159_s9, [#allocation16], %s7477_s4, %s7477_s4, %s7478_s29  }
  0x24   :  { %s87_s3 = sshll.u32 %s10922_s13, 4  ;;  %s7480_s28 = smov [#allocation3]   ;;  %s88_s3 = int_to_ptr.hbm [resolvable:$true] %s87_s3 }
  0x25   :  { %s58_s14 = sshll.u32 %s7480_s28, 4  ;;  %s7481_s27 = smov [#allocation8]   ;;  %s59_s14 = int_to_ptr.vmem [resolvable:$true] %s58_s14 }
  0x26   :  { %s89_s7 = sshll.u32 %s7481_s27, 4  ;;  %s115_s2 = sshll.u32 %s10925_s16, 4  ;;  %s90_s7 = int_to_ptr.vmem [resolvable:$true] %s89_s7  ;;  %s116_s2 = int_to_ptr.hbm [resolvable:$true] %s115_s2 }
  0x27   :  { %95 = dma.hbm_to_vmem [thread:$0]  %s88_s3, 512, %s90_s7, [#allocation7], %s7474_s5, %s7474_s5, %s7475_s10  }
  0x28   :  { %s56_s6 = sshll.u32 %s11069_s17, 4  ;;  %s141_s13 = sshll.u32 %s10927_s18, 4  ;;  %s57_s6 = int_to_ptr.hbm [resolvable:$true] %s56_s6  ;;  %s142_s13 = int_to_ptr.hbm [resolvable:$true] %s141_s13 }
  0x29   :  { %61 = dma.hbm_to_vmem [thread:$0]  %s57_s6, 256, %s59_s14, [#allocation4]  }
  0x2a   :  { %s7482_s17 = smov [#allocation11]   ;;  %s7483_s6 = smov [#allocation14]  }
  0x2b   :  { %s117_s20 = sshll.u32 %s7482_s17, 4  ;;  %s143_s16 = sshll.u32 %s7483_s6, 4  ;;  %s118_s20 = int_to_ptr.vmem [resolvable:$true] %s117_s20  ;;  %s144_s16 = int_to_ptr.vmem [resolvable:$true] %s143_s16 }
  0x2c   :  { %123 = dma.hbm_to_vmem [thread:$0]  %s116_s2, 512, %s118_s20, [#allocation10], %s7477_s4, %s7477_s4, %s7478_s29  }
  0x2d   :  { %s169_s14 = sshll.u32 %s10930_s21, 4  ;;  %s7484_s18 = smov [#allocation17]   ;;  %s170_s14 = int_to_ptr.hbm [resolvable:$true] %s169_s14 }
  0x2e   :  { %149 = dma.hbm_to_vmem [thread:$0]  %s142_s13, 512, %s144_s16, [#allocation13], %s7477_s4, %s7477_s4, %s7478_s29  }
  0x2f   :  { %s171_s5 = sshll.u32 %s7484_s18, 4  ;;  %s172_s5 = int_to_ptr.vmem [resolvable:$true] %s171_s5 }
  0x30   :  { %177 = dma.hbm_to_vmem [thread:$0]  %s170_s14, 512, %s172_s5, [#allocation16], %s7477_s4, %s7477_s4, %s7478_s29  }
  0x31   :  { %7458 = dma.done.wait [#allocation4], 256  }
  0x32   :  { %7459 = vsyncadd [#allocation4], 4294967040 }
  0x33   :  { %7460 = dma.done.wait [#allocation7], 640  }
  0x34   :  { %7461 = vsyncadd [#allocation7], 4294966656 }
  0x35   :  { %7462 = dma.done.wait [#allocation10], 1024  }
  0x36   :  { %7463 = vsyncadd [#allocation10], 4294966272 }
  0x37   :  { %7464 = dma.done.wait [#allocation13], 1024  }
  0x38   :  { %7465 = vsyncadd [#allocation13], 4294966272 }
  0x39   :  { %7466 = dma.done.wait [#allocation16], 1024  }
  0x3a   :  { %7467 = vsyncadd [#allocation16], 4294966272  ;;  %vm229_vm0 = vcmask 64512   ;;  %s11070_s3 = sld [smem:[#allocation64_spill]]  ;;  %vm323_vm1 = vcmask 261120   ;;  %v10944_v17 = vmov 0.0  }
  0x3b   :  { %s11071_s0 = sld [smem:[#allocation61_spill]]  ;;  %v6973_v32 = vld [vmem:[%s10920_s11] ss:$0 sm:$0xff]  ;;  %s7486_s28 = smov 64   ;;  %v568_v56 = vld [vmem:[#allocation8 + $0x10] sm:$0xff]  ;;  %v566_v57 = vld [vmem:[#allocation8] sm:$0xff] }
  0x3c   :  { %s11072_s8 = sld [smem:[#allocation65_spill]]  ;;  %s7487_s18 = smov 32   ;;  %v430_v55 = vld [vmem:[%s10932_s23] sm:$0xff]  ;;  %v7789_v58 = vld [vmem:[#allocation8 + $0x18] sm:$0xff]  ;;  %v7802_v61 = vld [vmem:[%s10921_s12 + $0x38] sm:$0xff]  ;;  %vm570_vm6 = vcmask 130048  }
  0x3d   :  { %s11073_s14 = sld [smem:[#allocation62_spill]]  ;;  %v7792_v59 = vld [vmem:[#allocation8 + $0x8] sm:$0xff]  ;;  %v7797_v60 = vld [vmem:[%s10921_s12 + $0x30] sm:$0xff]  ;;  %v7815_v63 = vld [vmem:[%s10921_s12 + $0x28] sm:$0xff]  ;;  %vm1024_vm11 = vcmask 1041409   ;;  %vm1027_vm12 = vcmask 1042434  }
  0x3e   :  { %s11074_s21 = sld [smem:[#allocation70_spill]]  ;;  %v7810_v62 = vld [vmem:[%s10921_s12 + $0x20] sm:$0xff]  ;;  %vm1030_vm13 = vcmask 1043459   ;;  %vm1033_vm14 = vcmask 1044484   ;;  %vm1036_vm15 = vcmask 1045509   ;;  %s7489_s2 = smov [#allocation19]  }
  0x3f   :  { %s11075_s13 = sld [smem:[#allocation69_spill]] }
  0x40   :  { %v228_v0 = vld [vmem:[%s11070_s3] sm:$0xff]  ;;  %s11076_s6 = sld [smem:[#allocation71_spill]]  ;;  %s7488_s3 = smov 96  }
  0x41   :  { %v220_v1 = vld [vmem:[%s11071_s0] sm:$0xff]  ;;  %269 = vmatpush.msra.mxu0 %v228_v0  ;;  %s11077_s20 = sld [smem:[#allocation63_spill]]  ;;  %v7822_v0 = vld [vmem:[%s10921_s12 + $0x10] sm:$0xff] }
  0x42   :  { %v322_v2 = vld [vmem:[%s11072_s8 + $0x18] sm:$0xff]  ;;  %6739 = vmatmul.msk.f32.vlgmr.msra.gmra.mxu0 %vm229_vm0, %v220_v1  ;;  %v321_v3 = vld [vmem:[%s11072_s8 + $0x10] sm:$0xff]  ;;  %v320_v4 = vld [vmem:[%s11072_s8 + $0x8] sm:$0xff]  ;;  %s11096_s5 = sld [smem:[#allocation66_spill]] }
  0x43   :  { %360 = vmatpush.msra.mxu1 %v322_v2  ;;  %v319_v5 = vld [vmem:[%s11072_s8] sm:$0xff]  ;;  %v7827_v1 = vld [vmem:[%s10921_s12 + $0x18] sm:$0xff]  ;;  %s6715_s8 = sshll.u32 %s7489_s2, 4  ;;  %s6716_s8 = int_to_ptr.vmem [resolvable:$true] %s6715_s8 }
  0x44   :  { %v303_v7 = vld [vmem:[%s11073_s14] sm:$0xff]  ;;  %v7700_v10 = vld [vmem:[%s11074_s21 + $0x18] sm:$0xff]  ;;  %v7706_v11 = vld [vmem:[%s11074_s21 + $0x10] sm:$0xff] }
  0x45   :  { %361 = vmatpush.msra.mxu1 %v321_v3  ;;  %455 = vmatpush.msra.mxu2 %v7700_v10  ;;  %v7712_v12 = vld [vmem:[%s11074_s21 + $0x8] sm:$0xff]  ;;  %v7718_v13 = vld [vmem:[%s11074_s21] sm:$0xff]  ;;  %v7723_v14 = vld [vmem:[%s11075_s13 + $0x18] sm:$0xff] }
  0x46   :  { %v7728_v15 = vld [vmem:[%s11076_s6 + $0x18] sm:$0xff]  ;;  %478 = vmatpush.msra.mxu3 %v7723_v14  ;;  %v7735_v16 = vld [vmem:[%s11075_s13 + $0x10] sm:$0xff]  ;;  %v7746_v19 = vld [vmem:[%s11075_s13 + $0x8] sm:$0xff] }
  0x47   :  { %362 = vmatpush.msra.mxu1 %v320_v4  ;;  %456 = vmatpush.msra.mxu2 %v7706_v11  ;;  %v7741_v18 = vld [vmem:[%s11076_s6 + $0x10] sm:$0xff]  ;;  %v7753_v20 = vld [vmem:[%s11076_s6 + $0x8] sm:$0xff]  ;;  %v7758_v21 = vld [vmem:[%s11075_s13] sm:$0xff] }
  0x48   :  { %479 = vmatpush.msra.mxu3 %v7735_v16  ;;  %v7767_v22 = vld [vmem:[%s11076_s6] sm:$0xff]  ;;  %v7839_v3 = vld [vmem:[%s10921_s12 + $0x8] sm:$0xff] }
  0x49   :  { %363 = vmatpush.msra.mxu1 %v319_v5  ;;  %457 = vmatpush.msra.mxu2 %v7712_v12  ;;  %v397_v24 = vld [vmem:[%s11077_s20] sm:$0xff] }
  0x4a   :  { %480 = vmatpush.msra.mxu3 %v7746_v19  ;;  %v7834_v2 = vld [vmem:[%s10921_s12] sm:$0xff] }
  0x4b   :  { %458 = vmatpush.msra.mxu2 %v7718_v13 }
  0x4c   :  { %459 = vmatmul.f32.vlgmr.msra.gmra.mxu2 %v10944_v17  ;;  %481 = vmatpush.msra.mxu3 %v7758_v21 }
  0x4d   :  { %502 = vmatpush.msrb.mxu2 %v7728_v15 }
  0x4e   :  { %587 = vmatpush.msrb.mxu3 %v568_v56  ;;  %v8030_v56 = vld [vmem:[%s10924_s15 + $0x20] sm:$0xff] }
  0x4f   :  { %503 = vmatpush.msrb.mxu2 %v7741_v18 }
  0x50   :  { %588 = vmatpush.msrb.mxu3 %v566_v57  ;;  %v227_v57 = vld [vmem:[%s11071_s0 + $0x38] sm:$0xff] }
  0x51   :  { %504 = vmatpush.msrb.mxu2 %v7753_v20 }
  0x53   :  { %505 = vmatpush.msrb.mxu2 %v7767_v22 }
  0x54   :  { %506 = vmatmul.f32.vlgmr.msrb.gmra.mxu2 %v10944_v17 }
  0x55   :  { %607 = vmatpush.msra.mxu2 %v7789_v58 }
  0x57   :  { %608 = vmatpush.msra.mxu2 %v7792_v59 }
  0x59   :  { %650 = vmatpush.msrb.mxu2 %v7802_v61 }
  0x5b   :  { %651 = vmatpush.msrb.mxu2 %v7815_v63 }
  0x5c   :  { %609 = vmatmul.f32.vlgmr.msra.gmra.mxu2 %v10944_v17 }
  0x5d   :  { %652 = vmatpush.msrb.mxu2 %v7827_v1 }
  0x5f   :  { %653 = vmatpush.msrb.mxu2 %v7839_v3 }
  0xbf   :  { %v271_v6 = vpop.f32.mrf.mxu0 }
  0xc0   :  { %v295_v8 = vmax.f32 %v271_v6, 0.0 }
  0xc2   :  { %v311_v9 = vmul.f32 %v303_v7, %v295_v8  ;;  %v7846_v8 = vld [vmem:[#allocation9 + $0x10] sm:$0xff] }
  0xc3   :  { %11079 = vst [vmem:[#allocation29_spill] sm:$0xff] %v7846_v8 }
  0xc4   :  { %6747 = vmatmul.msk.f32.vlgmr.msra.gmra.mxu1 %vm323_vm1, %v311_v9  ;;  %v7848_v9 = vld [vmem:[#allocation9] sm:$0xff] }
  0xc5   :  { %11080 = vst [vmem:[#allocation30_spill] sm:$0xff] %v7848_v9 }
  0xcf   :  { %v460_v28 = vpop.f32.mrf.mxu2 }
  0xd7   :  { %v507_v30 = vpop.f32.mrf.mxu2 }
 0x141   :  { %v365_v23 = vpop.f32.mrf.mxu1 }
 0x142   :  { %v389_v25 = vmax.f32 %v365_v23, 0.0  ;;  %v7850_v23 = vld [vmem:[#allocation9 + $0x18] sm:$0xff] }
 0x143   :  { %696 = vmatpush.msra.mxu2 %v7850_v23 }
 0x144   :  { %v405_v26 = vmul.f32 %v397_v24, %v389_v25  ;;  %v7854_v24 = vld [vmem:[#allocation9 + $0x8] sm:$0xff]  ;;  %v221_v25 = vld [vmem:[%s11071_s0 + $0x8] sm:$0xff] }
 0x145   :  { %697 = vmatpush.msra.mxu2 %v7854_v24  ;;  %6740 = vmatmul.msk.f32.gmra.mxu0 %vm229_vm0, %v221_v25  ;;  %v8063_v25 = vld [vmem:[%s10924_s15 + $0x8] sm:$0xff] }
 0x146   :  { %413 = vst.msk [vmem:[#allocation2] sm:$0xff] %vm323_vm1, %v405_v26  ;;  %v7864_v26 = vld [vmem:[%s10924_s15 + $0xf8] sm:$0xff] }
 0x147   :  { %762 = vmatpush.msrb.mxu0 %v7864_v26 }
 0x14d   :  { %v429_v27 = vld [vmem:[#allocation2] sm:$0xff] }
 0x14e   :  { %6755 = vmatmul.msk.f32.vlgmr.msra.gmra.mxu3 %vm323_vm1, %v429_v27  ;;  %v7870_v27 = vld [vmem:[%s10924_s15 + $0xf0] sm:$0xff] }
 0x14f   :  { %630 = vmatpush.msra.mxu3 %v7797_v60  ;;  %763 = vmatpush.msrb.mxu0 %v7870_v27 }
 0x151   :  { %631 = vmatpush.msra.mxu3 %v7810_v62 }
 0x153   :  { %632 = vmatpush.msra.mxu3 %v7822_v0 }
 0x155   :  { %633 = vmatpush.msra.mxu3 %v7834_v2 }
 0x156   :  { %589 = vmatmul.f32.vlgmr.msrb.gmra.mxu3 %v10944_v17 }
 0x157   :  { %676 = vmatpush.msrb.mxu3 %v7846_v8 }
 0x159   :  { %677 = vmatpush.msrb.mxu3 %v7848_v9 }
 0x1d1   :  { %v483_v29 = vpop.f32.mrf.mxu3 }
 0x1d2   :  { %v484_v31 = vadd.f32 %v483_v29, %v460_v28  ;;  %v7876_v28 = vld [vmem:[%s10924_s15 + $0xe8] sm:$0xff]  ;;  %v7882_v29 = vld [vmem:[%s10924_s15 + $0xe0] sm:$0xff] }
 0x1d3   :  { %764 = vmatpush.msrb.mxu0 %v7876_v28 }
 0x1d4   :  { %v510_v33 = vadd.f32 %v507_v30, %v484_v31  ;;  %v222_v30 = vld [vmem:[%s11071_s0 + $0x10] sm:$0xff]  ;;  %v7891_v31 = vld [vmem:[%s10924_s15 + $0xd8] sm:$0xff] }
 0x1d5   :  { %11081 = vst [vmem:[#allocation31_spill] sm:$0xff] %v7891_v31  ;;  %765 = vmatpush.msrb.mxu0 %v7882_v29 }
 0x1d6   :  { %v515_v34 = vadd.f32 %v6973_v32, %v510_v33  ;;  %6741 = vmatmul.msk.f32.gmra.mxu0 %vm229_vm0, %v222_v30  ;;  %v7898_v32 = vld [vmem:[%s10924_s15 + $0xd0] sm:$0xff]  ;;  %v7904_v33 = vld [vmem:[%s10924_s15 + $0xc8] sm:$0xff] }
 0x1d7   :  { %11082 = vst [vmem:[#allocation32_spill] sm:$0xff] %v7898_v32  ;;  %766 = vmatpush.msrb.mxu0 %v7891_v31  ;;  %v8068_v30 = vld [vmem:[%s10924_s15 + $0x88] sm:$0xff] }
 0x1d8   :  { %6997 = vtanh.f32 %v515_v34  ;;  %v6756_v36 = vmul.f32 -1.442695, %v515_v34  ;;  %11083 = vst [vmem:[#allocation33_spill] sm:$0xff] %v7904_v33  ;;  %v7910_v34 = vld [vmem:[%s10924_s15 + $0xc0] sm:$0xff] }
 0x1d9   :  { %767 = vmatpush.msrb.mxu0 %v7898_v32  ;;  %11084 = vst [vmem:[#allocation34_spill] sm:$0xff] %v7910_v34 }
 0x1da   :  { %6999 = vpow2.f32 %v6756_v36  ;;  %v7919_v36 = vld [vmem:[%s10924_s15 + $0xb8] sm:$0xff]  ;;  %11091 = vst [vmem:[#allocation41_spill] sm:$0xff] %v8068_v30 }
 0x1db   :  { %768 = vmatpush.msrb.mxu0 %v7904_v33  ;;  %11085 = vst [vmem:[#allocation35_spill] sm:$0xff] %v7919_v36  ;;  %v8099_v33 = vld [vmem:[#allocation3 + $0x8] sm:$0xff] }
 0x1dc   :  { %11094 = vst [vmem:[#allocation44_spill] sm:$0xff] %v8099_v33 }
 0x1dd   :  { %769 = vmatpush.msrb.mxu0 %v7910_v34 }
 0x1de   :  { %v6998_v35 = vpop.eup %6997 }
 0x1df   :  { %538 = vrot.lane.b32.xlu0 %v6998_v35, %s7486_s28  ;;  %v223_v35 = vld [vmem:[%s11071_s0 + $0x18] sm:$0xff]  ;;  %770 = vmatpush.msrb.mxu0 %v7919_v36  ;;  %v8097_v36 = vld [vmem:[#allocation3] sm:$0xff] }
 0x1e0   :  { %v7000_v37 = vpop.eup %6999  ;;  %6742 = vmatmul.msk.f32.gmra.mxu0 %vm229_vm0, %v223_v35  ;;  %v8075_v35 = vld [vmem:[%s10924_s15] sm:$0xff]  ;;  %11093 = vst [vmem:[#allocation43_spill] sm:$0xff] %v8097_v36 }
 0x1e1   :  { %v519_v38 = vadd.f32 1.0, %v7000_v37  ;;  %v224_v37 = vld [vmem:[%s11071_s0 + $0x20] sm:$0xff] }
 0x1e3   :  { %7001 = vrcp.f32 %v519_v38  ;;  %v531_v44 = vand.u32 2147483648, %v519_v38  ;;  %vm525_vm3 = vweird.f32 %v519_v38  ;;  %v529_v45 = vand.u32 2147483647, %v519_v38 }
 0x1e5   :  { %v532_v47 = vor.u32 1.1754944e-38, %v531_v44  ;;  %vm530_vm5 = vcmp.eq.f32.partialorder %v529_v45, 8.507059e+37  ;;  %v7963_v44 = vld [vmem:[%s10924_s15 + $0x58] sm:$0xff]  ;;  %v7971_v45 = vld [vmem:[%s10924_s15 + $0x50] sm:$0xff] }
 0x1e8   :  { %6743 = vmatmul.msk.f32.gmra.mxu0 %vm229_vm0, %v224_v37  ;;  %v8080_v37 = vld [vmem:[%s10924_s15 + $0x80] sm:$0xff] }
 0x1e9   :  { %v7002_v39 = vpop.eup %7001  ;;  %11092 = vst [vmem:[#allocation42_spill] sm:$0xff] %v8080_v37 }
 0x1ea   :  { %v521_v40 = vmul.f32 %v7002_v39, %v519_v38  ;;  %vm526_vm2 = vweird.f32 %v7002_v39  ;;  %v7930_v38 = vld [vmem:[%s10924_s15 + $0x78] sm:$0xff] }
 0x1eb   :  { %vm527_vm4 = vmor %vm525_vm3, %vm526_vm2  ;;  %vm10978_vm2 = vcmask 1047559  }
 0x1ec   :  { %v522_v41 = vsub.f32 1.0, %v521_v40  ;;  %v7941_v40 = vld [vmem:[%s10924_s15 + $0x70] sm:$0xff] }
 0x1ee   :  { %v523_v42 = vmul.f32 %v7002_v39, %v522_v41  ;;  %v7948_v41 = vld [vmem:[%s10924_s15 + $0x68] sm:$0xff] }
 0x1f0   :  { %v524_v43 = vadd.f32 %v7002_v39, %v523_v42  ;;  %v7954_v42 = vld [vmem:[%s10924_s15 + $0x60] sm:$0xff] }
 0x1f2   :  { %v528_v46 = vsel %vm527_vm4, %v7002_v39, %v524_v43  ;;  %v225_v43 = vld [vmem:[%s11071_s0 + $0x28] sm:$0xff] }
 0x1f3   :  { %v533_v49 = vsel %vm530_vm5, %v532_v47, %v528_v46  ;;  %6744 = vmatmul.msk.f32.gmra.mxu0 %vm229_vm0, %v225_v43  ;;  %v7979_v46 = vld [vmem:[%s10924_s15 + $0x48] sm:$0xff]  ;;  %v7984_v47 = vld [vmem:[%s10924_s15 + $0xb0] sm:$0xff]  ;;  %v274_v43 = vpop.f32.mrf.mxu0 }
 0x1f4   :  { %v536_v51 = vmul.f32 0.0, %v533_v49  ;;  %11086 = vst [vmem:[#allocation36_spill] sm:$0xff] %v7984_v47  ;;  %771 = vmatpush.msrb.mxu0 %v7984_v47  ;;  %v296_v9 = vmax.f32 %v274_v43, 0.0  ;;  %v306_v47 = vld [vmem:[%s11073_s14 + $0x18] sm:$0xff] }
 0x251   :  { %v539_v48 = vpop.permute.xlu0 %538 }
 0x252   :  { %v541_v50 = vmul.f32 %v539_v48, %v533_v49  ;;  %v7990_v48 = vld [vmem:[%s10924_s15 + $0x40] sm:$0xff] }
 0x254   :  { %543 = vrot.lane.b32.xlu0 %v541_v50, %s7487_s18  ;;  %v7999_v50 = vld [vmem:[%s10924_s15 + $0xa8] sm:$0xff] }
 0x255   :  { %11087 = vst [vmem:[#allocation37_spill] sm:$0xff] %v7999_v50  ;;  %772 = vmatpush.msrb.mxu0 %v7999_v50 }
 0x2c6   :  { %v544_v52 = vpop.permute.xlu0 %543 }
 0x2c7   :  { %v7781_v53 = vadd.f32 %v544_v52, %v536_v51  ;;  %v8004_v51 = vld [vmem:[%s10924_s15 + $0x38] sm:$0xff]  ;;  %v8012_v52 = vld [vmem:[%s10924_s15 + $0x30] sm:$0xff] }
 0x2c9   :  { %11078 = vst [vmem:[#allocation28_spill] sm:$0xff] %v7781_v53  ;;  %7003 = vtanh.f32 %v7781_v53  ;;  %v277_v53 = vpop.f32.mrf.mxu0 }
 0x2cf   :  { %v7004_v54 = vpop.eup %7003 }
 0x2d0   :  { %549 = vrot.lane.b32.xlu1 %v7004_v54, %s7486_s28  ;;  %v8019_v54 = vld [vmem:[%s10924_s15 + $0x28] sm:$0xff] }
 0x2d1   :  { %v280_v50 = vpop.f32.mrf.mxu0 }
 0x2d2   :  { %v298_v43 = vmax.f32 %v280_v50, 0.0 }
 0x2d8   :  { %554 = vrot.lane.b32.xlu1 %v430_v55, %s7488_s3  ;;  %v8025_v55 = vld [vmem:[%s10924_s15 + $0xa0] sm:$0xff] }
 0x2d9   :  { %11088 = vst [vmem:[#allocation38_spill] sm:$0xff] %v8025_v55  ;;  %773 = vmatpush.msrb.mxu0 %v8025_v55 }
 0x342   :  { %v550_v4 = vpop.permute.xlu1 %549 }
 0x343   :  { %v552_v5 = vmul.f32 %v550_v4, %v533_v49  ;;  %v226_v49 = vld [vmem:[%s11071_s0 + $0x30] sm:$0xff]  ;;  %v8041_v4 = vld [vmem:[%s10924_s15 + $0x98] sm:$0xff]  ;;  %s6704_s0 = sshll.u32 %s10934_s25, 4  ;;  %s6705_s0 = int_to_ptr.hbm [resolvable:$true] %s6704_s0 }
 0x344   :  { %6745 = vmatmul.msk.f32.gmra.mxu0 %vm229_vm0, %v226_v49  ;;  %11089 = vst [vmem:[#allocation39_spill] sm:$0xff] %v8041_v4  ;;  %v304_v49 = vld [vmem:[%s11073_s14 + $0x8] sm:$0xff] }
 0x345   :  { %774 = vmatpush.msrb.mxu0 %v8041_v4  ;;  %v312_v8 = vmul.f32 %v304_v49, %v296_v9 }
 0x347   :  { %6748 = vmatmul.msk.f32.gmra.mxu1 %vm323_vm1, %v312_v8 }
 0x34a   :  { %v555_v6 = vpop.permute.xlu1 %554 }
 0x34b   :  { %v557_v7 = vmul.f32 %v555_v6, %v552_v5  ;;  %v8046_v5 = vld [vmem:[%s10924_s15 + $0x18] sm:$0xff]  ;;  %v8053_v6 = vld [vmem:[%s10924_s15 + $0x10] sm:$0xff] }
 0x34c   :  { %6746 = vmatmul.msk.f32.gmra.mxu0 %vm229_vm0, %v227_v57  ;;  %v590_v57 = vpop.f32.mrf.mxu3  ;;  %vm1039_vm0 = vcmask 1046534  }
 0x34d   :  { %614 = vrot.lane.b32.xlu2 %v557_v7, %s7487_s18  ;;  %v8058_v7 = vld [vmem:[%s10924_s15 + $0x90] sm:$0xff] }
 0x34e   :  { %11090 = vst [vmem:[#allocation40_spill] sm:$0xff] %v8058_v7  ;;  %775 = vmatpush.msrb.mxu0 %v8058_v7  ;;  %v297_v7 = vmax.f32 %v277_v53, 0.0  ;;  %v314_v53 = vmul.f32 %v306_v47, %v298_v43 }
 0x350   :  { %776 = vmatpush.msrb.mxu0 %v8068_v30  ;;  %v305_v30 = vld [vmem:[%s11073_s14 + $0x10] sm:$0xff] }
 0x352   :  { %777 = vmatpush.msrb.mxu0 %v8080_v37  ;;  %v313_v37 = vmul.f32 %v305_v30, %v297_v7 }
 0x354   :  { %6749 = vmatmul.msk.f32.gmra.mxu1 %vm323_vm1, %v313_v37  ;;  %v283_v37 = vpop.f32.mrf.mxu0 }
 0x355   :  { %v299_v50 = vmax.f32 %v283_v37, 0.0 }
 0x35c   :  { %6750 = vmatmul.msk.f32.gmra.mxu1 %vm323_vm1, %v314_v53 }
 0x3a7   :  { %v7932_v39 = vpop.permute.xlu2 %614 }
 0x3a8   :  { %6757 = vmatmul.msk.f32.vlgmr.msra.gmra.mxu3 %vm323_vm1, %v7932_v39  ;;  %6758 = vmatmul.msk.f32.vlgmr.msrb.gmra.mxu2 %vm323_vm1, %v7932_v39 }
 0x3a9   :  { %742 = vmatpush.msra.mxu3 %v7930_v38 }
 0x3ab   :  { %743 = vmatpush.msra.mxu3 %v7941_v40 }
 0x3ad   :  { %744 = vmatpush.msra.mxu3 %v7948_v41 }
 0x3af   :  { %745 = vmatpush.msra.mxu3 %v7954_v42 }
 0x3b0   :  { %678 = vmatmul.f32.vlgmr.msrb.gmra.mxu3 %v10944_v17  ;;  %698 = vmatmul.f32.vlgmr.msra.gmra.mxu2 %v10944_v17  ;;  %v610_v17 = vpop.f32.mrf.mxu2 }
 0x3b1   :  { %746 = vmatpush.msra.mxu3 %v7963_v44 }
 0x3b3   :  { %747 = vmatpush.msra.mxu3 %v7971_v45 }
 0x3b5   :  { %748 = vmatpush.msra.mxu3 %v7979_v46 }
 0x3b7   :  { %749 = vmatpush.msra.mxu3 %v7990_v48 }
 0x3b9   :  { %750 = vmatpush.msra.mxu3 %v8004_v51 }
 0x3bb   :  { %751 = vmatpush.msra.mxu3 %v8012_v52 }
 0x3bd   :  { %752 = vmatpush.msra.mxu3 %v8019_v54 }
 0x3bf   :  { %753 = vmatpush.msra.mxu3 %v8030_v56 }
 0x3c1   :  { %754 = vmatpush.msra.mxu3 %v8046_v5 }
 0x3c3   :  { %755 = vmatpush.msra.mxu3 %v8053_v6 }
 0x3c5   :  { %756 = vmatpush.msra.mxu3 %v8063_v25 }
 0x3c7   :  { %757 = vmatpush.msra.mxu3 %v8075_v35 }
 0x42b   :  { %v635_v4 = vpop.f32.mrf.mxu3  ;;  %v655_v55 = vpop.f32.mrf.mxu2 }
 0x42c   :  { %v636_v9 = vadd.f32 %v635_v4, %v590_v57  ;;  %v656_v49 = vadd.f32 %v655_v55, %v610_v17  ;;  %v307_v17 = vld [vmem:[%s11073_s14 + $0x20] sm:$0xff] }
 0x42d   :  { %v315_v55 = vmul.f32 %v307_v17, %v299_v50  ;;  %v368_v17 = vpop.f32.mrf.mxu1  ;;  %v398_v50 = vld [vmem:[%s11077_s20 + $0x8] sm:$0xff] }
 0x42f   :  { %6751 = vmatmul.msk.f32.gmra.mxu1 %vm323_vm1, %v315_v55  ;;  %v390_v55 = vmax.f32 %v368_v17, 0.0 }
 0x433   :  { %v679_v8 = vpop.f32.mrf.mxu3  ;;  %v699_v34 = vpop.f32.mrf.mxu2 }
 0x434   :  { %v702_v32 = vadd.f32 %v679_v8, %v636_v9  ;;  %v703_v31 = vadd.f32 %v699_v34, %v656_v49  ;;  %v286_v34 = vpop.f32.mrf.mxu0  ;;  %v309_v9 = vld [vmem:[%s11073_s14 + $0x30] sm:$0xff] }
 0x436   :  { %v706_v7 = vadd.f32 %v8097_v36, %v702_v32  ;;  %v707_v30 = vadd.f32 %v8099_v33, %v703_v31  ;;  %v308_v31 = vld [vmem:[%s11073_s14 + $0x28] sm:$0xff]  ;;  %v300_v32 = vmax.f32 %v286_v34, 0.0  ;;  %v399_v34 = vld [vmem:[%s11077_s20 + $0x10] sm:$0xff] }
 0x438   :  { %7005 = vtanh.f32 %v706_v7  ;;  %v316_v57 = vmul.f32 %v308_v31, %v300_v32  ;;  %v310_v7 = vld [vmem:[%s11073_s14 + $0x38] sm:$0xff] }
 0x439   :  { %7007 = vtanh.f32 %v707_v30 }
 0x43a   :  { %6752 = vmatmul.msk.f32.gmra.mxu1 %vm323_vm1, %v316_v57 }
 0x43c   :  { %v289_v43 = vpop.f32.mrf.mxu0 }
 0x43d   :  { %v301_v49 = vmax.f32 %v289_v43, 0.0  ;;  %v400_v43 = vld [vmem:[%s11077_s20 + $0x18] sm:$0xff] }
 0x43e   :  { %v7006_v47 = vpop.eup %7005 }
 0x43f   :  { %v7008_v4 = vpop.eup %7007  ;;  %758 = vmatmul.f32.vlgmr.msra.gmra.mxu3 %v7006_v47  ;;  %v317_v8 = vmul.f32 %v309_v9, %v301_v49  ;;  %v406_v47 = vmul.f32 %v398_v50, %v390_v55 }
 0x440   :  { %778 = vmatmul.f32.vlgmr.msrb.gmra.mxu0 %v7008_v4  ;;  %v371_v4 = vpop.f32.mrf.mxu1 }
 0x441   :  { %415 = vst.msk [vmem:[#allocation2 + $0x8] sm:$0xff] %vm323_vm1, %v406_v47  ;;  %v391_v31 = vmax.f32 %v371_v4, 0.0 }
 0x442   :  { %6753 = vmatmul.msk.f32.gmra.mxu1 %vm323_vm1, %v317_v8  ;;  %v8132_v8 = vld [vmem:[#allocation6] sm:$0xff] }
 0x443   :  { %v407_v32 = vmul.f32 %v399_v34, %v391_v31  ;;  %11095 = vst [vmem:[#allocation45_spill] sm:$0xff] %v8132_v8  ;;  %v402_v31 = vld [vmem:[%s11077_s20 + $0x28] sm:$0xff] }
 0x444   :  { %v292_v53 = vpop.f32.mrf.mxu0 }
 0x445   :  { %v302_v30 = vmax.f32 %v292_v53, 0.0  ;;  %417 = vst.msk [vmem:[#allocation2 + $0x10] sm:$0xff] %vm323_vm1, %v407_v32 }
 0x447   :  { %v318_v37 = vmul.f32 %v310_v7, %v302_v30  ;;  %v401_v7 = vld [vmem:[%s11077_s20 + $0x20] sm:$0xff] }
 0x448   :  { %v374_v57 = vpop.f32.mrf.mxu1 }
 0x449   :  { %v392_v9 = vmax.f32 %v374_v57, 0.0 }
 0x44a   :  { %6754 = vmatmul.msk.f32.gmra.mxu1 %vm323_vm1, %v318_v37 }
 0x44b   :  { %v408_v49 = vmul.f32 %v400_v43, %v392_v9  ;;  %v403_v9 = vld [vmem:[%s11077_s20 + $0x30] sm:$0xff] }
 0x44d   :  { %419 = vst.msk [vmem:[#allocation2 + $0x18] sm:$0xff] %vm323_vm1, %v408_v49 }
 0x4ac   :  { %v377_v53 = vpop.f32.mrf.mxu1 }
 0x4ad   :  { %v393_v30 = vmax.f32 %v377_v53, 0.0 }
 0x4af   :  { %v409_v50 = vmul.f32 %v401_v7, %v393_v30 }
 0x4b1   :  { %421 = vst.msk [vmem:[#allocation2 + $0x20] sm:$0xff] %vm323_vm1, %v409_v50  ;;  %v8155_v50 = vld [vmem:[%s11096_s5 + $0x38] sm:$0xff] }
 0x4b2   :  { %912 = vmatpush.msrb.mxu1 %v8155_v50 }
 0x4b7   :  { %v380_v34 = vpop.f32.mrf.mxu1 }
 0x4b8   :  { %v394_v32 = vmax.f32 %v380_v34, 0.0 }
 0x4ba   :  { %v410_v57 = vmul.f32 %v402_v31, %v394_v32 }
 0x4bc   :  { %423 = vst.msk [vmem:[#allocation2 + $0x28] sm:$0xff] %vm323_vm1, %v410_v57  ;;  %v8162_v57 = vld [vmem:[%s11096_s5 + $0x8] sm:$0xff] }
 0x4bd   :  { %v779_v55 = vpop.f32.mrf.mxu0  ;;  %11097 = vst [vmem:[#allocation46_spill] sm:$0xff] %v8162_v57  ;;  %846 = vmatpush.msrb.mxu2 %v8162_v57 }
 0x4bf   :  { %v383_v43 = vpop.f32.mrf.mxu1 }
 0x4c0   :  { %v395_v49 = vmax.f32 %v383_v43, 0.0  ;;  %v8168_v43 = vld [vmem:[%s11096_s5] sm:$0xff] }
 0x4c1   :  { %11098 = vst [vmem:[#allocation47_spill] sm:$0xff] %v8168_v43  ;;  %847 = vmatpush.msrb.mxu2 %v8168_v43 }
 0x4c2   :  { %v759_v37 = vpop.f32.mrf.mxu3  ;;  %v411_v53 = vmul.f32 %v403_v9, %v395_v49  ;;  %v8178_v9 = vld [vmem:[%s11096_s5 + $0x68] sm:$0xff]  ;;  %v8183_v49 = vld [vmem:[%s11096_s5 + $0x30] sm:$0xff] }
 0x4c3   :  { %v760_v17 = vadd.f32 %v759_v37, %v8132_v8  ;;  %v404_v37 = vld [vmem:[%s11077_s20 + $0x38] sm:$0xff]  ;;  %11100 = vst [vmem:[#allocation49_spill] sm:$0xff] %v8178_v9  ;;  %913 = vmatpush.msrb.mxu1 %v8183_v49  ;;  %978 = vmatpush.msra.mxu0 %v8178_v9  ;;  %v8231_v9 = vld [vmem:[#allocation14 + $0x8] sm:$0xff] }
 0x4c4   :  { %425 = vst.msk [vmem:[#allocation2 + $0x30] sm:$0xff] %vm323_vm1, %v411_v53  ;;  %v8190_v53 = vld [vmem:[%s11096_s5 + $0x18] sm:$0xff] }
 0x4c5   :  { %v780_v47 = vadd.f32 %v779_v55, %v760_v17  ;;  %868 = vmatpush.msra.mxu2 %v8190_v53  ;;  %11109 = vst [vmem:[#allocation58_spill] sm:$0xff] %v8231_v9 }
 0x4c7   :  { %v782_v4 = vsel %vm570_vm6, %v780_v47, -inf  ;;  %v386_v7 = vpop.f32.mrf.mxu1 }
 0x4c8   :  { %783 = vmax.xlane.f32.xlu2 %v782_v4  ;;  %v396_v30 = vmax.f32 %v386_v7, 0.0  ;;  %v8195_v7 = vld [vmem:[%s11096_s5 + $0x50] sm:$0xff] }
 0x4c9   :  { %11101 = vst [vmem:[#allocation50_spill] sm:$0xff] %v8195_v7 }
 0x4ca   :  { %v412_v17 = vmul.f32 %v404_v37, %v396_v30  ;;  %v8202_v30 = vld [vmem:[%s11096_s5 + $0x60] sm:$0xff]  ;;  %v8207_v37 = vld [vmem:[#allocation11 + $0x18] sm:$0xff] }
 0x4cb   :  { %11102 = vst [vmem:[#allocation51_spill] sm:$0xff] %v8202_v30  ;;  %979 = vmatpush.msra.mxu0 %v8202_v30  ;;  %v8229_v30 = vld [vmem:[#allocation11 + $0x8] sm:$0xff] }
 0x4cc   :  { %427 = vst.msk [vmem:[#allocation2 + $0x38] sm:$0xff] %vm323_vm1, %v412_v17  ;;  %v8209_v17 = vld [vmem:[#allocation14 + $0x18] sm:$0xff] }
 0x4cd   :  { %11103 = vst [vmem:[#allocation52_spill] sm:$0xff] %v8207_v37  ;;  %1102 = vmatpush.msrb.mxu0 %v8209_v17 }
 0x4ce   :  { %11104 = vst [vmem:[#allocation53_spill] sm:$0xff] %v8209_v17  ;;  %v8240_v17 = vld [vmem:[%s11096_s5 + $0x70] sm:$0xff] }
 0x4cf   :  { %11108 = vst [vmem:[#allocation57_spill] sm:$0xff] %v8229_v30 }
 0x4d0   :  { %11110 = vst [vmem:[#allocation59_spill] sm:$0xff] %v8240_v17 }
 0x53b   :  { %v784_v55 = vpop.xlane.xlu2 %783 }
 0x53c   :  { %v785_v4 = vsub.f32 %v780_v47, %v784_v55  ;;  %v8173_v47 = vld [vmem:[%s11096_s5 + $0x58] sm:$0xff]  ;;  %v8214_v55 = vld [vmem:[%s11096_s5 + $0x10] sm:$0xff] }
 0x53d   :  { %11099 = vst [vmem:[#allocation48_spill] sm:$0xff] %v8173_v47  ;;  %956 = vmatpush.msrb.mxu3 %v8173_v47  ;;  %869 = vmatpush.msra.mxu2 %v8214_v55 }
 0x53e   :  { %v786_v34 = vmul.f32 1.442695, %v785_v4  ;;  %v8218_v4 = vld [vmem:[#allocation11 + $0x10] sm:$0xff] }
 0x53f   :  { %957 = vmatpush.msrb.mxu3 %v8195_v7  ;;  %11105 = vst [vmem:[#allocation54_spill] sm:$0xff] %v8218_v4  ;;  %v8242_v7 = vld [vmem:[#allocation11] sm:$0xff] }
 0x540   :  { %7009 = vpow2.f32 %v786_v34  ;;  %v8220_v34 = vld [vmem:[#allocation14 + $0x10] sm:$0xff] }
 0x541   :  { %1078 = vmatpush.msra.mxu3 %v8207_v37  ;;  %11106 = vst [vmem:[#allocation55_spill] sm:$0xff] %v8220_v34  ;;  %1103 = vmatpush.msrb.mxu0 %v8220_v34 }
 0x543   :  { %1079 = vmatpush.msra.mxu3 %v8218_v4  ;;  %1104 = vmatpush.msrb.mxu0 %v8231_v9 }
 0x545   :  { %1080 = vmatpush.msra.mxu3 %v8229_v30 }
 0x546   :  { %v7010_v31 = vpop.eup %7009 }
 0x547   :  { %v788_v32 = vsel %vm570_vm6, %v7010_v31, 0.0  ;;  %1081 = vmatpush.msra.mxu3 %v8242_v7 }
 0x548   :  { %789 = vadd.xlane.f32.xlu0 %v788_v32  ;;  %v8225_v32 = vld [vmem:[%s11096_s5 + $0x78] sm:$0xff] }
 0x549   :  { %11107 = vst [vmem:[#allocation56_spill] sm:$0xff] %v8225_v32  ;;  %1000 = vmatpush.msra.mxu1 %v8225_v32  ;;  %v8245_v32 = vld [vmem:[#allocation14] sm:$0xff] }
 0x54a   :  { %11111 = vst [vmem:[#allocation60_spill] sm:$0xff] %v8245_v32  ;;  %1105 = vmatpush.msrb.mxu0 %v8245_v32  ;;  %v8254_v32 = vld [vmem:[%s11096_s5 + $0x28] sm:$0xff] }
 0x54b   :  { %1001 = vmatpush.msra.mxu1 %v8240_v17 }
 0x5bb   :  { %v790_v34 = vpop.xlane.xlu0 %789 }
 0x5bc   :  { %7011 = vrcp.f32 %v790_v34  ;;  %v802_v36 = vand.u32 2147483648, %v790_v34  ;;  %v800_v30 = vand.u32 2147483647, %v790_v34  ;;  %vm796_vm8 = vweird.f32 %v790_v34 }
 0x5be   :  { %v803_v43 = vor.u32 1.1754944e-38, %v802_v36  ;;  %vm801_vm10 = vcmp.eq.f32.partialorder %v800_v30, 8.507059e+37 }
 0x5c2   :  { %v7012_v47 = vpop.eup %7011 }
 0x5c3   :  { %v792_v8 = vmul.f32 %v7012_v47, %v790_v34  ;;  %vm797_vm7 = vweird.f32 %v7012_v47 }
 0x5c4   :  { %vm798_vm9 = vmor %vm796_vm8, %vm797_vm7 }
 0x5c5   :  { %v793_v9 = vsub.f32 1.0, %v792_v8 }
 0x5c7   :  { %v794_v33 = vmul.f32 %v7012_v47, %v793_v9 }
 0x5c9   :  { %v795_v4 = vadd.f32 %v7012_v47, %v794_v33 }
 0x5cb   :  { %v799_v17 = vsel %vm798_vm9, %v7012_v47, %v795_v4  ;;  %v8280_v47 = vld [vmem:[%s11096_s5 + $0x48] sm:$0xff]  ;;  %v6974_v4 = vld [vmem:[%s10928_s19] ss:$0 sm:$0xff] }
 0x5cc   :  { %v804_v37 = vsel %vm801_vm10, %v803_v43, %v799_v17 }
 0x5cd   :  { %v8249_v57 = vmul.f32 %v7010_v31, %v804_v37  ;;  %v8266_v31 = vld [vmem:[%s11096_s5 + $0x20] sm:$0xff] }
 0x5cf   :  { %1217 = vst.msk [vmem:[#allocation19] sm:$0xff] %vm570_vm6, %v8249_v57  ;;  %6759 = vmatmul.msk.f32.vlgmr.msrb.gmra.mxu2 %vm570_vm6, %v8249_v57  ;;  %v809_v33 = vrot.slane %v8249_v57, 3  ;;  %v811_v36 = vrot.slane %v8249_v57, 5  ;;  %v812_v8 = vrot.slane %v8249_v57, 6  ;;  %v807_v43 = vrot.slane %v8249_v57, 1 }
 0x5d0   :  { %890 = vmatpush.msrb.mxu2 %v8254_v32  ;;  %v813_v9 = vrot.slane %v8249_v57, 7 }
 0x5d1   :  { %6762 = vmatmul.msk.f32.vlgmr.msrb.gmra.mxu1 %vm570_vm6, %v809_v33  ;;  %6764 = vmatmul.msk.f32.vlgmr.msrb.gmra.mxu3 %vm570_vm6, %v811_v36 }
 0x5d2   :  { %6765 = vmatmul.msk.f32.vlgmr.msra.gmra.mxu0 %vm570_vm6, %v812_v8  ;;  %891 = vmatpush.msrb.mxu2 %v8266_v31 }
 0x5d3   :  { %1266 = vmatpush.msra.mxu0 %v7723_v14  ;;  %1243 = vmatpush.msrb.mxu3 %v7700_v10  ;;  %v8289_v10 = vld [vmem:[%s11096_s5 + $0x40] sm:$0xff]  ;;  %v808_v14 = vrot.slane %v8249_v57, 2 }
 0x5d5   :  { %1267 = vmatpush.msra.mxu0 %v7735_v16  ;;  %1244 = vmatpush.msrb.mxu3 %v7706_v11  ;;  %v11112_v11 = vmov 0.0   ;;  %v8327_v16 = vld [vmem:[#allocation12 + $0x18] sm:$0xff] }
 0x5d7   :  { %6760 = vmatmul.msk.f32.vlgmr.msra.gmra.mxu2 %vm570_vm6, %v807_v43  ;;  %1268 = vmatpush.msra.mxu0 %v7746_v19  ;;  %v8330_v19 = vld [vmem:[#allocation17 + $0x18] sm:$0xff] }
 0x5d8   :  { %934 = vmatpush.msra.mxu2 %v8280_v47  ;;  %1245 = vmatpush.msrb.mxu3 %v7712_v12  ;;  %v1218_v12 = vld [vmem:[#allocation2 + $0x8] sm:$0xff] }
 0x5d9   :  { %6766 = vmatmul.msk.f32.vlgmr.msra.gmra.mxu1 %vm570_vm6, %v813_v9  ;;  %6768 = vmatmul.msk.f32.vlgmr.msra.gmra.mxu3 %vm323_vm1, %v7932_v39 }
 0x5da   :  { %1106 = vmatmul.f32.vlgmr.msrb.gmra.mxu0 %v11112_v11  ;;  %935 = vmatpush.msra.mxu2 %v8289_v10 }
 0x5db   :  { %1269 = vmatpush.msra.mxu0 %v7758_v21  ;;  %1246 = vmatpush.msrb.mxu3 %v7718_v13  ;;  %v810_v13 = vrot.slane %v8249_v57, 4  ;;  %v8333_v21 = vld [vmem:[#allocation12 + $0x10] sm:$0xff] }
 0x5dc   :  { %1178 = vmatpush.msrb.mxu1 %v8330_v19 }
 0x5dd   :  { %1392 = vmatpush.msra.mxu3 %v7789_v58  ;;  %1415 = vmatpush.msrb.mxu0 %v7797_v60  ;;  %v8335_v58 = vld [vmem:[#allocation17 + $0x10] sm:$0xff]  ;;  %v8341_v60 = vld [vmem:[#allocation17 + $0x8] sm:$0xff] }
 0x5de   :  { %1179 = vmatpush.msrb.mxu1 %v8335_v58 }
 0x5df   :  { %1393 = vmatpush.msra.mxu3 %v7792_v59  ;;  %1416 = vmatpush.msrb.mxu0 %v7810_v62  ;;  %v8339_v59 = vld [vmem:[#allocation12 + $0x8] sm:$0xff]  ;;  %v8343_v62 = vld [vmem:[#allocation12] sm:$0xff] }
 0x5e0   :  { %6761 = vmatmul.msk.f32.vlgmr.msrb.gmra.mxu2 %vm570_vm6, %v808_v14  ;;  %1180 = vmatpush.msrb.mxu1 %v8341_v60  ;;  %v6975_v14 = vld [vmem:[%s10920_s11] ss:$0 sm:$0xff] }
 0x5e1   :  { %1417 = vmatpush.msrb.mxu0 %v7822_v0  ;;  %1058 = vmatpush.msrb.mxu2 %v8327_v16  ;;  %v8347_v0 = vld [vmem:[#allocation17] sm:$0xff] }
 0x5e2   :  { %6775 = vmatmul.msk.f32.vlgmr.msra.gmra.mxu0 %vm323_vm1, %v1218_v12  ;;  %1181 = vmatpush.msrb.mxu1 %v8347_v0 }
 0x5e3   :  { %1418 = vmatpush.msrb.mxu0 %v7834_v2  ;;  %1059 = vmatpush.msrb.mxu2 %v8333_v21 }
 0x5e4   :  { %1290 = vmatpush.msra.mxu1 %v7728_v15 }
 0x5e5   :  { %1530 = vmatpush.msra.mxu0 %v7930_v38  ;;  %1060 = vmatpush.msrb.mxu2 %v8339_v59 }
 0x5e6   :  { %1291 = vmatpush.msra.mxu1 %v7741_v18 }
 0x5e7   :  { %1531 = vmatpush.msra.mxu0 %v7941_v40  ;;  %1061 = vmatpush.msrb.mxu2 %v8343_v62 }
 0x5e8   :  { %6763 = vmatmul.msk.f32.vlgmr.msra.gmra.mxu2 %vm570_vm6, %v810_v13  ;;  %1292 = vmatpush.msra.mxu1 %v7753_v20 }
 0x5e9   :  { %1532 = vmatpush.msra.mxu0 %v7948_v41 }
 0x5ea   :  { %1293 = vmatpush.msra.mxu1 %v7767_v22 }
 0x5eb   :  { %1533 = vmatpush.msra.mxu0 %v7954_v42 }
 0x5ed   :  { %1534 = vmatpush.msra.mxu0 %v7963_v44 }
 0x5ef   :  { %1535 = vmatpush.msra.mxu0 %v7971_v45 }
 0x5f1   :  { %1536 = vmatpush.msra.mxu0 %v7979_v46 }
 0x5f3   :  { %1537 = vmatpush.msra.mxu0 %v7990_v48 }
 0x5f5   :  { %1538 = vmatpush.msra.mxu0 %v8004_v51 }
 0x5f7   :  { %1539 = vmatpush.msra.mxu0 %v8012_v52 }
 0x5f9   :  { %1540 = vmatpush.msra.mxu0 %v8019_v54 }
 0x5fb   :  { %1541 = vmatpush.msra.mxu0 %v8030_v56 }
 0x5fd   :  { %1542 = vmatpush.msra.mxu0 %v8046_v5 }
 0x5ff   :  { %1543 = vmatpush.msra.mxu0 %v8053_v6 }
 0x601   :  { %1544 = vmatpush.msra.mxu0 %v8063_v25 }
 0x603   :  { %1545 = vmatpush.msra.mxu0 %v8075_v35 }
 0x64e   :  { %v915_v40 = vpop.f32.mrf.mxu1 }
 0x64f   :  { %v1029_v15 = vrot.slane %v915_v40, 5  ;;  %v981_v51 = vpop.f32.mrf.mxu0 }
 0x650   :  { %v1038_v56 = vrot.slane %v981_v51, 2 }
 0x652   :  { %v849_v2 = vpop.f32.mrf.mxu2 }
 0x654   :  { %v959_v46 = vpop.f32.mrf.mxu3 }
 0x655   :  { %v1035_v22 = vrot.slane %v959_v46, 3 }
 0x656   :  { %v1003_v20 = vpop.f32.mrf.mxu1 }
 0x657   :  { %v1041_v6 = vrot.slane %v1003_v20, 1 }
 0x65a   :  { %v871_v38 = vpop.f32.mrf.mxu2 }
 0x65b   :  { %v1023_v42 = vrot.slane %v871_v38, 7 }
 0x65d   :  { %v1025_v45 = vsel %vm1024_vm11, %v1023_v42, %v849_v2 }
 0x663   :  { %v893_v41 = vpop.f32.mrf.mxu2 }
 0x664   :  { %v1026_v44 = vrot.slane %v893_v41, 6 }
 0x666   :  { %v1028_v48 = vsel %vm1027_vm12, %v1026_v44, %v1025_v45 }
 0x667   :  { %v1031_v54 = vsel %vm1030_vm13, %v1029_v15, %v1028_v48 }
 0x66b   :  { %v937_v18 = vpop.f32.mrf.mxu2 }
 0x66c   :  { %v1032_v52 = vrot.slane %v937_v18, 4 }
 0x66e   :  { %v1034_v5 = vsel %vm1033_vm14, %v1032_v52, %v1031_v54 }
 0x66f   :  { %v1037_v25 = vsel %vm1036_vm15, %v1035_v22, %v1034_v5 }
 0x670   :  { %v1040_v35 = vsel %vm1039_vm0, %v1038_v56, %v1037_v25 }
 0x671   :  { %v1043_v30 = vsel %vm10978_vm2, %v1041_v6, %v1040_v35 }
 0x672   :  { %6767 = vmatmul.msk.f32.vlgmr.msrb.gmra.mxu2 %vm323_vm1, %v1043_v30  ;;  %6770 = vmatmul.msk.f32.vlgmr.msrb.gmra.mxu1 %vm323_vm1, %v1043_v30 }
 0x673   :  { %6774 = vmatmul.msk.f32.vlgmr.msrb.gmra.mxu3 %vm323_vm1, %v1043_v30  ;;  %1435 = vmatpush.msrb.mxu1 %v7802_v61  ;;  %v11113_v61 = vld [vmem:[#allocation31_spill] sm:$0xff] }
 0x674   :  { %1484 = vmatpush.msrb.mxu3 %v7850_v23  ;;  %v11117_v23 = vld [vmem:[#allocation35_spill] sm:$0xff] }
 0x675   :  { %1436 = vmatpush.msrb.mxu1 %v7815_v63  ;;  %v11114_v63 = vld [vmem:[#allocation32_spill] sm:$0xff] }
 0x676   :  { %1485 = vmatpush.msrb.mxu3 %v7854_v24  ;;  %v11118_v24 = vld [vmem:[#allocation36_spill] sm:$0xff] }
 0x677   :  { %1437 = vmatpush.msrb.mxu1 %v7827_v1  ;;  %v11115_v1 = vld [vmem:[#allocation33_spill] sm:$0xff] }
 0x679   :  { %1438 = vmatpush.msrb.mxu1 %v7839_v3  ;;  %v11116_v3 = vld [vmem:[#allocation34_spill] sm:$0xff] }
 0x67a   :  { %6776 = vmatmul.msk.f32.vlgmr.msra.gmra.mxu1 %vm323_vm1, %v7932_v39  ;;  %v11123_v39 = vld [vmem:[#allocation41_spill] sm:$0xff] }
 0x67b   :  { %6779 = vmatmul.msk.f32.vlgmr.msra.gmra.mxu3 %vm570_vm6, %v8249_v57  ;;  %1550 = vmatpush.msra.mxu1 %v7864_v26  ;;  %v11119_v26 = vld [vmem:[#allocation37_spill] sm:$0xff] }
 0x67c   :  { %1656 = vmatpush.msra.mxu3 %v8190_v53  ;;  %v1083_v53 = vpop.f32.mrf.mxu3 }
 0x67d   :  { %1551 = vmatpush.msra.mxu1 %v7870_v27  ;;  %v11120_v27 = vld [vmem:[#allocation38_spill] sm:$0xff] }
 0x67e   :  { %1657 = vmatpush.msra.mxu3 %v8214_v55 }
 0x67f   :  { %1552 = vmatpush.msra.mxu1 %v7876_v28  ;;  %v11121_v28 = vld [vmem:[#allocation39_spill] sm:$0xff] }
 0x681   :  { %1553 = vmatpush.msra.mxu1 %v7882_v29  ;;  %v11122_v29 = vld [vmem:[#allocation40_spill] sm:$0xff] }
 0x683   :  { %6783 = vmatmul.msk.f32.vlgmr.msrb.gmra.mxu3 %vm570_vm6, %v8249_v57  ;;  %1554 = vmatpush.msra.mxu1 %v11113_v61 }
 0x684   :  { %1700 = vmatpush.msrb.mxu3 %v8155_v50  ;;  %v11124_v50 = vld [vmem:[#allocation42_spill] sm:$0xff] }
 0x685   :  { %1555 = vmatpush.msra.mxu1 %v11114_v63 }
 0x686   :  { %1701 = vmatpush.msrb.mxu3 %v8183_v49  ;;  %v1107_v49 = vpop.f32.mrf.mxu0 }
 0x687   :  { %1556 = vmatpush.msra.mxu1 %v11115_v1 }
 0x689   :  { %1557 = vmatpush.msra.mxu1 %v11116_v3 }
 0x68b   :  { %1558 = vmatpush.msra.mxu1 %v11117_v23 }
 0x68d   :  { %1559 = vmatpush.msra.mxu1 %v11118_v24 }
 0x68e   :  { %v1271_v33 = vpop.f32.mrf.mxu0 }
 0x68f   :  { %1560 = vmatpush.msra.mxu1 %v11119_v26 }
 0x691   :  { %1561 = vmatpush.msra.mxu1 %v11120_v27 }
 0x693   :  { %1562 = vmatpush.msra.mxu1 %v11121_v28 }
 0x695   :  { %1563 = vmatpush.msra.mxu1 %v11122_v29  ;;  %v6772_v29 = vld [vmem:[%s10932_s23 + $0x8] sm:$0xff] }
 0x696   :  { %1342 = vrot.lane.b32.xlu0 %v6772_v29, %s7488_s3 }
 0x697   :  { %1564 = vmatpush.msra.mxu1 %v11123_v39  ;;  %v431_v39 = vld [vmem:[%s10933_s24] sm:$0xff] }
 0x698   :  { %1154 = vrot.lane.b32.xlu2 %v431_v39, %s7488_s3 }
 0x699   :  { %1565 = vmatpush.msra.mxu1 %v11124_v50 }
 0x6ef   :  { %v8397_v37 = vpop.f32.mrf.mxu1 }
 0x6f5   :  { %v1063_v17 = vpop.f32.mrf.mxu2 }
 0x6f6   :  { %v1084_v55 = vadd.f32 %v1083_v53, %v1063_v17  ;;  %v1248_v34 = vpop.f32.mrf.mxu3  ;;  %v11125_v17 = vld [vmem:[#allocation28_spill] sm:$0xff] }
 0x6f7   :  { %v1272_v8 = vadd.f32 %v1271_v33, %v1248_v34  ;;  %v1295_v43 = vpop.f32.mrf.mxu1 }
 0x6f8   :  { %v1110_v36 = vadd.f32 %v1107_v49, %v1084_v55 }
 0x6f9   :  { %v1298_v11 = vadd.f32 %v1295_v43, %v1272_v8  ;;  %v8426_v8 = vld [vmem:[#allocation15 + $0x18] sm:$0xff]  ;;  %v8428_v43 = vld [vmem:[#allocation15 + $0x10] sm:$0xff] }
 0x6fa   :  { %v1115_v9 = vadd.f32 %v6974_v4, %v1110_v36  ;;  %1203 = vmatpush.msra.mxu2 %v8426_v8 }
 0x6fb   :  { %v1303_v12 = vadd.f32 %v6975_v14, %v1298_v11  ;;  %v8434_v11 = vld [vmem:[#allocation15] sm:$0xff]  ;;  %v7189_v14 = vld [vmem:[#allocation8 + $0x10] sm:$0xff] }
 0x6fc   :  { %7013 = vtanh.f32 %v1115_v9  ;;  %v6769_v38 = vmul.f32 -1.442695, %v1115_v9  ;;  %v8431_v9 = vld [vmem:[#allocation15 + $0x8] sm:$0xff]  ;;  %1204 = vmatpush.msra.mxu2 %v8428_v43 }
 0x6fd   :  { %7015 = vtanh.f32 %v1303_v12  ;;  %v6777_v40 = vmul.f32 -1.442695, %v1303_v12  ;;  %v7190_v12 = vld [vmem:[#allocation8] sm:$0xff] }
 0x6fe   :  { %7017 = vpow2.f32 %v6769_v38  ;;  %1205 = vmatpush.msra.mxu2 %v8431_v9 }
 0x6ff   :  { %7019 = vpow2.f32 %v6777_v40 }
 0x700   :  { %1206 = vmatpush.msra.mxu2 %v8434_v11 }
 0x702   :  { %v7014_v13 = vpop.eup %7013  ;;  %1372 = vmatpush.msrb.mxu2 %v7189_v14 }
 0x703   :  { %1138 = vrot.lane.b32.xlu1 %v7014_v13, %s7486_s28  ;;  %v7016_v2 = vpop.eup %7015 }
 0x704   :  { %v7018_v41 = vpop.eup %7017  ;;  %1373 = vmatpush.msrb.mxu2 %v7190_v12 }
 0x705   :  { %v1119_v42 = vadd.f32 1.0, %v7018_v41  ;;  %v7020_v44 = vpop.eup %7019 }
 0x706   :  { %v1307_v45 = vadd.f32 1.0, %v7020_v44 }
 0x707   :  { %7021 = vrcp.f32 %v1119_v42  ;;  %v1131_v54 = vand.u32 2147483648, %v1119_v42  ;;  %vm1125_vm4 = vweird.f32 %v1119_v42  ;;  %v1129_v56 = vand.u32 2147483647, %v1119_v42 }
 0x708   :  { %7023 = vrcp.f32 %v1307_v45  ;;  %v1319_v1 = vand.u32 2147483648, %v1307_v45  ;;  %vm1313_vm9 = vweird.f32 %v1307_v45  ;;  %v1317_v3 = vand.u32 2147483647, %v1307_v45 }
 0x709   :  { %v1132_v25 = vor.u32 1.1754944e-38, %v1131_v54  ;;  %vm1130_vm7 = vcmp.eq.f32.partialorder %v1129_v56, 8.507059e+37  ;;  %v11132_v54 = vld [vmem:[#allocation57_spill] sm:$0xff] }
 0x70a   :  { %v1320_v24 = vor.u32 1.1754944e-38, %v1319_v1  ;;  %vm1318_vm2 = vcmp.eq.f32.partialorder %v1317_v3, 8.507059e+37 }
 0x70b   :  { %1326 = vrot.lane.b32.xlu1 %v7016_v2, %s7486_s28  ;;  %v1155_v2 = vpop.permute.xlu2 %1154 }
 0x70d   :  { %v7022_v46 = vpop.eup %7021 }
 0x70e   :  { %v1121_v48 = vmul.f32 %v7022_v46, %v1119_v42  ;;  %v7024_v51 = vpop.eup %7023  ;;  %vm1126_vm3 = vweird.f32 %v7022_v46  ;;  %v1343_v42 = vpop.permute.xlu0 %1342 }
 0x70f   :  { %v1309_v20 = vmul.f32 %v7024_v51, %v1307_v45  ;;  %vm1127_vm5 = vmor %vm1125_vm4, %vm1126_vm3  ;;  %vm1314_vm8 = vweird.f32 %v7024_v51 }
 0x710   :  { %v1122_v15 = vsub.f32 1.0, %v1121_v48  ;;  %vm1315_vm10 = vmor %vm1313_vm9, %vm1314_vm8  ;;  %v11126_v48 = vld [vmem:[#allocation29_spill] sm:$0xff] }
 0x711   :  { %v1310_v22 = vsub.f32 1.0, %v1309_v20  ;;  %v11129_v20 = vld [vmem:[#allocation52_spill] sm:$0xff] }
 0x712   :  { %v1123_v18 = vmul.f32 %v7022_v46, %v1122_v15  ;;  %v11127_v15 = vld [vmem:[#allocation30_spill] sm:$0xff] }
 0x713   :  { %v1311_v6 = vmul.f32 %v7024_v51, %v1310_v22  ;;  %v11131_v22 = vld [vmem:[#allocation54_spill] sm:$0xff] }
 0x714   :  { %v1124_v52 = vadd.f32 %v7022_v46, %v1123_v18  ;;  %v11128_v18 = vld [vmem:[#allocation46_spill] sm:$0xff] }
 0x715   :  { %v1312_v63 = vadd.f32 %v7024_v51, %v1311_v6 }
 0x716   :  { %v1128_v5 = vsel %vm1127_vm5, %v7022_v46, %v1124_v52  ;;  %v11130_v52 = vld [vmem:[#allocation47_spill] sm:$0xff] }
 0x717   :  { %v1133_v30 = vsel %vm1130_vm7, %v1132_v25, %v1128_v5  ;;  %v1316_v23 = vsel %vm1315_vm10, %v7024_v51, %v1312_v63  ;;  %vm11146_vm7 = vcmask 1047559  }
 0x718   :  { %v1321_v26 = vsel %vm1318_vm2, %v1320_v24, %v1316_v23  ;;  %v1136_v50 = vmul.f32 0.0, %v1133_v30  ;;  %v11134_v23 = vld [vmem:[#allocation43_spill] sm:$0xff] }
 0x719   :  { %v1324_v55 = vmul.f32 %v1321_v26, %v11125_v17 }
 0x775   :  { %v1139_v35 = vpop.permute.xlu1 %1138 }
 0x776   :  { %v1141_v61 = vmul.f32 %v1139_v35, %v1133_v30 }
 0x778   :  { %1143 = vrot.lane.b32.xlu1 %v1141_v61, %s7487_s18 }
 0x77d   :  { %v1327_v27 = vpop.permute.xlu1 %1326 }
 0x77e   :  { %v1329_v28 = vmul.f32 %v1327_v27, %v1321_v26  ;;  %v11135_v27 = vld [vmem:[#allocation45_spill] sm:$0xff] }
 0x780   :  { %1331 = vrot.lane.b32.xlu1 %v1329_v28, %s7487_s18 }
 0x7ea   :  { %v1144_v49 = vpop.permute.xlu1 %1143 }
 0x7eb   :  { %v8417_v53 = vadd.f32 %v1144_v49, %v1136_v50 }
 0x7ed   :  { %7025 = vtanh.f32 %v8417_v53 }
 0x7f2   :  { %v1332_v4 = vpop.permute.xlu1 %1331 }
 0x7f3   :  { %v7026_v34 = vpop.eup %7025  ;;  %v8421_v33 = vadd.f32 %v1332_v4, %v1324_v55 }
 0x7f4   :  { %1149 = vrot.lane.b32.xlu1 %v7026_v34, %s7486_s28 }
 0x7f5   :  { %7027 = vtanh.f32 %v8421_v33 }
 0x7fb   :  { %v7028_v36 = vpop.eup %7027 }
 0x7fc   :  { %1337 = vrot.lane.b32.xlu1 %v7028_v36, %s7486_s28 }
 0x866   :  { %v1150_v13 = vpop.permute.xlu1 %1149 }
 0x867   :  { %v1152_v38 = vmul.f32 %v1150_v13, %v1133_v30  ;;  %v11133_v30 = vld [vmem:[#allocation44_spill] sm:$0xff] }
 0x869   :  { %v1157_v40 = vmul.f32 %v1155_v2, %v1152_v38 }
 0x86b   :  { %1187 = vrot.lane.b32.xlu1 %v1157_v40, %s7487_s18 }
 0x86e   :  { %v1338_v41 = vpop.permute.xlu1 %1337 }
 0x86f   :  { %v1340_v44 = vmul.f32 %v1338_v41, %v1321_v26 }
 0x871   :  { %v1345_v45 = vmul.f32 %v1343_v42, %v1340_v44  ;;  %v11136_v44 = vld [vmem:[#allocation48_spill] sm:$0xff] }
 0x873   :  { %1399 = vrot.lane.b32.xlu1 %v1345_v45, %s7487_s18  ;;  %v11137_v45 = vld [vmem:[#allocation50_spill] sm:$0xff] }
 0x8dd   :  { %v8440_v46 = vpop.permute.xlu1 %1187 }
 0x8de   :  { %6771 = vmatmul.msk.f32.vlgmr.msra.gmra.mxu2 %vm323_vm1, %v8440_v46 }
 0x8df   :  { %1464 = vmatpush.msra.mxu2 %v11126_v48 }
 0x8e1   :  { %1465 = vmatpush.msra.mxu2 %v11127_v15 }
 0x8e5   :  { %v8446_v51 = vpop.permute.xlu1 %1399 }
 0x8e6   :  { %6778 = vmatmul.msk.f32.vlgmr.msrb.gmra.mxu2 %vm570_vm6, %v8249_v57  ;;  %6780 = vmatmul.msk.f32.vlgmr.msrb.gmra.mxu0 %vm323_vm1, %v8446_v51 }
 0x8e7   :  { %6781 = vmatmul.msk.f32.vlgmr.msrb.gmra.mxu1 %vm323_vm1, %v8446_v51  ;;  %1634 = vmatpush.msrb.mxu2 %v11128_v18  ;;  %v11138_v18 = vld [vmem:[#allocation49_spill] sm:$0xff] }
 0x8e8   :  { %1859 = vmatpush.msrb.mxu1 %v11129_v20  ;;  %1839 = vmatpush.msrb.mxu0 %v8327_v16  ;;  %v1395_v16 = vpop.f32.mrf.mxu3  ;;  %v11139_v20 = vld [vmem:[#allocation56_spill] sm:$0xff] }
 0x8e9   :  { %1635 = vmatpush.msrb.mxu2 %v11130_v52  ;;  %v11141_v52 = vld [vmem:[#allocation59_spill] sm:$0xff] }
 0x8ea   :  { %1860 = vmatpush.msrb.mxu1 %v11131_v22  ;;  %1840 = vmatpush.msrb.mxu0 %v8333_v21  ;;  %v6976_v21 = vld [vmem:[%s10931_s22] ss:$0 sm:$0xff] }
 0x8ec   :  { %1861 = vmatpush.msrb.mxu1 %v11132_v54  ;;  %1841 = vmatpush.msrb.mxu0 %v8339_v59  ;;  %v11142_v54 = vld [vmem:[#allocation53_spill] sm:$0xff] }
 0x8ee   :  { %6782 = vmatmul.msk.f32.vlgmr.msra.gmra.mxu2 %vm570_vm6, %v8249_v57  ;;  %1862 = vmatpush.msrb.mxu1 %v8242_v7 }
 0x8ef   :  { %1678 = vmatpush.msra.mxu2 %v8254_v32  ;;  %1842 = vmatpush.msrb.mxu0 %v8343_v62 }
 0x8f0   :  { %v1487_v35 = vpop.f32.mrf.mxu3 }
 0x8f1   :  { %1679 = vmatpush.msra.mxu2 %v8266_v31 }
 0x961   :  { %v1208_v56 = vpop.f32.mrf.mxu2 }
 0x962   :  { %v1209_v5 = vadd.f32 %v1208_v56, %v8397_v37 }
 0x963   :  { %v1420_v62 = vpop.f32.mrf.mxu0 }
 0x964   :  { %v1215_v59 = vadd.f32 %v6976_v21, %v1209_v5  ;;  %v1440_v6 = vpop.f32.mrf.mxu1  ;;  %v11144_v21 = vld [vmem:[#allocation58_spill] sm:$0xff]  ;;  %v8516_v5 = vld [vmem:[%s11075_s13 + $0x18] sm:$0xff] }
 0x965   :  { %v1441_v25 = vadd.f32 %v1440_v6, %v1395_v16  ;;  %v11143_v16 = vld [vmem:[#allocation55_spill] sm:$0xff] }
 0x966   :  { %1216 = vst [vmem:[#allocation18] sm:$0xff] %v1215_v59  ;;  %v11145_v59 = vld [vmem:[#allocation60_spill] sm:$0xff] }
 0x967   :  { %v1491_v7 = vadd.f32 %v1487_v35, %v1441_v25  ;;  %v8549_v25 = vld [vmem:[%s11074_s21 + $0x18] sm:$0xff]  ;;  %v8555_v35 = vld [vmem:[%s11074_s21 + $0x10] sm:$0xff] }
 0x969   :  { %v1495_v32 = vadd.f32 %v1491_v7, %v11133_v30  ;;  %v1375_v61 = vpop.f32.mrf.mxu2  ;;  %v8566_v7 = vld [vmem:[%s11074_s21] sm:$0xff]  ;;  %v8573_v30 = vld [vmem:[%s11076_s6 + $0x18] sm:$0xff] }
 0x96a   :  { %v1421_v31 = vadd.f32 %v1420_v62, %v1375_v61  ;;  %v8579_v61 = vld [vmem:[%s11076_s6 + $0x10] sm:$0xff] }
 0x96b   :  { %7029 = vtanh.f32 %v1495_v32  ;;  %v8581_v62 = vld [vmem:[#allocation8 + $0x18] sm:$0xff] }
 0x971   :  { %v7030_v63 = vpop.eup %7029  ;;  %v1467_v1 = vpop.f32.mrf.mxu2 }
 0x972   :  { %v1490_v3 = vadd.f32 %v1467_v1, %v1421_v31  ;;  %1566 = vmatmul.f32.vlgmr.msra.gmra.mxu1 %v7030_v63  ;;  %v8586_v31 = vld [vmem:[%s11076_s6 + $0x8] sm:$0xff]  ;;  %v8589_v63 = vld [vmem:[#allocation8 + $0x8] sm:$0xff] }
 0x973   :  { %2026 = vmatpush.msra.mxu1 %v8549_v25 }
 0x974   :  { %v1494_v24 = vadd.f32 %v1490_v3, %v11134_v23  ;;  %v8595_v3 = vld [vmem:[%s11076_s6] sm:$0xff] }
 0x975   :  { %2027 = vmatpush.msra.mxu1 %v8555_v35 }
 0x976   :  { %7031 = vtanh.f32 %v1494_v24 }
 0x97a   :  { %6793 = vmatmul.msk.f32.vlgmr.msrb.gmra.mxu1 %vm323_vm1, %v8446_v51 }
 0x97c   :  { %v7032_v37 = vpop.eup %7031 }
 0x97d   :  { %1546 = vmatmul.f32.vlgmr.msra.gmra.mxu0 %v7032_v37 }
 0x97e   :  { %1984 = vmatpush.msra.mxu0 %v8426_v8 }
 0x980   :  { %1985 = vmatpush.msra.mxu0 %v8428_v43 }
 0x982   :  { %1986 = vmatpush.msra.mxu0 %v8431_v9 }
 0x984   :  { %1987 = vmatpush.msra.mxu0 %v8434_v11 }
 0x9ef   :  { %v1567_v29 = vpop.f32.mrf.mxu1 }
 0x9fa   :  { %v1547_v26 = vpop.f32.mrf.mxu0 }
 0x9fb   :  { %v1548_v28 = vadd.f32 %v1547_v26, %v11135_v27 }
 0x9fd   :  { %v1568_v39 = vadd.f32 %v1567_v29, %v1548_v28 }
 0x9ff   :  { %v1570_v50 = vsel %vm570_vm6, %v1568_v39, -inf }
 0xa00   :  { %1571 = vmax.xlane.f32.xlu2 %v1570_v50 }
 0xa73   :  { %v1572_v49 = vpop.xlane.xlu2 %1571 }
 0xa74   :  { %v1573_v17 = vsub.f32 %v1568_v39, %v1572_v49 }
 0xa76   :  { %v1574_v55 = vmul.f32 1.442695, %v1573_v17 }
 0xa78   :  { %7033 = vpow2.f32 %v1574_v55 }
 0xa7e   :  { %v7034_v4 = vpop.eup %7033 }
 0xa7f   :  { %v1576_v34 = vsel %vm570_vm6, %v7034_v4, 0.0 }
 0xa80   :  { %1577 = vadd.xlane.f32.xlu0 %v1576_v34 }
 0xaf3   :  { %v1578_v36 = vpop.xlane.xlu0 %1577 }
 0xaf4   :  { %7035 = vrcp.f32 %v1578_v36  ;;  %v1590_v11 = vand.u32 2147483648, %v1578_v36  ;;  %v1588_v12 = vand.u32 2147483647, %v1578_v36  ;;  %vm1584_vm3 = vweird.f32 %v1578_v36 }
 0xaf6   :  { %v1591_v2 = vor.u32 1.1754944e-38, %v1590_v11  ;;  %vm1589_vm5 = vcmp.eq.f32.partialorder %v1588_v12, 8.507059e+37  ;;  %v8607_v12 = vld [vmem:[#allocation9 + $0x18] sm:$0xff] }
 0xafa   :  { %v7036_v8 = vpop.eup %7035 }
 0xafb   :  { %v1580_v43 = vmul.f32 %v7036_v8, %v1578_v36  ;;  %vm1585_vm2 = vweird.f32 %v7036_v8 }
 0xafc   :  { %vm1586_vm4 = vmor %vm1584_vm3, %vm1585_vm2 }
 0xafd   :  { %v1581_v9 = vsub.f32 1.0, %v1580_v43 }
 0xaff   :  { %v1582_v14 = vmul.f32 %v7036_v8, %v1581_v9 }
 0xb01   :  { %v1583_v13 = vadd.f32 %v7036_v8, %v1582_v14 }
 0xb03   :  { %v1587_v38 = vsel %vm1586_vm4, %v7036_v8, %v1583_v13  ;;  %v8612_v13 = vld [vmem:[#allocation9 + $0x8] sm:$0xff] }
 0xb04   :  { %v1592_v40 = vsel %vm1589_vm5, %v1591_v2, %v1587_v38  ;;  %v1864_v38 = vpop.f32.mrf.mxu1 }
 0xb05   :  { %v8483_v41 = vmul.f32 %v7034_v4, %v1592_v40 }
 0xb07   :  { %2000 = vst.msk [vmem:[#allocation19 + $0x8] sm:$0xff] %vm570_vm6, %v8483_v41  ;;  %6784 = vmatmul.msk.f32.vlgmr.msrb.gmra.mxu2 %vm570_vm6, %v8483_v41  ;;  %v1595_v42 = vrot.slane %v8483_v41, 1  ;;  %v1596_v48 = vrot.slane %v8483_v41, 2  ;;  %v1597_v15 = vrot.slane %v8483_v41, 3  ;;  %v1599_v22 = vrot.slane %v8483_v41, 5 }
 0xb08   :  { %1722 = vmatpush.msrb.mxu2 %v8280_v47  ;;  %v11140_v47 = vld [vmem:[#allocation51_spill] sm:$0xff]  ;;  %v1600_v56 = vrot.slane %v8483_v41, 6  ;;  %v1601_v6 = vrot.slane %v8483_v41, 7  ;;  %v8622_v2 = vadd.f32 %v8483_v41, %v8249_v57 }
 0xb09   :  { %6785 = vmatmul.msk.f32.vlgmr.msra.gmra.mxu3 %vm570_vm6, %v1595_v42 }
 0xb0a   :  { %1744 = vmatpush.msra.mxu3 %v11136_v44  ;;  %1723 = vmatpush.msrb.mxu2 %v8289_v10  ;;  %v1598_v10 = vrot.slane %v8483_v41, 4  ;;  %v6977_v44 = vld [vmem:[%s10928_s19] ss:$0 sm:$0xff] }
 0xb0c   :  { %1745 = vmatpush.msra.mxu3 %v11137_v45 }
 0xb0f   :  { %6786 = vmatmul.msk.f32.vlgmr.msra.gmra.mxu2 %vm570_vm6, %v1596_v48 }
 0xb10   :  { %1766 = vmatpush.msra.mxu2 %v11138_v18 }
 0xb11   :  { %6787 = vmatmul.msk.f32.vlgmr.msrb.gmra.mxu3 %vm570_vm6, %v1597_v15 }
 0xb12   :  { %1788 = vmatpush.msrb.mxu3 %v11139_v20  ;;  %1767 = vmatpush.msra.mxu2 %v11140_v47 }
 0xb14   :  { %1789 = vmatpush.msrb.mxu3 %v11141_v52  ;;  %v6978_v52 = vld [vmem:[%s10920_s11] ss:$0 sm:$0xff] }
 0xb17   :  { %6788 = vmatmul.msk.f32.vlgmr.msrb.gmra.mxu2 %vm570_vm6, %v1598_v10 }
 0xb18   :  { %1883 = vmatpush.msrb.mxu2 %v11142_v54 }
 0xb19   :  { %6789 = vmatmul.msk.f32.vlgmr.msra.gmra.mxu3 %vm570_vm6, %v1599_v22 }
 0xb1a   :  { %1884 = vmatpush.msrb.mxu2 %v11143_v16  ;;  %1959 = vmatpush.msra.mxu3 %v8330_v19  ;;  %v8525_v19 = vld [vmem:[%s11075_s13 + $0x10] sm:$0xff] }
 0xb1c   :  { %1885 = vmatpush.msrb.mxu2 %v11144_v21  ;;  %1960 = vmatpush.msra.mxu3 %v8335_v58  ;;  %v8533_v58 = vld [vmem:[%s11075_s13 + $0x8] sm:$0xff] }
 0xb1e   :  { %1886 = vmatpush.msrb.mxu2 %v11145_v59  ;;  %1961 = vmatpush.msra.mxu3 %v8341_v60  ;;  %v8539_v60 = vld [vmem:[%s11075_s13] sm:$0xff] }
 0xb1f   :  { %6790 = vmatmul.msk.f32.vlgmr.msra.gmra.mxu2 %vm570_vm6, %v1600_v56 }
 0xb20   :  { %2049 = vmatpush.msra.mxu2 %v8516_v5  ;;  %1962 = vmatpush.msra.mxu3 %v8347_v0  ;;  %v2001_v0 = vld [vmem:[#allocation2 + $0x10] sm:$0xff] }
 0xb21   :  { %6791 = vmatmul.msk.f32.vlgmr.msrb.gmra.mxu3 %vm570_vm6, %v1601_v6 }
 0xb22   :  { %2050 = vmatpush.msra.mxu2 %v8525_v19  ;;  %2073 = vmatpush.msrb.mxu3 %v8573_v30 }
 0xb24   :  { %2051 = vmatpush.msra.mxu2 %v8533_v58  ;;  %2074 = vmatpush.msrb.mxu3 %v8579_v61 }
 0xb26   :  { %2052 = vmatpush.msra.mxu2 %v8539_v60  ;;  %2075 = vmatpush.msrb.mxu3 %v8586_v31 }
 0xb27   :  { %6794 = vmatmul.msk.f32.vlgmr.msrb.gmra.mxu2 %vm323_vm1, %v8440_v46  ;;  %v8561_v46 = vld [vmem:[%s11074_s21 + $0x8] sm:$0xff] }
 0xb28   :  { %2028 = vmatpush.msra.mxu1 %v8561_v46  ;;  %2076 = vmatpush.msrb.mxu3 %v8595_v3 }
 0xb2a   :  { %2029 = vmatpush.msra.mxu1 %v8566_v7 }
 0xb2c   :  { %2175 = vmatpush.msrb.mxu1 %v8581_v62 }
 0xb2e   :  { %2176 = vmatpush.msrb.mxu1 %v8589_v63 }
 0xb2f   :  { %6801 = vmatmul.msk.f32.vlgmr.msra.gmra.mxu2 %vm323_vm1, %v2001_v0 }
 0xb8a   :  { %v1637_v32 = vpop.f32.mrf.mxu2 }
 0xb8c   :  { %v1659_v1 = vpop.f32.mrf.mxu3 }
 0xb8d   :  { %v1811_v37 = vrot.slane %v1659_v1, 7 }
 0xb8f   :  { %v1812_v28 = vsel %vm1024_vm11, %v1811_v37, %v1637_v32 }
 0xb92   :  { %v1681_v23 = vpop.f32.mrf.mxu2 }
 0xb93   :  { %v1813_v26 = vrot.slane %v1681_v23, 6 }
 0xb94   :  { %v1703_v24 = vpop.f32.mrf.mxu3 }
 0xb95   :  { %v1815_v29 = vrot.slane %v1703_v24, 5  ;;  %v1814_v50 = vsel %vm1027_vm12, %v1813_v26, %v1812_v28 }
 0xb97   :  { %v1816_v17 = vsel %vm1030_vm13, %v1815_v29, %v1814_v50 }
 0xb9a   :  { %v1725_v27 = vpop.f32.mrf.mxu2 }
 0xb9b   :  { %v1817_v49 = vrot.slane %v1725_v27, 4 }
 0xb9c   :  { %v1747_v39 = vpop.f32.mrf.mxu3 }
 0xb9d   :  { %v1819_v55 = vrot.slane %v1747_v39, 3  ;;  %v1818_v4 = vsel %vm1033_vm14, %v1817_v49, %v1816_v17 }
 0xb9f   :  { %v1820_v8 = vsel %vm1036_vm15, %v1819_v55, %v1818_v4 }
 0xba2   :  { %v1769_v34 = vpop.f32.mrf.mxu2 }
 0xba3   :  { %v1821_v36 = vrot.slane %v1769_v34, 2 }
 0xba4   :  { %v1791_v43 = vpop.f32.mrf.mxu3 }
 0xba5   :  { %v1822_v9 = vsel %vm1039_vm0, %v1821_v36, %v1820_v8  ;;  %v1823_v11 = vrot.slane %v1791_v43, 1 }
 0xba7   :  { %v1824_v14 = vsel %vm11146_vm7, %v1823_v11, %v1822_v9 }
 0xba8   :  { %6792 = vmatmul.msk.f32.vlgmr.msrb.gmra.mxu0 %vm323_vm1, %v1824_v14  ;;  %6796 = vmatmul.msk.f32.vlgmr.msra.gmra.mxu3 %vm323_vm1, %v1824_v14 }
 0xba9   :  { %6800 = vmatmul.msk.f32.vlgmr.msra.gmra.mxu1 %vm323_vm1, %v1824_v14 }
 0xbaa   :  { %2267 = vmatpush.msra.mxu1 %v8607_v12  ;;  %v1888_v45 = vpop.f32.mrf.mxu2 }
 0xbac   :  { %2268 = vmatpush.msra.mxu1 %v8612_v13 }
 0xbb0   :  { %6802 = vmatmul.msk.f32.vlgmr.msrb.gmra.mxu3 %vm323_vm1, %v8446_v51 }
 0xbb1   :  { %6805 = vmatmul.msk.f32.vlgmr.msrb.gmra.mxu1 %vm570_vm6, %v8483_v41 }
 0xbb2   :  { %v2054_v20 = vpop.f32.mrf.mxu2 }
 0xbb9   :  { %6809 = vmatmul.msk.f32.vlgmr.msra.gmra.mxu1 %vm570_vm6, %v8622_v2 }
 0xc25   :  { %v1844_v40 = vpop.f32.mrf.mxu0 }
 0xc26   :  { %v1865_v42 = vadd.f32 %v1864_v38, %v1844_v40  ;;  %v2031_v18 = vpop.f32.mrf.mxu1 }
 0xc27   :  { %v2055_v47 = vadd.f32 %v2054_v20, %v2031_v18 }
 0xc28   :  { %v1891_v48 = vadd.f32 %v1888_v45, %v1865_v42 }
 0xc2a   :  { %v1896_v51 = vadd.f32 %v6977_v44, %v1891_v48  ;;  %v6773_v44 = vld [vmem:[%s10933_s24 + $0x8] sm:$0xff] }
 0xc2b   :  { %v8629_v15 = vpop.f32.mrf.mxu3  ;;  %1935 = vrot.lane.b32.xlu2 %v6773_v44, %s7488_s3  ;;  %v8817_v44 = vld [vmem:[%s10924_s15 + $0x40] sm:$0xff] }
 0xc2c   :  { %7037 = vtanh.f32 %v1896_v51  ;;  %v6795_v21 = vmul.f32 -1.442695, %v1896_v51 }
 0xc32   :  { %v7038_v57 = vpop.eup %7037 }
 0xc33   :  { %v2078_v10 = vpop.f32.mrf.mxu3  ;;  %1919 = vrot.lane.b32.xlu1 %v7038_v57, %s7486_s28 }
 0xc34   :  { %v2081_v22 = vadd.f32 %v2078_v10, %v2055_v47 }
 0xc36   :  { %v2086_v54 = vadd.f32 %v6978_v52, %v2081_v22  ;;  %v6798_v52 = vld [vmem:[%s10932_s23 + $0x10] sm:$0xff] }
 0xc38   :  { %7039 = vtanh.f32 %v2086_v54  ;;  %v6803_v59 = vmul.f32 -1.442695, %v2086_v54 }
 0xc39   :  { %7041 = vpow2.f32 %v6795_v21 }
 0xc3a   :  { %7043 = vpow2.f32 %v6803_v59 }
 0xc3e   :  { %v7040_v16 = vpop.eup %7039 }
 0xc3f   :  { %2109 = vrot.lane.b32.xlu1 %v7040_v16, %s7486_s28  ;;  %v7042_v56 = vpop.eup %7041 }
 0xc40   :  { %v1900_v6 = vadd.f32 1.0, %v7042_v56  ;;  %v7044_v0 = vpop.eup %7043 }
 0xc41   :  { %v2090_v1 = vadd.f32 1.0, %v7044_v0  ;;  %v8663_v0 = vld [vmem:[%s10921_s12 + $0x30] sm:$0xff] }
 0xc42   :  { %7045 = vrcp.f32 %v1900_v6  ;;  %v1912_v29 = vand.u32 2147483648, %v1900_v6  ;;  %vm1906_vm9 = vweird.f32 %v1900_v6  ;;  %v1910_v39 = vand.u32 2147483647, %v1900_v6  ;;  %2198 = vmatpush.msrb.mxu2 %v8663_v0 }
 0xc43   :  { %7047 = vrcp.f32 %v2090_v1  ;;  %v2102_v43 = vand.u32 2147483648, %v2090_v1  ;;  %vm2096_vm4 = vweird.f32 %v2090_v1  ;;  %v2100_v9 = vand.u32 2147483647, %v2090_v1 }
 0xc44   :  { %v1913_v17 = vor.u32 1.1754944e-38, %v1912_v29  ;;  %vm1911_vm2 = vcmp.eq.f32.partialorder %v1910_v39, 8.507059e+37  ;;  %v8712_v29 = vld [vmem:[#allocation9 + $0x10] sm:$0xff] }
 0xc45   :  { %v2103_v14 = vor.u32 1.1754944e-38, %v2102_v43  ;;  %vm2101_vm7 = vcmp.eq.f32.partialorder %v2100_v9, 8.507059e+37  ;;  %11151 = vst [vmem:[#allocation35_spill] sm:$0xff] %v8712_v29  ;;  %v8776_v43 = vld [vmem:[%s10924_s15 + $0xe0] sm:$0xff]  ;;  %v8783_v9 = vld [vmem:[%s10924_s15 + $0x58] sm:$0xff] }
 0xc48   :  { %v7046_v32 = vpop.eup %7045 }
 0xc49   :  { %v1902_v23 = vmul.f32 %v7046_v32, %v1900_v6  ;;  %v7048_v26 = vpop.eup %7047  ;;  %vm1907_vm8 = vweird.f32 %v7046_v32  ;;  %v8658_v6 = vld [vmem:[#allocation8 + $0x10] sm:$0xff] }
 0xc4a   :  { %v2092_v28 = vmul.f32 %v7048_v26, %v2090_v1  ;;  %vm1908_vm10 = vmor %vm1906_vm9, %vm1907_vm8  ;;  %vm2097_vm3 = vweird.f32 %v7048_v26  ;;  %11149 = vst [vmem:[#allocation33_spill] sm:$0xff] %v8658_v6  ;;  %2155 = vmatpush.msrb.mxu0 %v8658_v6  ;;  %v8675_v1 = vld [vmem:[%s10921_s12 + $0x20] sm:$0xff] }
 0xc4b   :  { %v1903_v24 = vsub.f32 1.0, %v1902_v23  ;;  %vm2098_vm5 = vmor %vm2096_vm4, %vm2097_vm3  ;;  %v8677_v23 = vld [vmem:[#allocation8] sm:$0xff]  ;;  %2199 = vmatpush.msrb.mxu2 %v8675_v1  ;;  %vm11173_vm3 = vcmask 1047559  }
 0xc4c   :  { %v2093_v49 = vsub.f32 1.0, %v2092_v28  ;;  %11150 = vst [vmem:[#allocation34_spill] sm:$0xff] %v8677_v23  ;;  %2156 = vmatpush.msrb.mxu0 %v8677_v23  ;;  %v8708_v28 = vld [vmem:[%s10921_s12 + $0x8] sm:$0xff]  ;;  %v6979_v23 = vld [vmem:[%s10931_s22] ss:$0 sm:$0xff] }
 0xc4d   :  { %v1904_v37 = vmul.f32 %v7046_v32, %v1903_v24  ;;  %v8682_v24 = vld [vmem:[%s10921_s12 + $0x28] sm:$0xff] }
 0xc4e   :  { %v2094_v36 = vmul.f32 %v7048_v26, %v2093_v49 }
 0xc4f   :  { %v1905_v27 = vadd.f32 %v7046_v32, %v1904_v37  ;;  %v8691_v37 = vld [vmem:[%s10921_s12 + $0x10] sm:$0xff] }
 0xc50   :  { %v2095_v8 = vadd.f32 %v7048_v26, %v2094_v36  ;;  %2200 = vmatpush.msrb.mxu2 %v8691_v37  ;;  %v8764_v36 = vld [vmem:[%s10924_s15 + $0xe8] sm:$0xff] }
 0xc51   :  { %v1909_v50 = vsel %vm1908_vm10, %v7046_v32, %v1905_v27  ;;  %v8668_v32 = vld [vmem:[%s10921_s12 + $0x38] sm:$0xff]  ;;  %v8701_v27 = vld [vmem:[%s10921_s12] sm:$0xff] }
 0xc52   :  { %v1914_v4 = vsel %vm1911_vm2, %v1913_v17, %v1909_v50  ;;  %v2099_v11 = vsel %vm2098_vm5, %v7048_v26, %v2095_v8  ;;  %2218 = vmatpush.msra.mxu3 %v8668_v32  ;;  %v8696_v26 = vld [vmem:[%s10921_s12 + $0x18] sm:$0xff]  ;;  %2201 = vmatpush.msrb.mxu2 %v8701_v27  ;;  %v8769_v8 = vld [vmem:[%s10924_s15 + $0x60] sm:$0xff] }
 0xc53   :  { %v2104_v38 = vsel %vm2101_vm7, %v2103_v14, %v2099_v11  ;;  %v1917_v45 = vmul.f32 %v1914_v4, %v8417_v53  ;;  %v8718_v50 = vld [vmem:[#allocation9] sm:$0xff]  ;;  %v8793_v14 = vld [vmem:[%s10924_s15 + $0x50] sm:$0xff] }
 0xc54   :  { %v2107_v20 = vmul.f32 %v2104_v38, %v8421_v33  ;;  %2219 = vmatpush.msra.mxu3 %v8682_v24  ;;  %11152 = vst [vmem:[#allocation36_spill] sm:$0xff] %v8718_v50  ;;  %v8735_v17 = vld [vmem:[%s10924_s15 + $0x78] sm:$0xff] }
 0xc55   :  { %2313 = vmatpush.msra.mxu2 %v8735_v17  ;;  %v8788_v11 = vld [vmem:[%s10924_s15 + $0xd8] sm:$0xff] }
 0xc56   :  { %2220 = vmatpush.msra.mxu3 %v8696_v26 }
 0xc58   :  { %2221 = vmatpush.msra.mxu3 %v8708_v28 }
 0xc85   :  { %v1936_v22 = vpop.permute.xlu2 %1935 }
 0xca5   :  { %v1920_v55 = vpop.permute.xlu1 %1919 }
 0xca6   :  { %v1922_v34 = vmul.f32 %v1920_v55, %v1914_v4  ;;  %v8747_v55 = vld [vmem:[%s10924_s15 + $0x70] sm:$0xff] }
 0xca7   :  { %2314 = vmatpush.msra.mxu2 %v8747_v55 }
 0xca8   :  { %1924 = vrot.lane.b32.xlu1 %v1922_v34, %s7487_s18  ;;  %v8759_v34 = vld [vmem:[%s10924_s15 + $0x68] sm:$0xff] }
 0xca9   :  { %2315 = vmatpush.msra.mxu2 %v8759_v34 }
 0xcab   :  { %2316 = vmatpush.msra.mxu2 %v8769_v8 }
 0xcad   :  { %2317 = vmatpush.msra.mxu2 %v8783_v9 }
 0xcaf   :  { %2318 = vmatpush.msra.mxu2 %v8793_v14 }
 0xcb1   :  { %v2110_v40 = vpop.permute.xlu1 %2109 }
 0xcb2   :  { %v2112_v42 = vmul.f32 %v2110_v40, %v2104_v38  ;;  %v8805_v40 = vld [vmem:[%s10924_s15 + $0x48] sm:$0xff] }
 0xcb3   :  { %2319 = vmatpush.msra.mxu2 %v8805_v40 }
 0xcb4   :  { %2114 = vrot.lane.b32.xlu1 %v2112_v42, %s7487_s18  ;;  %v8810_v42 = vld [vmem:[%s10924_s15 + $0xc8] sm:$0xff] }
 0xcb5   :  { %11154 = vst [vmem:[#allocation38_spill] sm:$0xff] %v8810_v42  ;;  %2320 = vmatpush.msra.mxu2 %v8817_v44 }
 0xd1a   :  { %v1925_v48 = vpop.permute.xlu1 %1924 }
 0xd1b   :  { %v8643_v51 = vadd.f32 %v1925_v48, %v1917_v45  ;;  %v8822_v45 = vld [vmem:[%s10924_s15 + $0xc0] sm:$0xff]  ;;  %v8831_v48 = vld [vmem:[%s10924_s15 + $0x38] sm:$0xff] }
 0xd1c   :  { %11155 = vst [vmem:[#allocation39_spill] sm:$0xff] %v8822_v45  ;;  %2321 = vmatpush.msra.mxu2 %v8831_v48 }
 0xd1d   :  { %11147 = vst [vmem:[#allocation31_spill] sm:$0xff] %v8643_v51  ;;  %7049 = vtanh.f32 %v8643_v51  ;;  %v8928_v51 = vld [vmem:[#allocation11 + $0x18] sm:$0xff] }
 0xd1e   :  { %11164 = vst [vmem:[#allocation47_spill] sm:$0xff] %v8928_v51 }
 0xd23   :  { %v7050_v18 = vpop.eup %7049 }
 0xd24   :  { %1930 = vrot.lane.b32.xlu1 %v7050_v18, %s7486_s28  ;;  %v8836_v18 = vld [vmem:[%s10924_s15 + $0xb8] sm:$0xff] }
 0xd25   :  { %11156 = vst [vmem:[#allocation40_spill] sm:$0xff] %v8836_v18 }
 0xd26   :  { %v2115_v57 = vpop.permute.xlu1 %2114 }
 0xd27   :  { %v8648_v47 = vadd.f32 %v2115_v57, %v2107_v20  ;;  %v8843_v20 = vld [vmem:[%s10924_s15 + $0x30] sm:$0xff] }
 0xd28   :  { %v8848_v57 = vld [vmem:[%s10924_s15 + $0xb0] sm:$0xff]  ;;  %2322 = vmatpush.msra.mxu2 %v8843_v20 }
 0xd29   :  { %11148 = vst [vmem:[#allocation32_spill] sm:$0xff] %v8648_v47  ;;  %7051 = vtanh.f32 %v8648_v47 }
 0xd2a   :  { %11157 = vst [vmem:[#allocation41_spill] sm:$0xff] %v8848_v57 }
 0xd2c   :  { %2125 = vrot.lane.b32.xlu1 %v6798_v52, %s7488_s3  ;;  %v8855_v52 = vld [vmem:[%s10924_s15 + $0x28] sm:$0xff] }
 0xd2d   :  { %2323 = vmatpush.msra.mxu2 %v8855_v52 }
 0xd2f   :  { %v7052_v53 = vpop.eup %7051 }
 0xd30   :  { %2120 = vrot.lane.b32.xlu0 %v7052_v53, %s7486_s28  ;;  %v8860_v53 = vld [vmem:[%s10924_s15 + $0xa8] sm:$0xff] }
 0xd31   :  { %11158 = vst [vmem:[#allocation42_spill] sm:$0xff] %v8860_v53 }
 0xd96   :  { %v1931_v10 = vpop.permute.xlu1 %1930 }
 0xd97   :  { %v1933_v54 = vmul.f32 %v1931_v10, %v1914_v4  ;;  %v8752_v4 = vld [vmem:[%s10924_s15 + $0xf0] sm:$0xff]  ;;  %v8867_v10 = vld [vmem:[%s10924_s15 + $0x20] sm:$0xff] }
 0xd98   :  { %2324 = vmatpush.msra.mxu2 %v8867_v10 }
 0xd99   :  { %v1938_v16 = vmul.f32 %v1936_v22, %v1933_v54  ;;  %v8872_v22 = vld [vmem:[%s10924_s15 + $0xa0] sm:$0xff]  ;;  %v8879_v54 = vld [vmem:[%s10924_s15 + $0x18] sm:$0xff] }
 0xd9a   :  { %11159 = vst [vmem:[#allocation28_spill] sm:$0xff] %v8872_v22  ;;  %2325 = vmatpush.msra.mxu2 %v8879_v54 }
 0xd9b   :  { %1968 = vrot.lane.b32.xlu1 %v1938_v16, %s7487_s18  ;;  %v8884_v16 = vld [vmem:[%s10924_s15 + $0x98] sm:$0xff] }
 0xd9c   :  { %11160 = vst [vmem:[#allocation29_spill] sm:$0xff] %v8884_v16 }
 0xd9e   :  { %v2126_v21 = vpop.permute.xlu1 %2125 }
 0xda2   :  { %v2121_v33 = vpop.permute.xlu0 %2120 }
 0xda3   :  { %v2123_v56 = vmul.f32 %v2121_v33, %v2104_v38  ;;  %v8798_v38 = vld [vmem:[%s10924_s15 + $0xd0] sm:$0xff] }
 0xda4   :  { %11153 = vst [vmem:[#allocation37_spill] sm:$0xff] %v8798_v38  ;;  %v8891_v33 = vld [vmem:[%s10924_s15 + $0x10] sm:$0xff] }
 0xda5   :  { %v2128_v59 = vmul.f32 %v2126_v21, %v2123_v56  ;;  %v8896_v21 = vld [vmem:[%s10924_s15 + $0x90] sm:$0xff]  ;;  %v8901_v56 = vld [vmem:[%s10924_s15 + $0x8] sm:$0xff]  ;;  %2326 = vmatpush.msra.mxu2 %v8891_v33 }
 0xda6   :  { %11161 = vst [vmem:[#allocation30_spill] sm:$0xff] %v8896_v21 }
 0xda7   :  { %2182 = vrot.lane.b32.xlu1 %v2128_v59, %s7487_s18  ;;  %v8906_v59 = vld [vmem:[%s10924_s15 + $0x88] sm:$0xff]  ;;  %2327 = vmatpush.msra.mxu2 %v8901_v56 }
 0xda8   :  { %11162 = vst [vmem:[#allocation46_spill] sm:$0xff] %v8906_v59 }
 0xe0d   :  { %v8714_v39 = vpop.permute.xlu1 %1968 }
 0xe0e   :  { %6797 = vmatmul.msk.f32.vlgmr.msra.gmra.mxu0 %vm323_vm1, %v8714_v39 }
 0xe0f   :  { %2247 = vmatpush.msra.mxu0 %v8712_v29  ;;  %v8918_v29 = vld [vmem:[%s10924_s15 + $0x80] sm:$0xff] }
 0xe10   :  { %11163 = vst [vmem:[#allocation52_spill] sm:$0xff] %v8918_v29 }
 0xe11   :  { %2248 = vmatpush.msra.mxu0 %v8718_v50  ;;  %v8913_v50 = vld [vmem:[%s10924_s15] sm:$0xff] }
 0xe12   :  { %2328 = vmatpush.msra.mxu2 %v8913_v50 }
 0xe16   :  { %6804 = vmatmul.msk.f32.vlgmr.msrb.gmra.mxu0 %vm570_vm6, %v8483_v41  ;;  %v8740_v41 = vld [vmem:[%s10924_s15 + $0xf8] sm:$0xff] }
 0xe17   :  { %2333 = vmatpush.msrb.mxu3 %v8740_v41 }
 0xe19   :  { %v8724_v49 = vpop.permute.xlu1 %2182  ;;  %2334 = vmatpush.msrb.mxu3 %v8752_v4 }
 0xe1a   :  { %6806 = vmatmul.msk.f32.vlgmr.msrb.gmra.mxu2 %vm323_vm1, %v8724_v49  ;;  %6807 = vmatmul.msk.f32.vlgmr.msra.gmra.mxu3 %vm323_vm1, %v8724_v49 }
 0xe1b   :  { %2335 = vmatpush.msrb.mxu3 %v8764_v36 }
 0xe1d   :  { %2336 = vmatpush.msrb.mxu3 %v8776_v43 }
 0xe1e   :  { %6808 = vmatmul.msk.f32.vlgmr.msra.gmra.mxu0 %vm570_vm6, %v8622_v2 }
 0xe1f   :  { %2337 = vmatpush.msrb.mxu3 %v8788_v11 }
 0xe21   :  { %2338 = vmatpush.msrb.mxu3 %v8798_v38 }
 0xe23   :  { %2339 = vmatpush.msrb.mxu3 %v8810_v42 }
 0xe25   :  { %2340 = vmatpush.msrb.mxu3 %v8822_v45 }
 0xe27   :  { %2341 = vmatpush.msrb.mxu3 %v8836_v18 }
 0xe29   :  { %2342 = vmatpush.msrb.mxu3 %v8848_v57 }
 0xe2b   :  { %2343 = vmatpush.msrb.mxu3 %v8860_v53 }
 0xe2d   :  { %2344 = vmatpush.msrb.mxu3 %v8872_v22  ;;  %v8933_v22 = vld [vmem:[#allocation11 + $0x8] sm:$0xff] }
 0xe2e   :  { %11166 = vst [vmem:[#allocation57_spill] sm:$0xff] %v8933_v22 }
 0xe2f   :  { %2345 = vmatpush.msrb.mxu3 %v8884_v16 }
 0xe31   :  { %2346 = vmatpush.msrb.mxu3 %v8896_v21  ;;  %v8930_v21 = vld [vmem:[#allocation11 + $0x10] sm:$0xff] }
 0xe32   :  { %11165 = vst [vmem:[#allocation54_spill] sm:$0xff] %v8930_v21 }
 0xe33   :  { %2347 = vmatpush.msrb.mxu3 %v8906_v59  ;;  %v8936_v59 = vld [vmem:[#allocation11] sm:$0xff] }
 0xe34   :  { %11167 = vst [vmem:[#allocation44_spill] sm:$0xff] %v8936_v59 }
 0xe35   :  { %2348 = vmatpush.msrb.mxu3 %v8918_v29  ;;  %v2178_v29 = vpop.f32.mrf.mxu1 }
 0xe37   :  { %2642 = vmatpush.msra.mxu3 %v8928_v51 }
 0xe39   :  { %2643 = vmatpush.msra.mxu3 %v8930_v21 }
 0xe3b   :  { %2644 = vmatpush.msra.mxu3 %v8933_v22 }
 0xe3d   :  { %2645 = vmatpush.msra.mxu3 %v8936_v59  ;;  %v2270_v45 = vpop.f32.mrf.mxu1 }
 0xe8b   :  { %v1989_v6 = vpop.f32.mrf.mxu0 }
 0xe8c   :  { %v1990_v47 = vadd.f32 %v1989_v6, %v8629_v15 }
 0xe8e   :  { %v1996_v16 = vadd.f32 %v6979_v23, %v1990_v47  ;;  %v8940_v47 = vld [vmem:[#allocation3] sm:$0xff]  ;;  %v8942_v23 = vld [vmem:[#allocation3 + $0x8] sm:$0xff] }
 0xe8f   :  { %11168 = vst [vmem:[#allocation43_spill] sm:$0xff] %v8940_v47 }
 0xe90   :  { %1998 = vst [vmem:[#allocation18 + $0x8] sm:$0xff] %v1996_v16 }
 0xe91   :  { %11169 = vst [vmem:[#allocation45_spill] sm:$0xff] %v8942_v23 }
 0xe93   :  { %v2158_v15 = vpop.f32.mrf.mxu0 }
 0xe9b   :  { %v2250_v51 = vpop.f32.mrf.mxu0 }
 0xe9d   :  { %v2203_v6 = vpop.f32.mrf.mxu2  ;;  %v2223_v53 = vpop.f32.mrf.mxu3 }
 0xe9e   :  { %v2204_v57 = vadd.f32 %v2203_v6, %v2158_v15  ;;  %v2224_v18 = vadd.f32 %v2223_v53, %v2178_v29  ;;  %v8954_v29 = vld [vmem:[#allocation6] sm:$0xff]  ;;  %v8973_v53 = vld [vmem:[%s11096_s5] sm:$0xff] }
 0xe9f   :  { %11170 = vst [vmem:[#allocation48_spill] sm:$0xff] %v8954_v29  ;;  %v8997_v15 = vld [vmem:[%s11096_s5 + $0x20] sm:$0xff]  ;;  %v9002_v6 = vld [vmem:[%s11096_s5 + $0x30] sm:$0xff] }
 0xea0   :  { %v2273_v21 = vadd.f32 %v2250_v51, %v2204_v57  ;;  %v2274_v16 = vadd.f32 %v2270_v45, %v2224_v18 }
 0xea2   :  { %v2277_v42 = vadd.f32 %v8940_v47, %v2273_v21  ;;  %v2278_v22 = vadd.f32 %v8942_v23, %v2274_v16  ;;  %v8985_v21 = vld [vmem:[%s11096_s5 + $0x28] sm:$0xff] }
 0xea3   :  { %v9012_v23 = vld [vmem:[%s11096_s5 + $0x48] sm:$0xff] }
 0xea4   :  { %7053 = vtanh.f32 %v2277_v42 }
 0xea5   :  { %7055 = vtanh.f32 %v2278_v22  ;;  %v8980_v22 = vld [vmem:[%s11096_s5 + $0x10] sm:$0xff] }
 0xeaa   :  { %v7054_v59 = vpop.eup %7053 }
 0xeab   :  { %v7056_v38 = vpop.eup %7055  ;;  %2329 = vmatmul.f32.vlgmr.msra.gmra.mxu2 %v7054_v59  ;;  %v8992_v59 = vld [vmem:[%s11096_s5 + $0x38] sm:$0xff] }
 0xeac   :  { %2349 = vmatmul.f32.vlgmr.msrb.gmra.mxu3 %v7056_v38 }
 0xead   :  { %2809 = vmatpush.msrb.mxu3 %v8549_v25 }
 0xeaf   :  { %2810 = vmatpush.msrb.mxu3 %v8555_v35 }
 0xeb1   :  { %2811 = vmatpush.msrb.mxu3 %v8561_v46 }
 0xeb3   :  { %2812 = vmatpush.msrb.mxu3 %v8566_v7 }
 0xeb4   :  { %6819 = vmatmul.msk.f32.vlgmr.msra.gmra.mxu3 %vm323_vm1, %v8724_v49 }
 0xeb5   :  { %2958 = vmatpush.msra.mxu3 %v8581_v62  ;;  %v8962_v62 = vld [vmem:[%s11096_s5 + $0x8] sm:$0xff] }
 0xeb6   :  { %2417 = vmatpush.msrb.mxu0 %v8962_v62 }
 0xeb7   :  { %2959 = vmatpush.msra.mxu3 %v8589_v63  ;;  %v8968_v63 = vld [vmem:[%s11096_s5 + $0x18] sm:$0xff] }
 0xeb8   :  { %2439 = vmatpush.msrb.mxu1 %v8968_v63  ;;  %2418 = vmatpush.msrb.mxu0 %v8973_v53 }
 0xeba   :  { %2461 = vmatpush.msra.mxu0 %v8985_v21  ;;  %2440 = vmatpush.msrb.mxu1 %v8980_v22 }
 0xebc   :  { %2483 = vmatpush.msra.mxu1 %v8992_v59  ;;  %2462 = vmatpush.msra.mxu0 %v8997_v15 }
 0xebe   :  { %2484 = vmatpush.msra.mxu1 %v9002_v6 }
 0xf2e   :  { %v2330_v51 = vpop.f32.mrf.mxu2 }
 0xf2f   :  { %v2331_v38 = vadd.f32 %v8954_v29, %v2330_v51  ;;  %v2350_v42 = vpop.f32.mrf.mxu3 }
 0xf31   :  { %v2351_v25 = vadd.f32 %v2350_v42, %v2331_v38 }
 0xf33   :  { %v2353_v35 = vsel %vm570_vm6, %v2351_v25, -inf }
 0xf34   :  { %2354 = vmax.xlane.f32.xlu2 %v2353_v35 }
 0xfa7   :  { %v2355_v46 = vpop.xlane.xlu2 %2354 }
 0xfa8   :  { %v2356_v45 = vsub.f32 %v2351_v25, %v2355_v46 }
 0xfaa   :  { %v2357_v7 = vmul.f32 1.442695, %v2356_v45 }
 0xfac   :  { %7057 = vpow2.f32 %v2357_v7 }
 0xfb2   :  { %v7058_v18 = vpop.eup %7057 }
 0xfb3   :  { %v2359_v57 = vsel %vm570_vm6, %v7058_v18, 0.0 }
 0xfb4   :  { %2360 = vadd.xlane.f32.xlu0 %v2359_v57 }
0x1027   :  { %v2361_v16 = vpop.xlane.xlu0 %2360 }
0x1028   :  { %7059 = vrcp.f32 %v2361_v16  ;;  %v2373_v25 = vand.u32 2147483648, %v2361_v16  ;;  %v2371_v46 = vand.u32 2147483647, %v2361_v16  ;;  %vm2367_vm9 = vweird.f32 %v2361_v16 }
0x102a   :  { %v2374_v7 = vor.u32 1.1754944e-38, %v2373_v25  ;;  %vm2372_vm2 = vcmp.eq.f32.partialorder %v2371_v46, 8.507059e+37  ;;  %v9055_v46 = vld [vmem:[%s11096_s5 + $0x60] sm:$0xff] }
0x102b   :  { %11171 = vst [vmem:[#allocation50_spill] sm:$0xff] %v9055_v46 }
0x102e   :  { %v7060_v51 = vpop.eup %7059 }
0x102f   :  { %v2363_v38 = vmul.f32 %v7060_v51, %v2361_v16  ;;  %vm2368_vm8 = vweird.f32 %v7060_v51 }
0x1030   :  { %vm2369_vm10 = vmor %vm2367_vm9, %vm2368_vm8 }
0x1031   :  { %v2364_v42 = vsub.f32 1.0, %v2363_v38 }
0x1033   :  { %v2365_v35 = vmul.f32 %v7060_v51, %v2364_v42  ;;  %v9043_v42 = vld [vmem:[%s11096_s5 + $0x68] sm:$0xff] }
0x1035   :  { %v2366_v45 = vadd.f32 %v7060_v51, %v2365_v35  ;;  %v9050_v35 = vld [vmem:[%s11096_s5 + $0x78] sm:$0xff] }
0x1037   :  { %v2370_v57 = vsel %vm2369_vm10, %v7060_v51, %v2366_v45  ;;  %v9022_v51 = vld [vmem:[%s11096_s5 + $0x58] sm:$0xff]  ;;  %v9062_v45 = vld [vmem:[%s11096_s5 + $0x70] sm:$0xff] }
0x1038   :  { %v2375_v29 = vsel %vm2372_vm2, %v2374_v7, %v2370_v57  ;;  %11172 = vst [vmem:[#allocation49_spill] sm:$0xff] %v9062_v45  ;;  %v9068_v57 = vld [vmem:[#allocation14 + $0x18] sm:$0xff] }
0x1039   :  { %v9007_v47 = vmul.f32 %v7058_v18, %v2375_v29  ;;  %v9027_v29 = vld [vmem:[%s11096_s5 + $0x40] sm:$0xff]  ;;  %v9034_v18 = vld [vmem:[%s11096_s5 + $0x50] sm:$0xff] }
0x103b   :  { %2783 = vst.msk [vmem:[#allocation19 + $0x10] sm:$0xff] %vm570_vm6, %v9007_v47  ;;  %6810 = vmatmul.msk.f32.vlgmr.msrb.gmra.mxu0 %vm570_vm6, %v9007_v47  ;;  %v2378_v16 = vrot.slane %v9007_v47, 1  ;;  %v2379_v38 = vrot.slane %v9007_v47, 2  ;;  %v2380_v25 = vrot.slane %v9007_v47, 3  ;;  %v2381_v7 = vrot.slane %v9007_v47, 4 }
0x103c   :  { %2505 = vmatpush.msrb.mxu0 %v9012_v23 }
0x103d   :  { %6811 = vmatmul.msk.f32.vlgmr.msrb.gmra.mxu1 %vm570_vm6, %v2378_v16  ;;  %v2382_v16 = vrot.slane %v9007_v47, 5 }
0x103e   :  { %2527 = vmatpush.msrb.mxu1 %v9022_v51  ;;  %2506 = vmatpush.msrb.mxu0 %v9027_v29 }
0x1040   :  { %2528 = vmatpush.msrb.mxu1 %v9034_v18 }
0x1043   :  { %6812 = vmatmul.msk.f32.vlgmr.msra.gmra.mxu0 %vm570_vm6, %v2379_v38  ;;  %v9072_v38 = vld [vmem:[#allocation14 + $0x10] sm:$0xff] }
0x1044   :  { %2549 = vmatpush.msra.mxu0 %v9043_v42 }
0x1045   :  { %6813 = vmatmul.msk.f32.vlgmr.msra.gmra.mxu1 %vm570_vm6, %v2380_v25  ;;  %v9076_v25 = vld [vmem:[#allocation14 + $0x8] sm:$0xff] }
0x1046   :  { %2571 = vmatpush.msra.mxu1 %v9050_v35  ;;  %2550 = vmatpush.msra.mxu0 %v9055_v46  ;;  %v9079_v46 = vld [vmem:[#allocation14] sm:$0xff] }
0x1048   :  { %2572 = vmatpush.msra.mxu1 %v9062_v45  ;;  %v2383_v45 = vrot.slane %v9007_v47, 6 }
0x104b   :  { %6814 = vmatmul.msk.f32.vlgmr.msrb.gmra.mxu0 %vm570_vm6, %v2381_v7  ;;  %v2384_v7 = vrot.slane %v9007_v47, 7 }
0x104c   :  { %2666 = vmatpush.msrb.mxu0 %v9068_v57 }
0x104d   :  { %6815 = vmatmul.msk.f32.vlgmr.msrb.gmra.mxu1 %vm570_vm6, %v2382_v16 }
0x104e   :  { %2667 = vmatpush.msrb.mxu0 %v9072_v38 }
0x1050   :  { %2668 = vmatpush.msrb.mxu0 %v9076_v25 }
0x1052   :  { %2669 = vmatpush.msrb.mxu0 %v9079_v46 }
0x1053   :  { %6816 = vmatmul.msk.f32.vlgmr.msra.gmra.mxu0 %vm570_vm6, %v2383_v45  ;;  %v2784_v45 = vld [vmem:[#allocation2 + $0x18] sm:$0xff] }
0x1054   :  { %2832 = vmatpush.msra.mxu0 %v8516_v5  ;;  %v9114_v5 = vld [vmem:[#allocation12 + $0x18] sm:$0xff] }
0x1055   :  { %6817 = vmatmul.msk.f32.vlgmr.msra.gmra.mxu1 %vm570_vm6, %v2384_v7  ;;  %2622 = vmatpush.msrb.mxu2 %v9114_v5  ;;  %v6980_v7 = vld [vmem:[%s10928_s19] ss:$0 sm:$0xff] }
0x1056   :  { %2833 = vmatpush.msra.mxu0 %v8525_v19  ;;  %v9116_v19 = vld [vmem:[#allocation17 + $0x18] sm:$0xff] }
0x1057   :  { %2742 = vmatpush.msrb.mxu1 %v9116_v19 }
0x1058   :  { %2834 = vmatpush.msra.mxu0 %v8533_v58  ;;  %v9120_v58 = vld [vmem:[#allocation12 + $0x10] sm:$0xff] }
0x1059   :  { %2623 = vmatpush.msrb.mxu2 %v9120_v58 }
0x105a   :  { %2835 = vmatpush.msra.mxu0 %v8539_v60  ;;  %v9122_v60 = vld [vmem:[#allocation17 + $0x10] sm:$0xff] }
0x105b   :  { %6820 = vmatmul.msk.f32.vlgmr.msrb.gmra.mxu0 %vm323_vm1, %v8714_v39  ;;  %2743 = vmatpush.msrb.mxu1 %v9122_v60 }
0x105c   :  { %2981 = vmatpush.msrb.mxu0 %v8663_v0  ;;  %v9126_v0 = vld [vmem:[#allocation12 + $0x8] sm:$0xff] }
0x105d   :  { %2624 = vmatpush.msrb.mxu2 %v9126_v0 }
0x105e   :  { %2982 = vmatpush.msrb.mxu0 %v8675_v1  ;;  %v9128_v1 = vld [vmem:[#allocation17 + $0x8] sm:$0xff] }
0x105f   :  { %2744 = vmatpush.msrb.mxu1 %v9128_v1 }
0x1060   :  { %2983 = vmatpush.msrb.mxu0 %v8691_v37  ;;  %v9130_v37 = vld [vmem:[#allocation12] sm:$0xff] }
0x1061   :  { %2625 = vmatpush.msrb.mxu2 %v9130_v37 }
0x1062   :  { %2984 = vmatpush.msrb.mxu0 %v8701_v27  ;;  %v9134_v27 = vld [vmem:[#allocation17] sm:$0xff] }
0x1063   :  { %6827 = vmatmul.msk.f32.vlgmr.msra.gmra.mxu0 %vm323_vm1, %v2784_v45  ;;  %2745 = vmatpush.msrb.mxu1 %v9134_v27 }
0x1064   :  { %3096 = vmatpush.msra.mxu0 %v8735_v17 }
0x1065   :  { %2856 = vmatpush.msra.mxu1 %v8573_v30 }
0x1066   :  { %3097 = vmatpush.msra.mxu0 %v8747_v55 }
0x1067   :  { %2857 = vmatpush.msra.mxu1 %v8579_v61 }
0x1068   :  { %3098 = vmatpush.msra.mxu0 %v8759_v34 }
0x1069   :  { %2858 = vmatpush.msra.mxu1 %v8586_v31 }
0x106a   :  { %3099 = vmatpush.msra.mxu0 %v8769_v8 }
0x106b   :  { %2859 = vmatpush.msra.mxu1 %v8595_v3 }
0x106c   :  { %3100 = vmatpush.msra.mxu0 %v8783_v9 }
0x106e   :  { %3101 = vmatpush.msra.mxu0 %v8793_v14 }
0x1070   :  { %3102 = vmatpush.msra.mxu0 %v8805_v40 }
0x1072   :  { %3103 = vmatpush.msra.mxu0 %v8817_v44 }
0x1074   :  { %3104 = vmatpush.msra.mxu0 %v8831_v48 }
0x1076   :  { %3105 = vmatpush.msra.mxu0 %v8843_v20 }
0x1078   :  { %3106 = vmatpush.msra.mxu0 %v8855_v52 }
0x107a   :  { %3107 = vmatpush.msra.mxu0 %v8867_v10 }
0x107c   :  { %3108 = vmatpush.msra.mxu0 %v8879_v54 }
0x107e   :  { %3109 = vmatpush.msra.mxu0 %v8891_v33 }
0x1080   :  { %3110 = vmatpush.msra.mxu0 %v8901_v56 }
0x1082   :  { %3111 = vmatpush.msra.mxu0 %v8913_v50 }
0x10b8   :  { %v2420_v39 = vpop.f32.mrf.mxu0 }
0x10ba   :  { %v2442_v50 = vpop.f32.mrf.mxu1 }
0x10bb   :  { %v2594_v34 = vrot.slane %v2442_v50, 7 }
0x10bd   :  { %v2595_v14 = vsel %vm1024_vm11, %v2594_v34, %v2420_v39 }
0x10c0   :  { %v2464_v17 = vpop.f32.mrf.mxu0 }
0x10c1   :  { %v2596_v8 = vrot.slane %v2464_v17, 6 }
0x10c2   :  { %v2486_v55 = vpop.f32.mrf.mxu1 }
0x10c3   :  { %v2598_v40 = vrot.slane %v2486_v55, 5  ;;  %v2597_v48 = vsel %vm1027_vm12, %v2596_v8, %v2595_v14 }
0x10c5   :  { %v2599_v20 = vsel %vm1030_vm13, %v2598_v40, %v2597_v48 }
0x10c8   :  { %v2508_v9 = vpop.f32.mrf.mxu0 }
0x10c9   :  { %v2600_v30 = vrot.slane %v2508_v9, 4  ;;  %v6981_v9 = vld [vmem:[%s10920_s11] ss:$0 sm:$0xff] }
0x10ca   :  { %v2530_v44 = vpop.f32.mrf.mxu1 }
0x10cb   :  { %v2602_v61 = vrot.slane %v2530_v44, 3  ;;  %v2601_v52 = vsel %vm1033_vm14, %v2600_v30, %v2599_v20 }
0x10cd   :  { %v2603_v3 = vsel %vm1036_vm15, %v2602_v61, %v2601_v52 }
0x10d0   :  { %v2552_v31 = vpop.f32.mrf.mxu0 }
0x10d1   :  { %v2604_v10 = vrot.slane %v2552_v31, 2 }
0x10d2   :  { %v2574_v54 = vpop.f32.mrf.mxu1 }
0x10d3   :  { %v2605_v33 = vsel %vm1039_vm0, %v2604_v10, %v2603_v3  ;;  %v2606_v56 = vrot.slane %v2574_v54, 1 }
0x10d5   :  { %v2607_v16 = vsel %vm11173_vm3, %v2606_v56, %v2605_v33 }
0x10d6   :  { %6818 = vmatmul.msk.f32.vlgmr.msrb.gmra.mxu2 %vm323_vm1, %v2607_v16  ;;  %6822 = vmatmul.msk.f32.vlgmr.msrb.gmra.mxu1 %vm323_vm1, %v2607_v16 }
0x10d7   :  { %6826 = vmatmul.msk.f32.vlgmr.msrb.gmra.mxu3 %vm323_vm1, %v2607_v16  ;;  %3001 = vmatpush.msrb.mxu1 %v8668_v32  ;;  %v11175_v32 = vld [vmem:[#allocation38_spill] sm:$0xff] }
0x10d8   :  { %3050 = vmatpush.msrb.mxu3 %v8607_v12  ;;  %v9169_v12 = vadd.f32 %v9007_v47, %v8622_v2  ;;  %v11178_v2 = vld [vmem:[#allocation41_spill] sm:$0xff] }
0x10d9   :  { %3002 = vmatpush.msrb.mxu1 %v8682_v24  ;;  %v11176_v24 = vld [vmem:[#allocation39_spill] sm:$0xff] }
0x10da   :  { %3051 = vmatpush.msrb.mxu3 %v8612_v13  ;;  %v11174_v13 = vld [vmem:[#allocation37_spill] sm:$0xff] }
0x10db   :  { %3003 = vmatpush.msrb.mxu1 %v8696_v26  ;;  %v11177_v26 = vld [vmem:[#allocation40_spill] sm:$0xff] }
0x10dd   :  { %3004 = vmatpush.msrb.mxu1 %v8708_v28  ;;  %v11179_v28 = vld [vmem:[#allocation42_spill] sm:$0xff] }
0x10de   :  { %6828 = vmatmul.msk.f32.vlgmr.msra.gmra.mxu1 %vm323_vm1, %v8724_v49  ;;  %v11180_v49 = vld [vmem:[#allocation28_spill] sm:$0xff] }
0x10df   :  { %6831 = vmatmul.msk.f32.vlgmr.msra.gmra.mxu3 %vm570_vm6, %v9007_v47  ;;  %3116 = vmatpush.msra.mxu1 %v8740_v41  ;;  %v11181_v41 = vld [vmem:[#allocation29_spill] sm:$0xff] }
0x10e0   :  { %3222 = vmatpush.msra.mxu3 %v8968_v63  ;;  %v2647_v63 = vpop.f32.mrf.mxu3 }
0x10e1   :  { %3117 = vmatpush.msra.mxu1 %v8752_v4  ;;  %v11182_v4 = vld [vmem:[#allocation30_spill] sm:$0xff] }
0x10e2   :  { %3223 = vmatpush.msra.mxu3 %v8980_v22 }
0x10e3   :  { %3118 = vmatpush.msra.mxu1 %v8764_v36  ;;  %v11183_v36 = vld [vmem:[#allocation46_spill] sm:$0xff] }
0x10e5   :  { %3119 = vmatpush.msra.mxu1 %v8776_v43  ;;  %v11184_v43 = vld [vmem:[#allocation52_spill] sm:$0xff] }
0x10e7   :  { %6835 = vmatmul.msk.f32.vlgmr.msrb.gmra.mxu3 %vm570_vm6, %v9169_v12  ;;  %3120 = vmatpush.msra.mxu1 %v8788_v11  ;;  %v2671_v11 = vpop.f32.mrf.mxu0 }
0x10e8   :  { %3266 = vmatpush.msrb.mxu3 %v8992_v59 }
0x10e9   :  { %3121 = vmatpush.msra.mxu1 %v11174_v13 }
0x10ea   :  { %3267 = vmatpush.msrb.mxu3 %v9002_v6 }
0x10eb   :  { %3122 = vmatpush.msra.mxu1 %v11175_v32 }
0x10ed   :  { %3123 = vmatpush.msra.mxu1 %v11176_v24 }
0x10ef   :  { %3124 = vmatpush.msra.mxu1 %v11177_v26  ;;  %v2837_v39 = vpop.f32.mrf.mxu0 }
0x10f1   :  { %3125 = vmatpush.msra.mxu1 %v11178_v2 }
0x10f3   :  { %3126 = vmatpush.msra.mxu1 %v11179_v28 }
0x10f5   :  { %3127 = vmatpush.msra.mxu1 %v11180_v49 }
0x10f7   :  { %3128 = vmatpush.msra.mxu1 %v11181_v41 }
0x10f9   :  { %3129 = vmatpush.msra.mxu1 %v11182_v4 }
0x10fb   :  { %3130 = vmatpush.msra.mxu1 %v11183_v36 }
0x10fd   :  { %3131 = vmatpush.msra.mxu1 %v11184_v43 }
0x1153   :  { %v9188_v22 = vpop.f32.mrf.mxu1 }
0x1159   :  { %v2627_v59 = vpop.f32.mrf.mxu2 }
0x115a   :  { %v2648_v6 = vadd.f32 %v2647_v63, %v2627_v59  ;;  %v2814_v45 = vpop.f32.mrf.mxu3 }
0x115b   :  { %v2838_v17 = vadd.f32 %v2837_v39, %v2814_v45  ;;  %v2861_v55 = vpop.f32.mrf.mxu1 }
0x115c   :  { %v2674_v50 = vadd.f32 %v2671_v11, %v2648_v6 }
0x115d   :  { %v2864_v8 = vadd.f32 %v2861_v55, %v2838_v17  ;;  %v11185_v17 = vld [vmem:[#allocation31_spill] sm:$0xff] }
0x115e   :  { %v2679_v34 = vadd.f32 %v6980_v7, %v2674_v50  ;;  %v6799_v50 = vld [vmem:[%s10933_s24 + $0x10] sm:$0xff] }
0x115f   :  { %v2869_v14 = vadd.f32 %v6981_v9, %v2864_v8  ;;  %2718 = vrot.lane.b32.xlu2 %v6799_v50, %s7488_s3  ;;  %v11186_v9 = vld [vmem:[#allocation32_spill] sm:$0xff] }
0x1160   :  { %7061 = vtanh.f32 %v2679_v34  ;;  %v6821_v48 = vmul.f32 -1.442695, %v2679_v34 }
0x1161   :  { %7063 = vtanh.f32 %v2869_v14  ;;  %v6829_v30 = vmul.f32 -1.442695, %v2869_v14 }
0x1162   :  { %7065 = vpow2.f32 %v6821_v48 }
0x1163   :  { %7067 = vpow2.f32 %v6829_v30  ;;  %v6824_v30 = vld [vmem:[%s10932_s23 + $0x18] sm:$0xff] }
0x1166   :  { %v7062_v40 = vpop.eup %7061 }
0x1167   :  { %2702 = vrot.lane.b32.xlu1 %v7062_v40, %s7486_s28  ;;  %v7064_v44 = vpop.eup %7063 }
0x1168   :  { %v7066_v20 = vpop.eup %7065 }
0x1169   :  { %v2683_v61 = vadd.f32 1.0, %v7066_v20  ;;  %v7068_v52 = vpop.eup %7067 }
0x116a   :  { %v2873_v31 = vadd.f32 1.0, %v7068_v52  ;;  %v9220_v52 = vld [vmem:[#allocation15 + $0x10] sm:$0xff] }
0x116b   :  { %7069 = vrcp.f32 %v2683_v61  ;;  %v2695_v24 = vand.u32 2147483648, %v2683_v61  ;;  %vm2689_vm5 = vweird.f32 %v2683_v61  ;;  %v2693_v26 = vand.u32 2147483647, %v2683_v61 }
0x116c   :  { %7071 = vrcp.f32 %v2873_v31  ;;  %v2885_v11 = vand.u32 2147483648, %v2873_v31  ;;  %vm2879_vm10 = vweird.f32 %v2873_v31  ;;  %v2883_v63 = vand.u32 2147483647, %v2873_v31 }
0x116d   :  { %v2696_v49 = vor.u32 1.1754944e-38, %v2695_v24  ;;  %vm2694_vm8 = vcmp.eq.f32.partialorder %v2693_v26, 8.507059e+37 }
0x116e   :  { %v2886_v6 = vor.u32 1.1754944e-38, %v2885_v11  ;;  %vm2884_vm3 = vcmp.eq.f32.partialorder %v2883_v63, 8.507059e+37  ;;  %v11193_v11 = vld [vmem:[#allocation57_spill] sm:$0xff] }
0x116f   :  { %2892 = vrot.lane.b32.xlu1 %v7064_v44, %s7486_s28 }
0x1171   :  { %v7070_v10 = vpop.eup %7069 }
0x1172   :  { %v2685_v3 = vmul.f32 %v7070_v10, %v2683_v61  ;;  %v7072_v33 = vpop.eup %7071  ;;  %vm2690_vm4 = vweird.f32 %v7070_v10  ;;  %v9218_v61 = vld [vmem:[#allocation15 + $0x18] sm:$0xff] }
0x1173   :  { %v2875_v16 = vmul.f32 %v7072_v33, %v2873_v31  ;;  %vm2691_vm7 = vmor %vm2689_vm5, %vm2690_vm4  ;;  %vm2880_vm9 = vweird.f32 %v7072_v33  ;;  %2767 = vmatpush.msra.mxu2 %v9218_v61  ;;  %v9223_v31 = vld [vmem:[#allocation15 + $0x8] sm:$0xff] }
0x1174   :  { %v2686_v54 = vsub.f32 1.0, %v2685_v3  ;;  %vm2881_vm2 = vmor %vm2879_vm10, %vm2880_vm9  ;;  %v11187_v3 = vld [vmem:[#allocation33_spill] sm:$0xff]  ;;  %vm11200_vm9 = vcmask 1047559  }
0x1175   :  { %v2876_v32 = vsub.f32 1.0, %v2875_v16  ;;  %2768 = vmatpush.msra.mxu2 %v9220_v52 }
0x1176   :  { %v2687_v56 = vmul.f32 %v7070_v10, %v2686_v54  ;;  %v11188_v54 = vld [vmem:[#allocation34_spill] sm:$0xff] }
0x1177   :  { %v2877_v28 = vmul.f32 %v7072_v33, %v2876_v32  ;;  %2769 = vmatpush.msra.mxu2 %v9223_v31 }
0x1178   :  { %v2688_v13 = vadd.f32 %v7070_v10, %v2687_v56 }
0x1179   :  { %v2878_v43 = vadd.f32 %v7072_v33, %v2877_v28 }
0x117a   :  { %v2692_v2 = vsel %vm2691_vm7, %v7070_v10, %v2688_v13  ;;  %v2722_v10 = vld [vmem:[#allocation15] sm:$0xff] }
0x117b   :  { %v2697_v4 = vsel %vm2694_vm8, %v2696_v49, %v2692_v2  ;;  %v2882_v59 = vsel %vm2881_vm2, %v7072_v33, %v2878_v43  ;;  %2770 = vmatpush.msra.mxu2 %v2722_v10  ;;  %v11189_v49 = vld [vmem:[#allocation35_spill] sm:$0xff]  ;;  %v11192_v43 = vld [vmem:[#allocation54_spill] sm:$0xff] }
0x117c   :  { %v2887_v7 = vsel %vm2884_vm3, %v2886_v6, %v2882_v59  ;;  %v2700_v55 = vmul.f32 %v2697_v4, %v11185_v17 }
0x117d   :  { %v2890_v14 = vmul.f32 %v2887_v7, %v11186_v9  ;;  %2938 = vmatpush.msrb.mxu2 %v11187_v3 }
0x117f   :  { %2939 = vmatpush.msrb.mxu2 %v11188_v54 }
0x11b9   :  { %v2719_v56 = vpop.permute.xlu2 %2718 }
0x11d9   :  { %v2703_v41 = vpop.permute.xlu1 %2702 }
0x11da   :  { %v2705_v36 = vmul.f32 %v2703_v41, %v2697_v4  ;;  %v11190_v41 = vld [vmem:[#allocation36_spill] sm:$0xff] }
0x11dc   :  { %2707 = vrot.lane.b32.xlu1 %v2705_v36, %s7487_s18 }
0x11e1   :  { %v2893_v45 = vpop.permute.xlu1 %2892 }
0x11e2   :  { %v2895_v39 = vmul.f32 %v2893_v45, %v2887_v7  ;;  %v11195_v45 = vld [vmem:[#allocation45_spill] sm:$0xff] }
0x11e4   :  { %2897 = vrot.lane.b32.xlu1 %v2895_v39, %s7487_s18 }
0x124e   :  { %v2708_v34 = vpop.permute.xlu1 %2707 }
0x124f   :  { %v9205_v8 = vadd.f32 %v2708_v34, %v2700_v55  ;;  %v11196_v34 = vld [vmem:[#allocation43_spill] sm:$0xff] }
0x1251   :  { %7073 = vtanh.f32 %v9205_v8 }
0x1256   :  { %v2898_v40 = vpop.permute.xlu1 %2897 }
0x1257   :  { %v7074_v44 = vpop.eup %7073  ;;  %v9209_v48 = vadd.f32 %v2898_v40, %v2890_v14  ;;  %v11197_v40 = vld [vmem:[#allocation48_spill] sm:$0xff] }
0x1258   :  { %2713 = vrot.lane.b32.xlu1 %v7074_v44, %s7486_s28 }
0x1259   :  { %7075 = vtanh.f32 %v9209_v48 }
0x125f   :  { %v7076_v20 = vpop.eup %7075 }
0x1260   :  { %2903 = vrot.lane.b32.xlu0 %v7076_v20, %s7486_s28  ;;  %2908 = vrot.lane.b32.xlu1 %v6824_v30, %s7488_s3 }
0x12ca   :  { %v2714_v33 = vpop.permute.xlu1 %2713 }
0x12cb   :  { %v2716_v16 = vmul.f32 %v2714_v33, %v2697_v4  ;;  %v11191_v4 = vld [vmem:[#allocation47_spill] sm:$0xff] }
0x12cd   :  { %v2721_v13 = vmul.f32 %v2719_v56, %v2716_v16 }
0x12cf   :  { %2751 = vrot.lane.b32.xlu1 %v2721_v13, %s7487_s18 }
0x12d2   :  { %v2904_v32 = vpop.permute.xlu0 %2903  ;;  %v2909_v24 = vpop.permute.xlu1 %2908 }
0x12d3   :  { %v2906_v26 = vmul.f32 %v2904_v32, %v2887_v7 }
0x12d5   :  { %v2911_v2 = vmul.f32 %v2909_v24, %v2906_v26 }
0x12d7   :  { %2965 = vrot.lane.b32.xlu1 %v2911_v2, %s7487_s18 }
0x1341   :  { %v9231_v28 = vpop.permute.xlu1 %2751 }
0x1342   :  { %6823 = vmatmul.msk.f32.vlgmr.msra.gmra.mxu2 %vm323_vm1, %v9231_v28 }
0x1343   :  { %3030 = vmatpush.msra.mxu2 %v11189_v49 }
0x1345   :  { %3031 = vmatpush.msra.mxu2 %v11190_v41 }
0x1349   :  { %v9237_v36 = vpop.permute.xlu1 %2965 }
0x134a   :  { %6830 = vmatmul.msk.f32.vlgmr.msrb.gmra.mxu2 %vm570_vm6, %v9007_v47  ;;  %6832 = vmatmul.msk.f32.vlgmr.msrb.gmra.mxu0 %vm323_vm1, %v9237_v36  ;;  %v11194_v47 = vld [vmem:[#allocation44_spill] sm:$0xff] }
0x134b   :  { %6833 = vmatmul.msk.f32.vlgmr.msrb.gmra.mxu1 %vm323_vm1, %v9237_v36  ;;  %3200 = vmatpush.msrb.mxu2 %v8962_v62  ;;  %v2961_v62 = vpop.f32.mrf.mxu3 }
0x134c   :  { %3425 = vmatpush.msrb.mxu1 %v11191_v4  ;;  %3405 = vmatpush.msrb.mxu0 %v9114_v5 }
0x134d   :  { %3201 = vmatpush.msrb.mxu2 %v8973_v53  ;;  %v6982_v53 = vld [vmem:[%s10931_s22] ss:$0 sm:$0xff] }
0x134e   :  { %3426 = vmatpush.msrb.mxu1 %v11192_v43  ;;  %3406 = vmatpush.msrb.mxu0 %v9120_v58 }
0x1350   :  { %3427 = vmatpush.msrb.mxu1 %v11193_v11  ;;  %3407 = vmatpush.msrb.mxu0 %v9126_v0 }
0x1352   :  { %6834 = vmatmul.msk.f32.vlgmr.msra.gmra.mxu2 %vm570_vm6, %v9169_v12  ;;  %3428 = vmatpush.msrb.mxu1 %v11194_v47 }
0x1353   :  { %3244 = vmatpush.msra.mxu2 %v8985_v21  ;;  %3408 = vmatpush.msrb.mxu0 %v9130_v37  ;;  %v3053_v6 = vpop.f32.mrf.mxu3 }
0x1355   :  { %3245 = vmatpush.msra.mxu2 %v8997_v15 }
0x13c5   :  { %v2772_v5 = vpop.f32.mrf.mxu2 }
0x13c6   :  { %v2773_v58 = vadd.f32 %v2772_v5, %v9188_v22 }
0x13c7   :  { %v2986_v37 = vpop.f32.mrf.mxu0 }
0x13c8   :  { %v2779_v0 = vadd.f32 %v6982_v53, %v2773_v58  ;;  %v3006_v63 = vpop.f32.mrf.mxu1  ;;  %v11199_v53 = vld [vmem:[#allocation49_spill] sm:$0xff]  ;;  %v9369_v58 = vld [vmem:[%s11076_s6 + $0x10] sm:$0xff] }
0x13c9   :  { %v3007_v59 = vadd.f32 %v3006_v63, %v2961_v62  ;;  %v9376_v63 = vld [vmem:[%s11076_s6 + $0x8] sm:$0xff] }
0x13ca   :  { %2781 = vst [vmem:[#allocation18 + $0x10] sm:$0xff] %v2779_v0  ;;  %v9371_v0 = vld [vmem:[#allocation8 + $0x18] sm:$0xff] }
0x13cb   :  { %v3057_v7 = vadd.f32 %v3053_v6, %v3007_v59  ;;  %v9379_v59 = vld [vmem:[#allocation8 + $0x8] sm:$0xff] }
0x13cd   :  { %v3061_v21 = vadd.f32 %v3057_v7, %v11195_v45  ;;  %v2941_v39 = vpop.f32.mrf.mxu2  ;;  %v9385_v7 = vld [vmem:[%s11076_s6] sm:$0xff] }
0x13ce   :  { %v2987_v15 = vadd.f32 %v2986_v37, %v2941_v39 }
0x13cf   :  { %7077 = vtanh.f32 %v3061_v21 }
0x13d5   :  { %v7078_v50 = vpop.eup %7077  ;;  %v3033_v17 = vpop.f32.mrf.mxu2 }
0x13d6   :  { %v3056_v55 = vadd.f32 %v3033_v17, %v2987_v15  ;;  %3132 = vmatmul.f32.vlgmr.msra.gmra.mxu1 %v7078_v50 }
0x13d8   :  { %v3060_v9 = vadd.f32 %v3056_v55, %v11196_v34 }
0x13da   :  { %7079 = vtanh.f32 %v3060_v9 }
0x13de   :  { %6845 = vmatmul.msk.f32.vlgmr.msrb.gmra.mxu1 %vm323_vm1, %v9237_v36 }
0x13e0   :  { %v7080_v22 = vpop.eup %7079 }
0x13e1   :  { %3112 = vmatmul.f32.vlgmr.msra.gmra.mxu0 %v7080_v22 }
0x13e2   :  { %3550 = vmatpush.msra.mxu0 %v9218_v61 }
0x13e4   :  { %3551 = vmatpush.msra.mxu0 %v9220_v52 }
0x13e6   :  { %3552 = vmatpush.msra.mxu0 %v9223_v31 }
0x13e8   :  { %3553 = vmatpush.msra.mxu0 %v2722_v10 }
0x1453   :  { %v3133_v30 = vpop.f32.mrf.mxu1 }
0x145e   :  { %v3113_v14 = vpop.f32.mrf.mxu0 }
0x145f   :  { %v3114_v44 = vadd.f32 %v11197_v40, %v3113_v14 }
0x1461   :  { %v3134_v20 = vadd.f32 %v3133_v30, %v3114_v44 }
0x1463   :  { %v3136_v3 = vsel %vm570_vm6, %v3134_v20, -inf }
0x1464   :  { %3137 = vmax.xlane.f32.xlu0 %v3136_v3 }
0x14d7   :  { %v3138_v54 = vpop.xlane.xlu0 %3137 }
0x14d8   :  { %v3139_v33 = vsub.f32 %v3134_v20, %v3138_v54 }
0x14da   :  { %v3140_v56 = vmul.f32 1.442695, %v3139_v33 }
0x14dc   :  { %7081 = vpow2.f32 %v3140_v56 }
0x14e2   :  { %v7082_v16 = vpop.eup %7081 }
0x14e3   :  { %v3142_v61 = vsel %vm570_vm6, %v7082_v16, 0.0 }
0x14e4   :  { %3143 = vadd.xlane.f32.xlu2 %v3142_v61  ;;  %v9402_v61 = vld [vmem:[#allocation9 + $0x8] sm:$0xff] }
0x1557   :  { %v3144_v52 = vpop.xlane.xlu2 %3143 }
0x1558   :  { %7083 = vrcp.f32 %v3144_v52  ;;  %v3156_v32 = vand.u32 2147483648, %v3144_v52  ;;  %v3154_v26 = vand.u32 2147483647, %v3144_v52  ;;  %vm3150_vm5 = vweird.f32 %v3144_v52 }
0x155a   :  { %v3157_v49 = vor.u32 1.1754944e-38, %v3156_v32  ;;  %vm3155_vm8 = vcmp.eq.f32.partialorder %v3154_v26, 8.507059e+37  ;;  %v6983_v32 = vld [vmem:[%s10928_s19] ss:$0 sm:$0xff] }
0x155e   :  { %v7084_v31 = vpop.eup %7083 }
0x155f   :  { %v3146_v10 = vmul.f32 %v7084_v31, %v3144_v52  ;;  %vm3151_vm4 = vweird.f32 %v7084_v31 }
0x1560   :  { %vm3152_vm7 = vmor %vm3150_vm5, %vm3151_vm4 }
0x1561   :  { %v3147_v13 = vsub.f32 1.0, %v3146_v10 }
0x1563   :  { %v3148_v24 = vmul.f32 %v7084_v31, %v3147_v13 }
0x1565   :  { %v3149_v2 = vadd.f32 %v7084_v31, %v3148_v24 }
0x1567   :  { %v3153_v41 = vsel %vm3152_vm7, %v7084_v31, %v3149_v2  ;;  %v3430_v31 = vpop.f32.mrf.mxu1 }
0x1568   :  { %v3158_v4 = vsel %vm3155_vm8, %v3157_v49, %v3153_v41 }
0x1569   :  { %v9273_v43 = vmul.f32 %v7082_v16, %v3158_v4  ;;  %v9397_v16 = vld [vmem:[#allocation9 + $0x18] sm:$0xff] }
0x156b   :  { %3566 = vst.msk [vmem:[#allocation19 + $0x18] sm:$0xff] %vm570_vm6, %v9273_v43  ;;  %6836 = vmatmul.msk.f32.vlgmr.msrb.gmra.mxu2 %vm570_vm6, %v9273_v43  ;;  %v3161_v11 = vrot.slane %v9273_v43, 1  ;;  %v3162_v47 = vrot.slane %v9273_v43, 2  ;;  %v3163_v62 = vrot.slane %v9273_v43, 3  ;;  %v9412_v52 = vadd.f32 %v9273_v43, %v9169_v12 }
0x156c   :  { %3288 = vmatpush.msrb.mxu2 %v9012_v23  ;;  %v11198_v23 = vld [vmem:[#allocation50_spill] sm:$0xff] }
0x156d   :  { %6837 = vmatmul.msk.f32.vlgmr.msra.gmra.mxu3 %vm570_vm6, %v3161_v11  ;;  %v6984_v11 = vld [vmem:[%s10920_s11] ss:$0 sm:$0xff] }
0x156e   :  { %3310 = vmatpush.msra.mxu3 %v9022_v51  ;;  %3289 = vmatpush.msrb.mxu2 %v9027_v29  ;;  %v3164_v51 = vrot.slane %v9273_v43, 4  ;;  %v3165_v29 = vrot.slane %v9273_v43, 5 }
0x1570   :  { %3311 = vmatpush.msra.mxu3 %v9034_v18  ;;  %v3166_v18 = vrot.slane %v9273_v43, 6 }
0x1573   :  { %6838 = vmatmul.msk.f32.vlgmr.msra.gmra.mxu2 %vm570_vm6, %v3162_v47 }
0x1574   :  { %3332 = vmatpush.msra.mxu2 %v9043_v42  ;;  %v9306_v42 = vld [vmem:[%s11075_s13 + $0x18] sm:$0xff] }
0x1575   :  { %6839 = vmatmul.msk.f32.vlgmr.msrb.gmra.mxu3 %vm570_vm6, %v3163_v62 }
0x1576   :  { %3354 = vmatpush.msrb.mxu3 %v9050_v35  ;;  %3333 = vmatpush.msra.mxu2 %v11198_v23  ;;  %v3167_v35 = vrot.slane %v9273_v43, 7 }
0x1578   :  { %3355 = vmatpush.msrb.mxu3 %v11199_v53 }
0x157b   :  { %6840 = vmatmul.msk.f32.vlgmr.msrb.gmra.mxu2 %vm570_vm6, %v3164_v51 }
0x157c   :  { %3449 = vmatpush.msrb.mxu2 %v9068_v57  ;;  %v9315_v57 = vld [vmem:[%s11075_s13 + $0x10] sm:$0xff] }
0x157d   :  { %6841 = vmatmul.msk.f32.vlgmr.msra.gmra.mxu3 %vm570_vm6, %v3165_v29 }
0x157e   :  { %3450 = vmatpush.msrb.mxu2 %v9072_v38  ;;  %3525 = vmatpush.msra.mxu3 %v9116_v19  ;;  %v9329_v38 = vld [vmem:[%s11075_s13] sm:$0xff]  ;;  %v9339_v19 = vld [vmem:[%s11074_s21 + $0x18] sm:$0xff] }
0x157f   :  { %3592 = vmatpush.msra.mxu1 %v9339_v19 }
0x1580   :  { %3451 = vmatpush.msrb.mxu2 %v9076_v25  ;;  %3526 = vmatpush.msra.mxu3 %v9122_v60  ;;  %v3567_v25 = vld [vmem:[#allocation2 + $0x20] sm:$0xff]  ;;  %v9345_v60 = vld [vmem:[%s11074_s21 + $0x10] sm:$0xff] }
0x1581   :  { %3593 = vmatpush.msra.mxu1 %v9345_v60 }
0x1582   :  { %3452 = vmatpush.msrb.mxu2 %v9079_v46  ;;  %3527 = vmatpush.msra.mxu3 %v9128_v1  ;;  %v9323_v46 = vld [vmem:[%s11075_s13 + $0x8] sm:$0xff] }
0x1583   :  { %6842 = vmatmul.msk.f32.vlgmr.msra.gmra.mxu2 %vm570_vm6, %v3166_v18  ;;  %v9351_v1 = vld [vmem:[%s11074_s21 + $0x8] sm:$0xff] }
0x1584   :  { %3615 = vmatpush.msra.mxu2 %v9306_v42  ;;  %3528 = vmatpush.msra.mxu3 %v9134_v27  ;;  %v9357_v27 = vld [vmem:[%s11074_s21] sm:$0xff] }
0x1585   :  { %6843 = vmatmul.msk.f32.vlgmr.msrb.gmra.mxu3 %vm570_vm6, %v3167_v35  ;;  %3594 = vmatpush.msra.mxu1 %v9351_v1 }
0x1586   :  { %3616 = vmatpush.msra.mxu2 %v9315_v57 }
0x1587   :  { %3595 = vmatpush.msra.mxu1 %v9357_v27 }
0x1588   :  { %3617 = vmatpush.msra.mxu2 %v9323_v46 }
0x1589   :  { %3741 = vmatpush.msrb.mxu1 %v9371_v0 }
0x158a   :  { %3618 = vmatpush.msra.mxu2 %v9329_v38 }
0x158b   :  { %6846 = vmatmul.msk.f32.vlgmr.msrb.gmra.mxu2 %vm323_vm1, %v9231_v28  ;;  %v9363_v28 = vld [vmem:[%s11076_s6 + $0x18] sm:$0xff]  ;;  %3742 = vmatpush.msrb.mxu1 %v9379_v59 }
0x158c   :  { %3639 = vmatpush.msrb.mxu3 %v9363_v28 }
0x158e   :  { %3640 = vmatpush.msrb.mxu3 %v9369_v58 }
0x1590   :  { %3641 = vmatpush.msrb.mxu3 %v9376_v63 }
0x1592   :  { %3642 = vmatpush.msrb.mxu3 %v9385_v7 }
0x1593   :  { %6853 = vmatmul.msk.f32.vlgmr.msra.gmra.mxu2 %vm323_vm1, %v3567_v25 }
0x15ee   :  { %v3203_v5 = vpop.f32.mrf.mxu2 }
0x15f0   :  { %v3225_v6 = vpop.f32.mrf.mxu3 }
0x15f1   :  { %v3377_v39 = vrot.slane %v3225_v6, 7 }
0x15f3   :  { %v3378_v50 = vsel %vm1024_vm11, %v3377_v39, %v3203_v5 }
0x15f6   :  { %v3247_v45 = vpop.f32.mrf.mxu2 }
0x15f7   :  { %v3379_v37 = vrot.slane %v3247_v45, 6 }
0x15f8   :  { %v3269_v21 = vpop.f32.mrf.mxu3 }
0x15f9   :  { %v3381_v17 = vrot.slane %v3269_v21, 5  ;;  %v3380_v34 = vsel %vm1027_vm12, %v3379_v37, %v3378_v50 }
0x15fb   :  { %v3382_v22 = vsel %vm1030_vm13, %v3381_v17, %v3380_v34 }
0x15fe   :  { %v3291_v15 = vpop.f32.mrf.mxu2 }
0x15ff   :  { %v3383_v9 = vrot.slane %v3291_v15, 4 }
0x1600   :  { %v3313_v55 = vpop.f32.mrf.mxu3 }
0x1601   :  { %v3385_v14 = vrot.slane %v3313_v55, 3  ;;  %v3384_v40 = vsel %vm1033_vm14, %v3383_v9, %v3382_v22 }
0x1603   :  { %v3386_v20 = vsel %vm1036_vm15, %v3385_v14, %v3384_v40 }
0x1606   :  { %v3335_v44 = vpop.f32.mrf.mxu2 }
0x1607   :  { %v3387_v30 = vrot.slane %v3335_v44, 2 }
0x1608   :  { %v3357_v3 = vpop.f32.mrf.mxu3 }
0x1609   :  { %v3388_v54 = vsel %vm1039_vm0, %v3387_v30, %v3386_v20  ;;  %v3389_v33 = vrot.slane %v3357_v3, 1 }
0x160b   :  { %v3390_v56 = vsel %vm11200_vm9, %v3389_v33, %v3388_v54 }
0x160c   :  { %6844 = vmatmul.msk.f32.vlgmr.msrb.gmra.mxu0 %vm323_vm1, %v3390_v56  ;;  %6848 = vmatmul.msk.f32.vlgmr.msra.gmra.mxu3 %vm323_vm1, %v3390_v56 }
0x160d   :  { %6852 = vmatmul.msk.f32.vlgmr.msra.gmra.mxu1 %vm323_vm1, %v3390_v56 }
0x160e   :  { %3833 = vmatpush.msra.mxu1 %v9397_v16  ;;  %v3454_v24 = vpop.f32.mrf.mxu2 }
0x1610   :  { %3834 = vmatpush.msra.mxu1 %v9402_v61 }
0x1614   :  { %6854 = vmatmul.msk.f32.vlgmr.msrb.gmra.mxu3 %vm323_vm1, %v9237_v36 }
0x1615   :  { %6857 = vmatmul.msk.f32.vlgmr.msrb.gmra.mxu1 %vm570_vm6, %v9273_v43 }
0x1616   :  { %v3620_v41 = vpop.f32.mrf.mxu2 }
0x161d   :  { %6861 = vmatmul.msk.f32.vlgmr.msra.gmra.mxu1 %vm570_vm6, %v9412_v52 }
0x1689   :  { %v3410_v10 = vpop.f32.mrf.mxu0 }
0x168a   :  { %v3431_v13 = vadd.f32 %v3430_v31, %v3410_v10  ;;  %v3597_v49 = vpop.f32.mrf.mxu1 }
0x168b   :  { %v3621_v4 = vadd.f32 %v3620_v41, %v3597_v49 }
0x168c   :  { %v3457_v26 = vadd.f32 %v3454_v24, %v3431_v13 }
0x168e   :  { %v3462_v36 = vadd.f32 %v6983_v32, %v3457_v26  ;;  %v6825_v32 = vld [vmem:[%s10933_s24 + $0x18] sm:$0xff] }
0x168f   :  { %v9419_v2 = vpop.f32.mrf.mxu3  ;;  %3501 = vrot.lane.b32.xlu0 %v6825_v32, %s7488_s3  ;;  %v9608_v32 = vld [vmem:[%s10924_s15 + $0xc0] sm:$0xff] }
0x1690   :  { %7085 = vtanh.f32 %v3462_v36  ;;  %v6847_v51 = vmul.f32 -1.442695, %v3462_v36  ;;  %11211 = vst [vmem:[#allocation40_spill] sm:$0xff] %v9608_v32 }
0x1696   :  { %v7086_v12 = vpop.eup %7085 }
0x1697   :  { %v3644_v47 = vpop.f32.mrf.mxu3  ;;  %3485 = vrot.lane.b32.xlu1 %v7086_v12, %s7486_s28 }
0x1698   :  { %v3647_v62 = vadd.f32 %v3644_v47, %v3621_v4  ;;  %v9449_v47 = vld [vmem:[%s10921_s12 + $0x30] sm:$0xff] }
0x1699   :  { %3764 = vmatpush.msrb.mxu2 %v9449_v47 }
0x169a   :  { %v3652_v23 = vadd.f32 %v6984_v11, %v3647_v62  ;;  %v6850_v11 = vld [vmem:[%s10932_s23 + $0x20] sm:$0xff] }
0x169c   :  { %7087 = vtanh.f32 %v3652_v23  ;;  %v6855_v18 = vmul.f32 -1.442695, %v3652_v23 }
0x169d   :  { %7089 = vpow2.f32 %v6847_v51 }
0x169e   :  { %7091 = vpow2.f32 %v6855_v18 }
0x16a2   :  { %v7088_v53 = vpop.eup %7087 }
0x16a3   :  { %3675 = vrot.lane.b32.xlu1 %v7088_v53, %s7486_s28  ;;  %v7090_v29 = vpop.eup %7089 }
0x16a4   :  { %v3466_v35 = vadd.f32 1.0, %v7090_v29  ;;  %v7092_v25 = vpop.eup %7091 }
0x16a5   :  { %v3656_v6 = vadd.f32 1.0, %v7092_v25 }
0x16a6   :  { %7093 = vrcp.f32 %v3466_v35  ;;  %v3478_v17 = vand.u32 2147483648, %v3466_v35  ;;  %vm3472_vm2 = vweird.f32 %v3466_v35  ;;  %v3476_v55 = vand.u32 2147483647, %v3466_v35 }
0x16a7   :  { %7095 = vrcp.f32 %v3656_v6  ;;  %v3668_v3 = vand.u32 2147483648, %v3656_v6  ;;  %vm3662_vm7 = vweird.f32 %v3656_v6  ;;  %v3666_v54 = vand.u32 2147483647, %v3656_v6 }
0x16a8   :  { %v3479_v22 = vor.u32 1.1754944e-38, %v3478_v17  ;;  %vm3477_vm4 = vcmp.eq.f32.partialorder %v3476_v55, 8.507059e+37  ;;  %v9505_v17 = vld [vmem:[%s10924_s15 + $0xf8] sm:$0xff] }
0x16a9   :  { %v3669_v56 = vor.u32 1.1754944e-38, %v3668_v3  ;;  %vm3667_vm9 = vcmp.eq.f32.partialorder %v3666_v54, 8.507059e+37  ;;  %v9510_v55 = vld [vmem:[%s10924_s15 + $0x78] sm:$0xff]  ;;  %v9560_v3 = vld [vmem:[%s10924_s15 + $0xe0] sm:$0xff] }
0x16aa   :  { %11207 = vst [vmem:[#allocation60_spill] sm:$0xff] %v9560_v3  ;;  %v9572_v54 = vld [vmem:[%s10924_s15 + $0xd8] sm:$0xff] }
0x16ab   :  { %11208 = vst [vmem:[#allocation37_spill] sm:$0xff] %v9572_v54 }
0x16ac   :  { %v7094_v5 = vpop.eup %7093 }
0x16ad   :  { %v3468_v45 = vmul.f32 %v7094_v5, %v3466_v35  ;;  %v7096_v37 = vpop.eup %7095  ;;  %vm3473_vm10 = vweird.f32 %v7094_v5 }
0x16ae   :  { %v3658_v50 = vmul.f32 %v7096_v37, %v3656_v6  ;;  %vm3474_vm3 = vmor %vm3472_vm2, %vm3473_vm10  ;;  %vm3663_vm5 = vweird.f32 %v7096_v37  ;;  %v9465_v6 = vld [vmem:[%s10921_s12 + $0x20] sm:$0xff] }
0x16af   :  { %v3469_v21 = vsub.f32 1.0, %v3468_v45  ;;  %vm3664_vm8 = vmor %vm3662_vm7, %vm3663_vm5  ;;  %v9470_v45 = vld [vmem:[%s10921_s12 + $0x28] sm:$0xff]  ;;  %3765 = vmatpush.msrb.mxu2 %v9465_v6  ;;  %vm11227_vm5 = vcmask 1047559  }
0x16b0   :  { %v3659_v9 = vsub.f32 1.0, %v3658_v50  ;;  %v9497_v50 = vld [vmem:[%s10921_s12 + $0x8] sm:$0xff] }
0x16b1   :  { %v3470_v39 = vmul.f32 %v7094_v5, %v3469_v21  ;;  %v9477_v21 = vld [vmem:[%s10921_s12 + $0x10] sm:$0xff] }
0x16b2   :  { %v3660_v30 = vmul.f32 %v7096_v37, %v3659_v9  ;;  %3766 = vmatpush.msrb.mxu2 %v9477_v21  ;;  %v9522_v9 = vld [vmem:[%s10924_s15 + $0x70] sm:$0xff] }
0x16b3   :  { %v3471_v15 = vadd.f32 %v7094_v5, %v3470_v39  ;;  %v9482_v39 = vld [vmem:[%s10921_s12 + $0x18] sm:$0xff] }
0x16b4   :  { %v3661_v20 = vadd.f32 %v7096_v37, %v3660_v30 }
0x16b5   :  { %v3475_v34 = vsel %vm3474_vm3, %v7094_v5, %v3471_v15  ;;  %v9460_v5 = vld [vmem:[#allocation8 + $0x10] sm:$0xff]  ;;  %v9490_v15 = vld [vmem:[%s10921_s12] sm:$0xff] }
0x16b6   :  { %v3480_v40 = vsel %vm3477_vm4, %v3479_v22, %v3475_v34  ;;  %v3665_v33 = vsel %vm3664_vm8, %v7096_v37, %v3661_v20  ;;  %11203 = vst [vmem:[#allocation59_spill] sm:$0xff] %v9460_v5  ;;  %3721 = vmatpush.msrb.mxu0 %v9460_v5  ;;  %v9484_v37 = vld [vmem:[#allocation8] sm:$0xff]  ;;  %3767 = vmatpush.msrb.mxu2 %v9490_v15  ;;  %v9515_v34 = vld [vmem:[%s10924_s15 + $0xf0] sm:$0xff]  ;;  %v9527_v22 = vld [vmem:[%s10924_s15 + $0xe8] sm:$0xff] }
0x16b7   :  { %v3670_v31 = vsel %vm3667_vm9, %v3669_v56, %v3665_v33  ;;  %v3483_v24 = vmul.f32 %v3480_v40, %v9205_v8  ;;  %11204 = vst [vmem:[#allocation53_spill] sm:$0xff] %v9484_v37  ;;  %v9555_v20 = vld [vmem:[%s10924_s15 + $0x68] sm:$0xff]  ;;  %v9579_v33 = vld [vmem:[%s10924_s15 + $0x58] sm:$0xff]  ;;  %v9584_v56 = vld [vmem:[%s10924_s15 + $0xd0] sm:$0xff] }
0x16b8   :  { %v3673_v41 = vmul.f32 %v3670_v31, %v9209_v48  ;;  %v9454_v48 = vld [vmem:[%s10921_s12 + $0x38] sm:$0xff]  ;;  %3722 = vmatpush.msrb.mxu0 %v9484_v37  ;;  %3879 = vmatpush.msra.mxu2 %v9510_v55  ;;  %11209 = vst [vmem:[#allocation38_spill] sm:$0xff] %v9584_v56  ;;  %v9713_v37 = vld [vmem:[#allocation11 + $0x18] sm:$0xff]  ;;  %v9717_v5 = vld [vmem:[#allocation11 + $0x10] sm:$0xff] }
0x16b9   :  { %3784 = vmatpush.msra.mxu3 %v9454_v48  ;;  %11220 = vst [vmem:[#allocation32_spill] sm:$0xff] %v9713_v37 }
0x16ba   :  { %3880 = vmatpush.msra.mxu2 %v9522_v9  ;;  %11221 = vst [vmem:[#allocation33_spill] sm:$0xff] %v9717_v5 }
0x16bb   :  { %3785 = vmatpush.msra.mxu3 %v9470_v45 }
0x16bc   :  { %3881 = vmatpush.msra.mxu2 %v9555_v20 }
0x16bd   :  { %3786 = vmatpush.msra.mxu3 %v9482_v39 }
0x16bf   :  { %3787 = vmatpush.msra.mxu3 %v9497_v50 }
0x16c1   :  { %3899 = vmatpush.msrb.mxu3 %v9505_v17 }
0x16c3   :  { %3900 = vmatpush.msrb.mxu3 %v9515_v34 }
0x16c5   :  { %3901 = vmatpush.msrb.mxu3 %v9527_v22 }
0x16c7   :  { %3902 = vmatpush.msrb.mxu3 %v9560_v3  ;;  %v9732_v3 = vld [vmem:[#allocation3] sm:$0xff] }
0x16c8   :  { %11223 = vst [vmem:[#allocation35_spill] sm:$0xff] %v9732_v3 }
0x16c9   :  { %3903 = vmatpush.msrb.mxu3 %v9572_v54 }
0x16cb   :  { %3904 = vmatpush.msrb.mxu3 %v9584_v56 }
0x1701   :  { %v3502_v23 = vpop.permute.xlu0 %3501 }
0x1709   :  { %v3486_v14 = vpop.permute.xlu1 %3485 }
0x170a   :  { %v3488_v44 = vmul.f32 %v3486_v14, %v3480_v40  ;;  %v9532_v14 = vld [vmem:[#allocation9 + $0x10] sm:$0xff] }
0x170b   :  { %11205 = vst [vmem:[#allocation55_spill] sm:$0xff] %v9532_v14 }
0x170c   :  { %3490 = vrot.lane.b32.xlu1 %v3488_v44, %s7487_s18  ;;  %v9538_v44 = vld [vmem:[#allocation9] sm:$0xff] }
0x170d   :  { %11206 = vst [vmem:[#allocation58_spill] sm:$0xff] %v9538_v44 }
0x1715   :  { %v3676_v10 = vpop.permute.xlu1 %3675 }
0x1716   :  { %v3678_v13 = vmul.f32 %v3676_v10, %v3670_v31  ;;  %v9596_v10 = vld [vmem:[%s10924_s15 + $0xc8] sm:$0xff] }
0x1717   :  { %11210 = vst [vmem:[#allocation39_spill] sm:$0xff] %v9596_v10  ;;  %3905 = vmatpush.msrb.mxu3 %v9596_v10 }
0x1718   :  { %3680 = vrot.lane.b32.xlu1 %v3678_v13, %s7487_s18  ;;  %v9603_v13 = vld [vmem:[%s10924_s15 + $0x48] sm:$0xff] }
0x1719   :  { %3906 = vmatpush.msrb.mxu3 %v9608_v32  ;;  %v9730_v32 = vld [vmem:[#allocation3 + $0x8] sm:$0xff] }
0x177e   :  { %v3491_v26 = vpop.permute.xlu1 %3490 }
0x177f   :  { %v9433_v36 = vadd.f32 %v3491_v26, %v3483_v24  ;;  %v9613_v24 = vld [vmem:[%s10924_s15 + $0x40] sm:$0xff]  ;;  %v9618_v26 = vld [vmem:[%s10924_s15 + $0xb8] sm:$0xff] }
0x1780   :  { %11212 = vst [vmem:[#allocation41_spill] sm:$0xff] %v9618_v26  ;;  %3907 = vmatpush.msrb.mxu3 %v9618_v26 }
0x1781   :  { %11201 = vst [vmem:[#allocation56_spill] sm:$0xff] %v9433_v36  ;;  %7097 = vtanh.f32 %v9433_v36  ;;  %v9722_v36 = vld [vmem:[#allocation11] sm:$0xff] }
0x1787   :  { %v7098_v49 = vpop.eup %7097 }
0x1788   :  { %3496 = vrot.lane.b32.xlu1 %v7098_v49, %s7486_s28  ;;  %v9627_v49 = vld [vmem:[%s10924_s15 + $0x38] sm:$0xff] }
0x178a   :  { %v3681_v12 = vpop.permute.xlu1 %3680 }
0x178b   :  { %v9438_v4 = vadd.f32 %v3681_v12, %v3673_v41  ;;  %v9632_v41 = vld [vmem:[%s10924_s15 + $0xb0] sm:$0xff] }
0x178c   :  { %11213 = vst [vmem:[#allocation42_spill] sm:$0xff] %v9632_v41  ;;  %3908 = vmatpush.msrb.mxu3 %v9632_v41  ;;  %v9639_v12 = vld [vmem:[%s10924_s15 + $0x30] sm:$0xff] }
0x178d   :  { %11202 = vst [vmem:[#allocation51_spill] sm:$0xff] %v9438_v4  ;;  %7099 = vtanh.f32 %v9438_v4  ;;  %v9719_v4 = vld [vmem:[#allocation11 + $0x8] sm:$0xff] }
0x178e   :  { %11222 = vst [vmem:[#allocation34_spill] sm:$0xff] %v9719_v4 }
0x1790   :  { %3691 = vrot.lane.b32.xlu1 %v6850_v11, %s7488_s3  ;;  %v9644_v11 = vld [vmem:[%s10924_s15 + $0xa8] sm:$0xff] }
0x1791   :  { %11214 = vst [vmem:[#allocation28_spill] sm:$0xff] %v9644_v11  ;;  %3909 = vmatpush.msrb.mxu3 %v9644_v11 }
0x1793   :  { %v7100_v8 = vpop.eup %7099 }
0x1794   :  { %3686 = vrot.lane.b32.xlu2 %v7100_v8, %s7486_s28  ;;  %v9651_v8 = vld [vmem:[%s10924_s15 + $0x28] sm:$0xff] }
0x17ee   :  { %v3687_v29 = vpop.permute.xlu2 %3686 }
0x17ef   :  { %v3689_v18 = vmul.f32 %v3687_v29, %v3670_v31  ;;  %v9589_v31 = vld [vmem:[%s10924_s15 + $0x50] sm:$0xff] }
0x17f0   :  { %v9680_v29 = vld [vmem:[%s10924_s15 + $0x90] sm:$0xff] }
0x17f1   :  { %11217 = vst [vmem:[#allocation46_spill] sm:$0xff] %v9680_v29 }
0x17fa   :  { %v3497_v62 = vpop.permute.xlu1 %3496 }
0x17fb   :  { %v3499_v53 = vmul.f32 %v3497_v62, %v3480_v40  ;;  %v9656_v62 = vld [vmem:[%s10924_s15 + $0xa0] sm:$0xff] }
0x17fc   :  { %11215 = vst [vmem:[#allocation29_spill] sm:$0xff] %v9656_v62  ;;  %3910 = vmatpush.msrb.mxu3 %v9656_v62 }
0x17fd   :  { %v3504_v51 = vmul.f32 %v3502_v23, %v3499_v53  ;;  %v9663_v23 = vld [vmem:[%s10924_s15 + $0x20] sm:$0xff]  ;;  %v9668_v53 = vld [vmem:[%s10924_s15 + $0x98] sm:$0xff] }
0x17fe   :  { %11216 = vst [vmem:[#allocation30_spill] sm:$0xff] %v9668_v53  ;;  %3911 = vmatpush.msrb.mxu3 %v9668_v53  ;;  %v3744_v53 = vpop.f32.mrf.mxu1 }
0x17ff   :  { %3534 = vrot.lane.b32.xlu1 %v3504_v51, %s7487_s18  ;;  %v9675_v51 = vld [vmem:[%s10924_s15 + $0x18] sm:$0xff] }
0x1800   :  { %3912 = vmatpush.msrb.mxu3 %v9680_v29 }
0x1802   :  { %v3692_v35 = vpop.permute.xlu1 %3691 }
0x1803   :  { %v3694_v25 = vmul.f32 %v3692_v35, %v3689_v18  ;;  %v9685_v18 = vld [vmem:[%s10924_s15 + $0x10] sm:$0xff]  ;;  %v9692_v35 = vld [vmem:[%s10924_s15 + $0x88] sm:$0xff] }
0x1804   :  { %11218 = vst [vmem:[#allocation52_spill] sm:$0xff] %v9692_v35  ;;  %3913 = vmatpush.msrb.mxu3 %v9692_v35 }
0x1805   :  { %3748 = vrot.lane.b32.xlu0 %v3694_v25, %s7487_s18  ;;  %v9697_v25 = vld [vmem:[%s10924_s15 + $0x8] sm:$0xff] }
0x1806   :  { %v3836_v26 = vpop.f32.mrf.mxu1 }
0x1871   :  { %v9534_v40 = vpop.permute.xlu1 %3534 }
0x1872   :  { %6849 = vmatmul.msk.f32.vlgmr.msra.gmra.mxu0 %vm323_vm1, %v9534_v40 }
0x1873   :  { %3813 = vmatpush.msra.mxu0 %v9532_v14  ;;  %v9711_v14 = vld [vmem:[%s10924_s15] sm:$0xff] }
0x1875   :  { %3814 = vmatpush.msra.mxu0 %v9538_v44  ;;  %v9702_v44 = vld [vmem:[%s10924_s15 + $0x80] sm:$0xff] }
0x1876   :  { %11219 = vst [vmem:[#allocation31_spill] sm:$0xff] %v9702_v44  ;;  %3914 = vmatpush.msrb.mxu3 %v9702_v44  ;;  %v6985_v44 = vld [vmem:[%s10931_s22] ss:$0 sm:$0xff] }
0x1877   :  { %v9542_v30 = vpop.permute.xlu0 %3748 }
0x1878   :  { %6858 = vmatmul.msk.f32.vlgmr.msrb.gmra.mxu2 %vm323_vm1, %v9542_v30  ;;  %6859 = vmatmul.msk.f32.vlgmr.msra.gmra.mxu3 %vm323_vm1, %v9542_v30 }
0x1879   :  { %4208 = vmatpush.msra.mxu3 %v9713_v37 }
0x187a   :  { %6856 = vmatmul.msk.f32.vlgmr.msrb.gmra.mxu0 %vm570_vm6, %v9273_v43  ;;  %v9567_v43 = vld [vmem:[%s10924_s15 + $0x60] sm:$0xff] }
0x187b   :  { %3882 = vmatpush.msra.mxu2 %v9567_v43  ;;  %4209 = vmatpush.msra.mxu3 %v9717_v5 }
0x187d   :  { %3883 = vmatpush.msra.mxu2 %v9579_v33  ;;  %4210 = vmatpush.msra.mxu3 %v9719_v4 }
0x187f   :  { %3884 = vmatpush.msra.mxu2 %v9589_v31  ;;  %4211 = vmatpush.msra.mxu3 %v9722_v36 }
0x1881   :  { %3885 = vmatpush.msra.mxu2 %v9603_v13 }
0x1882   :  { %6860 = vmatmul.msk.f32.vlgmr.msra.gmra.mxu0 %vm570_vm6, %v9412_v52 }
0x1883   :  { %3886 = vmatpush.msra.mxu2 %v9613_v24 }
0x1885   :  { %3887 = vmatpush.msra.mxu2 %v9627_v49 }
0x1887   :  { %3888 = vmatpush.msra.mxu2 %v9639_v12 }
0x1889   :  { %3889 = vmatpush.msra.mxu2 %v9651_v8 }
0x188b   :  { %3890 = vmatpush.msra.mxu2 %v9663_v23 }
0x188d   :  { %3891 = vmatpush.msra.mxu2 %v9675_v51 }
0x188f   :  { %3892 = vmatpush.msra.mxu2 %v9685_v18 }
0x1891   :  { %3893 = vmatpush.msra.mxu2 %v9697_v25 }
0x1893   :  { %3894 = vmatpush.msra.mxu2 %v9711_v14 }
0x18ef   :  { %v3555_v35 = vpop.f32.mrf.mxu0 }
0x18f0   :  { %v3556_v29 = vadd.f32 %v3555_v35, %v9419_v2  ;;  %v9782_v35 = vld [vmem:[%s11096_s5 + $0x38] sm:$0xff] }
0x18f2   :  { %v3562_v37 = vadd.f32 %v6985_v44, %v3556_v29 }
0x18f4   :  { %3564 = vst [vmem:[#allocation18 + $0x18] sm:$0xff] %v3562_v37 }
0x18f7   :  { %v3724_v62 = vpop.f32.mrf.mxu0 }
0x18fb   :  { %v3769_v11 = vpop.f32.mrf.mxu2  ;;  %v3789_v41 = vpop.f32.mrf.mxu3 }
0x18fc   :  { %v3790_v5 = vadd.f32 %v3789_v41, %v3744_v53  ;;  %v3770_v10 = vadd.f32 %v3769_v11, %v3724_v62  ;;  %v9763_v11 = vld [vmem:[%s11096_s5] sm:$0xff]  ;;  %v9770_v62 = vld [vmem:[%s11096_s5 + $0x10] sm:$0xff]  ;;  %v9775_v53 = vld [vmem:[%s11096_s5 + $0x28] sm:$0xff] }
0x18fe   :  { %v3840_v56 = vadd.f32 %v3836_v26, %v3790_v5  ;;  %v9744_v5 = vld [vmem:[#allocation6] sm:$0xff] }
0x18ff   :  { %v3816_v54 = vpop.f32.mrf.mxu0  ;;  %11224 = vst [vmem:[#allocation36_spill] sm:$0xff] %v9744_v5 }
0x1900   :  { %v3844_v4 = vadd.f32 %v9730_v32, %v3840_v56  ;;  %v3839_v2 = vadd.f32 %v3816_v54, %v3770_v10 }
0x1902   :  { %7101 = vtanh.f32 %v3844_v4  ;;  %v3843_v44 = vadd.f32 %v9732_v3, %v3839_v2  ;;  %v9787_v2 = vld [vmem:[%s11096_s5 + $0x20] sm:$0xff]  ;;  %v9802_v3 = vld [vmem:[%s11096_s5 + $0x48] sm:$0xff] }
0x1904   :  { %7103 = vtanh.f32 %v3843_v44  ;;  %v9792_v44 = vld [vmem:[%s11096_s5 + $0x30] sm:$0xff] }
0x1908   :  { %v7102_v37 = vpop.eup %7101 }
0x1909   :  { %3915 = vmatmul.f32.vlgmr.msrb.gmra.mxu3 %v7102_v37 }
0x190a   :  { %v7104_v29 = vpop.eup %7103  ;;  %4375 = vmatpush.msrb.mxu3 %v9339_v19 }
0x190b   :  { %3895 = vmatmul.f32.vlgmr.msra.gmra.mxu2 %v7104_v29 }
0x190c   :  { %4376 = vmatpush.msrb.mxu3 %v9345_v60 }
0x190e   :  { %4377 = vmatpush.msrb.mxu3 %v9351_v1 }
0x1910   :  { %4378 = vmatpush.msrb.mxu3 %v9357_v27 }
0x1911   :  { %6871 = vmatmul.msk.f32.vlgmr.msra.gmra.mxu3 %vm323_vm1, %v9542_v30 }
0x1912   :  { %4524 = vmatpush.msra.mxu3 %v9371_v0  ;;  %v9752_v0 = vld [vmem:[%s11096_s5 + $0x8] sm:$0xff] }
0x1913   :  { %3983 = vmatpush.msrb.mxu0 %v9752_v0 }
0x1914   :  { %4525 = vmatpush.msra.mxu3 %v9379_v59  ;;  %v9758_v59 = vld [vmem:[%s11096_s5 + $0x18] sm:$0xff] }
0x1915   :  { %4005 = vmatpush.msrb.mxu1 %v9758_v59  ;;  %3984 = vmatpush.msrb.mxu0 %v9763_v11 }
0x1917   :  { %4027 = vmatpush.msra.mxu0 %v9775_v53  ;;  %4006 = vmatpush.msrb.mxu1 %v9770_v62 }
0x1919   :  { %4049 = vmatpush.msra.mxu1 %v9782_v35  ;;  %4028 = vmatpush.msra.mxu0 %v9787_v2 }
0x191b   :  { %4050 = vmatpush.msra.mxu1 %v9792_v44 }
0x198c   :  { %v3916_v19 = vpop.f32.mrf.mxu3 }
0x198e   :  { %v3896_v4 = vpop.f32.mrf.mxu2 }
0x198f   :  { %v3897_v54 = vadd.f32 %v9744_v5, %v3896_v4 }
0x1991   :  { %v3917_v56 = vadd.f32 %v3916_v19, %v3897_v54 }
0x1993   :  { %v3919_v60 = vsel %vm570_vm6, %v3917_v56, -inf }
0x1994   :  { %3920 = vmax.xlane.f32.xlu1 %v3919_v60 }
0x1a07   :  { %v3921_v1 = vpop.xlane.xlu1 %3920 }
0x1a08   :  { %v3922_v10 = vsub.f32 %v3917_v56, %v3921_v1 }
0x1a0a   :  { %v3923_v27 = vmul.f32 1.442695, %v3922_v10 }
0x1a0c   :  { %7105 = vpow2.f32 %v3923_v27 }
0x1a12   :  { %v7106_v26 = vpop.eup %7105 }
0x1a13   :  { %v3925_v41 = vsel %vm570_vm6, %v7106_v26, 0.0 }
0x1a14   :  { %3926 = vadd.xlane.f32.xlu2 %v3925_v41 }
0x1a87   :  { %v3927_v37 = vpop.xlane.xlu2 %3926 }
0x1a88   :  { %7107 = vrcp.f32 %v3927_v37  ;;  %v3939_v19 = vand.u32 2147483648, %v3927_v37  ;;  %v3937_v60 = vand.u32 2147483647, %v3927_v37  ;;  %vm3933_vm2 = vweird.f32 %v3927_v37 }
0x1a8a   :  { %v3940_v10 = vor.u32 1.1754944e-38, %v3939_v19  ;;  %vm3938_vm4 = vcmp.eq.f32.partialorder %v3937_v60, 8.507059e+37  ;;  %v9833_v19 = vld [vmem:[%s11096_s5 + $0x68] sm:$0xff]  ;;  %v9840_v60 = vld [vmem:[%s11096_s5 + $0x78] sm:$0xff] }
0x1a8e   :  { %v7108_v29 = vpop.eup %7107 }
0x1a8f   :  { %v3929_v4 = vmul.f32 %v7108_v29, %v3927_v37  ;;  %vm3934_vm10 = vweird.f32 %v7108_v29 }
0x1a90   :  { %vm3935_vm3 = vmor %vm3933_vm2, %vm3934_vm10 }
0x1a91   :  { %v3930_v54 = vsub.f32 1.0, %v3929_v4  ;;  %v9824_v4 = vld [vmem:[%s11096_s5 + $0x50] sm:$0xff] }
0x1a93   :  { %v3931_v56 = vmul.f32 %v7108_v29, %v3930_v54 }
0x1a95   :  { %v3932_v1 = vadd.f32 %v7108_v29, %v3931_v56 }
0x1a97   :  { %v3936_v27 = vsel %vm3935_vm3, %v7108_v29, %v3932_v1  ;;  %v9812_v29 = vld [vmem:[%s11096_s5 + $0x58] sm:$0xff]  ;;  %v9845_v1 = vld [vmem:[%s11096_s5 + $0x60] sm:$0xff] }
0x1a98   :  { %v3941_v41 = vsel %vm3938_vm4, %v3940_v10, %v3936_v27  ;;  %11225 = vst [vmem:[#allocation47_spill] sm:$0xff] %v9845_v1  ;;  %v9852_v10 = vld [vmem:[%s11096_s5 + $0x70] sm:$0xff] }
0x1a99   :  { %v9797_v5 = vmul.f32 %v7106_v26, %v3941_v41  ;;  %v9817_v26 = vld [vmem:[%s11096_s5 + $0x40] sm:$0xff]  ;;  %11226 = vst [vmem:[#allocation54_spill] sm:$0xff] %v9852_v10  ;;  %v9858_v41 = vld [vmem:[#allocation14 + $0x18] sm:$0xff] }
0x1a9b   :  { %4349 = vst.msk [vmem:[#allocation19 + $0x20] sm:$0xff] %vm570_vm6, %v9797_v5  ;;  %6862 = vmatmul.msk.f32.vlgmr.msrb.gmra.mxu0 %vm570_vm6, %v9797_v5  ;;  %v3944_v37 = vrot.slane %v9797_v5, 1  ;;  %v3945_v54 = vrot.slane %v9797_v5, 2  ;;  %v3946_v56 = vrot.slane %v9797_v5, 3  ;;  %v3947_v27 = vrot.slane %v9797_v5, 4 }
0x1a9c   :  { %4071 = vmatpush.msrb.mxu0 %v9802_v3 }
0x1a9d   :  { %6863 = vmatmul.msk.f32.vlgmr.msrb.gmra.mxu1 %vm570_vm6, %v3944_v37  ;;  %v3948_v37 = vrot.slane %v9797_v5, 5 }
0x1a9e   :  { %4093 = vmatpush.msrb.mxu1 %v9812_v29  ;;  %4072 = vmatpush.msrb.mxu0 %v9817_v26 }
0x1aa0   :  { %4094 = vmatpush.msrb.mxu1 %v9824_v4 }
0x1aa3   :  { %6864 = vmatmul.msk.f32.vlgmr.msra.gmra.mxu0 %vm570_vm6, %v3945_v54  ;;  %v9862_v54 = vld [vmem:[#allocation14 + $0x10] sm:$0xff] }
0x1aa4   :  { %4115 = vmatpush.msra.mxu0 %v9833_v19 }
0x1aa5   :  { %6865 = vmatmul.msk.f32.vlgmr.msra.gmra.mxu1 %vm570_vm6, %v3946_v56  ;;  %v9866_v56 = vld [vmem:[#allocation14 + $0x8] sm:$0xff] }
0x1aa6   :  { %4137 = vmatpush.msra.mxu1 %v9840_v60  ;;  %4116 = vmatpush.msra.mxu0 %v9845_v1  ;;  %v9869_v1 = vld [vmem:[#allocation14] sm:$0xff] }
0x1aa8   :  { %4138 = vmatpush.msra.mxu1 %v9852_v10  ;;  %v3949_v10 = vrot.slane %v9797_v5, 6 }
0x1aab   :  { %6866 = vmatmul.msk.f32.vlgmr.msrb.gmra.mxu0 %vm570_vm6, %v3947_v27  ;;  %v3950_v27 = vrot.slane %v9797_v5, 7 }
0x1aac   :  { %4232 = vmatpush.msrb.mxu0 %v9858_v41 }
0x1aad   :  { %6867 = vmatmul.msk.f32.vlgmr.msrb.gmra.mxu1 %vm570_vm6, %v3948_v37 }
0x1aae   :  { %4233 = vmatpush.msrb.mxu0 %v9862_v54 }
0x1ab0   :  { %4234 = vmatpush.msrb.mxu0 %v9866_v56 }
0x1ab2   :  { %4235 = vmatpush.msrb.mxu0 %v9869_v1 }
0x1ab3   :  { %6868 = vmatmul.msk.f32.vlgmr.msra.gmra.mxu0 %vm570_vm6, %v3949_v10  ;;  %v4350_v10 = vld [vmem:[#allocation2 + $0x28] sm:$0xff] }
0x1ab4   :  { %4398 = vmatpush.msra.mxu0 %v9306_v42  ;;  %v9904_v42 = vld [vmem:[#allocation12 + $0x18] sm:$0xff] }
0x1ab5   :  { %6869 = vmatmul.msk.f32.vlgmr.msra.gmra.mxu1 %vm570_vm6, %v3950_v27  ;;  %4188 = vmatpush.msrb.mxu2 %v9904_v42  ;;  %v4213_v27 = vpop.f32.mrf.mxu3 }
0x1ab6   :  { %4399 = vmatpush.msra.mxu0 %v9315_v57  ;;  %v9906_v57 = vld [vmem:[#allocation17 + $0x18] sm:$0xff] }
0x1ab7   :  { %4308 = vmatpush.msrb.mxu1 %v9906_v57 }
0x1ab8   :  { %4400 = vmatpush.msra.mxu0 %v9323_v46  ;;  %v9910_v46 = vld [vmem:[#allocation12 + $0x10] sm:$0xff] }
0x1ab9   :  { %4189 = vmatpush.msrb.mxu2 %v9910_v46 }
0x1aba   :  { %4401 = vmatpush.msra.mxu0 %v9329_v38  ;;  %v9912_v38 = vld [vmem:[#allocation17 + $0x10] sm:$0xff] }
0x1abb   :  { %6872 = vmatmul.msk.f32.vlgmr.msrb.gmra.mxu0 %vm323_vm1, %v9534_v40  ;;  %4309 = vmatpush.msrb.mxu1 %v9912_v38 }
0x1abc   :  { %4547 = vmatpush.msrb.mxu0 %v9449_v47  ;;  %v9916_v47 = vld [vmem:[#allocation12 + $0x8] sm:$0xff] }
0x1abd   :  { %4190 = vmatpush.msrb.mxu2 %v9916_v47 }
0x1abe   :  { %4548 = vmatpush.msrb.mxu0 %v9465_v6  ;;  %v9918_v6 = vld [vmem:[#allocation17 + $0x8] sm:$0xff] }
0x1abf   :  { %4310 = vmatpush.msrb.mxu1 %v9918_v6 }
0x1ac0   :  { %4549 = vmatpush.msrb.mxu0 %v9477_v21  ;;  %v9922_v21 = vld [vmem:[#allocation12] sm:$0xff] }
0x1ac1   :  { %4191 = vmatpush.msrb.mxu2 %v9922_v21 }
0x1ac2   :  { %4550 = vmatpush.msrb.mxu0 %v9490_v15  ;;  %v9924_v15 = vld [vmem:[#allocation17] sm:$0xff] }
0x1ac3   :  { %6879 = vmatmul.msk.f32.vlgmr.msra.gmra.mxu0 %vm323_vm1, %v4350_v10  ;;  %4311 = vmatpush.msrb.mxu1 %v9924_v15 }
0x1ac4   :  { %4662 = vmatpush.msra.mxu0 %v9510_v55 }
0x1ac5   :  { %4422 = vmatpush.msra.mxu1 %v9363_v28 }
0x1ac6   :  { %4663 = vmatpush.msra.mxu0 %v9522_v9 }
0x1ac7   :  { %4423 = vmatpush.msra.mxu1 %v9369_v58 }
0x1ac8   :  { %4664 = vmatpush.msra.mxu0 %v9555_v20 }
0x1ac9   :  { %4424 = vmatpush.msra.mxu1 %v9376_v63 }
0x1aca   :  { %4665 = vmatpush.msra.mxu0 %v9567_v43 }
0x1acb   :  { %4425 = vmatpush.msra.mxu1 %v9385_v7 }
0x1acc   :  { %4666 = vmatpush.msra.mxu0 %v9579_v33 }
0x1ace   :  { %4667 = vmatpush.msra.mxu0 %v9589_v31 }
0x1ad0   :  { %4668 = vmatpush.msra.mxu0 %v9603_v13 }
0x1ad2   :  { %4669 = vmatpush.msra.mxu0 %v9613_v24 }
0x1ad4   :  { %4670 = vmatpush.msra.mxu0 %v9627_v49 }
0x1ad6   :  { %4671 = vmatpush.msra.mxu0 %v9639_v12 }
0x1ad8   :  { %4672 = vmatpush.msra.mxu0 %v9651_v8 }
0x1ada   :  { %4673 = vmatpush.msra.mxu0 %v9663_v23 }
0x1adc   :  { %4674 = vmatpush.msra.mxu0 %v9675_v51 }
0x1ade   :  { %4675 = vmatpush.msra.mxu0 %v9685_v18 }
0x1ae0   :  { %4676 = vmatpush.msra.mxu0 %v9697_v25 }
0x1ae2   :  { %4677 = vmatpush.msra.mxu0 %v9711_v14 }
0x1b18   :  { %v3986_v55 = vpop.f32.mrf.mxu0 }
0x1b1a   :  { %v4008_v9 = vpop.f32.mrf.mxu1 }
0x1b1b   :  { %v4160_v20 = vrot.slane %v4008_v9, 7 }
0x1b1d   :  { %v4161_v31 = vsel %vm1024_vm11, %v4160_v20, %v3986_v55 }
0x1b20   :  { %v4030_v14 = vpop.f32.mrf.mxu0 }
0x1b21   :  { %v4162_v43 = vrot.slane %v4030_v14, 6  ;;  %v6986_v14 = vld [vmem:[%s10928_s19] ss:$0 sm:$0xff] }
0x1b22   :  { %v4052_v40 = vpop.f32.mrf.mxu1 }
0x1b23   :  { %v4164_v13 = vrot.slane %v4052_v40, 5  ;;  %v4163_v49 = vsel %vm1027_vm12, %v4162_v43, %v4161_v31 }
0x1b25   :  { %v4165_v12 = vsel %vm1030_vm13, %v4164_v13, %v4163_v49  ;;  %v6987_v49 = vld [vmem:[%s10920_s11] ss:$0 sm:$0xff] }
0x1b28   :  { %v4074_v33 = vpop.f32.mrf.mxu0 }
0x1b29   :  { %v4166_v28 = vrot.slane %v4074_v33, 4 }
0x1b2a   :  { %v4096_v24 = vpop.f32.mrf.mxu1 }
0x1b2b   :  { %v4168_v58 = vrot.slane %v4096_v24, 3  ;;  %v4167_v8 = vsel %vm1033_vm14, %v4166_v28, %v4165_v12 }
0x1b2d   :  { %v4169_v7 = vsel %vm1036_vm15, %v4168_v58, %v4167_v8 }
0x1b30   :  { %v4118_v63 = vpop.f32.mrf.mxu0 }
0x1b31   :  { %v4170_v23 = vrot.slane %v4118_v63, 2 }
0x1b32   :  { %v4140_v51 = vpop.f32.mrf.mxu1 }
0x1b33   :  { %v4171_v18 = vsel %vm1039_vm0, %v4170_v23, %v4169_v7  ;;  %v4172_v25 = vrot.slane %v4140_v51, 1 }
0x1b35   :  { %v4173_v37 = vsel %vm11227_vm5, %v4172_v25, %v4171_v18 }
0x1b36   :  { %6870 = vmatmul.msk.f32.vlgmr.msrb.gmra.mxu2 %vm323_vm1, %v4173_v37  ;;  %6874 = vmatmul.msk.f32.vlgmr.msrb.gmra.mxu1 %vm323_vm1, %v4173_v37 }
0x1b37   :  { %6878 = vmatmul.msk.f32.vlgmr.msrb.gmra.mxu3 %vm323_vm1, %v4173_v37  ;;  %4567 = vmatpush.msrb.mxu1 %v9454_v48  ;;  %v11229_v48 = vld [vmem:[#allocation37_spill] sm:$0xff] }
0x1b38   :  { %4616 = vmatpush.msrb.mxu3 %v9397_v16  ;;  %v9959_v16 = vadd.f32 %v9797_v5, %v9412_v52  ;;  %v11234_v52 = vld [vmem:[#allocation42_spill] sm:$0xff] }
0x1b39   :  { %4568 = vmatpush.msrb.mxu1 %v9470_v45  ;;  %v11230_v45 = vld [vmem:[#allocation38_spill] sm:$0xff] }
0x1b3a   :  { %4617 = vmatpush.msrb.mxu3 %v9402_v61  ;;  %v11228_v61 = vld [vmem:[#allocation60_spill] sm:$0xff] }
0x1b3b   :  { %4569 = vmatpush.msrb.mxu1 %v9482_v39  ;;  %v11231_v39 = vld [vmem:[#allocation39_spill] sm:$0xff] }
0x1b3d   :  { %4570 = vmatpush.msrb.mxu1 %v9497_v50  ;;  %v11232_v50 = vld [vmem:[#allocation40_spill] sm:$0xff] }
0x1b3e   :  { %6880 = vmatmul.msk.f32.vlgmr.msra.gmra.mxu1 %vm323_vm1, %v9542_v30  ;;  %v11237_v30 = vld [vmem:[#allocation30_spill] sm:$0xff] }
0x1b3f   :  { %6883 = vmatmul.msk.f32.vlgmr.msra.gmra.mxu3 %vm570_vm6, %v9797_v5  ;;  %4682 = vmatpush.msra.mxu1 %v9505_v17  ;;  %v11233_v17 = vld [vmem:[#allocation41_spill] sm:$0xff] }
0x1b40   :  { %4788 = vmatpush.msra.mxu3 %v9758_v59  ;;  %v11238_v59 = vld [vmem:[#allocation46_spill] sm:$0xff] }
0x1b41   :  { %4683 = vmatpush.msra.mxu1 %v9515_v34  ;;  %v11235_v34 = vld [vmem:[#allocation28_spill] sm:$0xff] }
0x1b42   :  { %4789 = vmatpush.msra.mxu3 %v9770_v62  ;;  %v11239_v62 = vld [vmem:[#allocation52_spill] sm:$0xff] }
0x1b43   :  { %4684 = vmatpush.msra.mxu1 %v9527_v22  ;;  %v11236_v22 = vld [vmem:[#allocation29_spill] sm:$0xff] }
0x1b45   :  { %4685 = vmatpush.msra.mxu1 %v11228_v61 }
0x1b47   :  { %6887 = vmatmul.msk.f32.vlgmr.msrb.gmra.mxu3 %vm570_vm6, %v9959_v16  ;;  %4686 = vmatpush.msra.mxu1 %v11229_v48 }
0x1b48   :  { %4832 = vmatpush.msrb.mxu3 %v9782_v35  ;;  %v11240_v35 = vld [vmem:[#allocation31_spill] sm:$0xff] }
0x1b49   :  { %4687 = vmatpush.msra.mxu1 %v11230_v45 }
0x1b4a   :  { %4833 = vmatpush.msrb.mxu3 %v9792_v44  ;;  %v4237_v44 = vpop.f32.mrf.mxu0 }
0x1b4b   :  { %4688 = vmatpush.msra.mxu1 %v11231_v39 }
0x1b4d   :  { %4689 = vmatpush.msra.mxu1 %v11232_v50 }
0x1b4f   :  { %4690 = vmatpush.msra.mxu1 %v11233_v17 }
0x1b51   :  { %4691 = vmatpush.msra.mxu1 %v11234_v52 }
0x1b52   :  { %v4403_v20 = vpop.f32.mrf.mxu0 }
0x1b53   :  { %4692 = vmatpush.msra.mxu1 %v11235_v34 }
0x1b55   :  { %4693 = vmatpush.msra.mxu1 %v11236_v22 }
0x1b57   :  { %4694 = vmatpush.msra.mxu1 %v11237_v30 }
0x1b59   :  { %4695 = vmatpush.msra.mxu1 %v11238_v59 }
0x1b5b   :  { %4696 = vmatpush.msra.mxu1 %v11239_v62 }
0x1b5d   :  { %4697 = vmatpush.msra.mxu1 %v11240_v35 }
0x1bb3   :  { %v9978_v10 = vpop.f32.mrf.mxu1 }
0x1bb9   :  { %v4193_v55 = vpop.f32.mrf.mxu2 }
0x1bba   :  { %v4214_v9 = vadd.f32 %v4213_v27, %v4193_v55  ;;  %v4380_v40 = vpop.f32.mrf.mxu3 }
0x1bbb   :  { %v4404_v33 = vadd.f32 %v4403_v20, %v4380_v40  ;;  %v4427_v31 = vpop.f32.mrf.mxu1 }
0x1bbc   :  { %v4240_v43 = vadd.f32 %v4237_v44, %v4214_v9 }
0x1bbd   :  { %v4430_v24 = vadd.f32 %v4427_v31, %v4404_v33  ;;  %v6851_v31 = vld [vmem:[%s10933_s24 + $0x20] sm:$0xff] }
0x1bbe   :  { %v4245_v13 = vadd.f32 %v6986_v14, %v4240_v43  ;;  %4284 = vrot.lane.b32.xlu1 %v6851_v31, %s7488_s3 }
0x1bbf   :  { %v4435_v28 = vadd.f32 %v6987_v49, %v4430_v24 }
0x1bc0   :  { %7109 = vtanh.f32 %v4245_v13  ;;  %v6873_v8 = vmul.f32 -1.442695, %v4245_v13  ;;  %v11241_v13 = vld [vmem:[#allocation56_spill] sm:$0xff] }
0x1bc1   :  { %7111 = vtanh.f32 %v4435_v28  ;;  %v6881_v63 = vmul.f32 -1.442695, %v4435_v28 }
0x1bc2   :  { %7113 = vpow2.f32 %v6873_v8 }
0x1bc3   :  { %7115 = vpow2.f32 %v6881_v63 }
0x1bc6   :  { %v7110_v12 = vpop.eup %7109 }
0x1bc7   :  { %4268 = vrot.lane.b32.xlu0 %v7110_v12, %s7486_s28  ;;  %v7112_v58 = vpop.eup %7111  ;;  %v11242_v12 = vld [vmem:[#allocation51_spill] sm:$0xff] }
0x1bc8   :  { %v7114_v23 = vpop.eup %7113 }
0x1bc9   :  { %v4249_v7 = vadd.f32 1.0, %v7114_v23  ;;  %v7116_v51 = vpop.eup %7115 }
0x1bca   :  { %v4439_v18 = vadd.f32 1.0, %v7116_v51 }
0x1bcb   :  { %7117 = vrcp.f32 %v4249_v7  ;;  %v4261_v52 = vand.u32 2147483648, %v4249_v7  ;;  %vm4255_vm8 = vweird.f32 %v4249_v7  ;;  %v4259_v34 = vand.u32 2147483647, %v4249_v7 }
0x1bcc   :  { %7119 = vrcp.f32 %v4439_v18  ;;  %v4451_v55 = vand.u32 2147483648, %v4439_v18  ;;  %vm4445_vm3 = vweird.f32 %v4439_v18  ;;  %v4449_v9 = vand.u32 2147483647, %v4439_v18 }
0x1bcd   :  { %v4262_v59 = vor.u32 1.1754944e-38, %v4261_v52  ;;  %vm4260_vm10 = vcmp.eq.f32.partialorder %v4259_v34, 8.507059e+37 }
0x1bce   :  { %v4452_v40 = vor.u32 1.1754944e-38, %v4451_v55  ;;  %vm4450_vm5 = vcmp.eq.f32.partialorder %v4449_v9, 8.507059e+37  ;;  %v11248_v9 = vld [vmem:[#allocation33_spill] sm:$0xff] }
0x1bcf   :  { %4458 = vrot.lane.b32.xlu0 %v7112_v58, %s7486_s28 }
0x1bd1   :  { %v7118_v25 = vpop.eup %7117 }
0x1bd2   :  { %v4251_v37 = vmul.f32 %v7118_v25, %v4249_v7  ;;  %v7120_v48 = vpop.eup %7119  ;;  %vm4256_vm7 = vweird.f32 %v7118_v25  ;;  %v6876_v7 = vld [vmem:[%s10932_s23 + $0x28] sm:$0xff] }
0x1bd3   :  { %v4441_v39 = vmul.f32 %v7120_v48, %v4439_v18  ;;  %vm4257_vm9 = vmor %vm4255_vm8, %vm4256_vm7  ;;  %vm4446_vm2 = vweird.f32 %v7120_v48  ;;  %v10008_v18 = vld [vmem:[#allocation15 + $0x18] sm:$0xff] }
0x1bd4   :  { %v4252_v61 = vsub.f32 1.0, %v4251_v37  ;;  %vm4447_vm4 = vmor %vm4445_vm3, %vm4446_vm2  ;;  %4333 = vmatpush.msra.mxu2 %v10008_v18  ;;  %v10013_v37 = vld [vmem:[#allocation15 + $0x8] sm:$0xff]  ;;  %vm11254_vm2 = vcmask 1047559  }
0x1bd5   :  { %v4442_v17 = vsub.f32 1.0, %v4441_v39 }
0x1bd6   :  { %v4253_v45 = vmul.f32 %v7118_v25, %v4252_v61  ;;  %v4288_v61 = vld [vmem:[#allocation15] sm:$0xff] }
0x1bd7   :  { %v4443_v30 = vmul.f32 %v7120_v48, %v4442_v17 }
0x1bd8   :  { %v4254_v50 = vadd.f32 %v7118_v25, %v4253_v45  ;;  %v11244_v45 = vld [vmem:[#allocation53_spill] sm:$0xff] }
0x1bd9   :  { %v4444_v27 = vadd.f32 %v7120_v48, %v4443_v30 }
0x1bda   :  { %v4258_v22 = vsel %vm4257_vm9, %v7118_v25, %v4254_v50  ;;  %v10010_v25 = vld [vmem:[#allocation15 + $0x10] sm:$0xff] }
0x1bdb   :  { %v4263_v35 = vsel %vm4260_vm10, %v4262_v59, %v4258_v22  ;;  %v4448_v14 = vsel %vm4447_vm4, %v7120_v48, %v4444_v27  ;;  %4334 = vmatpush.msra.mxu2 %v10010_v25  ;;  %v11243_v48 = vld [vmem:[#allocation59_spill] sm:$0xff]  ;;  %v11246_v27 = vld [vmem:[#allocation58_spill] sm:$0xff] }
0x1bdc   :  { %v4453_v20 = vsel %vm4450_vm5, %v4452_v40, %v4448_v14  ;;  %v4266_v24 = vmul.f32 %v4263_v35, %v11241_v13  ;;  %v11249_v14 = vld [vmem:[#allocation34_spill] sm:$0xff] }
0x1bdd   :  { %v4456_v58 = vmul.f32 %v4453_v20, %v11242_v12  ;;  %4335 = vmatpush.msra.mxu2 %v10013_v37  ;;  %v11251_v12 = vld [vmem:[#allocation36_spill] sm:$0xff] }
0x1bdf   :  { %4336 = vmatpush.msra.mxu2 %v4288_v61 }
0x1be1   :  { %4504 = vmatpush.msrb.mxu2 %v11243_v48 }
0x1be3   :  { %4505 = vmatpush.msrb.mxu2 %v11244_v45 }
0x1c30   :  { %v4285_v50 = vpop.permute.xlu1 %4284 }
0x1c39   :  { %v4269_v62 = vpop.permute.xlu0 %4268 }
0x1c3a   :  { %v4271_v44 = vmul.f32 %v4269_v62, %v4263_v35 }
0x1c3c   :  { %4273 = vrot.lane.b32.xlu0 %v4271_v44, %s7487_s18  ;;  %v11245_v44 = vld [vmem:[#allocation55_spill] sm:$0xff] }
0x1c41   :  { %v4459_v43 = vpop.permute.xlu0 %4458 }
0x1c42   :  { %v4461_v33 = vmul.f32 %v4459_v43, %v4453_v20 }
0x1c44   :  { %4463 = vrot.lane.b32.xlu0 %v4461_v33, %s7487_s18 }
0x1cae   :  { %v4274_v49 = vpop.permute.xlu0 %4273 }
0x1caf   :  { %v9995_v28 = vadd.f32 %v4274_v49, %v4266_v24  ;;  %v11250_v24 = vld [vmem:[#allocation35_spill] sm:$0xff] }
0x1cb1   :  { %7121 = vtanh.f32 %v9995_v28 }
0x1cb6   :  { %v4464_v8 = vpop.permute.xlu0 %4463 }
0x1cb7   :  { %v7122_v63 = vpop.eup %7121  ;;  %v9999_v23 = vadd.f32 %v4464_v8, %v4456_v58 }
0x1cb8   :  { %4279 = vrot.lane.b32.xlu0 %v7122_v63, %s7486_s28 }
0x1cb9   :  { %7123 = vtanh.f32 %v9999_v23 }
0x1cbf   :  { %v7124_v51 = vpop.eup %7123 }
0x1cc0   :  { %4469 = vrot.lane.b32.xlu2 %v7124_v51, %s7486_s28  ;;  %4474 = vrot.lane.b32.xlu0 %v6876_v7, %s7488_s3 }
0x1d1a   :  { %v4470_v34 = vpop.permute.xlu2 %4469 }
0x1d1b   :  { %v4472_v30 = vmul.f32 %v4470_v34, %v4453_v20 }
0x1d2a   :  { %v4280_v39 = vpop.permute.xlu0 %4279 }
0x1d2b   :  { %v4282_v17 = vmul.f32 %v4280_v39, %v4263_v35  ;;  %v11247_v35 = vld [vmem:[#allocation32_spill] sm:$0xff] }
0x1d2d   :  { %v4287_v52 = vmul.f32 %v4285_v50, %v4282_v17 }
0x1d2f   :  { %4317 = vrot.lane.b32.xlu0 %v4287_v52, %s7487_s18 }
0x1d32   :  { %v4475_v22 = vpop.permute.xlu0 %4474 }
0x1d33   :  { %v4477_v59 = vmul.f32 %v4475_v22, %v4472_v30 }
0x1d37   :  { %4531 = vrot.lane.b32.xlu0 %v4477_v59, %s7487_s18 }
0x1da1   :  { %v10021_v62 = vpop.permute.xlu0 %4317 }
0x1da2   :  { %6875 = vmatmul.msk.f32.vlgmr.msra.gmra.mxu2 %vm323_vm1, %v10021_v62 }
0x1da3   :  { %4596 = vmatpush.msra.mxu2 %v11245_v44 }
0x1da5   :  { %4597 = vmatpush.msra.mxu2 %v11246_v27 }
0x1da9   :  { %v10027_v55 = vpop.permute.xlu0 %4531 }
0x1daa   :  { %6882 = vmatmul.msk.f32.vlgmr.msrb.gmra.mxu2 %vm570_vm6, %v9797_v5  ;;  %6884 = vmatmul.msk.f32.vlgmr.msrb.gmra.mxu0 %vm323_vm1, %v10027_v55  ;;  %v4527_v5 = vpop.f32.mrf.mxu3 }
0x1dab   :  { %6885 = vmatmul.msk.f32.vlgmr.msrb.gmra.mxu1 %vm323_vm1, %v10027_v55  ;;  %4766 = vmatpush.msrb.mxu2 %v9752_v0  ;;  %v6988_v0 = vld [vmem:[%s10931_s22] ss:$0 sm:$0xff] }
0x1dac   :  { %4991 = vmatpush.msrb.mxu1 %v11247_v35  ;;  %4971 = vmatpush.msrb.mxu0 %v9904_v42 }
0x1dad   :  { %4767 = vmatpush.msrb.mxu2 %v9763_v11 }
0x1dae   :  { %4992 = vmatpush.msrb.mxu1 %v11248_v9  ;;  %4972 = vmatpush.msrb.mxu0 %v9910_v46 }
0x1db0   :  { %4993 = vmatpush.msrb.mxu1 %v11249_v14  ;;  %4973 = vmatpush.msrb.mxu0 %v9916_v47 }
0x1db2   :  { %6886 = vmatmul.msk.f32.vlgmr.msra.gmra.mxu2 %vm570_vm6, %v9959_v16  ;;  %4994 = vmatpush.msrb.mxu1 %v9722_v36  ;;  %v4619_v20 = vpop.f32.mrf.mxu3 }
0x1db3   :  { %4810 = vmatpush.msra.mxu2 %v9775_v53  ;;  %4974 = vmatpush.msrb.mxu0 %v9922_v21 }
0x1db5   :  { %4811 = vmatpush.msra.mxu2 %v9787_v2 }
0x1e25   :  { %v4338_v11 = vpop.f32.mrf.mxu2 }
0x1e26   :  { %v4339_v42 = vadd.f32 %v4338_v11, %v9978_v10  ;;  %v10159_v11 = vld [vmem:[%s11076_s6 + $0x10] sm:$0xff] }
0x1e27   :  { %v4552_v21 = vpop.f32.mrf.mxu0 }
0x1e28   :  { %v4345_v46 = vadd.f32 %v6988_v0, %v4339_v42  ;;  %v4572_v47 = vpop.f32.mrf.mxu1  ;;  %v10161_v42 = vld [vmem:[#allocation8 + $0x18] sm:$0xff] }
0x1e29   :  { %v4573_v40 = vadd.f32 %v4572_v47, %v4527_v5  ;;  %v11253_v5 = vld [vmem:[#allocation54_spill] sm:$0xff]  ;;  %v10169_v47 = vld [vmem:[#allocation8 + $0x8] sm:$0xff] }
0x1e2a   :  { %4347 = vst [vmem:[#allocation18 + $0x20] sm:$0xff] %v4345_v46  ;;  %v10166_v46 = vld [vmem:[%s11076_s6 + $0x8] sm:$0xff] }
0x1e2b   :  { %v4623_v36 = vadd.f32 %v4619_v20, %v4573_v40  ;;  %v10175_v20 = vld [vmem:[%s11076_s6] sm:$0xff] }
0x1e2d   :  { %v4627_v53 = vadd.f32 %v4623_v36, %v9730_v32  ;;  %v4507_v43 = vpop.f32.mrf.mxu2 }
0x1e2e   :  { %v4553_v2 = vadd.f32 %v4552_v21, %v4507_v43 }
0x1e2f   :  { %7125 = vtanh.f32 %v4627_v53 }
0x1e35   :  { %v7126_v33 = vpop.eup %7125  ;;  %v4599_v31 = vpop.f32.mrf.mxu2 }
0x1e36   :  { %v4622_v13 = vadd.f32 %v4599_v31, %v4553_v2  ;;  %4698 = vmatmul.f32.vlgmr.msra.gmra.mxu1 %v7126_v33 }
0x1e38   :  { %v4626_v49 = vadd.f32 %v4622_v13, %v11250_v24 }
0x1e3a   :  { %7127 = vtanh.f32 %v4626_v49 }
0x1e3e   :  { %6897 = vmatmul.msk.f32.vlgmr.msrb.gmra.mxu1 %vm323_vm1, %v10027_v55 }
0x1e40   :  { %v7128_v10 = vpop.eup %7127 }
0x1e41   :  { %4678 = vmatmul.f32.vlgmr.msra.gmra.mxu0 %v7128_v10 }
0x1e42   :  { %5116 = vmatpush.msra.mxu0 %v10008_v18 }
0x1e44   :  { %5117 = vmatpush.msra.mxu0 %v10010_v25 }
0x1e46   :  { %5118 = vmatpush.msra.mxu0 %v10013_v37 }
0x1e48   :  { %5119 = vmatpush.msra.mxu0 %v4288_v61 }
0x1eb3   :  { %v4699_v8 = vpop.f32.mrf.mxu1 }
0x1ebe   :  { %v4679_v32 = vpop.f32.mrf.mxu0 }
0x1ebf   :  { %v4680_v58 = vadd.f32 %v11251_v12, %v4679_v32 }
0x1ec1   :  { %v4700_v63 = vadd.f32 %v4699_v8, %v4680_v58 }
0x1ec3   :  { %v4702_v7 = vsel %vm570_vm6, %v4700_v63, -inf }
0x1ec4   :  { %4703 = vmax.xlane.f32.xlu1 %v4702_v7 }
0x1f37   :  { %v4704_v51 = vpop.xlane.xlu1 %4703 }
0x1f38   :  { %v4705_v48 = vsub.f32 %v4700_v63, %v4704_v51 }
0x1f3a   :  { %v4706_v45 = vmul.f32 1.442695, %v4705_v48 }
0x1f3c   :  { %7129 = vpow2.f32 %v4706_v45 }
0x1f42   :  { %v7130_v39 = vpop.eup %7129 }
0x1f43   :  { %v4708_v18 = vsel %vm570_vm6, %v7130_v39, 0.0 }
0x1f44   :  { %4709 = vadd.xlane.f32.xlu2 %v4708_v18  ;;  %v10192_v18 = vld [vmem:[#allocation9 + $0x8] sm:$0xff] }
0x1fb7   :  { %v4710_v25 = vpop.xlane.xlu2 %4709 }
0x1fb8   :  { %7131 = vrcp.f32 %v4710_v25  ;;  %v4722_v17 = vand.u32 2147483648, %v4710_v25  ;;  %v4720_v34 = vand.u32 2147483647, %v4710_v25  ;;  %vm4716_vm8 = vweird.f32 %v4710_v25 }
0x1fba   :  { %v4723_v30 = vor.u32 1.1754944e-38, %v4722_v17  ;;  %vm4721_vm10 = vcmp.eq.f32.partialorder %v4720_v34, 8.507059e+37  ;;  %v6989_v17 = vld [vmem:[%s10928_s19] ss:$0 sm:$0xff] }
0x1fbe   :  { %v7132_v37 = vpop.eup %7131 }
0x1fbf   :  { %v4712_v61 = vmul.f32 %v7132_v37, %v4710_v25  ;;  %vm4717_vm7 = vweird.f32 %v7132_v37 }
0x1fc0   :  { %vm4718_vm9 = vmor %vm4716_vm8, %vm4717_vm7 }
0x1fc1   :  { %v4713_v50 = vsub.f32 1.0, %v4712_v61 }
0x1fc3   :  { %v4714_v52 = vmul.f32 %v7132_v37, %v4713_v50 }
0x1fc5   :  { %v4715_v22 = vadd.f32 %v7132_v37, %v4714_v52 }
0x1fc7   :  { %v4719_v59 = vsel %vm4718_vm9, %v7132_v37, %v4715_v22  ;;  %v4996_v37 = vpop.f32.mrf.mxu1 }
0x1fc8   :  { %v4724_v44 = vsel %vm4721_vm10, %v4723_v30, %v4719_v59 }
0x1fc9   :  { %v10063_v27 = vmul.f32 %v7130_v39, %v4724_v44  ;;  %v10187_v39 = vld [vmem:[#allocation9 + $0x18] sm:$0xff] }
0x1fcb   :  { %5132 = vst.msk [vmem:[#allocation19 + $0x28] sm:$0xff] %vm570_vm6, %v10063_v27  ;;  %6888 = vmatmul.msk.f32.vlgmr.msrb.gmra.mxu2 %vm570_vm6, %v10063_v27  ;;  %v4727_v35 = vrot.slane %v10063_v27, 1  ;;  %v4728_v9 = vrot.slane %v10063_v27, 2  ;;  %v4729_v14 = vrot.slane %v10063_v27, 3  ;;  %v10202_v25 = vadd.f32 %v10063_v27, %v9959_v16 }
0x1fcc   :  { %4854 = vmatpush.msrb.mxu2 %v9802_v3  ;;  %v11252_v3 = vld [vmem:[#allocation47_spill] sm:$0xff] }
0x1fcd   :  { %6889 = vmatmul.msk.f32.vlgmr.msra.gmra.mxu3 %vm570_vm6, %v4727_v35  ;;  %v6990_v35 = vld [vmem:[%s10920_s11] ss:$0 sm:$0xff] }
0x1fce   :  { %4876 = vmatpush.msra.mxu3 %v9812_v29  ;;  %4855 = vmatpush.msrb.mxu2 %v9817_v26  ;;  %v4730_v29 = vrot.slane %v10063_v27, 4  ;;  %v4731_v26 = vrot.slane %v10063_v27, 5 }
0x1fd0   :  { %4877 = vmatpush.msra.mxu3 %v9824_v4  ;;  %v4732_v4 = vrot.slane %v10063_v27, 6 }
0x1fd3   :  { %6890 = vmatmul.msk.f32.vlgmr.msra.gmra.mxu2 %vm570_vm6, %v4728_v9 }
0x1fd4   :  { %4898 = vmatpush.msra.mxu2 %v9833_v19  ;;  %v10096_v19 = vld [vmem:[%s11075_s13 + $0x18] sm:$0xff] }
0x1fd5   :  { %6891 = vmatmul.msk.f32.vlgmr.msrb.gmra.mxu3 %vm570_vm6, %v4729_v14 }
0x1fd6   :  { %4920 = vmatpush.msrb.mxu3 %v9840_v60  ;;  %4899 = vmatpush.msra.mxu2 %v11252_v3  ;;  %v4733_v60 = vrot.slane %v10063_v27, 7 }
0x1fd8   :  { %4921 = vmatpush.msrb.mxu3 %v11253_v5 }
0x1fdb   :  { %6892 = vmatmul.msk.f32.vlgmr.msrb.gmra.mxu2 %vm570_vm6, %v4730_v29 }
0x1fdc   :  { %5015 = vmatpush.msrb.mxu2 %v9858_v41  ;;  %v10105_v41 = vld [vmem:[%s11075_s13 + $0x10] sm:$0xff] }
0x1fdd   :  { %6893 = vmatmul.msk.f32.vlgmr.msra.gmra.mxu3 %vm570_vm6, %v4731_v26 }
0x1fde   :  { %5016 = vmatpush.msrb.mxu2 %v9862_v54  ;;  %5091 = vmatpush.msra.mxu3 %v9906_v57  ;;  %v10119_v54 = vld [vmem:[%s11075_s13] sm:$0xff]  ;;  %v10129_v57 = vld [vmem:[%s11074_s21 + $0x18] sm:$0xff] }
0x1fdf   :  { %5158 = vmatpush.msra.mxu1 %v10129_v57 }
0x1fe0   :  { %5017 = vmatpush.msrb.mxu2 %v9866_v56  ;;  %5092 = vmatpush.msra.mxu3 %v9912_v38  ;;  %v5133_v56 = vld [vmem:[#allocation2 + $0x30] sm:$0xff] }
0x1fe1   :  { %v10135_v38 = vld [vmem:[%s11074_s21 + $0x10] sm:$0xff] }
0x1fe2   :  { %5018 = vmatpush.msrb.mxu2 %v9869_v1  ;;  %5093 = vmatpush.msra.mxu3 %v9918_v6  ;;  %v10113_v1 = vld [vmem:[%s11075_s13 + $0x8] sm:$0xff] }
0x1fe3   :  { %6894 = vmatmul.msk.f32.vlgmr.msra.gmra.mxu2 %vm570_vm6, %v4732_v4  ;;  %5159 = vmatpush.msra.mxu1 %v10135_v38  ;;  %v10141_v6 = vld [vmem:[%s11074_s21 + $0x8] sm:$0xff] }
0x1fe4   :  { %5181 = vmatpush.msra.mxu2 %v10096_v19  ;;  %5094 = vmatpush.msra.mxu3 %v9924_v15  ;;  %v10147_v15 = vld [vmem:[%s11074_s21] sm:$0xff] }
0x1fe5   :  { %6895 = vmatmul.msk.f32.vlgmr.msrb.gmra.mxu3 %vm570_vm6, %v4733_v60  ;;  %5160 = vmatpush.msra.mxu1 %v10141_v6 }
0x1fe6   :  { %5182 = vmatpush.msra.mxu2 %v10105_v41 }
0x1fe7   :  { %5161 = vmatpush.msra.mxu1 %v10147_v15 }
0x1fe8   :  { %5183 = vmatpush.msra.mxu2 %v10113_v1 }
0x1fe9   :  { %5307 = vmatpush.msrb.mxu1 %v10161_v42 }
0x1fea   :  { %5184 = vmatpush.msra.mxu2 %v10119_v54 }
0x1feb   :  { %6898 = vmatmul.msk.f32.vlgmr.msrb.gmra.mxu2 %vm323_vm1, %v10021_v62  ;;  %v10153_v62 = vld [vmem:[%s11076_s6 + $0x18] sm:$0xff]  ;;  %5308 = vmatpush.msrb.mxu1 %v10169_v47 }
0x1fec   :  { %5205 = vmatpush.msrb.mxu3 %v10153_v62 }
0x1fee   :  { %5206 = vmatpush.msrb.mxu3 %v10159_v11 }
0x1ff0   :  { %5207 = vmatpush.msrb.mxu3 %v10166_v46 }
0x1ff2   :  { %5208 = vmatpush.msrb.mxu3 %v10175_v20 }
0x1ff3   :  { %6905 = vmatmul.msk.f32.vlgmr.msra.gmra.mxu2 %vm323_vm1, %v5133_v56 }
0x204e   :  { %v4769_v0 = vpop.f32.mrf.mxu2 }
0x2050   :  { %v4791_v40 = vpop.f32.mrf.mxu3 }
0x2051   :  { %v4943_v43 = vrot.slane %v4791_v40, 7 }
0x2053   :  { %v4944_v33 = vsel %vm1024_vm11, %v4943_v43, %v4769_v0 }
0x2056   :  { %v4813_v36 = vpop.f32.mrf.mxu2 }
0x2057   :  { %v4945_v21 = vrot.slane %v4813_v36, 6 }
0x2058   :  { %v4835_v53 = vpop.f32.mrf.mxu3 }
0x2059   :  { %v4947_v31 = vrot.slane %v4835_v53, 5  ;;  %v4946_v24 = vsel %vm1027_vm12, %v4945_v21, %v4944_v33 }
0x205b   :  { %v4948_v10 = vsel %vm1030_vm13, %v4947_v31, %v4946_v24 }
0x205e   :  { %v4857_v2 = vpop.f32.mrf.mxu2 }
0x205f   :  { %v4949_v49 = vrot.slane %v4857_v2, 4 }
0x2060   :  { %v4879_v13 = vpop.f32.mrf.mxu3 }
0x2061   :  { %v4951_v32 = vrot.slane %v4879_v13, 3  ;;  %v4950_v12 = vsel %vm1033_vm14, %v4949_v49, %v4948_v10 }
0x2063   :  { %v4952_v63 = vsel %vm1036_vm15, %v4951_v32, %v4950_v12 }
0x2066   :  { %v4901_v58 = vpop.f32.mrf.mxu2 }
0x2067   :  { %v4953_v8 = vrot.slane %v4901_v58, 2 }
0x2068   :  { %v4923_v7 = vpop.f32.mrf.mxu3 }
0x2069   :  { %v4954_v51 = vsel %vm1039_vm0, %v4953_v8, %v4952_v63  ;;  %v4955_v48 = vrot.slane %v4923_v7, 1 }
0x206b   :  { %v4956_v45 = vsel %vm11254_vm2, %v4955_v48, %v4954_v51 }
0x206c   :  { %6896 = vmatmul.msk.f32.vlgmr.msrb.gmra.mxu0 %vm323_vm1, %v4956_v45  ;;  %6900 = vmatmul.msk.f32.vlgmr.msra.gmra.mxu3 %vm323_vm1, %v4956_v45 }
0x206d   :  { %6904 = vmatmul.msk.f32.vlgmr.msra.gmra.mxu1 %vm323_vm1, %v4956_v45 }
0x206e   :  { %5399 = vmatpush.msra.mxu1 %v10187_v39  ;;  %v5020_v52 = vpop.f32.mrf.mxu2 }
0x2070   :  { %5400 = vmatpush.msra.mxu1 %v10192_v18 }
0x2074   :  { %6906 = vmatmul.msk.f32.vlgmr.msrb.gmra.mxu3 %vm323_vm1, %v10027_v55 }
0x2075   :  { %6909 = vmatmul.msk.f32.vlgmr.msrb.gmra.mxu1 %vm570_vm6, %v10063_v27 }
0x2076   :  { %v5186_v59 = vpop.f32.mrf.mxu2 }
0x207d   :  { %6913 = vmatmul.msk.f32.vlgmr.msra.gmra.mxu1 %vm570_vm6, %v10202_v25 }
0x20e9   :  { %v4976_v61 = vpop.f32.mrf.mxu0 }
0x20ea   :  { %v4997_v50 = vadd.f32 %v4996_v37, %v4976_v61  ;;  %v5163_v30 = vpop.f32.mrf.mxu1 }
0x20eb   :  { %v5187_v44 = vadd.f32 %v5186_v59, %v5163_v30 }
0x20ec   :  { %v5023_v34 = vadd.f32 %v5020_v52, %v4997_v50 }
0x20ee   :  { %v5028_v55 = vadd.f32 %v6989_v17, %v5023_v34  ;;  %v6877_v17 = vld [vmem:[%s10933_s24 + $0x28] sm:$0xff] }
0x20ef   :  { %v10209_v22 = vpop.f32.mrf.mxu3  ;;  %5067 = vrot.lane.b32.xlu1 %v6877_v17, %s7488_s3  ;;  %v10397_v17 = vld [vmem:[%s10924_s15 + $0x40] sm:$0xff] }
0x20f0   :  { %7133 = vtanh.f32 %v5028_v55  ;;  %v6899_v29 = vmul.f32 -1.442695, %v5028_v55 }
0x20f6   :  { %v7134_v16 = vpop.eup %7133 }
0x20f7   :  { %v5210_v9 = vpop.f32.mrf.mxu3  ;;  %5051 = vrot.lane.b32.xlu0 %v7134_v16, %s7486_s28 }
0x20f8   :  { %v5213_v14 = vadd.f32 %v5210_v9, %v5187_v44 }
0x20fa   :  { %v5218_v3 = vadd.f32 %v6990_v35, %v5213_v14  ;;  %v6902_v35 = vld [vmem:[%s10932_s23 + $0x30] sm:$0xff] }
0x20fc   :  { %7135 = vtanh.f32 %v5218_v3  ;;  %v6907_v4 = vmul.f32 -1.442695, %v5218_v3 }
0x20fd   :  { %7137 = vpow2.f32 %v6899_v29 }
0x20fe   :  { %7139 = vpow2.f32 %v6907_v4 }
0x2102   :  { %v7136_v5 = vpop.eup %7135 }
0x2103   :  { %5241 = vrot.lane.b32.xlu0 %v7136_v5, %s7486_s28  ;;  %v7138_v26 = vpop.eup %7137 }
0x2104   :  { %v5032_v60 = vadd.f32 1.0, %v7138_v26  ;;  %v7140_v56 = vpop.eup %7139 }
0x2105   :  { %v5222_v40 = vadd.f32 1.0, %v7140_v56  ;;  %v10243_v56 = vld [vmem:[%s10921_s12 + $0x30] sm:$0xff] }
0x2106   :  { %7141 = vrcp.f32 %v5032_v60  ;;  %v5044_v31 = vand.u32 2147483648, %v5032_v60  ;;  %vm5038_vm4 = vweird.f32 %v5032_v60  ;;  %v5042_v13 = vand.u32 2147483647, %v5032_v60  ;;  %5330 = vmatpush.msrb.mxu2 %v10243_v56 }
0x2107   :  { %7143 = vrcp.f32 %v5222_v40  ;;  %v5234_v7 = vand.u32 2147483648, %v5222_v40  ;;  %vm5228_vm9 = vweird.f32 %v5222_v40  ;;  %v5232_v51 = vand.u32 2147483647, %v5222_v40 }
0x2108   :  { %v5045_v10 = vor.u32 1.1754944e-38, %v5044_v31  ;;  %vm5043_vm7 = vcmp.eq.f32.partialorder %v5042_v13, 8.507059e+37  ;;  %v10295_v31 = vld [vmem:[%s10924_s15 + $0x78] sm:$0xff] }
0x2109   :  { %v5235_v45 = vor.u32 1.1754944e-38, %v5234_v7  ;;  %vm5233_vm2 = vcmp.eq.f32.partialorder %v5232_v51, 8.507059e+37  ;;  %v10300_v13 = vld [vmem:[%s10924_s15 + $0xf8] sm:$0xff]  ;;  %v10356_v7 = vld [vmem:[%s10924_s15 + $0xe0] sm:$0xff] }
0x210a   :  { %v10363_v51 = vld [vmem:[%s10924_s15 + $0x58] sm:$0xff] }
0x210c   :  { %v7142_v0 = vpop.eup %7141 }
0x210d   :  { %v5034_v36 = vmul.f32 %v7142_v0, %v5032_v60  ;;  %v7144_v21 = vpop.eup %7143  ;;  %vm5039_vm3 = vweird.f32 %v7142_v0  ;;  %v10238_v60 = vld [vmem:[#allocation8 + $0x10] sm:$0xff] }
0x210e   :  { %v5224_v33 = vmul.f32 %v7144_v21, %v5222_v40  ;;  %vm5040_vm5 = vmor %vm5038_vm4, %vm5039_vm3  ;;  %vm5229_vm8 = vweird.f32 %v7144_v21  ;;  %11257 = vst [vmem:[#allocation45_spill] sm:$0xff] %v10238_v60  ;;  %5287 = vmatpush.msrb.mxu0 %v10238_v60  ;;  %v10255_v40 = vld [vmem:[%s10921_s12 + $0x20] sm:$0xff]  ;;  %v10506_v60 = vld [vmem:[#allocation11 + $0x10] sm:$0xff] }
0x210f   :  { %v5035_v53 = vsub.f32 1.0, %v5034_v36  ;;  %vm5230_vm10 = vmor %vm5228_vm9, %vm5229_vm8  ;;  %v10260_v36 = vld [vmem:[%s10921_s12 + $0x28] sm:$0xff]  ;;  %5331 = vmatpush.msrb.mxu2 %v10255_v40  ;;  %11274 = vst [vmem:[#allocation31_spill] sm:$0xff] %v10506_v60  ;;  %vm11281_vm8 = vcmask 1047559  }
0x2110   :  { %v5225_v49 = vsub.f32 1.0, %v5224_v33  ;;  %v10287_v33 = vld [vmem:[%s10921_s12 + $0x8] sm:$0xff] }
0x2111   :  { %v5036_v43 = vmul.f32 %v7142_v0, %v5035_v53  ;;  %v10262_v53 = vld [vmem:[#allocation8] sm:$0xff] }
0x2112   :  { %v5226_v8 = vmul.f32 %v7144_v21, %v5225_v49  ;;  %11258 = vst [vmem:[#allocation43_spill] sm:$0xff] %v10262_v53  ;;  %5288 = vmatpush.msrb.mxu0 %v10262_v53  ;;  %v10312_v49 = vld [vmem:[%s10924_s15 + $0xf0] sm:$0xff] }
0x2113   :  { %v5037_v2 = vadd.f32 %v7142_v0, %v5036_v43  ;;  %v10268_v43 = vld [vmem:[%s10921_s12 + $0x10] sm:$0xff] }
0x2114   :  { %v5227_v63 = vadd.f32 %v7144_v21, %v5226_v8  ;;  %5332 = vmatpush.msrb.mxu2 %v10268_v43  ;;  %v10339_v8 = vld [vmem:[%s10924_s15 + $0x68] sm:$0xff]  ;;  %v10504_v53 = vld [vmem:[#allocation11 + $0x18] sm:$0xff] }
0x2115   :  { %v5041_v24 = vsel %vm5040_vm5, %v7142_v0, %v5037_v2  ;;  %v10248_v0 = vld [vmem:[%s10921_s12 + $0x38] sm:$0xff]  ;;  %v10281_v2 = vld [vmem:[%s10921_s12] sm:$0xff]  ;;  %11273 = vst [vmem:[#allocation52_spill] sm:$0xff] %v10504_v53 }
0x2116   :  { %v5046_v12 = vsel %vm5043_vm7, %v5045_v10, %v5041_v24  ;;  %v5231_v48 = vsel %vm5230_vm10, %v7144_v21, %v5227_v63  ;;  %5350 = vmatpush.msra.mxu3 %v10248_v0  ;;  %v10275_v21 = vld [vmem:[%s10921_s12 + $0x18] sm:$0xff]  ;;  %5333 = vmatpush.msrb.mxu2 %v10281_v2  ;;  %v10305_v24 = vld [vmem:[%s10924_s15 + $0x70] sm:$0xff]  ;;  %v10316_v10 = vld [vmem:[#allocation9 + $0x10] sm:$0xff] }
0x2117   :  { %v5236_v37 = vsel %vm5233_vm2, %v5235_v45, %v5231_v48  ;;  %v5049_v52 = vmul.f32 %v5046_v12, %v9995_v28  ;;  %11259 = vst [vmem:[#allocation48_spill] sm:$0xff] %v10316_v10  ;;  %v10344_v63 = vld [vmem:[%s10924_s15 + $0xe8] sm:$0xff]  ;;  %v10368_v48 = vld [vmem:[%s10924_s15 + $0xd8] sm:$0xff]  ;;  %v10373_v45 = vld [vmem:[%s10924_s15 + $0x50] sm:$0xff] }
0x2118   :  { %v5239_v59 = vmul.f32 %v5236_v37, %v9999_v23  ;;  %5351 = vmatpush.msra.mxu3 %v10260_v36  ;;  %5445 = vmatpush.msra.mxu2 %v10295_v31  ;;  %11261 = vst [vmem:[#allocation49_spill] sm:$0xff] %v10368_v48 }
0x211a   :  { %5352 = vmatpush.msra.mxu3 %v10275_v21  ;;  %5446 = vmatpush.msra.mxu2 %v10305_v24 }
0x211c   :  { %5353 = vmatpush.msra.mxu3 %v10287_v33  ;;  %5447 = vmatpush.msra.mxu2 %v10339_v8 }
0x211e   :  { %5465 = vmatpush.msrb.mxu3 %v10300_v13 }
0x2120   :  { %5466 = vmatpush.msrb.mxu3 %v10312_v49 }
0x2122   :  { %5467 = vmatpush.msrb.mxu3 %v10344_v63 }
0x2124   :  { %5468 = vmatpush.msrb.mxu3 %v10356_v7 }
0x2126   :  { %5469 = vmatpush.msrb.mxu3 %v10368_v48  ;;  %v10522_v48 = vld [vmem:[#allocation3 + $0x8] sm:$0xff] }
0x2127   :  { %11277 = vst [vmem:[#allocation59_spill] sm:$0xff] %v10522_v48 }
0x2161   :  { %v5068_v14 = vpop.permute.xlu1 %5067 }
0x2169   :  { %v5052_v32 = vpop.permute.xlu0 %5051 }
0x216a   :  { %v5054_v58 = vmul.f32 %v5052_v32, %v5046_v12 }
0x216c   :  { %5056 = vrot.lane.b32.xlu0 %v5054_v58, %s7487_s18 }
0x2175   :  { %v5242_v61 = vpop.permute.xlu0 %5241 }
0x2176   :  { %v5244_v50 = vmul.f32 %v5242_v61, %v5236_v37  ;;  %v10387_v61 = vld [vmem:[%s10924_s15 + $0x48] sm:$0xff] }
0x2178   :  { %5246 = vrot.lane.b32.xlu0 %v5244_v50, %s7487_s18  ;;  %v10392_v50 = vld [vmem:[%s10924_s15 + $0xc8] sm:$0xff] }
0x2179   :  { %11263 = vst [vmem:[#allocation37_spill] sm:$0xff] %v10392_v50 }
0x21de   :  { %v5057_v34 = vpop.permute.xlu0 %5056 }
0x21df   :  { %v10223_v55 = vadd.f32 %v5057_v34, %v5049_v52  ;;  %v10402_v52 = vld [vmem:[%s10924_s15 + $0xc0] sm:$0xff]  ;;  %v10409_v34 = vld [vmem:[%s10924_s15 + $0x38] sm:$0xff] }
0x21e0   :  { %11264 = vst [vmem:[#allocation38_spill] sm:$0xff] %v10402_v52 }
0x21e1   :  { %11255 = vst [vmem:[#allocation57_spill] sm:$0xff] %v10223_v55  ;;  %7145 = vtanh.f32 %v10223_v55  ;;  %v10512_v55 = vld [vmem:[#allocation11 + $0x8] sm:$0xff] }
0x21e2   :  { %11275 = vst [vmem:[#allocation56_spill] sm:$0xff] %v10512_v55 }
0x21e7   :  { %v7146_v30 = vpop.eup %7145 }
0x21e8   :  { %5062 = vrot.lane.b32.xlu0 %v7146_v30, %s7486_s28  ;;  %v10414_v30 = vld [vmem:[%s10924_s15 + $0xb8] sm:$0xff] }
0x21e9   :  { %11265 = vst [vmem:[#allocation39_spill] sm:$0xff] %v10414_v30 }
0x21ea   :  { %v5247_v16 = vpop.permute.xlu0 %5246 }
0x21eb   :  { %v10228_v44 = vadd.f32 %v5247_v16, %v5239_v59  ;;  %v10423_v59 = vld [vmem:[%s10924_s15 + $0x30] sm:$0xff] }
0x21ec   :  { %v10428_v16 = vld [vmem:[%s10924_s15 + $0xb0] sm:$0xff] }
0x21ed   :  { %11256 = vst [vmem:[#allocation44_spill] sm:$0xff] %v10228_v44  ;;  %7147 = vtanh.f32 %v10228_v44  ;;  %v6991_v44 = vld [vmem:[%s10931_s22] ss:$0 sm:$0xff] }
0x21ee   :  { %11266 = vst [vmem:[#allocation40_spill] sm:$0xff] %v10428_v16 }
0x21f0   :  { %5257 = vrot.lane.b32.xlu0 %v6902_v35, %s7488_s3  ;;  %v10435_v35 = vld [vmem:[%s10924_s15 + $0x28] sm:$0xff] }
0x21f3   :  { %v7148_v28 = vpop.eup %7147 }
0x21f4   :  { %5252 = vrot.lane.b32.xlu2 %v7148_v28, %s7486_s28  ;;  %v10440_v28 = vld [vmem:[%s10924_s15 + $0xa8] sm:$0xff] }
0x21f5   :  { %11267 = vst [vmem:[#allocation41_spill] sm:$0xff] %v10440_v28 }
0x224e   :  { %v5253_v23 = vpop.permute.xlu2 %5252 }
0x224f   :  { %v5255_v26 = vmul.f32 %v5253_v23, %v5236_v37  ;;  %v10380_v37 = vld [vmem:[%s10924_s15 + $0xd0] sm:$0xff] }
0x2250   :  { %11262 = vst [vmem:[#allocation60_spill] sm:$0xff] %v10380_v37  ;;  %5470 = vmatpush.msrb.mxu3 %v10380_v37  ;;  %v10471_v23 = vld [vmem:[%s10924_s15 + $0x10] sm:$0xff]  ;;  %v10520_v37 = vld [vmem:[#allocation3] sm:$0xff] }
0x2251   :  { %11276 = vst [vmem:[#allocation51_spill] sm:$0xff] %v10520_v37 }
0x2252   :  { %5471 = vmatpush.msrb.mxu3 %v10392_v50 }
0x2254   :  { %5472 = vmatpush.msrb.mxu3 %v10402_v52 }
0x2256   :  { %5473 = vmatpush.msrb.mxu3 %v10414_v30 }
0x2258   :  { %5474 = vmatpush.msrb.mxu3 %v10428_v16 }
0x225a   :  { %v5063_v9 = vpop.permute.xlu0 %5062  ;;  %5475 = vmatpush.msrb.mxu3 %v10440_v28 }
0x225b   :  { %v5065_v3 = vmul.f32 %v5063_v9, %v5046_v12  ;;  %v10322_v12 = vld [vmem:[#allocation9] sm:$0xff]  ;;  %v10447_v9 = vld [vmem:[%s10924_s15 + $0x20] sm:$0xff] }
0x225c   :  { %11260 = vst [vmem:[#allocation50_spill] sm:$0xff] %v10322_v12 }
0x225d   :  { %v5070_v5 = vmul.f32 %v5068_v14, %v5065_v3  ;;  %v10452_v14 = vld [vmem:[%s10924_s15 + $0xa0] sm:$0xff]  ;;  %v10459_v3 = vld [vmem:[%s10924_s15 + $0x18] sm:$0xff] }
0x225e   :  { %11268 = vst [vmem:[#allocation42_spill] sm:$0xff] %v10452_v14  ;;  %5476 = vmatpush.msrb.mxu3 %v10452_v14 }
0x225f   :  { %5100 = vrot.lane.b32.xlu0 %v5070_v5, %s7487_s18  ;;  %v10464_v5 = vld [vmem:[%s10924_s15 + $0x98] sm:$0xff] }
0x2260   :  { %11269 = vst [vmem:[#allocation28_spill] sm:$0xff] %v10464_v5  ;;  %5477 = vmatpush.msrb.mxu3 %v10464_v5  ;;  %v10516_v5 = vld [vmem:[#allocation11] sm:$0xff] }
0x2262   :  { %v5258_v29 = vpop.permute.xlu0 %5257 }
0x2263   :  { %v5260_v4 = vmul.f32 %v5258_v29, %v5255_v26  ;;  %v10476_v29 = vld [vmem:[%s10924_s15 + $0x90] sm:$0xff]  ;;  %v10481_v26 = vld [vmem:[%s10924_s15 + $0x8] sm:$0xff] }
0x2264   :  { %11270 = vst [vmem:[#allocation29_spill] sm:$0xff] %v10476_v29  ;;  %5478 = vmatpush.msrb.mxu3 %v10476_v29 }
0x2267   :  { %5314 = vrot.lane.b32.xlu0 %v5260_v4, %s7487_s18  ;;  %v10486_v4 = vld [vmem:[%s10924_s15 + $0x88] sm:$0xff] }
0x2268   :  { %11271 = vst [vmem:[#allocation30_spill] sm:$0xff] %v10486_v4  ;;  %5479 = vmatpush.msrb.mxu3 %v10486_v4 }
0x22d1   :  { %v10318_v32 = vpop.permute.xlu0 %5100 }
0x22d2   :  { %6901 = vmatmul.msk.f32.vlgmr.msra.gmra.mxu0 %vm323_vm1, %v10318_v32 }
0x22d3   :  { %5379 = vmatpush.msra.mxu0 %v10316_v10  ;;  %v10498_v10 = vld [vmem:[%s10924_s15 + $0x80] sm:$0xff] }
0x22d4   :  { %11272 = vst [vmem:[#allocation46_spill] sm:$0xff] %v10498_v10  ;;  %5480 = vmatpush.msrb.mxu3 %v10498_v10 }
0x22d5   :  { %5380 = vmatpush.msra.mxu0 %v10322_v12  ;;  %v10493_v12 = vld [vmem:[%s10924_s15] sm:$0xff] }
0x22d9   :  { %v10326_v58 = vpop.permute.xlu0 %5314 }
0x22da   :  { %6908 = vmatmul.msk.f32.vlgmr.msrb.gmra.mxu0 %vm570_vm6, %v10063_v27  ;;  %6910 = vmatmul.msk.f32.vlgmr.msrb.gmra.mxu2 %vm323_vm1, %v10326_v58  ;;  %v10351_v27 = vld [vmem:[%s10924_s15 + $0x60] sm:$0xff] }
0x22db   :  { %6911 = vmatmul.msk.f32.vlgmr.msra.gmra.mxu3 %vm323_vm1, %v10326_v58  ;;  %5448 = vmatpush.msra.mxu2 %v10351_v27 }
0x22dc   :  { %5774 = vmatpush.msra.mxu3 %v10504_v53  ;;  %v5310_v53 = vpop.f32.mrf.mxu1 }
0x22dd   :  { %5449 = vmatpush.msra.mxu2 %v10363_v51 }
0x22de   :  { %5775 = vmatpush.msra.mxu3 %v10506_v60 }
0x22df   :  { %5450 = vmatpush.msra.mxu2 %v10373_v45 }
0x22e0   :  { %5776 = vmatpush.msra.mxu3 %v10512_v55 }
0x22e1   :  { %5451 = vmatpush.msra.mxu2 %v10387_v61 }
0x22e2   :  { %6912 = vmatmul.msk.f32.vlgmr.msra.gmra.mxu0 %vm570_vm6, %v10202_v25  ;;  %5777 = vmatpush.msra.mxu3 %v10516_v5 }
0x22e3   :  { %5452 = vmatpush.msra.mxu2 %v10397_v17 }
0x22e4   :  { %v5402_v60 = vpop.f32.mrf.mxu1 }
0x22e5   :  { %5453 = vmatpush.msra.mxu2 %v10409_v34 }
0x22e7   :  { %5454 = vmatpush.msra.mxu2 %v10423_v59 }
0x22e9   :  { %5455 = vmatpush.msra.mxu2 %v10435_v35 }
0x22eb   :  { %5456 = vmatpush.msra.mxu2 %v10447_v9 }
0x22ed   :  { %5457 = vmatpush.msra.mxu2 %v10459_v3 }
0x22ef   :  { %5458 = vmatpush.msra.mxu2 %v10471_v23 }
0x22f1   :  { %5459 = vmatpush.msra.mxu2 %v10481_v26 }
0x22f3   :  { %5460 = vmatpush.msra.mxu2 %v10493_v12 }
0x234f   :  { %v5121_v29 = vpop.f32.mrf.mxu0 }
0x2350   :  { %v5122_v4 = vadd.f32 %v5121_v29, %v10209_v22 }
0x2352   :  { %v5128_v10 = vadd.f32 %v6991_v44, %v5122_v4 }
0x2354   :  { %5130 = vst [vmem:[#allocation18 + $0x28] sm:$0xff] %v5128_v10 }
0x2357   :  { %v5290_v14 = vpop.f32.mrf.mxu0 }
0x235d   :  { %v5335_v28 = vpop.f32.mrf.mxu2 }
0x235e   :  { %v5336_v16 = vadd.f32 %v5335_v28, %v5290_v14  ;;  %v5355_v30 = vpop.f32.mrf.mxu3  ;;  %v10553_v28 = vld [vmem:[%s11096_s5] sm:$0xff]  ;;  %v10560_v14 = vld [vmem:[%s11096_s5 + $0x10] sm:$0xff] }
0x235f   :  { %v5356_v52 = vadd.f32 %v5355_v30, %v5310_v53  ;;  %v5382_v50 = vpop.f32.mrf.mxu0 }
0x2360   :  { %v5405_v22 = vadd.f32 %v5382_v50, %v5336_v16 }
0x2361   :  { %v5406_v29 = vadd.f32 %v5402_v60, %v5356_v52  ;;  %v10534_v60 = vld [vmem:[#allocation6] sm:$0xff] }
0x2362   :  { %v5409_v55 = vadd.f32 %v10520_v37, %v5405_v22  ;;  %11278 = vst [vmem:[#allocation53_spill] sm:$0xff] %v10534_v60  ;;  %v10565_v22 = vld [vmem:[%s11096_s5 + $0x28] sm:$0xff] }
0x2363   :  { %v5410_v44 = vadd.f32 %v10522_v48, %v5406_v29  ;;  %v10572_v29 = vld [vmem:[%s11096_s5 + $0x38] sm:$0xff]  ;;  %v10592_v48 = vld [vmem:[%s11096_s5 + $0x48] sm:$0xff] }
0x2364   :  { %7149 = vtanh.f32 %v5409_v55 }
0x2365   :  { %7151 = vtanh.f32 %v5410_v44  ;;  %v10577_v44 = vld [vmem:[%s11096_s5 + $0x20] sm:$0xff] }
0x236a   :  { %v7150_v10 = vpop.eup %7149 }
0x236b   :  { %v7152_v4 = vpop.eup %7151  ;;  %5461 = vmatmul.f32.vlgmr.msra.gmra.mxu2 %v7150_v10  ;;  %v10582_v10 = vld [vmem:[%s11096_s5 + $0x30] sm:$0xff] }
0x236c   :  { %5481 = vmatmul.f32.vlgmr.msrb.gmra.mxu3 %v7152_v4 }
0x236d   :  { %5941 = vmatpush.msrb.mxu3 %v10129_v57 }
0x236f   :  { %5942 = vmatpush.msrb.mxu3 %v10135_v38 }
0x2371   :  { %5943 = vmatpush.msrb.mxu3 %v10141_v6 }
0x2373   :  { %5944 = vmatpush.msrb.mxu3 %v10147_v15 }
0x2374   :  { %6923 = vmatmul.msk.f32.vlgmr.msra.gmra.mxu3 %vm323_vm1, %v10326_v58 }
0x2375   :  { %6090 = vmatpush.msra.mxu3 %v10161_v42  ;;  %v10542_v42 = vld [vmem:[%s11096_s5 + $0x8] sm:$0xff] }
0x2376   :  { %5549 = vmatpush.msrb.mxu0 %v10542_v42 }
0x2377   :  { %6091 = vmatpush.msra.mxu3 %v10169_v47  ;;  %v10548_v47 = vld [vmem:[%s11096_s5 + $0x18] sm:$0xff] }
0x2378   :  { %5571 = vmatpush.msrb.mxu1 %v10548_v47  ;;  %5550 = vmatpush.msrb.mxu0 %v10553_v28 }
0x237a   :  { %5593 = vmatpush.msra.mxu0 %v10565_v22  ;;  %5572 = vmatpush.msrb.mxu1 %v10560_v14 }
0x237c   :  { %5615 = vmatpush.msra.mxu1 %v10572_v29  ;;  %5594 = vmatpush.msra.mxu0 %v10577_v44 }
0x237e   :  { %5616 = vmatpush.msra.mxu1 %v10582_v10 }
0x23ee   :  { %v5462_v55 = vpop.f32.mrf.mxu2 }
0x23ef   :  { %v5463_v53 = vadd.f32 %v10534_v60, %v5462_v55  ;;  %v5482_v50 = vpop.f32.mrf.mxu3 }
0x23f1   :  { %v5483_v57 = vadd.f32 %v5482_v50, %v5463_v53 }
0x23f3   :  { %v5485_v38 = vsel %vm570_vm6, %v5483_v57, -inf }
0x23f4   :  { %5486 = vmax.xlane.f32.xlu1 %v5485_v38 }
0x2467   :  { %v5487_v6 = vpop.xlane.xlu1 %5486 }
0x2468   :  { %v5488_v52 = vsub.f32 %v5483_v57, %v5487_v6 }
0x246a   :  { %v5489_v15 = vmul.f32 1.442695, %v5488_v52 }
0x246c   :  { %7153 = vpow2.f32 %v5489_v15 }
0x2472   :  { %v7154_v30 = vpop.eup %7153 }
0x2473   :  { %v5491_v16 = vsel %vm570_vm6, %v7154_v30, 0.0 }
0x2474   :  { %5492 = vadd.xlane.f32.xlu2 %v5491_v16 }
0x24e7   :  { %v5493_v4 = vpop.xlane.xlu2 %5492 }
0x24e8   :  { %7155 = vrcp.f32 %v5493_v4  ;;  %v5505_v57 = vand.u32 2147483648, %v5493_v4  ;;  %v5503_v6 = vand.u32 2147483647, %v5493_v4  ;;  %vm5499_vm4 = vweird.f32 %v5493_v4 }
0x24ea   :  { %v5506_v15 = vor.u32 1.1754944e-38, %v5505_v57  ;;  %vm5504_vm7 = vcmp.eq.f32.partialorder %v5503_v6, 8.507059e+37  ;;  %v10635_v6 = vld [vmem:[%s11096_s5 + $0x60] sm:$0xff] }
0x24eb   :  { %11279 = vst [vmem:[#allocation55_spill] sm:$0xff] %v10635_v6 }
0x24ee   :  { %v7156_v55 = vpop.eup %7155 }
0x24ef   :  { %v5495_v53 = vmul.f32 %v7156_v55, %v5493_v4  ;;  %vm5500_vm3 = vweird.f32 %v7156_v55 }
0x24f0   :  { %vm5501_vm5 = vmor %vm5499_vm4, %vm5500_vm3 }
0x24f1   :  { %v5496_v50 = vsub.f32 1.0, %v5495_v53 }
0x24f3   :  { %v5497_v38 = vmul.f32 %v7156_v55, %v5496_v50  ;;  %v10623_v50 = vld [vmem:[%s11096_s5 + $0x68] sm:$0xff] }
0x24f5   :  { %v5498_v52 = vadd.f32 %v7156_v55, %v5497_v38  ;;  %v10630_v38 = vld [vmem:[%s11096_s5 + $0x78] sm:$0xff] }
0x24f7   :  { %v5502_v16 = vsel %vm5501_vm5, %v7156_v55, %v5498_v52  ;;  %v10602_v55 = vld [vmem:[%s11096_s5 + $0x58] sm:$0xff]  ;;  %v10642_v52 = vld [vmem:[%s11096_s5 + $0x70] sm:$0xff] }
0x24f8   :  { %v5507_v60 = vsel %vm5504_vm7, %v5506_v15, %v5502_v16  ;;  %11280 = vst [vmem:[#allocation58_spill] sm:$0xff] %v10642_v52  ;;  %v10648_v16 = vld [vmem:[#allocation14 + $0x18] sm:$0xff] }
0x24f9   :  { %v10587_v37 = vmul.f32 %v7154_v30, %v5507_v60  ;;  %v10607_v60 = vld [vmem:[%s11096_s5 + $0x40] sm:$0xff]  ;;  %v10614_v30 = vld [vmem:[%s11096_s5 + $0x50] sm:$0xff] }
0x24fb   :  { %5915 = vst.msk [vmem:[#allocation19 + $0x30] sm:$0xff] %vm570_vm6, %v10587_v37  ;;  %6914 = vmatmul.msk.f32.vlgmr.msrb.gmra.mxu0 %vm570_vm6, %v10587_v37  ;;  %v5510_v4 = vrot.slane %v10587_v37, 1  ;;  %v5511_v53 = vrot.slane %v10587_v37, 2  ;;  %v5512_v57 = vrot.slane %v10587_v37, 3  ;;  %v5513_v15 = vrot.slane %v10587_v37, 4 }
0x24fc   :  { %5637 = vmatpush.msrb.mxu0 %v10592_v48 }
0x24fd   :  { %6915 = vmatmul.msk.f32.vlgmr.msrb.gmra.mxu1 %vm570_vm6, %v5510_v4  ;;  %v5514_v4 = vrot.slane %v10587_v37, 5 }
0x24fe   :  { %5659 = vmatpush.msrb.mxu1 %v10602_v55  ;;  %5638 = vmatpush.msrb.mxu0 %v10607_v60 }
0x2500   :  { %5660 = vmatpush.msrb.mxu1 %v10614_v30 }
0x2503   :  { %6916 = vmatmul.msk.f32.vlgmr.msra.gmra.mxu0 %vm570_vm6, %v5511_v53  ;;  %v10652_v53 = vld [vmem:[#allocation14 + $0x10] sm:$0xff] }
0x2504   :  { %5681 = vmatpush.msra.mxu0 %v10623_v50 }
0x2505   :  { %6917 = vmatmul.msk.f32.vlgmr.msra.gmra.mxu1 %vm570_vm6, %v5512_v57  ;;  %v10656_v57 = vld [vmem:[#allocation14 + $0x8] sm:$0xff] }
0x2506   :  { %5703 = vmatpush.msra.mxu1 %v10630_v38  ;;  %5682 = vmatpush.msra.mxu0 %v10635_v6  ;;  %v10659_v6 = vld [vmem:[#allocation14] sm:$0xff] }
0x2508   :  { %5704 = vmatpush.msra.mxu1 %v10642_v52  ;;  %v5515_v52 = vrot.slane %v10587_v37, 6 }
0x250b   :  { %6918 = vmatmul.msk.f32.vlgmr.msrb.gmra.mxu0 %vm570_vm6, %v5513_v15  ;;  %v5516_v15 = vrot.slane %v10587_v37, 7 }
0x250c   :  { %5798 = vmatpush.msrb.mxu0 %v10648_v16 }
0x250d   :  { %6919 = vmatmul.msk.f32.vlgmr.msrb.gmra.mxu1 %vm570_vm6, %v5514_v4 }
0x250e   :  { %5799 = vmatpush.msrb.mxu0 %v10652_v53 }
0x2510   :  { %5800 = vmatpush.msrb.mxu0 %v10656_v57 }
0x2512   :  { %5801 = vmatpush.msrb.mxu0 %v10659_v6 }
0x2513   :  { %6920 = vmatmul.msk.f32.vlgmr.msra.gmra.mxu0 %vm570_vm6, %v5515_v52  ;;  %v5916_v52 = vld [vmem:[#allocation2 + $0x38] sm:$0xff] }
0x2514   :  { %5964 = vmatpush.msra.mxu0 %v10096_v19  ;;  %v10694_v19 = vld [vmem:[#allocation12 + $0x18] sm:$0xff] }
0x2515   :  { %6921 = vmatmul.msk.f32.vlgmr.msra.gmra.mxu1 %vm570_vm6, %v5516_v15  ;;  %5754 = vmatpush.msrb.mxu2 %v10694_v19 }
0x2516   :  { %5965 = vmatpush.msra.mxu0 %v10105_v41  ;;  %v10696_v41 = vld [vmem:[#allocation17 + $0x18] sm:$0xff] }
0x2517   :  { %5874 = vmatpush.msrb.mxu1 %v10696_v41 }
0x2518   :  { %5966 = vmatpush.msra.mxu0 %v10113_v1  ;;  %v10700_v1 = vld [vmem:[#allocation12 + $0x10] sm:$0xff] }
0x2519   :  { %5755 = vmatpush.msrb.mxu2 %v10700_v1 }
0x251a   :  { %5967 = vmatpush.msra.mxu0 %v10119_v54  ;;  %v10702_v54 = vld [vmem:[#allocation17 + $0x10] sm:$0xff] }
0x251b   :  { %6924 = vmatmul.msk.f32.vlgmr.msrb.gmra.mxu0 %vm323_vm1, %v10318_v32  ;;  %5875 = vmatpush.msrb.mxu1 %v10702_v54 }
0x251c   :  { %6113 = vmatpush.msrb.mxu0 %v10243_v56  ;;  %v10706_v56 = vld [vmem:[#allocation12 + $0x8] sm:$0xff] }
0x251d   :  { %5756 = vmatpush.msrb.mxu2 %v10706_v56 }
0x251e   :  { %6114 = vmatpush.msrb.mxu0 %v10255_v40  ;;  %v10708_v40 = vld [vmem:[#allocation17 + $0x8] sm:$0xff] }
0x251f   :  { %5876 = vmatpush.msrb.mxu1 %v10708_v40 }
0x2520   :  { %6115 = vmatpush.msrb.mxu0 %v10268_v43  ;;  %v10712_v43 = vld [vmem:[#allocation12] sm:$0xff] }
0x2521   :  { %5757 = vmatpush.msrb.mxu2 %v10712_v43 }
0x2522   :  { %6116 = vmatpush.msrb.mxu0 %v10281_v2  ;;  %v10714_v2 = vld [vmem:[#allocation17] sm:$0xff] }
0x2523   :  { %6931 = vmatmul.msk.f32.vlgmr.msra.gmra.mxu0 %vm323_vm1, %v5916_v52  ;;  %5877 = vmatpush.msrb.mxu1 %v10714_v2 }
0x2524   :  { %6228 = vmatpush.msra.mxu0 %v10295_v31 }
0x2525   :  { %5988 = vmatpush.msra.mxu1 %v10153_v62 }
0x2526   :  { %6229 = vmatpush.msra.mxu0 %v10305_v24 }
0x2527   :  { %5989 = vmatpush.msra.mxu1 %v10159_v11 }
0x2528   :  { %6230 = vmatpush.msra.mxu0 %v10339_v8 }
0x2529   :  { %5990 = vmatpush.msra.mxu1 %v10166_v46 }
0x252a   :  { %6231 = vmatpush.msra.mxu0 %v10351_v27 }
0x252b   :  { %5991 = vmatpush.msra.mxu1 %v10175_v20 }
0x252c   :  { %6232 = vmatpush.msra.mxu0 %v10363_v51 }
0x252e   :  { %6233 = vmatpush.msra.mxu0 %v10373_v45 }
0x2530   :  { %6234 = vmatpush.msra.mxu0 %v10387_v61 }
0x2532   :  { %6235 = vmatpush.msra.mxu0 %v10397_v17 }
0x2534   :  { %6236 = vmatpush.msra.mxu0 %v10409_v34 }
0x2536   :  { %6237 = vmatpush.msra.mxu0 %v10423_v59 }
0x2538   :  { %6238 = vmatpush.msra.mxu0 %v10435_v35 }
0x253a   :  { %6239 = vmatpush.msra.mxu0 %v10447_v9 }
0x253c   :  { %6240 = vmatpush.msra.mxu0 %v10459_v3 }
0x253e   :  { %6241 = vmatpush.msra.mxu0 %v10471_v23 }
0x2540   :  { %6242 = vmatpush.msra.mxu0 %v10481_v26 }
0x2542   :  { %6243 = vmatpush.msra.mxu0 %v10493_v12 }
0x2578   :  { %v5552_v31 = vpop.f32.mrf.mxu0 }
0x257a   :  { %v5574_v24 = vpop.f32.mrf.mxu1 }
0x257b   :  { %v5726_v8 = vrot.slane %v5574_v24, 7 }
0x257d   :  { %v5727_v45 = vsel %vm1024_vm11, %v5726_v8, %v5552_v31  ;;  %v6992_v31 = vld [vmem:[%s10928_s19] ss:$0 sm:$0xff] }
0x2580   :  { %v5596_v32 = vpop.f32.mrf.mxu0 }
0x2581   :  { %v5728_v27 = vrot.slane %v5596_v32, 6 }
0x2582   :  { %v5618_v12 = vpop.f32.mrf.mxu1 }
0x2583   :  { %v5730_v61 = vrot.slane %v5618_v12, 5  ;;  %v5729_v34 = vsel %vm1027_vm12, %v5728_v27, %v5727_v45 }
0x2585   :  { %v5731_v59 = vsel %vm1030_vm13, %v5730_v61, %v5729_v34  ;;  %v6993_v61 = vld [vmem:[%s10920_s11] ss:$0 sm:$0xff] }
0x2588   :  { %v5640_v51 = vpop.f32.mrf.mxu0 }
0x2589   :  { %v5732_v62 = vrot.slane %v5640_v51, 4 }
0x258a   :  { %v5662_v17 = vpop.f32.mrf.mxu1 }
0x258b   :  { %v5734_v11 = vrot.slane %v5662_v17, 3  ;;  %v5733_v35 = vsel %vm1033_vm14, %v5732_v62, %v5731_v59 }
0x258d   :  { %v5735_v20 = vsel %vm1036_vm15, %v5734_v11, %v5733_v35 }
0x2590   :  { %v5684_v46 = vpop.f32.mrf.mxu0 }
0x2591   :  { %v5736_v9 = vrot.slane %v5684_v46, 2 }
0x2592   :  { %v5706_v3 = vpop.f32.mrf.mxu1 }
0x2593   :  { %v5737_v23 = vsel %vm1039_vm0, %v5736_v9, %v5735_v20  ;;  %v5738_v26 = vrot.slane %v5706_v3, 1 }
0x2595   :  { %v5739_v4 = vsel %vm11281_vm8, %v5738_v26, %v5737_v23 }
0x2596   :  { %6922 = vmatmul.msk.f32.vlgmr.msrb.gmra.mxu2 %vm323_vm1, %v5739_v4  ;;  %6926 = vmatmul.msk.f32.vlgmr.msrb.gmra.mxu1 %vm323_vm1, %v5739_v4 }
0x2597   :  { %6930 = vmatmul.msk.f32.vlgmr.msrb.gmra.mxu3 %vm323_vm1, %v5739_v4  ;;  %6133 = vmatpush.msrb.mxu1 %v10248_v0  ;;  %v11283_v0 = vld [vmem:[#allocation60_spill] sm:$0xff] }
0x2598   :  { %6182 = vmatpush.msrb.mxu3 %v10187_v39  ;;  %v10749_v39 = vadd.f32 %v10587_v37, %v10202_v25  ;;  %v11287_v25 = vld [vmem:[#allocation40_spill] sm:$0xff] }
0x2599   :  { %6134 = vmatpush.msrb.mxu1 %v10260_v36  ;;  %v11284_v36 = vld [vmem:[#allocation37_spill] sm:$0xff] }
0x259a   :  { %6183 = vmatpush.msrb.mxu3 %v10192_v18  ;;  %v11282_v18 = vld [vmem:[#allocation49_spill] sm:$0xff] }
0x259b   :  { %6135 = vmatpush.msrb.mxu1 %v10275_v21  ;;  %v11285_v21 = vld [vmem:[#allocation38_spill] sm:$0xff] }
0x259d   :  { %6136 = vmatpush.msrb.mxu1 %v10287_v33  ;;  %v11286_v33 = vld [vmem:[#allocation39_spill] sm:$0xff] }
0x259e   :  { %6932 = vmatmul.msk.f32.vlgmr.msra.gmra.mxu1 %vm323_vm1, %v10326_v58  ;;  %v11290_v58 = vld [vmem:[#allocation28_spill] sm:$0xff] }
0x259f   :  { %6935 = vmatmul.msk.f32.vlgmr.msra.gmra.mxu3 %vm570_vm6, %v10587_v37  ;;  %6248 = vmatpush.msra.mxu1 %v10300_v13  ;;  %v11288_v13 = vld [vmem:[#allocation41_spill] sm:$0xff] }
0x25a0   :  { %6354 = vmatpush.msra.mxu3 %v10548_v47  ;;  %v11293_v47 = vld [vmem:[#allocation46_spill] sm:$0xff] }
0x25a1   :  { %6249 = vmatpush.msra.mxu1 %v10312_v49  ;;  %v11289_v49 = vld [vmem:[#allocation42_spill] sm:$0xff] }
0x25a2   :  { %6355 = vmatpush.msra.mxu3 %v10560_v14  ;;  %v5803_v14 = vpop.f32.mrf.mxu0 }
0x25a3   :  { %6250 = vmatpush.msra.mxu1 %v10344_v63  ;;  %v11291_v63 = vld [vmem:[#allocation29_spill] sm:$0xff] }
0x25a5   :  { %6251 = vmatpush.msra.mxu1 %v10356_v7  ;;  %v11292_v7 = vld [vmem:[#allocation30_spill] sm:$0xff] }
0x25a7   :  { %6939 = vmatmul.msk.f32.vlgmr.msrb.gmra.mxu3 %vm570_vm6, %v10749_v39  ;;  %6252 = vmatpush.msra.mxu1 %v11282_v18 }
0x25a8   :  { %6398 = vmatpush.msrb.mxu3 %v10572_v29  ;;  %v5779_v29 = vpop.f32.mrf.mxu3 }
0x25a9   :  { %6253 = vmatpush.msra.mxu1 %v11283_v0 }
0x25aa   :  { %6399 = vmatpush.msrb.mxu3 %v10582_v10  ;;  %v5969_v32 = vpop.f32.mrf.mxu0 }
0x25ab   :  { %6254 = vmatpush.msra.mxu1 %v11284_v36 }
0x25ad   :  { %6255 = vmatpush.msra.mxu1 %v11285_v21 }
0x25af   :  { %6256 = vmatpush.msra.mxu1 %v11286_v33 }
0x25b1   :  { %6257 = vmatpush.msra.mxu1 %v11287_v25 }
0x25b3   :  { %6258 = vmatpush.msra.mxu1 %v11288_v13 }
0x25b5   :  { %6259 = vmatpush.msra.mxu1 %v11289_v49 }
0x25b7   :  { %6260 = vmatpush.msra.mxu1 %v11290_v58 }
0x25b9   :  { %6261 = vmatpush.msra.mxu1 %v11291_v63 }
0x25bb   :  { %6262 = vmatpush.msra.mxu1 %v11292_v7 }
0x25bd   :  { %6263 = vmatpush.msra.mxu1 %v11293_v47 }
0x2613   :  { %v10768_v10 = vpop.f32.mrf.mxu1 }
0x2619   :  { %v5759_v15 = vpop.f32.mrf.mxu2 }
0x261a   :  { %v5780_v52 = vadd.f32 %v5779_v29, %v5759_v15  ;;  %v5946_v24 = vpop.f32.mrf.mxu3 }
0x261b   :  { %v5970_v8 = vadd.f32 %v5969_v32, %v5946_v24  ;;  %v5993_v27 = vpop.f32.mrf.mxu1 }
0x261c   :  { %v5806_v12 = vadd.f32 %v5803_v14, %v5780_v52 }
0x261d   :  { %v5996_v45 = vadd.f32 %v5993_v27, %v5970_v8  ;;  %v6928_v8 = vld [vmem:[%s10932_s23 + $0x38] sm:$0xff]  ;;  %v6903_v27 = vld [vmem:[%s10933_s24 + $0x30] sm:$0xff] }
0x261e   :  { %v5811_v51 = vadd.f32 %v6992_v31, %v5806_v12  ;;  %6040 = vrot.lane.b32.xlu1 %v6928_v8, %s7488_s3  ;;  %5850 = vrot.lane.b32.xlu2 %v6903_v27, %s7488_s3  ;;  %v11304_v27 = vld [vmem:[#allocation51_spill] sm:$0xff] }
0x261f   :  { %v6001_v17 = vadd.f32 %v6993_v61, %v5996_v45 }
0x2620   :  { %7157 = vtanh.f32 %v5811_v51  ;;  %v6925_v59 = vmul.f32 -1.442695, %v5811_v51  ;;  %v11294_v51 = vld [vmem:[#allocation57_spill] sm:$0xff] }
0x2621   :  { %7159 = vtanh.f32 %v6001_v17  ;;  %v6933_v11 = vmul.f32 -1.442695, %v6001_v17 }
0x2622   :  { %7161 = vpow2.f32 %v6925_v59 }
0x2623   :  { %7163 = vpow2.f32 %v6933_v11 }
0x2626   :  { %v7158_v34 = vpop.eup %7157 }
0x2627   :  { %5834 = vrot.lane.b32.xlu0 %v7158_v34, %s7486_s28  ;;  %v7160_v62 = vpop.eup %7159  ;;  %v11295_v34 = vld [vmem:[#allocation44_spill] sm:$0xff] }
0x2628   :  { %v7162_v35 = vpop.eup %7161 }
0x2629   :  { %v5815_v46 = vadd.f32 1.0, %v7162_v35  ;;  %v7164_v9 = vpop.eup %7163 }
0x262a   :  { %v6005_v20 = vadd.f32 1.0, %v7164_v9  ;;  %v10795_v9 = vld [vmem:[#allocation15 + $0x18] sm:$0xff] }
0x262b   :  { %7165 = vrcp.f32 %v5815_v46  ;;  %v5827_v33 = vand.u32 2147483648, %v5815_v46  ;;  %vm5821_vm10 = vweird.f32 %v5815_v46  ;;  %v5825_v25 = vand.u32 2147483647, %v5815_v46  ;;  %5899 = vmatpush.msra.mxu2 %v10795_v9 }
0x262c   :  { %7167 = vrcp.f32 %v6005_v20  ;;  %v6017_v29 = vand.u32 2147483648, %v6005_v20  ;;  %vm6011_vm5 = vweird.f32 %v6005_v20  ;;  %v6015_v15 = vand.u32 2147483647, %v6005_v20 }
0x262d   :  { %v5828_v58 = vor.u32 1.1754944e-38, %v5827_v33  ;;  %vm5826_vm3 = vcmp.eq.f32.partialorder %v5825_v25, 8.507059e+37 }
0x262e   :  { %v6018_v31 = vor.u32 1.1754944e-38, %v6017_v29  ;;  %vm6016_vm8 = vcmp.eq.f32.partialorder %v6015_v15, 8.507059e+37  ;;  %v11301_v29 = vld [vmem:[#allocation31_spill] sm:$0xff]  ;;  %v11302_v15 = vld [vmem:[#allocation56_spill] sm:$0xff] }
0x262f   :  { %6024 = vrot.lane.b32.xlu0 %v7160_v62, %s7486_s28 }
0x2631   :  { %v7166_v3 = vpop.eup %7165 }
0x2632   :  { %v5817_v23 = vmul.f32 %v7166_v3, %v5815_v46  ;;  %v7168_v4 = vpop.eup %7167  ;;  %vm5822_vm9 = vweird.f32 %v7166_v3 }
0x2633   :  { %v6007_v0 = vmul.f32 %v7168_v4, %v6005_v20  ;;  %vm5823_vm2 = vmor %vm5821_vm10, %vm5822_vm9  ;;  %vm6012_vm4 = vweird.f32 %v7168_v4  ;;  %v10797_v20 = vld [vmem:[#allocation15 + $0x10] sm:$0xff] }
0x2634   :  { %v5818_v26 = vsub.f32 1.0, %v5817_v23  ;;  %vm6013_vm7 = vmor %vm6011_vm5, %vm6012_vm4  ;;  %5900 = vmatpush.msra.mxu2 %v10797_v20  ;;  %v5854_v23 = vld [vmem:[#allocation15] sm:$0xff] }
0x2635   :  { %v6008_v21 = vsub.f32 1.0, %v6007_v0 }
0x2636   :  { %v5819_v18 = vmul.f32 %v7166_v3, %v5818_v26  ;;  %v11296_v26 = vld [vmem:[#allocation45_spill] sm:$0xff] }
0x2637   :  { %v6009_v49 = vmul.f32 %v7168_v4, %v6008_v21 }
0x2638   :  { %v5820_v36 = vadd.f32 %v7166_v3, %v5819_v18 }
0x2639   :  { %v6010_v14 = vadd.f32 %v7168_v4, %v6009_v49 }
0x263a   :  { %v5824_v13 = vsel %vm5823_vm2, %v7166_v3, %v5820_v36  ;;  %v10800_v3 = vld [vmem:[#allocation15 + $0x8] sm:$0xff] }
0x263b   :  { %v5829_v7 = vsel %vm5826_vm3, %v5828_v58, %v5824_v13  ;;  %v6014_v52 = vsel %vm6013_vm7, %v7168_v4, %v6010_v14  ;;  %5901 = vmatpush.msra.mxu2 %v10800_v3  ;;  %v11297_v4 = vld [vmem:[#allocation43_spill] sm:$0xff] }
0x263c   :  { %v6019_v32 = vsel %vm6016_vm8, %v6018_v31, %v6014_v52  ;;  %v5832_v45 = vmul.f32 %v5829_v7, %v11294_v51  ;;  %v11303_v31 = vld [vmem:[#allocation59_spill] sm:$0xff] }
0x263d   :  { %v6022_v62 = vmul.f32 %v6019_v32, %v11295_v34  ;;  %5902 = vmatpush.msra.mxu2 %v5854_v23 }
0x263f   :  { %6070 = vmatpush.msrb.mxu2 %v11296_v26 }
0x2641   :  { %6071 = vmatpush.msrb.mxu2 %v11297_v4 }
0x2678   :  { %v5851_v0 = vpop.permute.xlu2 %5850 }
0x2690   :  { %v6041_v25 = vpop.permute.xlu1 %6040 }
0x2699   :  { %v5835_v63 = vpop.permute.xlu0 %5834 }
0x269a   :  { %v5837_v47 = vmul.f32 %v5835_v63, %v5829_v7  ;;  %v11298_v63 = vld [vmem:[#allocation48_spill] sm:$0xff] }
0x269c   :  { %5839 = vrot.lane.b32.xlu0 %v5837_v47, %s7487_s18  ;;  %v11299_v47 = vld [vmem:[#allocation50_spill] sm:$0xff] }
0x26a1   :  { %v6025_v24 = vpop.permute.xlu0 %6024 }
0x26a2   :  { %v6027_v12 = vmul.f32 %v6025_v24, %v6019_v32 }
0x26a4   :  { %6029 = vrot.lane.b32.xlu0 %v6027_v12, %s7487_s18 }
0x270e   :  { %v5840_v61 = vpop.permute.xlu0 %5839 }
0x270f   :  { %v10789_v17 = vadd.f32 %v5840_v61, %v5832_v45  ;;  %v11305_v61 = vld [vmem:[#allocation53_spill] sm:$0xff] }
0x2711   :  { %7169 = vtanh.f32 %v10789_v17 }
0x2716   :  { %v6030_v59 = vpop.permute.xlu0 %6029 }
0x2717   :  { %v7170_v11 = vpop.eup %7169  ;;  %v6032_v35 = vadd.f32 %v6030_v59, %v6022_v62 }
0x2718   :  { %5845 = vrot.lane.b32.xlu0 %v7170_v11, %s7486_s28 }
0x2719   :  { %7171 = vtanh.f32 %v6032_v35 }
0x271f   :  { %v7172_v46 = vpop.eup %7171 }
0x2720   :  { %6035 = vrot.lane.b32.xlu0 %v7172_v46, %s7486_s28 }
0x278a   :  { %v5846_v18 = vpop.permute.xlu0 %5845 }
0x278b   :  { %v5848_v36 = vmul.f32 %v5846_v18, %v5829_v7  ;;  %v11300_v7 = vld [vmem:[#allocation52_spill] sm:$0xff] }
0x278d   :  { %v5853_v21 = vmul.f32 %v5851_v0, %v5848_v36 }
0x278f   :  { %5883 = vrot.lane.b32.xlu0 %v5853_v21, %s7487_s18 }
0x2792   :  { %v6036_v33 = vpop.permute.xlu0 %6035 }
0x2793   :  { %v6038_v13 = vmul.f32 %v6036_v33, %v6019_v32 }
0x2795   :  { %v6043_v49 = vmul.f32 %v6041_v25, %v6038_v13 }
0x2797   :  { %6097 = vrot.lane.b32.xlu0 %v6043_v49, %s7487_s18 }
0x2801   :  { %v10808_v58 = vpop.permute.xlu0 %5883 }
0x2802   :  { %6927 = vmatmul.msk.f32.vlgmr.msra.gmra.mxu2 %vm323_vm1, %v10808_v58 }
0x2803   :  { %6162 = vmatpush.msra.mxu2 %v11298_v63 }
0x2805   :  { %6163 = vmatpush.msra.mxu2 %v11299_v47 }
0x2809   :  { %v6098_v14 = vpop.permute.xlu0 %6097 }
0x280a   :  { %6934 = vmatmul.msk.f32.vlgmr.msrb.gmra.mxu2 %vm570_vm6, %v10587_v37  ;;  %6936 = vmatmul.msk.f32.vlgmr.msrb.gmra.mxu0 %vm323_vm1, %v6098_v14  ;;  %v6093_v37 = vpop.f32.mrf.mxu3 }
0x280b   :  { %6937 = vmatmul.msk.f32.vlgmr.msrb.gmra.mxu1 %vm323_vm1, %v6098_v14  ;;  %6332 = vmatpush.msrb.mxu2 %v10542_v42  ;;  %v6994_v42 = vld [vmem:[%s10931_s22] ss:$0 sm:$0xff] }
0x280c   :  { %6556 = vmatpush.msrb.mxu1 %v11300_v7  ;;  %6536 = vmatpush.msrb.mxu0 %v10694_v19 }
0x280d   :  { %6333 = vmatpush.msrb.mxu2 %v10553_v28 }
0x280e   :  { %6557 = vmatpush.msrb.mxu1 %v11301_v29  ;;  %6537 = vmatpush.msrb.mxu0 %v10700_v1  ;;  %v11306_v29 = vld [vmem:[#allocation55_spill] sm:$0xff] }
0x2810   :  { %6558 = vmatpush.msrb.mxu1 %v11302_v15  ;;  %6538 = vmatpush.msrb.mxu0 %v10706_v56 }
0x2812   :  { %6938 = vmatmul.msk.f32.vlgmr.msra.gmra.mxu2 %vm570_vm6, %v10749_v39  ;;  %6559 = vmatpush.msrb.mxu1 %v10516_v5  ;;  %v6185_v39 = vpop.f32.mrf.mxu3 }
0x2813   :  { %6376 = vmatpush.msra.mxu2 %v10565_v22  ;;  %6539 = vmatpush.msrb.mxu0 %v10712_v43 }
0x2815   :  { %6377 = vmatpush.msra.mxu2 %v10577_v44 }
0x2885   :  { %v5904_v28 = vpop.f32.mrf.mxu2 }
0x2886   :  { %v5905_v19 = vadd.f32 %v5904_v28, %v10768_v10 }
0x2887   :  { %v6118_v43 = vpop.f32.mrf.mxu0 }
0x2888   :  { %v5911_v1 = vadd.f32 %v6994_v42, %v5905_v19  ;;  %v6138_v56 = vpop.f32.mrf.mxu1 }
0x2889   :  { %v6139_v52 = vadd.f32 %v6138_v56, %v6093_v37 }
0x288a   :  { %5913 = vst [vmem:[#allocation18 + $0x30] sm:$0xff] %v5911_v1 }
0x288b   :  { %v6189_v5 = vadd.f32 %v6185_v39, %v6139_v52 }
0x288d   :  { %v6193_v22 = vadd.f32 %v6189_v5, %v11303_v31  ;;  %v6073_v24 = vpop.f32.mrf.mxu2 }
0x288e   :  { %v6119_v44 = vadd.f32 %v6118_v43, %v6073_v24 }
0x288f   :  { %7173 = vtanh.f32 %v6193_v22 }
0x2895   :  { %v7174_v32 = vpop.eup %7173  ;;  %v6165_v12 = vpop.f32.mrf.mxu2 }
0x2896   :  { %v6188_v8 = vadd.f32 %v6165_v12, %v6119_v44  ;;  %6264 = vmatmul.f32.vlgmr.msra.gmra.mxu1 %v7174_v32  ;;  %v6995_v32 = vld [vmem:[%s10928_s19] ss:$0 sm:$0xff] }
0x2898   :  { %v6192_v51 = vadd.f32 %v6188_v8, %v11304_v27 }
0x289a   :  { %7175 = vtanh.f32 %v6192_v51 }
0x289e   :  { %6949 = vmatmul.msk.f32.vlgmr.msrb.gmra.mxu1 %vm323_vm1, %v6098_v14 }
0x28a0   :  { %v7176_v10 = vpop.eup %7175 }
0x28a1   :  { %6244 = vmatmul.f32.vlgmr.msra.gmra.mxu0 %v7176_v10 }
0x28a2   :  { %6681 = vmatpush.msra.mxu0 %v10795_v9 }
0x28a4   :  { %6682 = vmatpush.msra.mxu0 %v10797_v20 }
0x28a6   :  { %6683 = vmatpush.msra.mxu0 %v10800_v3 }
0x28a8   :  { %6684 = vmatpush.msra.mxu0 %v5854_v23 }
0x2913   :  { %v6265_v62 = vpop.f32.mrf.mxu1 }
0x291b   :  { %v6561_v24 = vpop.f32.mrf.mxu1 }
0x291e   :  { %v6245_v45 = vpop.f32.mrf.mxu0 }
0x291f   :  { %v6246_v34 = vadd.f32 %v11305_v61, %v6245_v45 }
0x2921   :  { %v6266_v59 = vadd.f32 %v6265_v62, %v6246_v34 }
0x2923   :  { %v6268_v11 = vsel %vm570_vm6, %v6266_v59, -inf }
0x2924   :  { %6269 = vmax.xlane.f32.xlu2 %v6268_v11 }
0x2997   :  { %v6270_v35 = vpop.xlane.xlu2 %6269 }
0x2998   :  { %v6271_v46 = vsub.f32 %v6266_v59, %v6270_v35 }
0x299a   :  { %v6272_v26 = vmul.f32 1.442695, %v6271_v46 }
0x299c   :  { %7177 = vpow2.f32 %v6272_v26 }
0x29a2   :  { %v7178_v4 = vpop.eup %7177 }
0x29a3   :  { %v6274_v9 = vsel %vm570_vm6, %v7178_v4, 0.0 }
0x29a4   :  { %6275 = vadd.xlane.f32.xlu0 %v6274_v9 }
0x2a17   :  { %v6276_v20 = vpop.xlane.xlu0 %6275 }
0x2a18   :  { %7179 = vrcp.f32 %v6276_v20  ;;  %v6288_v0 = vand.u32 2147483648, %v6276_v20  ;;  %v6286_v21 = vand.u32 2147483647, %v6276_v20  ;;  %vm6282_vm10 = vweird.f32 %v6276_v20 }
0x2a1a   :  { %v6289_v25 = vor.u32 1.1754944e-38, %v6288_v0  ;;  %vm6287_vm3 = vcmp.eq.f32.partialorder %v6286_v21, 8.507059e+37 }
0x2a1e   :  { %v7180_v3 = vpop.eup %7179 }
0x2a1f   :  { %v6278_v23 = vmul.f32 %v7180_v3, %v6276_v20  ;;  %vm6283_vm9 = vweird.f32 %v7180_v3 }
0x2a20   :  { %vm6284_vm2 = vmor %vm6282_vm10, %vm6283_vm9 }
0x2a21   :  { %v6279_v18 = vsub.f32 1.0, %v6278_v23 }
0x2a23   :  { %v6280_v36 = vmul.f32 %v7180_v3, %v6279_v18 }
0x2a25   :  { %v6281_v33 = vadd.f32 %v7180_v3, %v6280_v36 }
0x2a27   :  { %v6285_v13 = vsel %vm6284_vm2, %v7180_v3, %v6281_v33  ;;  %v6929_v33 = vld [vmem:[%s10933_s24 + $0x38] sm:$0xff] }
0x2a28   :  { %v6290_v49 = vsel %vm6287_vm3, %v6289_v25, %v6285_v13 }
0x2a29   :  { %v6291_v63 = vmul.f32 %v7178_v4, %v6290_v49 }
0x2a2b   :  { %6697 = vst.msk [vmem:[#allocation19 + $0x38] sm:$0xff] %vm570_vm6, %v6291_v63  ;;  %6940 = vmatmul.msk.f32.vlgmr.msrb.gmra.mxu2 %vm570_vm6, %v6291_v63  ;;  %v6293_v47 = vrot.slane %v6291_v63, 1  ;;  %v6294_v14 = vrot.slane %v6291_v63, 2  ;;  %v6295_v7 = vrot.slane %v6291_v63, 3  ;;  %v6296_v15 = vrot.slane %v6291_v63, 4 }
0x2a2c   :  { %6420 = vmatpush.msrb.mxu2 %v10592_v48  ;;  %v11307_v48 = vld [vmem:[#allocation58_spill] sm:$0xff] }
0x2a2d   :  { %6941 = vmatmul.msk.f32.vlgmr.msra.gmra.mxu3 %vm570_vm6, %v6293_v47 }
0x2a2e   :  { %6442 = vmatpush.msra.mxu3 %v10602_v55  ;;  %6421 = vmatpush.msrb.mxu2 %v10607_v60  ;;  %v6297_v55 = vrot.slane %v6291_v63, 5  ;;  %v6298_v60 = vrot.slane %v6291_v63, 6 }
0x2a30   :  { %6443 = vmatpush.msra.mxu3 %v10614_v30  ;;  %v6299_v30 = vrot.slane %v6291_v63, 7 }
0x2a33   :  { %6942 = vmatmul.msk.f32.vlgmr.msra.gmra.mxu2 %vm570_vm6, %v6294_v14 }
0x2a34   :  { %6464 = vmatpush.msra.mxu2 %v10623_v50 }
0x2a35   :  { %6943 = vmatmul.msk.f32.vlgmr.msrb.gmra.mxu3 %vm570_vm6, %v6295_v7 }
0x2a36   :  { %6486 = vmatpush.msrb.mxu3 %v10630_v38  ;;  %6465 = vmatpush.msra.mxu2 %v11306_v29 }
0x2a38   :  { %6487 = vmatpush.msrb.mxu3 %v11307_v48 }
0x2a3b   :  { %6944 = vmatmul.msk.f32.vlgmr.msrb.gmra.mxu2 %vm570_vm6, %v6296_v15 }
0x2a3c   :  { %6580 = vmatpush.msrb.mxu2 %v10648_v16 }
0x2a3d   :  { %6945 = vmatmul.msk.f32.vlgmr.msra.gmra.mxu3 %vm570_vm6, %v6297_v55 }
0x2a3e   :  { %6581 = vmatpush.msrb.mxu2 %v10652_v53  ;;  %6656 = vmatpush.msra.mxu3 %v10696_v41 }
0x2a40   :  { %6582 = vmatpush.msrb.mxu2 %v10656_v57  ;;  %6657 = vmatpush.msra.mxu3 %v10702_v54 }
0x2a42   :  { %6583 = vmatpush.msrb.mxu2 %v10659_v6  ;;  %6658 = vmatpush.msra.mxu3 %v10708_v40 }
0x2a43   :  { %6946 = vmatmul.msk.f32.vlgmr.msra.gmra.mxu2 %vm570_vm6, %v6298_v60 }
0x2a44   :  { %6659 = vmatpush.msra.mxu3 %v10714_v2 }
0x2a45   :  { %6947 = vmatmul.msk.f32.vlgmr.msrb.gmra.mxu3 %vm570_vm6, %v6299_v30  ;;  %vm11308_vm6 = vcmask 1047559  }
0x2a4b   :  { %6950 = vmatmul.msk.f32.vlgmr.msrb.gmra.mxu2 %vm323_vm1, %v10808_v58 }
0x2aae   :  { %v6335_v50 = vpop.f32.mrf.mxu2 }
0x2ab0   :  { %v6357_v38 = vpop.f32.mrf.mxu3 }
0x2ab1   :  { %v6508_v57 = vrot.slane %v6357_v38, 7 }
0x2ab3   :  { %v6509_v6 = vsel %vm1024_vm11, %v6508_v57, %v6335_v50 }
0x2ab6   :  { %v6379_v16 = vpop.f32.mrf.mxu2 }
0x2ab7   :  { %v6510_v41 = vrot.slane %v6379_v16, 6 }
0x2ab8   :  { %v6401_v53 = vpop.f32.mrf.mxu3 }
0x2ab9   :  { %v6512_v40 = vrot.slane %v6401_v53, 5  ;;  %v6511_v42 = vsel %vm1027_vm12, %v6510_v41, %v6509_v6 }
0x2abb   :  { %v6513_v2 = vsel %vm1030_vm13, %v6512_v40, %v6511_v42 }
0x2abe   :  { %v6423_v54 = vpop.f32.mrf.mxu2 }
0x2abf   :  { %v6514_v28 = vrot.slane %v6423_v54, 4 }
0x2ac0   :  { %v6445_v37 = vpop.f32.mrf.mxu3 }
0x2ac1   :  { %v6516_v19 = vrot.slane %v6445_v37, 3  ;;  %v6515_v1 = vsel %vm1033_vm14, %v6514_v28, %v6513_v2 }
0x2ac3   :  { %v6517_v52 = vsel %vm1036_vm15, %v6516_v19, %v6515_v1 }
0x2ac6   :  { %v6467_v58 = vpop.f32.mrf.mxu2 }
0x2ac7   :  { %v6518_v56 = vrot.slane %v6467_v58, 2 }
0x2ac8   :  { %v6489_v39 = vpop.f32.mrf.mxu3 }
0x2ac9   :  { %v6519_v5 = vsel %vm1039_vm0, %v6518_v56, %v6517_v52  ;;  %v6520_v31 = vrot.slane %v6489_v39, 1 }
0x2acb   :  { %v6521_v22 = vsel %vm11308_vm6, %v6520_v31, %v6519_v5 }
0x2acc   :  { %6948 = vmatmul.msk.f32.vlgmr.msrb.gmra.mxu0 %vm323_vm1, %v6521_v22  ;;  %6952 = vmatmul.msk.f32.vlgmr.msra.gmra.mxu3 %vm323_vm1, %v6521_v22 }
0x2ace   :  { %v6585_v12 = vpop.f32.mrf.mxu2 }
0x2b49   :  { %v6541_v43 = vpop.f32.mrf.mxu0 }
0x2b4a   :  { %v6562_v44 = vadd.f32 %v6561_v24, %v6541_v43 }
0x2b4c   :  { %v6588_v8 = vadd.f32 %v6585_v12, %v6562_v44 }
0x2b4e   :  { %v6593_v27 = vadd.f32 %v6995_v32, %v6588_v8 }
0x2b4f   :  { %v6661_v14 = vpop.f32.mrf.mxu3 }
0x2b50   :  { %7181 = vtanh.f32 %v6593_v27  ;;  %v6951_v10 = vmul.f32 -1.442695, %v6593_v27 }
0x2b52   :  { %7183 = vpow2.f32 %v6951_v10 }
0x2b56   :  { %v7182_v51 = vpop.eup %7181 }
0x2b57   :  { %6616 = vrot.lane.b32.xlu1 %v7182_v51, %s7486_s28 }
0x2b58   :  { %v7184_v45 = vpop.eup %7183 }
0x2b59   :  { %v6597_v61 = vadd.f32 1.0, %v7184_v45 }
0x2b5b   :  { %7185 = vrcp.f32 %v6597_v61  ;;  %v6609_v46 = vand.u32 2147483648, %v6597_v61  ;;  %vm6603_vm12 = vweird.f32 %v6597_v61  ;;  %v6607_v26 = vand.u32 2147483647, %v6597_v61 }
0x2b5d   :  { %v6610_v9 = vor.u32 1.1754944e-38, %v6609_v46  ;;  %vm6608_vm14 = vcmp.eq.f32.partialorder %v6607_v26, 8.507059e+37 }
0x2b61   :  { %v7186_v34 = vpop.eup %7185 }
0x2b62   :  { %v6599_v62 = vmul.f32 %v7186_v34, %v6597_v61  ;;  %vm6604_vm11 = vweird.f32 %v7186_v34 }
0x2b63   :  { %vm6605_vm13 = vmor %vm6603_vm12, %vm6604_vm11 }
0x2b64   :  { %v6600_v59 = vsub.f32 1.0, %v6599_v62 }
0x2b66   :  { %v6601_v11 = vmul.f32 %v7186_v34, %v6600_v59 }
0x2b68   :  { %v6602_v35 = vadd.f32 %v7186_v34, %v6601_v11 }
0x2b6a   :  { %v6606_v4 = vsel %vm6605_vm13, %v7186_v34, %v6602_v35 }
0x2b6b   :  { %v6611_v3 = vsel %vm6608_vm14, %v6610_v9, %v6606_v4 }
0x2b6c   :  { %v6614_v18 = vmul.f32 %v6611_v3, %v10789_v17  ;;  %v6996_v17 = vld [vmem:[%s10931_s22] ss:$0 sm:$0xff] }
0x2bc9   :  { %v6617_v20 = vpop.permute.xlu1 %6616 }
0x2bca   :  { %v6619_v23 = vmul.f32 %v6617_v20, %v6611_v3 }
0x2bcc   :  { %6621 = vrot.lane.b32.xlu1 %v6619_v23, %s7487_s18 }
0x2c3e   :  { %v6622_v0 = vpop.permute.xlu1 %6621 }
0x2c3f   :  { %v6624_v36 = vadd.f32 %v6622_v0, %v6614_v18 }
0x2c41   :  { %7187 = vtanh.f32 %v6624_v36 }
0x2c47   :  { %v7188_v21 = vpop.eup %7187 }
0x2c48   :  { %6627 = vrot.lane.b32.xlu1 %v7188_v21, %s7486_s28  ;;  %s6717_s28 = sshll.u32 %s10935_s26, 4  ;;  %s6718_s28 = int_to_ptr.hbm [resolvable:$true] %s6717_s28 }
0x2c49   :  { %6723 = dma.vmem_to_hbm [thread:$0]  %s6716_s8, 1024, %s6718_s28, [#allocation20], %s7477_s4, %s7477_s4, %s7478_s29  }
0x2c50   :  { %6632 = vrot.lane.b32.xlu1 %v6929_v33, %s7488_s3 }
0x2cba   :  { %v6628_v25 = vpop.permute.xlu1 %6627 }
0x2cbb   :  { %v6630_v13 = vmul.f32 %v6628_v25, %v6611_v3 }
0x2cc2   :  { %v6633_v49 = vpop.permute.xlu1 %6632 }
0x2cc3   :  { %v6635_v63 = vmul.f32 %v6633_v49, %v6630_v13 }
0x2cc5   :  { %6665 = vrot.lane.b32.xlu1 %v6635_v63, %s7487_s18  ;;  %s7490_s18 = smov [#allocation18]  }
0x2cc6   :  { %s6702_s9 = sshll.u32 %s7490_s18, 4  ;;  %s6703_s9 = int_to_ptr.vmem [resolvable:$true] %s6702_s9 }
0x2d37   :  { %v6666_v47 = vpop.permute.xlu1 %6665 }
0x2d38   :  { %6953 = vmatmul.msk.f32.vlgmr.msra.gmra.mxu0 %vm323_vm1, %v6666_v47 }
0x2db5   :  { %v6686_v7 = vpop.f32.mrf.mxu0 }
0x2db6   :  { %v6687_v29 = vadd.f32 %v6686_v7, %v6661_v14 }
0x2db8   :  { %v6693_v48 = vadd.f32 %v6996_v17, %v6687_v29 }
0x2dba   :  { %6695 = vst [vmem:[#allocation18 + $0x38] sm:$0xff] %v6693_v48 }
0x2dbb   :  { %6710 = dma.vmem_to_hbm [thread:$0]  %s6703_s9, 1024, %s6705_s0, [#allocation5], %s7477_s4, %s7477_s4, %s7478_s29  }
0x2dbc   :  { %7468 = dma.done.wait [#allocation5], 1024  }
0x2dbd   :  { %7469 = vsyncadd [#allocation5], 4294966272 }
0x2dbe   :  { %7470 = dma.done.wait [#allocation20], 1024  }
0x2dbf   :  { %7471 = vsyncadd [#allocation20], 4294966272 }
0x2dc0   :  { %6732 = vsyncpa [#allocation4], 1 }
0x2dc1   :  { %6733 = vsyncpa [#allocation7], 1 }
0x2dc2   :  { %6734 = vsyncpa [#allocation10], 1 }
0x2dc3   :  { %6735 = vsyncpa [#allocation13], 1 }
0x2dc4   :  { %6736 = vsyncpa [#allocation16], 1 }
0x2dc5   :  { %6737 = vsyncpa [#allocation5], 1 }
0x2dc6   :  { %6738 = vsyncpa [#allocation20], 1 }

</bundles_post_ra>
